<compile_context>
chip_gen: v7x
topology: tpu7x:2x2x1
jax: 0.10.0
libtpu: 0.0.40
codegen_flags: <defaults>
</compile_context>

<pallas_src>
import jax
import jax.numpy as jnp
from jax.experimental import pallas as pl
from jax.experimental.pallas import tpu as pltpu

# (context_size, dilation) for tdnn1..tdnn5 of X_vector
_TDNN_CFG = [(5, 1), (3, 1), (2, 2), (1, 1), (1, 3)]
_DOUT = 512
_PAD = 8   # zeroed tail rows of each activation buffer (>= per-layer tap shift, multiple of 8)


def _round_up(x, m):
    return ((x + m - 1) // m) * m


def _vmem_limit_bytes():
    # Leave headroom for compiler-internal scratch: ~40 MiB on v7x (64 MiB/TC),
    # up to 96 MiB on v5e/v6e (128 MiB).
    try:
        cap = int(pltpu.get_tpu_info().vmem_capacity_bytes)
        return min(cap - 24 * 1024 * 1024, 96 * 1024 * 1024)
    except Exception:
        return 40 * 1024 * 1024


# ----------------------------------------------------------------------------
# Fused kernel: tdnn1..tdnn5 -> stats pooling (mean + unbiased var) -> segment6/7/output.
# Grid = (batch,), one batch element per program; activations stay resident in VMEM scratch.
# ----------------------------------------------------------------------------
def _fused_xvector(u, w1t, w2t, w3t, w4t, w5t, bt, w6t, b6, w7t, b7, wot, bo,
                   *, t_phys, l_out, num_classes):
    B, _, k1 = u.shape
    dout = _DOUT
    n = float(l_out)

    def kernel(u_ref, w1_ref, w2_ref, w3_ref, w4_ref, w5_ref, bt_ref,
               w6_ref, b6_ref, w7_ref, b7_ref, wo_ref, bo_ref,
               o_ref, buf_a, buf_b):
        # Keep the lookahead tail rows zeroed so shifted tap reads never see stale VMEM.
        zpad = jnp.zeros((_PAD, dout), jnp.bfloat16)
        buf_a[pl.ds(t_phys, _PAD), :] = zpad
        buf_b[pl.ds(t_phys, _PAD), :] = zpad

        # ---- tdnn1: taps were pre-folded into a single K=k1 matmul by the wrapper ----
        acc = jnp.dot(u_ref[0], w1_ref[...], preferred_element_type=jnp.float32)
        acc = acc + bt_ref[pl.ds(0, 1), :]
        buf_a[pl.ds(0, t_phys), :] = jnp.maximum(acc, 0.0).astype(jnp.bfloat16)

        # ---- tdnn2..tdnn5: shifted-window matmuls on the VMEM-resident activation ----
        bufs = (buf_a, buf_b)
        w_refs = (w2_ref, w3_ref, w4_ref, w5_ref)
        for idx, ((ctx, dil), w_ref) in enumerate(zip(_TDNN_CFG[1:], w_refs)):
            src = bufs[idx % 2]
            dst = bufs[(idx + 1) % 2]
            acc = jnp.zeros((t_phys, dout), jnp.float32)
            for j in range(ctx):                      # unrolled static tap loop
                sh = j * dil
                xj = src[pl.ds(sh, t_phys), :]        # shifted window, single load per tap
                acc = acc + jnp.dot(xj, w_ref[j], preferred_element_type=jnp.float32)
            acc = acc + bt_ref[pl.ds(idx + 1, 1), :]
            dst[pl.ds(0, t_phys), :] = jnp.maximum(acc, 0.0).astype(jnp.bfloat16)

        h5 = bufs[len(w_refs) % 2]                    # buf_a after four ping-pongs

        # ---- stats pooling over the l_out valid frames ----
        # Rows >= l_out hold finite garbage (zero-pad / ReLU(bias)-driven) that is never
        # consumed by any valid TDNN output row; it MUST be masked here.
        xv = h5[pl.ds(0, t_phys), :].astype(jnp.float32)
        rows = jax.lax.broadcasted_iota(jnp.int32, (t_phys, 1), 0)
        mask = rows < l_out
        xm = jnp.where(mask, xv, 0.0)
        ones = jnp.ones((1, t_phys), jnp.float32)
        mean = jnp.dot(ones, xm, preferred_element_type=jnp.float32) * (1.0 / n)
        d = jnp.where(mask, xv - mean, 0.0)           # centered two-pass variance, f32
        var = jnp.dot(ones, d * d, preferred_element_type=jnp.float32) * (1.0 / (n - 1.0))

        # ---- segment6 -> segment7 -> output (bf16 weights, f32 accumulation) ----
        stats = jnp.concatenate([mean, var], axis=1).astype(jnp.bfloat16)   # (1, 2*dout)
        s6 = jnp.dot(stats, w6_ref[...], preferred_element_type=jnp.float32) + b6_ref[...]
        xvec = jnp.dot(s6.astype(jnp.bfloat16), w7_ref[...],
                       preferred_element_type=jnp.float32) + b7_ref[...]
        o_ref[0] = jnp.dot(xvec.astype(jnp.bfloat16), wo_ref[...],
                           preferred_element_type=jnp.float32) + bo_ref[...]

    out = pl.pallas_call(
        kernel,
        out_shape=jax.ShapeDtypeStruct((B, 1, num_classes), jnp.float32),
        grid=(B,),
        in_specs=[
            pl.BlockSpec((1, t_phys, k1), lambda b: (b, 0, 0)),
            pl.BlockSpec((k1, dout), lambda b: (0, 0)),
            pl.BlockSpec((3, dout, dout), lambda b: (0, 0, 0)),
            pl.BlockSpec((2, dout, dout), lambda b: (0, 0, 0)),
            pl.BlockSpec((1, dout, dout), lambda b: (0, 0, 0)),
            pl.BlockSpec((1, dout, dout), lambda b: (0, 0, 0)),
            pl.BlockSpec((5, dout), lambda b: (0, 0)),
            pl.BlockSpec((2 * dout, dout), lambda b: (0, 0)),
            pl.BlockSpec((1, dout), lambda b: (0, 0)),
            pl.BlockSpec((dout, dout), lambda b: (0, 0)),
            pl.BlockSpec((1, dout), lambda b: (0, 0)),
            pl.BlockSpec((dout, num_classes), lambda b: (0, 0)),
            pl.BlockSpec((1, num_classes), lambda b: (0, 0)),
        ],
        out_specs=pl.BlockSpec((1, 1, num_classes), lambda b: (b, 0, 0)),
        scratch_shapes=[pltpu.VMEM((t_phys + _PAD, dout), jnp.bfloat16),
                        pltpu.VMEM((t_phys + _PAD, dout), jnp.bfloat16)],
        compiler_params=pltpu.CompilerParams(
            dimension_semantics=("parallel",),
            vmem_limit_bytes=_vmem_limit_bytes()),
    )(u, w1t, w2t, w3t, w4t, w5t, bt, w6t, b6, w7t, b7, wot, bo)
    return out[:, 0, :]


# ----------------------------------------------------------------------------
# Deterministic parameter init (torch.nn.Linear default: U(-1/sqrt(fan_in), 1/sqrt(fan_in)))
# ----------------------------------------------------------------------------
def init_params(key, input_dim=23, num_classes=8):
    keys = iter(jax.random.split(key, 16))

    def lin(in_f, out_f):
        k1, k2 = jax.random.split(next(keys))
        bound = 1.0 / (in_f ** 0.5)
        w = jax.random.uniform(k1, (out_f, in_f), jnp.float32, -bound, bound)
        b = jax.random.uniform(k2, (out_f,), jnp.float32, -bound, bound)
        return w, b

    p = {'tdnn': []}
    din = input_dim
    for ctx, _dil in _TDNN_CFG:
        w, b = lin(din * ctx, _DOUT)
        p['tdnn'].append({'w': w, 'b': b})
        din = _DOUT
    p['seg6'] = lin(2 * _DOUT, _DOUT)
    p['seg7'] = lin(_DOUT, _DOUT)
    p['out'] = lin(_DOUT, num_classes)
    return p


# ----------------------------------------------------------------------------
# Forward pass (matches XVectorModel.forward -> X_vector.forward, returns predictions only)
# ----------------------------------------------------------------------------
def forward(x, p):
    # inputs (B, 1, input_dim, T) -> squeeze(1) -> transpose(1, 2) -> (B, T, input_dim)
    h = jnp.transpose(jnp.squeeze(x, axis=1), (0, 2, 1)).astype(jnp.float32)
    B, T, D = h.shape

    total_ctx = sum((c - 1) * d for c, d in _TDNN_CFG)          # 8 frames
    l_out = T - total_ctx
    assert l_out >= 2, "sequence too short for the TDNN context stack (need T >= 10)"

    t_phys = _round_up(T, 8)
    assert t_phys <= 2048, "fused VMEM-resident kernel supports T <= 2048 frames"
    ctx1, dil1 = _TDNN_CFG[0]
    look1 = (ctx1 - 1) * dil1

    # Layer-1 unfold in the wrapper (tiny, input_dim wide): tap-major columns, padded to 128 lanes.
    hp = jnp.pad(h, ((0, 0), (0, t_phys + look1 - T), (0, 0)))
    u = jnp.concatenate([hp[:, j * dil1: j * dil1 + t_phys, :] for j in range(ctx1)], axis=-1)
    k1 = _round_up(ctx1 * D, 128)
    u = jnp.pad(u, ((0, 0), (0, 0), (0, k1 - ctx1 * D))).astype(jnp.bfloat16)

    # Weight prep: torch Linear computes y = v @ W.T; unfold column order is tap-major.
    w1 = p['tdnn'][0]['w']                                       # (512, ctx1*D)
    w1t = jnp.pad(jnp.transpose(w1), ((0, k1 - ctx1 * D), (0, 0))).astype(jnp.bfloat16)
    wts = []
    for (ctx, _dil), lp in zip(_TDNN_CFG[1:], p['tdnn'][1:]):
        wts.append(jnp.transpose(lp['w']).reshape(ctx, _DOUT, _DOUT).astype(jnp.bfloat16))
    bt = jnp.stack([lp['b'] for lp in p['tdnn']], axis=0).astype(jnp.float32)   # (5, 512)

    w6, b6 = p['seg6']
    w7, b7 = p['seg7']
    wo, bo = p['out']
    nc = wo.shape[0]
    w6t = jnp.transpose(w6).astype(jnp.bfloat16)                 # (1024, 512)
    w7t = jnp.transpose(w7).astype(jnp.bfloat16)                 # (512, 512)
    wot = jnp.transpose(wo).astype(jnp.bfloat16)                 # (512, nc)
    b6v = b6.reshape(1, _DOUT).astype(jnp.float32)
    b7v = b7.reshape(1, _DOUT).astype(jnp.float32)
    bov = bo.reshape(1, nc).astype(jnp.float32)

    # Dropout(p=0.5) layers are identity in eval mode; softmax is defined but unused in forward.
    return _fused_xvector(u, w1t, wts[0], wts[1], wts[2], wts[3], bt,
                          w6t, b6v, w7t, b7v, wot, bov,
                          t_phys=t_phys, l_out=l_out, num_classes=nc)


if __name__ == "__main__":
    key = jax.random.PRNGKey(0)
    pkey, xkey = jax.random.split(key)

    INPUT_DIM, NUM_CLASSES = 23, 8
    params = init_params(pkey, input_dim=INPUT_DIM, num_classes=NUM_CLASSES)

    B, T = 2, 32                       # small shapes; T must exceed the total context (8 frames)
    x = jax.random.normal(xkey, (B, 1, INPUT_DIM, T), jnp.float32)

    fwd = jax.jit(forward)
    out = jax.block_until_ready(fwd(x, params))
    assert out.shape == (B, NUM_CLASSES), out.shape
    assert bool(jnp.all(jnp.isfinite(out)))
    print("KERNEL_OK")
</pallas_src>

<mosaic_0001>
module attributes {stable_mosaic.version = 11 : i64} {
  func.func @kernel(%arg0: i32, %arg1: memref<1x32x128xbf16, #tpu.memory_space<vmem>>, %arg2: memref<128x512xbf16, #tpu.memory_space<vmem>>, %arg3: memref<3x512x512xbf16, #tpu.memory_space<vmem>>, %arg4: memref<2x512x512xbf16, #tpu.memory_space<vmem>>, %arg5: memref<1x512x512xbf16, #tpu.memory_space<vmem>>, %arg6: memref<1x512x512xbf16, #tpu.memory_space<vmem>>, %arg7: memref<5x512xf32, #tpu.memory_space<vmem>>, %arg8: memref<1024x512xbf16, #tpu.memory_space<vmem>>, %arg9: memref<1x512xf32, #tpu.memory_space<vmem>>, %arg10: memref<512x512xbf16, #tpu.memory_space<vmem>>, %arg11: memref<1x512xf32, #tpu.memory_space<vmem>>, %arg12: memref<512x8xbf16, #tpu.memory_space<vmem>>, %arg13: memref<1x8xf32, #tpu.memory_space<vmem>>, %arg14: memref<1x1x8xf32, #tpu.memory_space<vmem>>, %arg15: memref<40x512xbf16, #tpu.memory_space<vmem>>, %arg16: memref<40x512xbf16, #tpu.memory_space<vmem>>) attributes {dimension_semantics = [#tpu.dimension_semantics<parallel>], iteration_bounds = array<i64: 2>, scalar_prefetch = 0 : i64, scratch_operands = 2 : i64, tpu.core_type = #tpu.core_type<tc>, window_params = [{transform_indices = @transform_0, window_bounds = array<i64: 1, 32, 128>}, {pipeline_mode = #tpu.pipeline_mode<synchronous>, transform_indices = @transform_1, window_bounds = array<i64: 128, 512>}, {pipeline_mode = #tpu.pipeline_mode<synchronous>, transform_indices = @transform_2, window_bounds = array<i64: 3, 512, 512>}, {pipeline_mode = #tpu.pipeline_mode<synchronous>, transform_indices = @transform_3, window_bounds = array<i64: 2, 512, 512>}, {pipeline_mode = #tpu.pipeline_mode<synchronous>, transform_indices = @transform_4, window_bounds = array<i64: 1, 512, 512>}, {pipeline_mode = #tpu.pipeline_mode<synchronous>, transform_indices = @transform_5, window_bounds = array<i64: 1, 512, 512>}, {pipeline_mode = #tpu.pipeline_mode<synchronous>, transform_indices = @transform_6, window_bounds = array<i64: 5, 512>}, {pipeline_mode = #tpu.pipeline_mode<synchronous>, transform_indices = @transform_7, window_bounds = array<i64: 1024, 512>}, {pipeline_mode = #tpu.pipeline_mode<synchronous>, transform_indices = @transform_8, window_bounds = array<i64: 1, 512>}, {pipeline_mode = #tpu.pipeline_mode<synchronous>, transform_indices = @transform_9, window_bounds = array<i64: 512, 512>}, {pipeline_mode = #tpu.pipeline_mode<synchronous>, transform_indices = @transform_10, window_bounds = array<i64: 1, 512>}, {pipeline_mode = #tpu.pipeline_mode<synchronous>, transform_indices = @transform_11, window_bounds = array<i64: 512, 8>}, {pipeline_mode = #tpu.pipeline_mode<synchronous>, transform_indices = @transform_12, window_bounds = array<i64: 1, 8>}, {transform_indices = @transform_13, window_bounds = array<i64: 1, 1, 8>}]} {
    %cst = arith.constant 0.000000e+00 : bf16
    %0 = vector.broadcast %cst : bf16 to vector<8x512xbf16>
    %c32 = arith.constant 32 : index
    %c0 = arith.constant 0 : index
    %1 = vector.load %arg15[%c32, %c0] : memref<40x512xbf16, #tpu.memory_space<vmem>>, vector<8x512xbf16>
    tpu.vector_store %arg15[%c32, %c0], %0 {strides = array<i32>} : memref<40x512xbf16, #tpu.memory_space<vmem>>, vector<8x512xbf16>,
    %c32_0 = arith.constant 32 : index
    %c0_1 = arith.constant 0 : index
    %2 = vector.load %arg16[%c32_0, %c0_1] : memref<40x512xbf16, #tpu.memory_space<vmem>>, vector<8x512xbf16>
    tpu.vector_store %arg16[%c32_0, %c0_1], %0 {strides = array<i32>} : memref<40x512xbf16, #tpu.memory_space<vmem>>, vector<8x512xbf16>,
    %c0_2 = arith.constant 0 : index
    %c0_3 = arith.constant 0 : index
    %c0_4 = arith.constant 0 : index
    %3 = vector.load %arg1[%c0_2, %c0_3, %c0_4] : memref<1x32x128xbf16, #tpu.memory_space<vmem>>, vector<1x32x128xbf16>
    %4 = vector.shape_cast %3 : vector<1x32x128xbf16> to vector<32x128xbf16>
    %c0_5 = arith.constant 0 : index
    %c0_6 = arith.constant 0 : index
    %5 = vector.load %arg2[%c0_5, %c0_6] : memref<128x512xbf16, #tpu.memory_space<vmem>>, vector<128x512xbf16>
    %cst_7 = arith.constant dense<0.000000e+00> : vector<32x512xf32>
    %6 = tpu.matmul %4, %5, %cst_7 {dimension_numbers = #tpu.dot_dimension_numbers<[1], [0], [0], [1], [0, 0, 1, 1], [], []>} : vector<32x128xbf16>, vector<128x512xbf16>, vector<32x512xf32> -> vector<32x512xf32>
    %c0_8 = arith.constant 0 : index
    %c0_9 = arith.constant 0 : index
    %7 = vector.load %arg7[%c0_8, %c0_9] : memref<5x512xf32, #tpu.memory_space<vmem>>, vector<1x512xf32>
    %8 = vector.broadcast %7 : vector<1x512xf32> to vector<32x512xf32>
    %9 = arith.addf %6, %8 : vector<32x512xf32>
    %cst_10 = arith.constant 0.000000e+00 : f32
    %10 = vector.broadcast %cst_10 : f32 to vector<32x512xf32>
    %11 = arith.maximumf %9, %10 : vector<32x512xf32>
    %12 = arith.truncf %11 : vector<32x512xf32> to vector<32x512xbf16>
    %c0_11 = arith.constant 0 : index
    %c0_12 = arith.constant 0 : index
    %13 = vector.load %arg15[%c0_11, %c0_12] : memref<40x512xbf16, #tpu.memory_space<vmem>>, vector<32x512xbf16>
    tpu.vector_store %arg15[%c0_11, %c0_12], %12 {strides = array<i32>} : memref<40x512xbf16, #tpu.memory_space<vmem>>, vector<32x512xbf16>,
    %cst_13 = arith.constant 0.000000e+00 : f32
    %14 = vector.broadcast %cst_13 : f32 to vector<32x512xf32>
    %c0_14 = arith.constant 0 : index
    %c0_15 = arith.constant 0 : index
    %15 = vector.load %arg15[%c0_14, %c0_15] : memref<40x512xbf16, #tpu.memory_space<vmem>>, vector<32x512xbf16>
    %c0_16 = arith.constant 0 : index
    %c0_17 = arith.constant 0 : index
    %c0_18 = arith.constant 0 : index
    %16 = vector.load %arg3[%c0_16, %c0_17, %c0_18] : memref<3x512x512xbf16, #tpu.memory_space<vmem>>, vector<1x512x512xbf16>
    %17 = vector.shape_cast %16 : vector<1x512x512xbf16> to vector<512x512xbf16>
    %cst_19 = arith.constant dense<0.000000e+00> : vector<32x512xf32>
    %18 = tpu.matmul %15, %17, %cst_19 {dimension_numbers = #tpu.dot_dimension_numbers<[1], [0], [0], [1], [0, 0, 1, 1], [], []>} : vector<32x512xbf16>, vector<512x512xbf16>, vector<32x512xf32> -> vector<32x512xf32>
    %19 = arith.addf %14, %18 : vector<32x512xf32>
    %c1 = arith.constant 1 : index
    %c0_20 = arith.constant 0 : index
    %20 = vector.load %arg15[%c1, %c0_20] : memref<40x512xbf16, #tpu.memory_space<vmem>>, vector<32x512xbf16>
    %c1_21 = arith.constant 1 : index
    %c0_22 = arith.constant 0 : index
    %c0_23 = arith.constant 0 : index
    %21 = vector.load %arg3[%c1_21, %c0_22, %c0_23] : memref<3x512x512xbf16, #tpu.memory_space<vmem>>, vector<1x512x512xbf16>
    %22 = vector.shape_cast %21 : vector<1x512x512xbf16> to vector<512x512xbf16>
    %cst_24 = arith.constant dense<0.000000e+00> : vector<32x512xf32>
    %23 = tpu.matmul %20, %22, %cst_24 {dimension_numbers = #tpu.dot_dimension_numbers<[1], [0], [0], [1], [0, 0, 1, 1], [], []>} : vector<32x512xbf16>, vector<512x512xbf16>, vector<32x512xf32> -> vector<32x512xf32>
    %24 = arith.addf %19, %23 : vector<32x512xf32>
    %c2 = arith.constant 2 : index
    %c0_25 = arith.constant 0 : index
    %25 = vector.load %arg15[%c2, %c0_25] : memref<40x512xbf16, #tpu.memory_space<vmem>>, vector<32x512xbf16>
    %c2_26 = arith.constant 2 : index
    %c0_27 = arith.constant 0 : index
    %c0_28 = arith.constant 0 : index
    %26 = vector.load %arg3[%c2_26, %c0_27, %c0_28] : memref<3x512x512xbf16, #tpu.memory_space<vmem>>, vector<1x512x512xbf16>
    %27 = vector.shape_cast %26 : vector<1x512x512xbf16> to vector<512x512xbf16>
    %cst_29 = arith.constant dense<0.000000e+00> : vector<32x512xf32>
    %28 = tpu.matmul %25, %27, %cst_29 {dimension_numbers = #tpu.dot_dimension_numbers<[1], [0], [0], [1], [0, 0, 1, 1], [], []>} : vector<32x512xbf16>, vector<512x512xbf16>, vector<32x512xf32> -> vector<32x512xf32>
    %29 = arith.addf %24, %28 : vector<32x512xf32>
    %c1_30 = arith.constant 1 : index
    %c0_31 = arith.constant 0 : index
    %30 = vector.load %arg7[%c1_30, %c0_31] : memref<5x512xf32, #tpu.memory_space<vmem>>, vector<1x512xf32>
    %31 = vector.broadcast %30 : vector<1x512xf32> to vector<32x512xf32>
    %32 = arith.addf %29, %31 : vector<32x512xf32>
    %cst_32 = arith.constant 0.000000e+00 : f32
    %33 = vector.broadcast %cst_32 : f32 to vector<32x512xf32>
    %34 = arith.maximumf %32, %33 : vector<32x512xf32>
    %35 = arith.truncf %34 : vector<32x512xf32> to vector<32x512xbf16>
    %c0_33 = arith.constant 0 : index
    %c0_34 = arith.constant 0 : index
    %36 = vector.load %arg16[%c0_33, %c0_34] : memref<40x512xbf16, #tpu.memory_space<vmem>>, vector<32x512xbf16>
    tpu.vector_store %arg16[%c0_33, %c0_34], %35 {strides = array<i32>} : memref<40x512xbf16, #tpu.memory_space<vmem>>, vector<32x512xbf16>,
    %cst_35 = arith.constant 0.000000e+00 : f32
    %37 = vector.broadcast %cst_35 : f32 to vector<32x512xf32>
    %c0_36 = arith.constant 0 : index
    %c0_37 = arith.constant 0 : index
    %38 = vector.load %arg16[%c0_36, %c0_37] : memref<40x512xbf16, #tpu.memory_space<vmem>>, vector<32x512xbf16>
    %c0_38 = arith.constant 0 : index
    %c0_39 = arith.constant 0 : index
    %c0_40 = arith.constant 0 : index
    %39 = vector.load %arg4[%c0_38, %c0_39, %c0_40] : memref<2x512x512xbf16, #tpu.memory_space<vmem>>, vector<1x512x512xbf16>
    %40 = vector.shape_cast %39 : vector<1x512x512xbf16> to vector<512x512xbf16>
    %cst_41 = arith.constant dense<0.000000e+00> : vector<32x512xf32>
    %41 = tpu.matmul %38, %40, %cst_41 {dimension_numbers = #tpu.dot_dimension_numbers<[1], [0], [0], [1], [0, 0, 1, 1], [], []>} : vector<32x512xbf16>, vector<512x512xbf16>, vector<32x512xf32> -> vector<32x512xf32>
    %42 = arith.addf %37, %41 : vector<32x512xf32>
    %c2_42 = arith.constant 2 : index
    %c0_43 = arith.constant 0 : index
    %43 = vector.load %arg16[%c2_42, %c0_43] : memref<40x512xbf16, #tpu.memory_space<vmem>>, vector<32x512xbf16>
    %c1_44 = arith.constant 1 : index
    %c0_45 = arith.constant 0 : index
    %c0_46 = arith.constant 0 : index
    %44 = vector.load %arg4[%c1_44, %c0_45, %c0_46] : memref<2x512x512xbf16, #tpu.memory_space<vmem>>, vector<1x512x512xbf16>
    %45 = vector.shape_cast %44 : vector<1x512x512xbf16> to vector<512x512xbf16>
    %cst_47 = arith.constant dense<0.000000e+00> : vector<32x512xf32>
    %46 = tpu.matmul %43, %45, %cst_47 {dimension_numbers = #tpu.dot_dimension_numbers<[1], [0], [0], [1], [0, 0, 1, 1], [], []>} : vector<32x512xbf16>, vector<512x512xbf16>, vector<32x512xf32> -> vector<32x512xf32>
    %47 = arith.addf %42, %46 : vector<32x512xf32>
    %c2_48 = arith.constant 2 : index
    %c0_49 = arith.constant 0 : index
    %48 = vector.load %arg7[%c2_48, %c0_49] : memref<5x512xf32, #tpu.memory_space<vmem>>, vector<1x512xf32>
    %49 = vector.broadcast %48 : vector<1x512xf32> to vector<32x512xf32>
    %50 = arith.addf %47, %49 : vector<32x512xf32>
    %cst_50 = arith.constant 0.000000e+00 : f32
    %51 = vector.broadcast %cst_50 : f32 to vector<32x512xf32>
    %52 = arith.maximumf %50, %51 : vector<32x512xf32>
    %53 = arith.truncf %52 : vector<32x512xf32> to vector<32x512xbf16>
    %c0_51 = arith.constant 0 : index
    %c0_52 = arith.constant 0 : index
    %54 = vector.load %arg15[%c0_51, %c0_52] : memref<40x512xbf16, #tpu.memory_space<vmem>>, vector<32x512xbf16>
    tpu.vector_store %arg15[%c0_51, %c0_52], %53 {strides = array<i32>} : memref<40x512xbf16, #tpu.memory_space<vmem>>, vector<32x512xbf16>,
    %cst_53 = arith.constant 0.000000e+00 : f32
    %55 = vector.broadcast %cst_53 : f32 to vector<32x512xf32>
    %c0_54 = arith.constant 0 : index
    %c0_55 = arith.constant 0 : index
    %56 = vector.load %arg15[%c0_54, %c0_55] : memref<40x512xbf16, #tpu.memory_space<vmem>>, vector<32x512xbf16>
    %c0_56 = arith.constant 0 : index
    %c0_57 = arith.constant 0 : index
    %c0_58 = arith.constant 0 : index
    %57 = vector.load %arg5[%c0_56, %c0_57, %c0_58] : memref<1x512x512xbf16, #tpu.memory_space<vmem>>, vector<1x512x512xbf16>
    %58 = vector.shape_cast %57 : vector<1x512x512xbf16> to vector<512x512xbf16>
    %cst_59 = arith.constant dense<0.000000e+00> : vector<32x512xf32>
    %59 = tpu.matmul %56, %58, %cst_59 {dimension_numbers = #tpu.dot_dimension_numbers<[1], [0], [0], [1], [0, 0, 1, 1], [], []>} : vector<32x512xbf16>, vector<512x512xbf16>, vector<32x512xf32> -> vector<32x512xf32>
    %60 = arith.addf %55, %59 : vector<32x512xf32>
    %c3 = arith.constant 3 : index
    %c0_60 = arith.constant 0 : index
    %61 = vector.load %arg7[%c3, %c0_60] : memref<5x512xf32, #tpu.memory_space<vmem>>, vector<1x512xf32>
    %62 = vector.broadcast %61 : vector<1x512xf32> to vector<32x512xf32>
    %63 = arith.addf %60, %62 : vector<32x512xf32>
    %cst_61 = arith.constant 0.000000e+00 : f32
    %64 = vector.broadcast %cst_61 : f32 to vector<32x512xf32>
    %65 = arith.maximumf %63, %64 : vector<32x512xf32>
    %66 = arith.truncf %65 : vector<32x512xf32> to vector<32x512xbf16>
    %c0_62 = arith.constant 0 : index
    %c0_63 = arith.constant 0 : index
    %67 = vector.load %arg16[%c0_62, %c0_63] : memref<40x512xbf16, #tpu.memory_space<vmem>>, vector<32x512xbf16>
    tpu.vector_store %arg16[%c0_62, %c0_63], %66 {strides = array<i32>} : memref<40x512xbf16, #tpu.memory_space<vmem>>, vector<32x512xbf16>,
    %cst_64 = arith.constant 0.000000e+00 : f32
    %68 = vector.broadcast %cst_64 : f32 to vector<32x512xf32>
    %c0_65 = arith.constant 0 : index
    %c0_66 = arith.constant 0 : index
    %69 = vector.load %arg16[%c0_65, %c0_66] : memref<40x512xbf16, #tpu.memory_space<vmem>>, vector<32x512xbf16>
    %c0_67 = arith.constant 0 : index
    %c0_68 = arith.constant 0 : index
    %c0_69 = arith.constant 0 : index
    %70 = vector.load %arg6[%c0_67, %c0_68, %c0_69] : memref<1x512x512xbf16, #tpu.memory_space<vmem>>, vector<1x512x512xbf16>
    %71 = vector.shape_cast %70 : vector<1x512x512xbf16> to vector<512x512xbf16>
    %cst_70 = arith.constant dense<0.000000e+00> : vector<32x512xf32>
    %72 = tpu.matmul %69, %71, %cst_70 {dimension_numbers = #tpu.dot_dimension_numbers<[1], [0], [0], [1], [0, 0, 1, 1], [], []>} : vector<32x512xbf16>, vector<512x512xbf16>, vector<32x512xf32> -> vector<32x512xf32>
    %73 = arith.addf %68, %72 : vector<32x512xf32>
    %c4 = arith.constant 4 : index
    %c0_71 = arith.constant 0 : index
    %74 = vector.load %arg7[%c4, %c0_71] : memref<5x512xf32, #tpu.memory_space<vmem>>, vector<1x512xf32>
    %75 = vector.broadcast %74 : vector<1x512xf32> to vector<32x512xf32>
    %76 = arith.addf %73, %75 : vector<32x512xf32>
    %cst_72 = arith.constant 0.000000e+00 : f32
    %77 = vector.broadcast %cst_72 : f32 to vector<32x512xf32>
    %78 = arith.maximumf %76, %77 : vector<32x512xf32>
    %79 = arith.truncf %78 : vector<32x512xf32> to vector<32x512xbf16>
    %c0_73 = arith.constant 0 : index
    %c0_74 = arith.constant 0 : index
    %80 = vector.load %arg15[%c0_73, %c0_74] : memref<40x512xbf16, #tpu.memory_space<vmem>>, vector<32x512xbf16>
    tpu.vector_store %arg15[%c0_73, %c0_74], %79 {strides = array<i32>} : memref<40x512xbf16, #tpu.memory_space<vmem>>, vector<32x512xbf16>,
    %c0_75 = arith.constant 0 : index
    %c0_76 = arith.constant 0 : index
    %81 = vector.load %arg15[%c0_75, %c0_76] : memref<40x512xbf16, #tpu.memory_space<vmem>>, vector<32x512xbf16>
    %82 = arith.extf %81 : vector<32x512xbf16> to vector<32x512xf32>
    %83 = tpu.iota {dimensions = array<i32: 0>} : vector<32x1xi32>
    %c24_i32 = arith.constant 24 : i32
    %84 = vector.broadcast %c24_i32 : i32 to vector<32x1xi32>
    %85 = arith.cmpi slt, %83, %84 : vector<32x1xi32>
    %cst_77 = arith.constant 0.000000e+00 : f32
    %86 = vector.shape_cast %85 : vector<32x1xi1> to vector<32x1xi1>
    %87 = vector.broadcast %86 : vector<32x1xi1> to vector<32x512xi1>
    %88 = vector.broadcast %cst_77 : f32 to vector<32x512xf32>
    %89 = arith.select %87, %82, %88 : vector<32x512xi1>, vector<32x512xf32>
    %cst_78 = arith.constant 1.000000e+00 : f32
    %90 = vector.broadcast %cst_78 : f32 to vector<1x32xf32>
    %cst_79 = arith.constant dense<0.000000e+00> : vector<1x512xf32>
    %91 = tpu.matmul %90, %89, %cst_79 {dimension_numbers = #tpu.dot_dimension_numbers<[1], [0], [0], [1], [0, 0, 1, 1], [], []>} : vector<1x32xf32>, vector<32x512xf32>, vector<1x512xf32> -> vector<1x512xf32>
    %cst_80 = arith.constant 0.0416666679 : f32
    %92 = vector.broadcast %cst_80 : f32 to vector<1x512xf32>
    %93 = arith.mulf %91, %92 : vector<1x512xf32>
    %94 = vector.broadcast %93 : vector<1x512xf32> to vector<32x512xf32>
    %95 = arith.subf %82, %94 : vector<32x512xf32>
    %cst_81 = arith.constant 0.000000e+00 : f32
    %96 = vector.shape_cast %85 : vector<32x1xi1> to vector<32x1xi1>
    %97 = vector.broadcast %96 : vector<32x1xi1> to vector<32x512xi1>
    %98 = vector.broadcast %cst_81 : f32 to vector<32x512xf32>
    %99 = arith.select %97, %95, %98 : vector<32x512xi1>, vector<32x512xf32>
    %100 = arith.mulf %99, %99 : vector<32x512xf32>
    %cst_82 = arith.constant dense<0.000000e+00> : vector<1x512xf32>
    %101 = tpu.matmul %90, %100, %cst_82 {dimension_numbers = #tpu.dot_dimension_numbers<[1], [0], [0], [1], [0, 0, 1, 1], [], []>} : vector<1x32xf32>, vector<32x512xf32>, vector<1x512xf32> -> vector<1x512xf32>
    %cst_83 = arith.constant 0.0434782617 : f32
    %102 = vector.broadcast %cst_83 : f32 to vector<1x512xf32>
    %103 = arith.mulf %101, %102 : vector<1x512xf32>
    %104 = tpu.concatenate %93, %103 in 1 : vector<1x512xf32>, vector<1x512xf32> -> vector<1x1024xf32>
    %105 = arith.truncf %104 : vector<1x1024xf32> to vector<1x1024xbf16>
    %c0_84 = arith.constant 0 : index
    %c0_85 = arith.constant 0 : index
    %106 = vector.load %arg8[%c0_84, %c0_85] : memref<1024x512xbf16, #tpu.memory_space<vmem>>, vector<1024x512xbf16>
    %cst_86 = arith.constant dense<0.000000e+00> : vector<1x512xf32>
    %107 = tpu.matmul %105, %106, %cst_86 {dimension_numbers = #tpu.dot_dimension_numbers<[1], [0], [0], [1], [0, 0, 1, 1], [], []>} : vector<1x1024xbf16>, vector<1024x512xbf16>, vector<1x512xf32> -> vector<1x512xf32>
    %c0_87 = arith.constant 0 : index
    %c0_88 = arith.constant 0 : index
    %108 = vector.load %arg9[%c0_87, %c0_88] : memref<1x512xf32, #tpu.memory_space<vmem>>, vector<1x512xf32>
    %109 = arith.addf %107, %108 : vector<1x512xf32>
    %110 = arith.truncf %109 : vector<1x512xf32> to vector<1x512xbf16>
    %c0_89 = arith.constant 0 : index
    %c0_90 = arith.constant 0 : index
    %111 = vector.load %arg10[%c0_89, %c0_90] : memref<512x512xbf16, #tpu.memory_space<vmem>>, vector<512x512xbf16>
    %cst_91 = arith.constant dense<0.000000e+00> : vector<1x512xf32>
    %112 = tpu.matmul %110, %111, %cst_91 {dimension_numbers = #tpu.dot_dimension_numbers<[1], [0], [0], [1], [0, 0, 1, 1], [], []>} : vector<1x512xbf16>, vector<512x512xbf16>, vector<1x512xf32> -> vector<1x512xf32>
    %c0_92 = arith.constant 0 : index
    %c0_93 = arith.constant 0 : index
    %113 = vector.load %arg11[%c0_92, %c0_93] : memref<1x512xf32, #tpu.memory_space<vmem>>, vector<1x512xf32>
    %114 = arith.addf %112, %113 : vector<1x512xf32>
    %115 = arith.truncf %114 : vector<1x512xf32> to vector<1x512xbf16>
    %c0_94 = arith.constant 0 : index
    %c0_95 = arith.constant 0 : index
    %116 = vector.load %arg12[%c0_94, %c0_95] : memref<512x8xbf16, #tpu.memory_space<vmem>>, vector<512x8xbf16>
    %cst_96 = arith.constant dense<0.000000e+00> : vector<1x8xf32>
    %117 = tpu.matmul %115, %116, %cst_96 {dimension_numbers = #tpu.dot_dimension_numbers<[1], [0], [0], [1], [0, 0, 1, 1], [], []>} : vector<1x512xbf16>, vector<512x8xbf16>, vector<1x8xf32> -> vector<1x8xf32>
    %c0_97 = arith.constant 0 : index
    %c0_98 = arith.constant 0 : index
    %118 = vector.load %arg13[%c0_97, %c0_98] : memref<1x8xf32, #tpu.memory_space<vmem>>, vector<1x8xf32>
    %119 = arith.addf %117, %118 : vector<1x8xf32>
    %c0_99 = arith.constant 0 : index
    %c0_100 = arith.constant 0 : index
    %c0_101 = arith.constant 0 : index
    %120 = vector.load %arg14[%c0_99, %c0_100, %c0_101] : memref<1x1x8xf32, #tpu.memory_space<vmem>>, vector<1x1x8xf32>
    %121 = vector.shape_cast %120 : vector<1x1x8xf32> to vector<1x8xf32>
    %122 = vector.shape_cast %119 : vector<1x8xf32> to vector<1x1x8xf32>
    tpu.vector_store %arg14[%c0_99, %c0_100, %c0_101], %122 {strides = array<i32>} : memref<1x1x8xf32, #tpu.memory_space<vmem>>, vector<1x1x8xf32>,
    return
  }
  func.func @transform_0(%arg0: i32) -> (i32, i32, i32) {
    %c0_i32 = arith.constant 0 : i32
    %c0_i32_0 = arith.constant 0 : i32
    %c0_i32_1 = arith.constant 0 : i32
    return %arg0, %c0_i32, %c0_i32_0 : i32, i32, i32
  }
  func.func @transform_1(%arg0: i32) -> (i32, i32) {
    %c0_i32 = arith.constant 0 : i32
    %c0_i32_0 = arith.constant 0 : i32
    %c0_i32_1 = arith.constant 0 : i32
    return %c0_i32, %c0_i32_0 : i32, i32
  }
  func.func @transform_2(%arg0: i32) -> (i32, i32, i32) {
    %c0_i32 = arith.constant 0 : i32
    %c0_i32_0 = arith.constant 0 : i32
    %c0_i32_1 = arith.constant 0 : i32
    %c0_i32_2 = arith.constant 0 : i32
    return %c0_i32, %c0_i32_0, %c0_i32_1 : i32, i32, i32
  }
  func.func @transform_3(%arg0: i32) -> (i32, i32, i32) {
    %c0_i32 = arith.constant 0 : i32
    %c0_i32_0 = arith.constant 0 : i32
    %c0_i32_1 = arith.constant 0 : i32
    %c0_i32_2 = arith.constant 0 : i32
    return %c0_i32, %c0_i32_0, %c0_i32_1 : i32, i32, i32
  }
  func.func @transform_4(%arg0: i32) -> (i32, i32, i32) {
    %c0_i32 = arith.constant 0 : i32
    %c0_i32_0 = arith.constant 0 : i32
    %c0_i32_1 = arith.constant 0 : i32
    %c0_i32_2 = arith.constant 0 : i32
    return %c0_i32, %c0_i32_0, %c0_i32_1 : i32, i32, i32
  }
  func.func @transform_5(%arg0: i32) -> (i32, i32, i32) {
    %c0_i32 = arith.constant 0 : i32
    %c0_i32_0 = arith.constant 0 : i32
    %c0_i32_1 = arith.constant 0 : i32
    %c0_i32_2 = arith.constant 0 : i32
    return %c0_i32, %c0_i32_0, %c0_i32_1 : i32, i32, i32
  }
  func.func @transform_6(%arg0: i32) -> (i32, i32) {
    %c0_i32 = arith.constant 0 : i32
    %c0_i32_0 = arith.constant 0 : i32
    %c0_i32_1 = arith.constant 0 : i32
    return %c0_i32, %c0_i32_0 : i32, i32
  }
  func.func @transform_7(%arg0: i32) -> (i32, i32) {
    %c0_i32 = arith.constant 0 : i32
    %c0_i32_0 = arith.constant 0 : i32
    %c0_i32_1 = arith.constant 0 : i32
    return %c0_i32, %c0_i32_0 : i32, i32
  }
  func.func @transform_8(%arg0: i32) -> (i32, i32) {
    %c0_i32 = arith.constant 0 : i32
    %c0_i32_0 = arith.constant 0 : i32
    %c0_i32_1 = arith.constant 0 : i32
    return %c0_i32, %c0_i32_0 : i32, i32
  }
  func.func @transform_9(%arg0: i32) -> (i32, i32) {
    %c0_i32 = arith.constant 0 : i32
    %c0_i32_0 = arith.constant 0 : i32
    %c0_i32_1 = arith.constant 0 : i32
    return %c0_i32, %c0_i32_0 : i32, i32
  }
  func.func @transform_10(%arg0: i32) -> (i32, i32) {
    %c0_i32 = arith.constant 0 : i32
    %c0_i32_0 = arith.constant 0 : i32
    %c0_i32_1 = arith.constant 0 : i32
    return %c0_i32, %c0_i32_0 : i32, i32
  }
  func.func @transform_11(%arg0: i32) -> (i32, i32) {
    %c0_i32 = arith.constant 0 : i32
    %c0_i32_0 = arith.constant 0 : i32
    %c0_i32_1 = arith.constant 0 : i32
    return %c0_i32, %c0_i32_0 : i32, i32
  }
  func.func @transform_12(%arg0: i32) -> (i32, i32) {
    %c0_i32 = arith.constant 0 : i32
    %c0_i32_0 = arith.constant 0 : i32
    %c0_i32_1 = arith.constant 0 : i32
    return %c0_i32, %c0_i32_0 : i32, i32
  }
  func.func @transform_13(%arg0: i32) -> (i32, i32, i32) {
    %c0_i32 = arith.constant 0 : i32
    %c0_i32_0 = arith.constant 0 : i32
    %c0_i32_1 = arith.constant 0 : i32
    return %arg0, %c0_i32, %c0_i32_0 : i32, i32, i32
  }
}

</mosaic_0001>

<bundles_post_ra>
// kernel: forward.1
= control target key start
LH: loop header
LB: loop body
LE: loop exit
PB: predicated region body
PF: predicated region fallthrough
CT: control target
= control target key end

     0   :  { %18 = vsyncpa [#allocation5], 0  ;;  %s21172_s0 = inlined_call_operand.vmem [shape: bf16[2,32,128], index: 0, kind: input, shape index: {}]   ;;  %s21173_s1 = inlined_call_operand.vmem [shape: bf16[128,512], index: 1, kind: input, shape index: {}]   ;;  %s21174_s2 = inlined_call_operand.vmem [shape: bf16[3,512,512], index: 2, kind: input, shape index: {}]   ;;  %s21175_s3 = inlined_call_operand.vmem [shape: bf16[2,512,512], index: 3, kind: input, shape index: {}]   ;;  %s21176_s4 = inlined_call_operand.vmem [shape: bf16[1,512,512], index: 4, kind: input, shape index: {}]   ;;  %s21177_s5 = inlined_call_operand.vmem [shape: bf16[1,512,512], index: 5, kind: input, shape index: {}]   ;;  %s21178_s6 = inlined_call_operand.vmem [shape: f32[5,512], index: 6, kind: input, shape index: {}]   ;;  %s21179_s7 = inlined_call_operand.vmem [shape: bf16[1024,512], index: 7, kind: input, shape index: {}]   ;;  %s21180_s8 = inlined_call_operand.vmem [shape: f32[1,512], index: 8, kind: input, shape index: {}]   ;;  %s21181_s9 = inlined_call_operand.vmem [shape: bf16[512,512], index: 9, kind: input, shape index: {}]   ;;  %s21182_s10 = inlined_call_operand.vmem [shape: f32[1,512], index: 10, kind: input, shape index: {}]   ;;  %s21183_s11 = inlined_call_operand.vmem [shape: bf16[512,8], index: 11, kind: input, shape index: {}]   ;;  %s21184_s12 = inlined_call_operand.vmem [shape: f32[1,8], index: 12, kind: input, shape index: {}]   ;;  %s21185_s13 = inlined_call_operand.hbm [shape: f32[2,1,8], index: 13, kind: output, shape index: {}]  }
   0x1   :  { %20 = vsyncpa [#allocation5 + $0x1], 0  ;;  %s16699_s25 = smov 0   ;;  %s16701_s26 = smov 0  }
   0x2   :  { %s16703_s27 = smov 0   ;;  %s16705_s28 = smov 0  }
   0x3 LB: > { %21190 = sst [smem:[#allocation7_spill]] %s16619_s27  ;;  %s16720_s29 = sadd.s32 4294967295, %s16623_s28   ;;  %s16623_s28 = sphi %s16705_s28, %s21197_s28   ;;  %s16619_s27 = sphi %s16703_s27, %s21199_s27   ;;  %s16615_s26 = sphi %s16701_s26, %s21201_s26   ;;  %s16611_s25 = sphi %s16699_s25, %s21200_s25  }
   0x4   : > { %s12276_s30 = sadd.s32 4294967294, %s16623_s28   ;;  %s16724_s14 = sadd.s32 1, %s16623_s28  }
   0x5   : > { %21191 = sst [smem:[#allocation8_spill]] %s16724_s14  ;;  %s311_s15 = sadd.s32 1, %s16619_s27 }
   0x6   : > { %s308_s16 = ssub.s32 %s16623_s28, %s16724_s14  ;;  %p321_p0 = scmp.ne.s32.totalorder %s16619_s27, %s16615_s26 }
   0x7   : > { %p309_p1 = scmp.eq.s32.totalorder %s308_s16, 0  ;;  %p322_p2 = scmp.eq.s32.totalorder %s16720_s29, 1 }
   0x8   : > { %p327_p3 = scmp.ne.s32.totalorder %s16615_s26, %s16611_s25  ;;  %p328_p4 = scmp.eq.s32.totalorder %s12276_s30, 1 }
   0x9   : > { %s16735_s17 = scalar_select %p309_p1, %s16619_s27, %s311_s15  }
   0xa   : > { %p16737_p5 = por %p322_p2, %p321_p0  ;;  %p16741_p6 = por %p328_p4, %p327_p3 }
   0xb   : > { %21192 = sst [smem:[#allocation9_spill]] %s16735_s17  ;;  %p12279_p7 = scmp.ge.s32.totalorder %s16623_s28, 1 }
   0xc   : > { %s21194_s19 = scalar_select %p16741_p6, 1, 0 }
   0xd   : > { %p390_p8 = scmp.lt.s32.totalorder %s16623_s28, 3 }
   0xe   : > { %21195 = sst [smem:[#allocation10_spill]] %s21194_s19 }
   0xf   : > { %p391_p9 = pnand %p12279_p7, %p390_p8 }
  0x10   : > { %v14502_v0 = vld [vmem:[%s21173_s1 + $0x4] ss:$16 sps:$4 sm:$0xff] (!%p391_p9)   ;;  %p433_p10 = scmp.lt.s32.totalorder (!%p391_p9), %s16720_s29, 1  ;;  %v14504_v1 = vld [vmem:[%s21173_s1] ss:$16 sps:$4 sm:$0xff] (!%p391_p9)   ;;  %v16625_v2 = vmov (!%p391_p9), 0  }
  0x11   : > { %394 = sbr.rel (%p391_p9) target bundleno = 3082 (0xc0a), region = 72  ;;  %439 = vst [vmem:[#allocation2 + $0x40] sm:$0xff] (!%p391_p9), %v16625_v2  ;;  %440 = vst [vmem:[#allocation2 + $0x48] sm:$0xff] (!%p391_p9), %v16625_v2  ;;  %705 = vmatprep.mubr.bf16.mxu0 (!%p391_p9), %v16625_v2  ;;  %758 = vmatprep.mubr.bf16.mxu1 (!%p391_p9), %v16625_v2  ;;  %v14505_v3 = vld [vmem:[%s21173_s1 + $0x24] ss:$16 sps:$4 sm:$0xff] (!%p391_p9)   ;;  %vm3142_vm1 = vcmask (!%p391_p9), 1046528  }
  0x12   : > { %441 = vst [vmem:[#allocation3 + $0x40] sm:$0xff] (!%p391_p9), %v16625_v2  ;;  %442 = vst [vmem:[#allocation3 + $0x48] sm:$0xff] (!%p391_p9), %v16625_v2  ;;  %673 = vmatprep.subr.bf16.mxu0 (!%p391_p9), %v14502_v0  ;;  %v14507_v4 = vld [vmem:[%s21173_s1 + $0x20] ss:$16 sps:$4 sm:$0xff] (!%p391_p9)   ;;  %v14508_v5 = vld [vmem:[%s21173_s1 + $0x44] ss:$16 sps:$4 sm:$0xff] (!%p391_p9)  }
  0x13   : > { %674 = vmatpush1.bf16.msra.mxu0 (!%p391_p9), %v14504_v1  ;;  %v14510_v6 = vld [vmem:[%s21173_s1 + $0x40] ss:$16 sps:$4 sm:$0xff] (!%p391_p9)   ;;  %v14511_v7 = vld [vmem:[%s21173_s1 + $0x64] ss:$16 sps:$4 sm:$0xff] (!%p391_p9)   ;;  %v14528_v10 = vld [vmem:[%s21173_s1 + $0xc] ss:$16 sps:$4 sm:$0xff] (!%p391_p9)  }
  0x14   : > { %675 = vmatprep.subr.bf16.mxu0 (!%p391_p9), %v14505_v3  ;;  %v14513_v8 = vld [vmem:[%s21173_s1 + $0x60] ss:$16 sps:$4 sm:$0xff] (!%p391_p9)   ;;  %v14514_v9 = vld [vmem:[%s21173_s1 + $0x84] ss:$16 sps:$4 sm:$0xff] (!%p391_p9)   ;;  %v14530_v11 = vld [vmem:[%s21173_s1 + $0x8] ss:$16 sps:$4 sm:$0xff] (!%p391_p9)   ;;  %726 = vmatprep.subr.bf16.mxu1 (!%p391_p9), %v14528_v10 }
  0x15   : > { %v14531_v12 = vld [vmem:[%s21173_s1 + $0x2c] ss:$16 sps:$4 sm:$0xff] (!%p391_p9)   ;;  %v14516_v13 = vld [vmem:[%s21173_s1 + $0x80] ss:$16 sps:$4 sm:$0xff] (!%p391_p9)   ;;  %v14517_v14 = vld [vmem:[%s21173_s1 + $0xa4] ss:$16 sps:$4 sm:$0xff] (!%p391_p9)   ;;  %727 = vmatpush1.bf16.msra.mxu1 (!%p391_p9), %v14530_v11 }
  0x16   : > { %v14533_v15 = vld [vmem:[%s21173_s1 + $0x28] ss:$16 sps:$4 sm:$0xff] (!%p391_p9)   ;;  %728 = vmatprep.subr.bf16.mxu1 (!%p391_p9), %v14531_v12  ;;  %v14534_v16 = vld [vmem:[%s21173_s1 + $0x4c] ss:$16 sps:$4 sm:$0xff] (!%p391_p9)   ;;  %v14519_v17 = vld [vmem:[%s21173_s1 + $0xa0] ss:$16 sps:$4 sm:$0xff] (!%p391_p9)  }
  0x17   : > { %676 = vmatpush1.bf16.msra.mxu0 (!%p391_p9), %v14507_v4  ;;  %v14520_v18 = vld [vmem:[%s21173_s1 + $0xc4] ss:$16 sps:$4 sm:$0xff] (!%p391_p9)   ;;  %v14536_v19 = vld [vmem:[%s21173_s1 + $0x48] ss:$16 sps:$4 sm:$0xff] (!%p391_p9)   ;;  %v14537_v20 = vld [vmem:[%s21173_s1 + $0x6c] ss:$16 sps:$4 sm:$0xff] (!%p391_p9)  }
  0x18   : > { %s434_s15 = scalar_select %p433_p10, %s16720_s29, 1  ;;  %677 = vmatprep.subr.bf16.mxu0 %v14508_v5  ;;  %v14522_v21 = vld [vmem:[%s21173_s1 + $0xc0] ss:$16 sps:$4 sm:$0xff]   ;;  %v14523_v22 = vld [vmem:[%s21173_s1 + $0xe4] ss:$16 sps:$4 sm:$0xff]   ;;  %vm8653_vm2 = vcmask 261120  }
  0x19   : > { %729 = vmatpush1.bf16.msra.mxu1 %v14533_v15  ;;  %v14539_v23 = vld [vmem:[%s21173_s1 + $0x68] ss:$16 sps:$4 sm:$0xff]   ;;  %v14540_v24 = vld [vmem:[%s21173_s1 + $0x8c] ss:$16 sps:$4 sm:$0xff]   ;;  %v14525_v25 = vld [vmem:[%s21173_s1 + $0xe0] ss:$16 sps:$4 sm:$0xff]  }
  0x1a   : > { %s14123_s23 = sshll.u32 %s434_s15, 4  ;;  %730 = vmatprep.subr.bf16.mxu1 %v14534_v16  ;;  %v14542_v26 = vld [vmem:[%s21173_s1 + $0x88] ss:$16 sps:$4 sm:$0xff]   ;;  %v14554_v27 = vld [vmem:[%s21174_s2 + $0x404] ss:$16 sps:$4 sm:$0xff]   ;;  %s431_s17 = sand.u32 1, %s16615_s26  }
  0x1b   : > { %s16779_s16 = scalar_lea.vmem %s21172_s0, %s14123_s23  ;;  %678 = vmatpush1.bf16.msra.mxu0 %v14510_v6  ;;  %v14543_v28 = vld [vmem:[%s21173_s1 + $0xac] ss:$16 sps:$4 sm:$0xff]   ;;  %v14552_v30 = vld [vmem:[%s21174_s2 + $0x400] ss:$16 sps:$4 sm:$0xff]   ;;  %v14545_v31 = vld [vmem:[%s21173_s1 + $0xa8] ss:$16 sps:$4 sm:$0xff]  }
  0x1c   : > { %679 = vmatprep.subr.bf16.mxu0 %v14511_v7  ;;  %v14526_v29 = vld [vmem:[%s16779_s16] sm:$0xff]   ;;  %v14546_v33 = vld [vmem:[%s21173_s1 + $0xcc] ss:$16 sps:$4 sm:$0xff]   ;;  %v14548_v35 = vld [vmem:[%s21173_s1 + $0xc8] ss:$16 sps:$4 sm:$0xff]   ;;  %s14120_s14 = sshll.u32 %s16720_s29, 4 }
  0x1d   : > { %731 = vmatpush1.bf16.msra.mxu1 %v14536_v19  ;;  %v14560_v32 = vld [vmem:[%s21174_s2 + $0x424] ss:$16 sps:$4 sm:$0xff]   ;;  %v14558_v34 = vld [vmem:[%s21174_s2 + $0x420] ss:$16 sps:$4 sm:$0xff]   ;;  %v14549_v37 = vld [vmem:[%s21173_s1 + $0xec] ss:$16 sps:$4 sm:$0xff]   ;;  %s21130_s21 = scalar_lea.hbm %s21185_s13, %s14120_s14 }
  0x1e   : > { %732 = vmatprep.subr.bf16.mxu1 %v14537_v20  ;;  %v14566_v36 = vld [vmem:[%s21174_s2 + $0x444] ss:$16 sps:$4 sm:$0xff]   ;;  %v14527_v38 = vld [vmem:[%s16779_s16 + $0x8] sm:$0xff]   ;;  %v14564_v39 = vld [vmem:[%s21174_s2 + $0x440] ss:$16 sps:$4 sm:$0xff]   ;;  %s432_s19 = scalar_lea.vmem [#allocation4], %s431_s17 }
  0x1f   : > { %680 = vmatpush1.bf16.msra.mxu0 %v14513_v8  ;;  %v14551_v40 = vld [vmem:[%s21173_s1 + $0xe8] ss:$16 sps:$4 sm:$0xff]   ;;  %v14572_v41 = vld [vmem:[%s21174_s2 + $0x464] ss:$16 sps:$4 sm:$0xff]   ;;  %v14557_v42 = vld [vmem:[%s21174_s2 + $0x40c] ss:$16 sps:$4 sm:$0xff]  }
  0x20   : > { %681 = vmatprep.subr.bf16.mxu0 %v14514_v9  ;;  %v14570_v43 = vld [vmem:[%s21174_s2 + $0x460] ss:$16 sps:$4 sm:$0xff]   ;;  %v14555_v44 = vld [vmem:[%s21174_s2 + $0x408] ss:$16 sps:$4 sm:$0xff]   ;;  %v14563_v45 = vld [vmem:[%s21174_s2 + $0x42c] ss:$16 sps:$4 sm:$0xff]  }
  0x21   : > { %733 = vmatpush1.bf16.msra.mxu1 %v14539_v23  ;;  %v14576_v46 = vld [vmem:[%s21174_s2 + $0x480] ss:$16 sps:$4 sm:$0xff]   ;;  %v14578_v47 = vld [vmem:[%s21174_s2 + $0x484] ss:$16 sps:$4 sm:$0xff]   ;;  %v14561_v48 = vld [vmem:[%s21174_s2 + $0x428] ss:$16 sps:$4 sm:$0xff]  }
  0x22   : > { %734 = vmatprep.subr.bf16.mxu1 %v14540_v24  ;;  %v14584_v49 = vld [vmem:[%s21174_s2 + $0x4a4] ss:$16 sps:$4 sm:$0xff]   ;;  %v14569_v50 = vld [vmem:[%s21174_s2 + $0x44c] ss:$16 sps:$4 sm:$0xff]   ;;  %v14582_v51 = vld [vmem:[%s21174_s2 + $0x4a0] ss:$16 sps:$4 sm:$0xff]  }
  0x23   : > { %682 = vmatpush1.bf16.msra.mxu0 %v14516_v13  ;;  %v14567_v52 = vld [vmem:[%s21174_s2 + $0x448] ss:$16 sps:$4 sm:$0xff]   ;;  %v14590_v53 = vld [vmem:[%s21174_s2 + $0x4c4] ss:$16 sps:$4 sm:$0xff]   ;;  %v14575_v54 = vld [vmem:[%s21174_s2 + $0x46c] ss:$16 sps:$4 sm:$0xff]  }
  0x24   : > { %683 = vmatprep.subr.bf16.mxu0 %v14517_v14  ;;  %v14588_v55 = vld [vmem:[%s21174_s2 + $0x4c0] ss:$16 sps:$4 sm:$0xff]   ;;  %v14573_v56 = vld [vmem:[%s21174_s2 + $0x468] ss:$16 sps:$4 sm:$0xff]   ;;  %v14596_v57 = vld [vmem:[%s21174_s2 + $0x4e4] ss:$16 sps:$4 sm:$0xff]  }
  0x25   : > { %735 = vmatpush1.bf16.msra.mxu1 %v14542_v26  ;;  %v14581_v58 = vld [vmem:[%s21174_s2 + $0x48c] ss:$16 sps:$4 sm:$0xff]   ;;  %v14594_v59 = vld [vmem:[%s21174_s2 + $0x4e0] ss:$16 sps:$4 sm:$0xff]   ;;  %v14579_v60 = vld [vmem:[%s21174_s2 + $0x488] ss:$16 sps:$4 sm:$0xff]  }
  0x26   : > { %736 = vmatprep.subr.bf16.mxu1 %v14543_v28  ;;  %v14587_v61 = vld [vmem:[%s21174_s2 + $0x4ac] ss:$16 sps:$4 sm:$0xff]   ;;  %v14585_v62 = vld [vmem:[%s21174_s2 + $0x4a8] ss:$16 sps:$4 sm:$0xff]   ;;  %v14602_v3 = vld [vmem:[%s21174_s2 + $0x504] ss:$16 sps:$4 sm:$0xff]  }
  0x27   : > { %684 = vmatpush1.bf16.msra.mxu0 %v14519_v17  ;;  %v14593_v63 = vld [vmem:[%s21174_s2 + $0x4cc] ss:$16 sps:$4 sm:$0xff]   ;;  %v14591_v0 = vld [vmem:[%s21174_s2 + $0x4c8] ss:$16 sps:$4 sm:$0xff]   ;;  %v14600_v5 = vld [vmem:[%s21174_s2 + $0x500] ss:$16 sps:$4 sm:$0xff]  }
  0x28   : > { %685 = vmatprep.subr.bf16.mxu0 %v14520_v18  ;;  %v14599_v1 = vld [vmem:[%s21174_s2 + $0x4ec] ss:$16 sps:$4 sm:$0xff]   ;;  %v14603_v6 = vld [vmem:[%s21174_s2 + $0x508] ss:$16 sps:$4 sm:$0xff]   ;;  %v14608_v7 = vld [vmem:[%s21174_s2 + $0x524] ss:$16 sps:$4 sm:$0xff]  }
  0x29   : > { %737 = vmatpush1.bf16.msra.mxu1 %v14545_v31  ;;  %v14605_v4 = vld [vmem:[%s21174_s2 + $0x50c] ss:$16 sps:$4 sm:$0xff]   ;;  %v14606_v9 = vld [vmem:[%s21174_s2 + $0x520] ss:$16 sps:$4 sm:$0xff]   ;;  %v14609_v10 = vld [vmem:[%s21174_s2 + $0x528] ss:$16 sps:$4 sm:$0xff]  }
  0x2a   : > { %738 = vmatprep.subr.bf16.mxu1 %v14546_v33  ;;  %v14611_v8 = vld [vmem:[%s21174_s2 + $0x52c] ss:$16 sps:$4 sm:$0xff]   ;;  %v14614_v11 = vld [vmem:[%s21174_s2 + $0x544] ss:$16 sps:$4 sm:$0xff]   ;;  %v14612_v13 = vld [vmem:[%s21174_s2 + $0x540] ss:$16 sps:$4 sm:$0xff]  }
  0x2b   : > { %686 = vmatpush1.bf16.msra.mxu0 %v14522_v21  ;;  %v14617_v12 = vld [vmem:[%s21174_s2 + $0x54c] ss:$16 sps:$4 sm:$0xff]   ;;  %v14615_v14 = vld [vmem:[%s21174_s2 + $0x548] ss:$16 sps:$4 sm:$0xff]   ;;  %v14620_v15 = vld [vmem:[%s21174_s2 + $0x564] ss:$16 sps:$4 sm:$0xff]  }
  0x2c   : > { %687 = vmatprep.subr.bf16.mxu0 %v14523_v22  ;;  %v14623_v16 = vld [vmem:[%s21174_s2 + $0x56c] ss:$16 sps:$4 sm:$0xff]   ;;  %v14618_v17 = vld [vmem:[%s21174_s2 + $0x560] ss:$16 sps:$4 sm:$0xff]   ;;  %v14621_v18 = vld [vmem:[%s21174_s2 + $0x568] ss:$16 sps:$4 sm:$0xff]  }
  0x2d   : > { %739 = vmatpush1.bf16.msra.mxu1 %v14548_v35  ;;  %v14626_v19 = vld [vmem:[%s21174_s2 + $0x584] ss:$16 sps:$4 sm:$0xff]   ;;  %v14629_v20 = vld [vmem:[%s21174_s2 + $0x58c] ss:$16 sps:$4 sm:$0xff]   ;;  %v14624_v21 = vld [vmem:[%s21174_s2 + $0x580] ss:$16 sps:$4 sm:$0xff]  }
  0x2e   : > { %740 = vmatprep.subr.bf16.mxu1 %v14549_v37  ;;  %v14627_v22 = vld [vmem:[%s21174_s2 + $0x588] ss:$16 sps:$4 sm:$0xff]   ;;  %v14632_v23 = vld [vmem:[%s21174_s2 + $0x5a4] ss:$16 sps:$4 sm:$0xff]   ;;  %v14635_v24 = vld [vmem:[%s21174_s2 + $0x5ac] ss:$16 sps:$4 sm:$0xff]   ;;  %v481_v37 = vlaneseq }
  0x2f   : > { %688 = vmatpush1.bf16.msra.mxu0 %v14525_v25  ;;  %v14630_v25 = vld [vmem:[%s21174_s2 + $0x5a0] ss:$16 sps:$4 sm:$0xff]   ;;  %v14633_v26 = vld [vmem:[%s21174_s2 + $0x5a8] ss:$16 sps:$4 sm:$0xff]   ;;  %v14641_v28 = vld [vmem:[%s21174_s2 + $0x5cc] ss:$16 sps:$4 sm:$0xff]  }
  0x30   : > { %1897 = vmatprep.subr.bf16.mxu0 %v14554_v27  ;;  %v14638_v27 = vld [vmem:[%s21174_s2 + $0x5c4] ss:$16 sps:$4 sm:$0xff]   ;;  %v14642_v31 = vld [vmem:[%s21174_s2 + $0x5e0] ss:$16 sps:$4 sm:$0xff]   ;;  %v14645_v33 = vld [vmem:[%s21174_s2 + $0x5e8] ss:$16 sps:$4 sm:$0xff]  }
  0x31   : > { %741 = vmatpush1.bf16.msra.mxu1 %v14551_v40  ;;  %v14650_v35 = vld [vmem:[%s21174_s2 + $0x604] ss:$16 sps:$4 sm:$0xff]   ;;  %vm1168_vm0 = vsmask.f32 7424  ;;  %s12221_s23 = sshll.u32 %s432_s19, 4  ;;  %vm12206_vm3 = vcmask 57344   ;;  %s21132_s23 = int_to_ptr.vmem [resolvable:$true] %s12221_s23 }
  0x32   : > { %706 = vmatmul.mubr.bf16.vlgmr.msra.gmra.mrb[0].mxu0 %v14526_v29  ;;  %2003 = vmatprep.subr.bf16.mxu1 %v14557_v42  ;;  %s12209_s15 = scalar_lea.sflag [#allocation5], %s431_s17  ;;  %s16561_s22 = scalar_lea.vmem %s21132_s23, 16 }
  0x33   : > { %715 = vmatprep.mubr.bf16.mxu0 %v16625_v2  ;;  %1898 = vmatpush1.bf16.msra.mxu0 %v14552_v30  ;;  %v14639_v30 = vld [vmem:[%s21174_s2 + $0x5c8] ss:$16 sps:$4 sm:$0xff]   ;;  %p16562_p11 = scmp.ne.s32.totalorder %s21132_s23, %s16561_s22  ;;  %s16628_s29 = smov [#allocation4]  }
  0x34   : > { %1899 = vmatprep.subr.bf16.mxu0 %v14560_v32  ;;  %759 = vmatmul.mubr.bf16.vlgmr.msra.gmra.mrb[0].mxu1 %v14526_v29  ;;  %v14636_v29 = vld [vmem:[%s21174_s2 + $0x5c0] ss:$16 sps:$4 sm:$0xff]   ;;  %v14644_v32 = vld [vmem:[%s21174_s2 + $0x5e4] ss:$16 sps:$4 sm:$0xff]   ;;  %s16565_s27 = sshll.u32 %s16628_s29, 4  ;;  %s16566_s27 = int_to_ptr.vmem [resolvable:$false] %s16565_s27 }
  0x35   : > { %768 = vmatprep.mubr.bf16.mxu1 %v16625_v2  ;;  %2004 = vmatpush1.bf16.msra.mxu1 %v14555_v44  ;;  %v14597_v2 = vld [vmem:[%s21174_s2 + $0x4e8] ss:$16 sps:$4 sm:$0xff]   ;;  %p16563_p12 = pnand %p16562_p11, %p16737_p5  ;;  %s16567_s24 = scalar_lea.vmem %s16566_s27, 32 }
  0x36   : > { %2005 = vmatprep.subr.bf16.mxu1 %v14563_v45  ;;  %p16568_p0 = scmp.lt.s32.totalorder %s21132_s23, %s16566_s27  ;;  %p16569_p1 = scmp.lt.s32.totalorder %s16567_s24, %s16561_s22 }
  0x37   : > { %1900 = vmatpush1.bf16.msra.mxu0 %v14558_v34  ;;  %v14647_v34 = vld [vmem:[%s21174_s2 + $0x5ec] ss:$16 sps:$4 sm:$0xff]   ;;  %p16564_p13 = pneg %p16563_p12 }
  0x38   : > { %1901 = vmatprep.subr.bf16.mxu0 %v14566_v36  ;;  %v14653_v36 = vld [vmem:[%s21174_s2 + $0x60c] ss:$16 sps:$4 sm:$0xff]   ;;  %p16570_p2 = por %p16569_p1, %p16568_p0 }
  0x39   : > { %2006 = vmatpush1.bf16.msra.mxu1 %v14561_v48 }
  0x3a   : > { %716 = vmatmul.mubr.bf16.gmra.mrb[4].mxu0 %v14527_v38  ;;  %2007 = vmatprep.subr.bf16.mxu1 %v14569_v50  ;;  %p16571_p3 = pnand %p16570_p2, %p16564_p13 }
  0x3b   : > { %1902 = vmatpush1.bf16.msra.mxu0 %v14564_v39  ;;  %v479_v39 = vld [vmem:[%s21178_s6] ss:$8 sm:$0xf] }
  0x3c   : > { %1903 = vmatprep.subr.bf16.mxu0 %v14572_v41  ;;  %769 = vmatmul.mubr.bf16.gmra.mrb[4].mxu1 %v14527_v38  ;;  %v482_v38 = vshrl.u32 %v481_v37, 7 }
  0x3d   : > { %2008 = vmatpush1.bf16.msra.mxu1 %v14567_v52 }
  0x3e   : > { %2009 = vmatprep.subr.bf16.mxu1 %v14575_v54  ;;  %v17061_v40 = vsub.s32 0, %v482_v38  ;;  %v17063_v41 = vsub.s32 1, %v482_v38 }
  0x3f   : > { %1904 = vmatpush1.bf16.msra.mxu0 %v14570_v43 }
  0x40   : > { %1905 = vmatprep.subr.bf16.mxu0 %v14578_v47  ;;  %v484_v42 = vrot.slane %v479_v39, %v17061_v40  ;;  %v488_v43 = vrot.slane %v479_v39, %v17063_v41  ;;  %v995_v47 = vld [vmem:[#allocation2 + $0x40] sm:$0x11] }
  0x41   : > { %2010 = vmatpush1.bf16.msra.mxu1 %v14573_v56 }
  0x42   : > { %2011 = vmatprep.subr.bf16.mxu1 %v14581_v58  ;;  %v17067_v58 = vcombine.high %v995_v47, %v995_v47 }
  0x43   : > { %1906 = vmatpush1.bf16.msra.mxu0 %v14576_v46 }
  0x44   : > { %1907 = vmatprep.subr.bf16.mxu0 %v14584_v49 }
  0x45   : > { %2012 = vmatpush1.bf16.msra.mxu1 %v14579_v60  ;;  %v17071_v60 = vcombine.low %v995_v47, %v995_v47 }
  0x46   : > { %2013 = vmatprep.subr.bf16.mxu1 %v14587_v61  ;;  %v17073_v61 = vsub.s32 3, %v482_v38 }
  0x47   : > { %1908 = vmatpush1.bf16.msra.mxu0 %v14582_v51 }
  0x48   : > { %1909 = vmatprep.subr.bf16.mxu0 %v14590_v53 }
  0x49   : > { %2014 = vmatpush1.bf16.msra.mxu1 %v14585_v62 }
  0x4a   : > { %2015 = vmatprep.subr.bf16.mxu1 %v14593_v63 }
  0x4b   : > { %1910 = vmatpush1.bf16.msra.mxu0 %v14588_v55 }
  0x4c   : > { %1911 = vmatprep.subr.bf16.mxu0 %v14596_v57 }
  0x4d   : > { %2016 = vmatpush1.bf16.msra.mxu1 %v14591_v0  ;;  %v1229_v0 = vshll.u32 %v17067_v58, 16 }
  0x4e   : > { %2017 = vmatprep.subr.bf16.mxu1 %v14599_v1 }
  0x4f   : > { %1912 = vmatpush1.bf16.msra.mxu0 %v14594_v59  ;;  %v17069_v59 = vsub.s32 2, %v482_v38 }
  0x50   : > { %1913 = vmatprep.subr.bf16.mxu0 %v14602_v3  ;;  %v1221_v3 = vshll.u32 %v17071_v60, 16 }
  0x51   : > { %2018 = vmatpush1.bf16.msra.mxu1 %v14597_v2 }
  0x52   : > { %2019 = vmatprep.subr.bf16.mxu1 %v14605_v4 }
  0x53   : > { %1914 = vmatpush1.bf16.msra.mxu0 %v14600_v5 }
  0x54   : > { %1915 = vmatprep.subr.bf16.mxu0 %v14608_v7 }
  0x55   : > { %2020 = vmatpush1.bf16.msra.mxu1 %v14603_v6 }
  0x56   : > { %2021 = vmatprep.subr.bf16.mxu1 %v14611_v8  ;;  %v17084_v8 = vrot.slane %v479_v39, %v17069_v59 }
  0x57   : > { %1916 = vmatpush1.bf16.msra.mxu0 %v14606_v9 }
  0x58   : > { %1917 = vmatprep.subr.bf16.mxu0 %v14614_v11 }
  0x59   : > { %2022 = vmatpush1.bf16.msra.mxu1 %v14609_v10 }
  0x5a   : > { %2023 = vmatprep.subr.bf16.mxu1 %v14617_v12  ;;  %v17087_v12 = vrot.slane %v479_v39, %v17073_v61 }
  0x5b   : > { %1918 = vmatpush1.bf16.msra.mxu0 %v14612_v13 }
  0x5c   : > { %1919 = vmatprep.subr.bf16.mxu0 %v14620_v15 }
  0x5d   : > { %2024 = vmatpush1.bf16.msra.mxu1 %v14615_v14 }
  0x5e   : > { %2025 = vmatprep.subr.bf16.mxu1 %v14623_v16  ;;  %v17090_v16 = vrot.slane %v1229_v0, 1 }
  0x5f   : > { %1920 = vmatpush1.bf16.msra.mxu0 %v14618_v17  ;;  %v996_v17 = vld [vmem:[#allocation2 + $0x48] sm:$0x11] }
  0x60   : > { %1921 = vmatprep.subr.bf16.mxu0 %v14626_v19 }
  0x61   : > { %2026 = vmatpush1.bf16.msra.mxu1 %v14621_v18 }
  0x62   : > { %2027 = vmatprep.subr.bf16.mxu1 %v14629_v20  ;;  %v17093_v20 = vrot.slane %v1221_v3, 1 }
  0x63   : > { %1922 = vmatpush1.bf16.msra.mxu0 %v14624_v21 }
  0x64   : > { %1923 = vmatprep.subr.bf16.mxu0 %v14632_v23 }
  0x65   : > { %2028 = vmatpush1.bf16.msra.mxu1 %v14627_v22 }
  0x66   : > { %2029 = vmatprep.subr.bf16.mxu1 %v14635_v24 }
  0x67   : > { %1924 = vmatpush1.bf16.msra.mxu0 %v14630_v25 }
  0x68   : > { %1925 = vmatprep.subr.bf16.mxu0 %v14638_v27 }
  0x69   : > { %2030 = vmatpush1.bf16.msra.mxu1 %v14633_v26  ;;  %v3157_v26 = vrot.slane %v17067_v58, 1 }
  0x6a   : > { %2031 = vmatprep.subr.bf16.mxu1 %v14641_v28 }
  0x6b   : > { %1926 = vmatpush1.bf16.msra.mxu0 %v14636_v29 }
  0x6c   : > { %1927 = vmatprep.subr.bf16.mxu0 %v14644_v32  ;;  %v3155_v32 = vrot.slane %v17071_v60, 1 }
  0x6d   : > { %2032 = vmatpush1.bf16.msra.mxu1 %v14639_v30  ;;  %v17098_v30 = vcombine.high %v996_v17, %v996_v17 }
  0x6e   : > { %2033 = vmatprep.subr.bf16.mxu1 %v14647_v34 }
  0x6f   : > { %1928 = vmatpush1.bf16.msra.mxu0 %v14642_v31  ;;  %v3161_v60 = vrot.slane %v17098_v30, 1 }
  0x70   : > { %1950 = vmatprep.subr.bf16.mxu0 %v14650_v35 }
  0x71   : > { %2034 = vmatpush1.bf16.msra.mxu1 %v14645_v33 }
  0x72   : > { %2056 = vmatprep.subr.bf16.mxu1 %v14653_v36 }
 0x105   : > { %v707_v44 = vpop.f32.mrb[0].mxu0 }
 0x106   : > { %v708_v45 = vadd.f32 %v707_v44, %v484_v42  ;;  %v709_v46 = vpop.f32.mrb[1].mxu0 }
 0x107   : > { %v710_v48 = vadd.f32 %v709_v46, %v488_v43  ;;  %v711_v49 = vpop.f32.mrb[2].mxu0  ;;  %v760_v21 = vpop.f32.mrb[0].mxu1 }
 0x108   : > { %v779_v50 = vmax.f32 %v708_v45, 0.0  ;;  %v712_v51 = vadd.f32 %v711_v49, %v484_v42  ;;  %v713_v52 = vpop.f32.mrb[3].mxu0  ;;  %v761_v24 = vadd.f32 %v760_v21, %v17084_v8  ;;  %v762_v25 = vpop.f32.mrb[1].mxu1 }
 0x109   : > { %v780_v53 = vmax.f32 %v710_v48, 0.0  ;;  %v714_v54 = vadd.f32 %v713_v52, %v488_v43  ;;  %v763_v28 = vadd.f32 %v762_v25, %v17087_v12  ;;  %v764_v29 = vpop.f32.mrb[2].mxu1  ;;  %v14660_v25 = vld [vmem:[%s21174_s2 + $0x62c] ss:$16 sps:$4 sm:$0xff]  }
 0x10a   : > { %v783_v55 = vmax.f32 %v712_v51, 0.0  ;;  %v781_v35 = vmax.f32 %v761_v24, 0.0  ;;  %v765_v36 = vadd.f32 %v764_v29, %v17084_v8  ;;  %v766_v37 = vpop.f32.mrb[3].mxu1  ;;  %v17110_v51 = vcombine.low %v996_v17, %v996_v17  ;;  %v14657_v24 = vld [vmem:[%s21174_s2 + $0x624] ss:$16 sps:$4 sm:$0xff]  }
 0x10b   : > { %v14124_v56 = vpack.c.bf16 %v780_v53, %v779_v50  ;;  %v784_v57 = vmax.f32 %v714_v54, 0.0  ;;  %v782_v39 = vmax.f32 %v763_v28, 0.0 }
 0x10c   : > { %v17081_v7 = vpack.c.bf16 %v783_v55, %v779_v50  ;;  %v785_v47 = vmax.f32 %v765_v36, 0.0 }
 0x10d   : > { %843 = vst [vmem:[#allocation2] sm:$0xff] %v14124_v56  ;;  %v17075_v62 = vpack.c.bf16 %v784_v57, %v783_v55  ;;  %v717_v63 = vpop.f32.mrb[4].mxu0  ;;  %v17079_v6 = vpack.c.bf16 %v784_v57, %v780_v53  ;;  %v14125_v49 = vpack.c.bf16 %v782_v39, %v781_v35  ;;  %v14648_v56 = vld [vmem:[%s21174_s2 + $0x600] ss:$16 sps:$4 sm:$0xff]  }
 0x10e   : > { %v718_v1 = vadd.f32 %v717_v63, %v484_v42  ;;  %v719_v2 = vpop.f32.mrb[5].mxu0  ;;  %v1172_v19 = vshll.u32 %v17081_v7, 16  ;;  %v1170_v46 = vshrl.u32 %v17081_v7, 16 }
 0x10f   : > { %v720_v4 = vadd.f32 %v719_v2, %v488_v43  ;;  %v721_v5 = vpop.f32.mrb[6].mxu0  ;;  %v1184_v15 = vshll.u32 %v17079_v6, 16  ;;  %v1182_v38 = vshrl.u32 %v17079_v6, 16  ;;  %844 = vst [vmem:[#allocation2 + $0x8] sm:$0xff] %v14125_v49  ;;  %v770_v0 = vpop.f32.mrb[4].mxu1 }
 0x110   : > { %v787_v9 = vmax.f32 %v718_v1, 0.0  ;;  %v722_v10 = vadd.f32 %v721_v5, %v484_v42  ;;  %v723_v11 = vpop.f32.mrb[7].mxu0  ;;  %v1174_v34 = vrot.slane %v1172_v19, 1  ;;  %v767_v42 = vadd.f32 %v766_v37, %v17087_v12  ;;  %v14661_v49 = vld [vmem:[%s21174_s2 + $0x640] ss:$16 sps:$4 sm:$0xff]  }
 0x111   : > { %v788_v13 = vmax.f32 %v720_v4, 0.0  ;;  %v724_v14 = vadd.f32 %v723_v11, %v488_v43  ;;  %v1186_v27 = vrot.slane %v1184_v15, 1  ;;  %v14651_v4 = vld [vmem:[%s21174_s2 + $0x608] ss:$16 sps:$4 sm:$0xff]   ;;  %v17130_v15 = vpack.c.bf16 %v785_v47, %v781_v35 }
 0x112   : > { %v791_v18 = vmax.f32 %v722_v10, 0.0  ;;  %v786_v50 = vmax.f32 %v767_v42, 0.0  ;;  %v1175_v53 = vor.u32 %v1174_v34, %v1170_v46  ;;  %v772_v10 = vpop.f32.mrb[5].mxu1  ;;  %v14655_v34 = vld [vmem:[%s21174_s2 + $0x620] ss:$16 sps:$4 sm:$0xff]  }
 0x113   : > { %v14128_v22 = vpack.c.bf16 %v788_v13, %v787_v9  ;;  %v792_v23 = vmax.f32 %v724_v14, 0.0  ;;  %v1187_v48 = vor.u32 %v1186_v27, %v1182_v38  ;;  %v773_v11 = vadd.f32 %v772_v10, %v17087_v12  ;;  %v14658_v35 = vld [vmem:[%s21174_s2 + $0x628] ss:$16 sps:$4 sm:$0xff]  }
 0x114   : > { %v3001_v31 = vld [vmem:[#allocation2] sm:$0xee]  ;;  %v17107_v45 = vpack.c.bf16 %v791_v18, %v787_v9  ;;  %v17119_v63 = vpack.c.bf16 %v786_v50, %v785_v47  ;;  %v771_v9 = vadd.f32 %v770_v0, %v17084_v8  ;;  %v17128_v14 = vpack.c.bf16 %v786_v50, %v782_v39  ;;  %v14664_v50 = vld [vmem:[%s21174_s2 + $0x648] ss:$16 sps:$4 sm:$0xff]  }
 0x115   : > { %847 = vst [vmem:[#allocation2 + $0x20] sm:$0xff] %v14128_v22  ;;  %v14130_v33 = vpack.c.bf16 %v792_v23, %v791_v18  ;;  %v12857_v43 = vcombine.high %v3001_v31, %v17075_v62  ;;  %v17105_v44 = vpack.c.bf16 %v792_v23, %v788_v13  ;;  %v12856_v55 = vcombine.low %v3001_v31, %v17075_v62  ;;  %v774_v13 = vpop.f32.mrb[6].mxu1 }
 0x116   : > { %v1177_v54 = vshll.u32 %v17107_v45, 16  ;;  %v1217_v62 = vshrl.u32 %v17107_v45, 16  ;;  %v776_v22 = vpop.f32.mrb[7].mxu1  ;;  %v789_v27 = vmax.f32 %v771_v9, 0.0  ;;  %v790_v28 = vmax.f32 %v773_v11, 0.0 }
 0x117   : > { %849 = vst [vmem:[#allocation2 + $0x30] sm:$0xff] %v14130_v33  ;;  %v1189_v52 = vshll.u32 %v17105_v44, 16  ;;  %v1225_v57 = vshrl.u32 %v17105_v44, 16  ;;  %v3146_v1 = vrot.slane %v12857_v43, 1  ;;  %v3147_v2 = vrot.slane %v17105_v44, 1 }
 0x118   : > { %v1179_v5 = vrot.slane %v1177_v54, 1  ;;  %v3143_v23 = vrot.slane %v12856_v55, 1  ;;  %v775_v29 = vadd.f32 %v774_v13, %v17084_v8  ;;  %v777_v31 = vadd.f32 %v776_v22, %v17087_v12  ;;  %v14663_v12 = vld [vmem:[%s21174_s2 + $0x644] ss:$16 sps:$4 sm:$0xff]   ;;  %v14666_v43 = vld [vmem:[%s21174_s2 + $0x64c] ss:$16 sps:$4 sm:$0xff]  }
 0x119   : > { %v1191_v3 = vrot.slane %v1189_v52, 1  ;;  %v17133_v17 = vsel %vm3142_vm1, %v3146_v1, %v3147_v2  ;;  %v1206_v37 = vshrl.u32 %v17128_v14, 16  ;;  %v1208_v8 = vshll.u32 %v17128_v14, 16  ;;  %v14673_v54 = vld [vmem:[%s21174_s2 + $0x66c] ss:$16 sps:$4 sm:$0xff]  }
 0x11a   : > { %v1180_v19 = vsel %vm1168_vm0, %v1175_v53, %v1179_v5  ;;  %v1219_v36 = vor.u32 %v1217_v62, %v1179_v5  ;;  %v793_v38 = vmax.f32 %v775_v29, 0.0  ;;  %v794_v39 = vmax.f32 %v777_v31, 0.0  ;;  %v14671_v62 = vld [vmem:[%s21174_s2 + $0x668] ss:$16 sps:$4 sm:$0xff]  }
 0x11b   : > { %v1192_v18 = vsel %vm1168_vm0, %v1187_v48, %v1191_v3  ;;  %v1227_v21 = vor.u32 %v1225_v57, %v1191_v3  ;;  %v1194_v42 = vshrl.u32 %v17130_v15, 16  ;;  %v1210_v44 = vrot.slane %v1208_v8, 1 }
 0x11c   : > { %1929 = vmatprep.mubr.bf16.mxu0 %v1192_v18  ;;  %2035 = vmatprep.mubr.bf16.mxu1 %v1192_v18  ;;  %v1196_v46 = vshll.u32 %v17130_v15, 16  ;;  %v3144_v47 = vrot.slane %v17107_v45, 1  ;;  %v17167_v48 = vsel %vm3142_vm1, %v3147_v2, %v3157_v26  ;;  %v14131_v52 = vpack.c.bf16 %v794_v39, %v793_v38  ;;  %v3002_v45 = vld [vmem:[#allocation2 + $0x8] sm:$0xee]  ;;  %v14670_v26 = vld [vmem:[%s21174_s2 + $0x664] ss:$16 sps:$4 sm:$0xff]  }
 0x11d   : > { %1930 = vmatmul.mubr.bf16.vlgmr.msra.gmra.mrb[8].mxu0 %v1180_v19  ;;  %2036 = vmatmul.mubr.bf16.vlgmr.msra.gmra.mrb[8].mxu1 %v1180_v19  ;;  %v1232_v33 = vsel %vm1168_vm0, %v1227_v21, %v17090_v16  ;;  %v14129_v16 = vpack.c.bf16 %v790_v28, %v789_v27  ;;  %v1245_v53 = vshll.u32 %v17098_v30, 16  ;;  %v1224_v58 = vsel %vm1168_vm0, %v1219_v36, %v17093_v20  ;;  %v14679_v21 = vld [vmem:[%s21174_s2 + $0x68c] ss:$16 sps:$4 sm:$0xff]   ;;  %v14674_v36 = vld [vmem:[%s21174_s2 + $0x680] ss:$16 sps:$4 sm:$0xff]  }
 0x11e   : > { %1951 = vmatpush1.bf16.msra.mxu0 %v14648_v56  ;;  %2057 = vmatpush1.bf16.msra.mxu1 %v14651_v4  ;;  %v1198_v55 = vrot.slane %v1196_v46, 1  ;;  %v17185_v56 = vsel %vm3142_vm1, %v3143_v23, %v3144_v47  ;;  %v17190_v57 = vsel %vm3142_vm1, %v3144_v47, %v3155_v32  ;;  %850 = vst [vmem:[#allocation2 + $0x38] sm:$0xff] %v14131_v52  ;;  %v1237_v1 = vshll.u32 %v17110_v51, 16  ;;  %v14668_v32 = vld [vmem:[%s21174_s2 + $0x660] ss:$16 sps:$4 sm:$0xff]  }
 0x11f   : > { %1939 = vmatprep.mubr.bf16.mxu0 %v1232_v33  ;;  %2045 = vmatprep.mubr.bf16.mxu1 %v1232_v33  ;;  %848 = vst [vmem:[#allocation2 + $0x28] sm:$0xff] %v14129_v16  ;;  %v16533_v20 = vpack.c.bf16 %v794_v39, %v790_v28  ;;  %v16534_v0 = vpack.c.bf16 %v793_v38, %v789_v27  ;;  %v3159_v19 = vrot.slane %v17110_v51, 1  ;;  %v14682_v16 = vld [vmem:[%s21174_s2 + $0x6a4] ss:$16 sps:$4 sm:$0xff]   ;;  %v14685_v38 = vld [vmem:[%s21174_s2 + $0x6ac] ss:$16 sps:$4 sm:$0xff]  }
 0x120   : > { %1952 = vmatprep.subr.bf16.mxu0 %v14657_v24  ;;  %2058 = vmatprep.subr.bf16.mxu1 %v14660_v25  ;;  %v12859_v2 = vcombine.high %v3002_v45, %v17119_v63  ;;  %v1211_v3 = vor.u32 %v1210_v44, %v1206_v37  ;;  %v1199_v4 = vor.u32 %v1198_v55, %v1194_v42  ;;  %v1247_v24 = vrot.slane %v1245_v53, 1  ;;  %v14677_v37 = vld [vmem:[%s21174_s2 + $0x688] ss:$16 sps:$4 sm:$0xff]   ;;  %v14688_v46 = vld [vmem:[%s21174_s2 + $0x6c4] ss:$16 sps:$4 sm:$0xff]  }
 0x121   : > { %v12858_v5 = vcombine.low %v3002_v45, %v17119_v63  ;;  %v1213_v9 = vshll.u32 %v16533_v20, 16  ;;  %v1201_v10 = vshll.u32 %v16534_v0, 16  ;;  %v1241_v11 = vshrl.u32 %v16533_v20, 16  ;;  %v14676_v63 = vld [vmem:[%s21174_s2 + $0x684] ss:$16 sps:$4 sm:$0xff]  }
 0x122   : > { %1953 = vmatpush1.bf16.msra.mxu0 %v14655_v34  ;;  %2059 = vmatpush1.bf16.msra.mxu1 %v14658_v35  ;;  %v1233_v13 = vshrl.u32 %v16534_v0, 16  ;;  %v3152_v18 = vrot.slane %v12859_v2, 1  ;;  %v3153_v30 = vrot.slane %v16533_v20, 1  ;;  %v1239_v25 = vrot.slane %v1237_v1, 1  ;;  %v14683_v44 = vld [vmem:[%s21174_s2 + $0x6a8] ss:$16 sps:$4 sm:$0xff]  }
 0x123   : > { %1954 = vmatprep.subr.bf16.mxu0 %v14663_v12  ;;  %2060 = vmatprep.subr.bf16.mxu1 %v14666_v43  ;;  %v1215_v22 = vrot.slane %v1213_v9, 1  ;;  %v1203_v23 = vrot.slane %v1201_v10, 1  ;;  %v3149_v28 = vrot.slane %v12858_v5, 1  ;;  %v3150_v29 = vrot.slane %v16534_v0, 1  ;;  %v14680_v43 = vld [vmem:[%s21174_s2 + $0x6a0] ss:$16 sps:$4 sm:$0xff]  }
 0x124   : > { %v17210_v27 = vsel %vm3142_vm1, %v3152_v18, %v3153_v30  ;;  %v17213_v31 = vsel %vm3142_vm1, %v3153_v30, %v3161_v60  ;;  %v14691_v47 = vld [vmem:[%s21174_s2 + $0x6cc] ss:$16 sps:$4 sm:$0xff]   ;;  %v14694_v52 = vld [vmem:[%s21174_s2 + $0x6e4] ss:$16 sps:$4 sm:$0xff]   ;;  %v14692_v45 = vld [vmem:[%s21174_s2 + $0x6e0] ss:$16 sps:$4 sm:$0xff]  }
 0x125   : > { %1940 = vmatmul.mubr.bf16.gmra.mrb[12].mxu0 %v1224_v58  ;;  %2046 = vmatmul.mubr.bf16.gmra.mrb[12].mxu1 %v1224_v58  ;;  %v1216_v51 = vsel %vm1168_vm0, %v1211_v3, %v1215_v22  ;;  %v17217_v33 = vsel %vm1168_vm0, %v1199_v4, %v1203_v23  ;;  %v1243_v34 = vor.u32 %v1241_v11, %v1215_v22  ;;  %v14697_v53 = vld [vmem:[%s21174_s2 + $0x6ec] ss:$16 sps:$4 sm:$0xff]   ;;  %v14695_v58 = vld [vmem:[%s21174_s2 + $0x6e8] ss:$16 sps:$4 sm:$0xff]   ;;  %v14698_v55 = vld [vmem:[%s21174_s2 + $0x700] ss:$16 sps:$4 sm:$0xff]  }
 0x126   : > { %1955 = vmatpush1.bf16.msra.mxu0 %v14661_v49  ;;  %2061 = vmatpush1.bf16.msra.mxu1 %v14664_v50  ;;  %v1235_v35 = vor.u32 %v1233_v13, %v1203_v23  ;;  %v17226_v8 = vsel %vm3142_vm1, %v3149_v28, %v3150_v29  ;;  %v17229_v12 = vsel %vm3142_vm1, %v3150_v29, %v3159_v19  ;;  %v14686_v49 = vld [vmem:[%s21174_s2 + $0x6c0] ss:$16 sps:$4 sm:$0xff]   ;;  %v14689_v50 = vld [vmem:[%s21174_s2 + $0x6c8] ss:$16 sps:$4 sm:$0xff]   ;;  %v14706_v0 = vld [vmem:[%s21174_s2 + $0x724] ss:$16 sps:$4 sm:$0xff]  }
 0x127   : > { %1956 = vmatprep.subr.bf16.mxu0 %v14670_v26  ;;  %2062 = vmatprep.subr.bf16.mxu1 %v14673_v54  ;;  %v17238_v39 = vsel %vm1168_vm0, %v1243_v34, %v1247_v24  ;;  %v14700_v26 = vld [vmem:[%s21174_s2 + $0x704] ss:$16 sps:$4 sm:$0xff]   ;;  %v14703_v54 = vld [vmem:[%s21174_s2 + $0x70c] ss:$16 sps:$4 sm:$0xff]   ;;  %v14701_v20 = vld [vmem:[%s21174_s2 + $0x708] ss:$16 sps:$4 sm:$0xff]  }
 0x128   : > { %1982 = vmatprep.mubr.bf16.mxu0 %v1216_v51  ;;  %2088 = vmatprep.mubr.bf16.mxu1 %v1216_v51  ;;  %v17241_v42 = vsel %vm1168_vm0, %v1235_v35, %v1239_v25  ;;  %v14709_v1 = vld [vmem:[%s21174_s2 + $0x72c] ss:$16 sps:$4 sm:$0xff]   ;;  %v14704_v2 = vld [vmem:[%s21174_s2 + $0x720] ss:$16 sps:$4 sm:$0xff]   ;;  %v14707_v3 = vld [vmem:[%s21174_s2 + $0x728] ss:$16 sps:$4 sm:$0xff]  }
 0x129   : > { %v14712_v4 = vld [vmem:[%s21174_s2 + $0x744] ss:$16 sps:$4 sm:$0xff]   ;;  %v14715_v5 = vld [vmem:[%s21174_s2 + $0x74c] ss:$16 sps:$4 sm:$0xff]   ;;  %v14710_v60 = vld [vmem:[%s21174_s2 + $0x740] ss:$16 sps:$4 sm:$0xff]  }
 0x12a   : > { %1957 = vmatpush1.bf16.msra.mxu0 %v14668_v32  ;;  %2063 = vmatpush1.bf16.msra.mxu1 %v14671_v62  ;;  %v14713_v32 = vld [vmem:[%s21174_s2 + $0x748] ss:$16 sps:$4 sm:$0xff]   ;;  %v14718_v62 = vld [vmem:[%s21174_s2 + $0x764] ss:$16 sps:$4 sm:$0xff]   ;;  %v14721_v9 = vld [vmem:[%s21174_s2 + $0x76c] ss:$16 sps:$4 sm:$0xff]  }
 0x12b   : > { %1958 = vmatprep.subr.bf16.mxu0 %v14676_v63  ;;  %2064 = vmatprep.subr.bf16.mxu1 %v14679_v21  ;;  %v14716_v10 = vld [vmem:[%s21174_s2 + $0x760] ss:$16 sps:$4 sm:$0xff]   ;;  %v14719_v11 = vld [vmem:[%s21174_s2 + $0x768] ss:$16 sps:$4 sm:$0xff]   ;;  %v14724_v13 = vld [vmem:[%s21174_s2 + $0x784] ss:$16 sps:$4 sm:$0xff]  }
 0x12c   : > { %v14727_v63 = vld [vmem:[%s21174_s2 + $0x78c] ss:$16 sps:$4 sm:$0xff]   ;;  %v14722_v18 = vld [vmem:[%s21174_s2 + $0x780] ss:$16 sps:$4 sm:$0xff]   ;;  %v14725_v30 = vld [vmem:[%s21174_s2 + $0x788] ss:$16 sps:$4 sm:$0xff]  }
 0x12d   : > { %v14730_v19 = vld [vmem:[%s21174_s2 + $0x7a4] ss:$16 sps:$4 sm:$0xff]   ;;  %v14733_v21 = vld [vmem:[%s21174_s2 + $0x7ac] ss:$16 sps:$4 sm:$0xff]   ;;  %v14728_v22 = vld [vmem:[%s21174_s2 + $0x7a0] ss:$16 sps:$4 sm:$0xff]  }
 0x12e   : > { %1959 = vmatpush1.bf16.msra.mxu0 %v14674_v36  ;;  %2065 = vmatpush1.bf16.msra.mxu1 %v14677_v37  ;;  %v14731_v23 = vld [vmem:[%s21174_s2 + $0x7a8] ss:$16 sps:$4 sm:$0xff]   ;;  %v14736_v24 = vld [vmem:[%s21174_s2 + $0x7c4] ss:$16 sps:$4 sm:$0xff]   ;;  %v14739_v25 = vld [vmem:[%s21174_s2 + $0x7cc] ss:$16 sps:$4 sm:$0xff]  }
 0x12f   : > { %1960 = vmatprep.subr.bf16.mxu0 %v14682_v16  ;;  %2066 = vmatprep.subr.bf16.mxu1 %v14685_v38  ;;  %v14734_v28 = vld [vmem:[%s21174_s2 + $0x7c0] ss:$16 sps:$4 sm:$0xff]   ;;  %v14737_v29 = vld [vmem:[%s21174_s2 + $0x7c8] ss:$16 sps:$4 sm:$0xff]   ;;  %v14742_v51 = vld [vmem:[%s21174_s2 + $0x7e4] ss:$16 sps:$4 sm:$0xff]  }
 0x130   : > { %v14745_v34 = vld [vmem:[%s21174_s2 + $0x7ec] ss:$16 sps:$4 sm:$0xff]   ;;  %v14740_v35 = vld [vmem:[%s21174_s2 + $0x7e0] ss:$16 sps:$4 sm:$0xff]   ;;  %v14743_v36 = vld [vmem:[%s21174_s2 + $0x7e8] ss:$16 sps:$4 sm:$0xff]  }
 0x131   : > { %v14748_v37 = vld [vmem:[%s21174_s2 + $0x4] ss:$16 sps:$4 sm:$0xff]   ;;  %v14751_v16 = vld [vmem:[%s21174_s2 + $0xc] ss:$16 sps:$4 sm:$0xff]   ;;  %v14746_v38 = vld [vmem:[%s21174_s2] ss:$16 sps:$4 sm:$0xff]  }
 0x132   : > { %1961 = vmatpush1.bf16.msra.mxu0 %v14680_v43  ;;  %2067 = vmatpush1.bf16.msra.mxu1 %v14683_v44  ;;  %v14749_v43 = vld [vmem:[%s21174_s2 + $0x8] ss:$16 sps:$4 sm:$0xff]   ;;  %v14755_v44 = vld [vmem:[%s21174_s2 + $0x24] ss:$16 sps:$4 sm:$0xff]  }
 0x133   : > { %1962 = vmatprep.subr.bf16.mxu0 %v14688_v46  ;;  %2068 = vmatprep.subr.bf16.mxu1 %v14691_v47  ;;  %v14758_v46 = vld [vmem:[%s21174_s2 + $0x2c] ss:$16 sps:$4 sm:$0xff]   ;;  %v14753_v47 = vld [vmem:[%s21174_s2 + $0x20] ss:$16 sps:$4 sm:$0xff]  }
 0x136   : > { %1963 = vmatpush1.bf16.msra.mxu0 %v14686_v49  ;;  %2069 = vmatpush1.bf16.msra.mxu1 %v14689_v50  ;;  %v14756_v49 = vld [vmem:[%s21174_s2 + $0x28] ss:$16 sps:$4 sm:$0xff]   ;;  %v14762_v50 = vld [vmem:[%s21174_s2 + $0x44] ss:$16 sps:$4 sm:$0xff]  }
 0x137   : > { %1964 = vmatprep.subr.bf16.mxu0 %v14694_v52  ;;  %2070 = vmatprep.subr.bf16.mxu1 %v14697_v53  ;;  %v14760_v52 = vld [vmem:[%s21174_s2 + $0x40] ss:$16 sps:$4 sm:$0xff]   ;;  %v14768_v53 = vld [vmem:[%s21174_s2 + $0x64] ss:$16 sps:$4 sm:$0xff]  }
 0x13a   : > { %1965 = vmatpush1.bf16.msra.mxu0 %v14692_v45  ;;  %2071 = vmatpush1.bf16.msra.mxu1 %v14695_v58  ;;  %v14771_v45 = vld [vmem:[%s21174_s2 + $0x6c] ss:$16 sps:$4 sm:$0xff]   ;;  %v14766_v58 = vld [vmem:[%s21174_s2 + $0x60] ss:$16 sps:$4 sm:$0xff]  }
 0x13b   : > { %1966 = vmatprep.subr.bf16.mxu0 %v14700_v26  ;;  %2072 = vmatprep.subr.bf16.mxu1 %v14703_v54  ;;  %v14769_v26 = vld [vmem:[%s21174_s2 + $0x68] ss:$16 sps:$4 sm:$0xff]   ;;  %v14774_v54 = vld [vmem:[%s21174_s2 + $0x84] ss:$16 sps:$4 sm:$0xff]  }
 0x13e   : > { %1967 = vmatpush1.bf16.msra.mxu0 %v14698_v55  ;;  %2073 = vmatpush1.bf16.msra.mxu1 %v14701_v20  ;;  %v14775_v55 = vld [vmem:[%s21174_s2 + $0x88] ss:$16 sps:$4 sm:$0xff]   ;;  %v14780_v20 = vld [vmem:[%s21174_s2 + $0xa4] ss:$16 sps:$4 sm:$0xff]  }
 0x13f   : > { %1968 = vmatprep.subr.bf16.mxu0 %v14706_v0  ;;  %2074 = vmatprep.subr.bf16.mxu1 %v14709_v1  ;;  %v14783_v0 = vld [vmem:[%s21174_s2 + $0xac] ss:$16 sps:$4 sm:$0xff]   ;;  %v14778_v1 = vld [vmem:[%s21174_s2 + $0xa0] ss:$16 sps:$4 sm:$0xff]  }
 0x142   : > { %1969 = vmatpush1.bf16.msra.mxu0 %v14704_v2  ;;  %2075 = vmatpush1.bf16.msra.mxu1 %v14707_v3  ;;  %v14781_v2 = vld [vmem:[%s21174_s2 + $0xa8] ss:$16 sps:$4 sm:$0xff]   ;;  %v14786_v3 = vld [vmem:[%s21174_s2 + $0xc4] ss:$16 sps:$4 sm:$0xff]  }
 0x143   : > { %1970 = vmatprep.subr.bf16.mxu0 %v14712_v4  ;;  %2076 = vmatprep.subr.bf16.mxu1 %v14715_v5  ;;  %v14789_v4 = vld [vmem:[%s21174_s2 + $0xcc] ss:$16 sps:$4 sm:$0xff]   ;;  %v14784_v5 = vld [vmem:[%s21174_s2 + $0xc0] ss:$16 sps:$4 sm:$0xff]  }
 0x146   : > { %1971 = vmatpush1.bf16.msra.mxu0 %v14710_v60  ;;  %2077 = vmatpush1.bf16.msra.mxu1 %v14713_v32  ;;  %v14787_v60 = vld [vmem:[%s21174_s2 + $0xc8] ss:$16 sps:$4 sm:$0xff]   ;;  %v14792_v32 = vld [vmem:[%s21174_s2 + $0xe4] ss:$16 sps:$4 sm:$0xff]  }
 0x147   : > { %1972 = vmatprep.subr.bf16.mxu0 %v14718_v62  ;;  %2078 = vmatprep.subr.bf16.mxu1 %v14721_v9  ;;  %v14795_v62 = vld [vmem:[%s21174_s2 + $0xec] ss:$16 sps:$4 sm:$0xff]   ;;  %v14790_v9 = vld [vmem:[%s21174_s2 + $0xe0] ss:$16 sps:$4 sm:$0xff]  }
 0x14a   : > { %1973 = vmatpush1.bf16.msra.mxu0 %v14716_v10  ;;  %2079 = vmatpush1.bf16.msra.mxu1 %v14719_v11  ;;  %v14793_v10 = vld [vmem:[%s21174_s2 + $0xe8] ss:$16 sps:$4 sm:$0xff]   ;;  %v14798_v11 = vld [vmem:[%s21174_s2 + $0x104] ss:$16 sps:$4 sm:$0xff]  }
 0x14b   : > { %1974 = vmatprep.subr.bf16.mxu0 %v14724_v13  ;;  %2080 = vmatprep.subr.bf16.mxu1 %v14727_v63  ;;  %v14801_v13 = vld [vmem:[%s21174_s2 + $0x10c] ss:$16 sps:$4 sm:$0xff]   ;;  %v14796_v63 = vld [vmem:[%s21174_s2 + $0x100] ss:$16 sps:$4 sm:$0xff]  }
 0x14e   : > { %1975 = vmatpush1.bf16.msra.mxu0 %v14722_v18  ;;  %2081 = vmatpush1.bf16.msra.mxu1 %v14725_v30  ;;  %v14799_v18 = vld [vmem:[%s21174_s2 + $0x108] ss:$16 sps:$4 sm:$0xff]   ;;  %v14804_v30 = vld [vmem:[%s21174_s2 + $0x124] ss:$16 sps:$4 sm:$0xff]  }
 0x14f   : > { %1976 = vmatprep.subr.bf16.mxu0 %v14730_v19  ;;  %2082 = vmatprep.subr.bf16.mxu1 %v14733_v21  ;;  %v14807_v19 = vld [vmem:[%s21174_s2 + $0x12c] ss:$16 sps:$4 sm:$0xff]   ;;  %v14802_v21 = vld [vmem:[%s21174_s2 + $0x120] ss:$16 sps:$4 sm:$0xff]  }
 0x152   : > { %1977 = vmatpush1.bf16.msra.mxu0 %v14728_v22  ;;  %2083 = vmatpush1.bf16.msra.mxu1 %v14731_v23  ;;  %v14805_v22 = vld [vmem:[%s21174_s2 + $0x128] ss:$16 sps:$4 sm:$0xff]   ;;  %v14810_v23 = vld [vmem:[%s21174_s2 + $0x144] ss:$16 sps:$4 sm:$0xff]  }
 0x153   : > { %1978 = vmatprep.subr.bf16.mxu0 %v14736_v24  ;;  %2084 = vmatprep.subr.bf16.mxu1 %v14739_v25  ;;  %v14813_v24 = vld [vmem:[%s21174_s2 + $0x14c] ss:$16 sps:$4 sm:$0xff]   ;;  %v14808_v25 = vld [vmem:[%s21174_s2 + $0x140] ss:$16 sps:$4 sm:$0xff]  }
 0x156   : > { %1979 = vmatpush1.bf16.msra.mxu0 %v14734_v28  ;;  %2085 = vmatpush1.bf16.msra.mxu1 %v14737_v29  ;;  %v14811_v28 = vld [vmem:[%s21174_s2 + $0x148] ss:$16 sps:$4 sm:$0xff]   ;;  %v14816_v29 = vld [vmem:[%s21174_s2 + $0x164] ss:$16 sps:$4 sm:$0xff]  }
 0x157   : > { %1980 = vmatprep.subr.bf16.mxu0 %v14742_v51  ;;  %2086 = vmatprep.subr.bf16.mxu1 %v14745_v34  ;;  %v14819_v51 = vld [vmem:[%s21174_s2 + $0x16c] ss:$16 sps:$4 sm:$0xff]   ;;  %v14814_v34 = vld [vmem:[%s21174_s2 + $0x160] ss:$16 sps:$4 sm:$0xff]  }
 0x15a   : > { %1981 = vmatpush1.bf16.msra.mxu0 %v14740_v35  ;;  %2087 = vmatpush1.bf16.msra.mxu1 %v14743_v36  ;;  %v14817_v35 = vld [vmem:[%s21174_s2 + $0x168] ss:$16 sps:$4 sm:$0xff]   ;;  %v14822_v36 = vld [vmem:[%s21174_s2 + $0x184] ss:$16 sps:$4 sm:$0xff]  }
 0x15b   : > { %2789 = vmatprep.subr.bf16.mxu0 %v14748_v37  ;;  %2895 = vmatprep.subr.bf16.mxu1 %v14751_v16  ;;  %v14825_v37 = vld [vmem:[%s21174_s2 + $0x18c] ss:$16 sps:$4 sm:$0xff]   ;;  %v14820_v16 = vld [vmem:[%s21174_s2 + $0x180] ss:$16 sps:$4 sm:$0xff]  }
 0x15d   : > { %1983 = vmatmul.mubr.bf16.vlgmr.msra.gmra.mrb[8].mxu0 %v17217_v33  ;;  %2089 = vmatmul.mubr.bf16.vlgmr.msra.gmra.mrb[8].mxu1 %v17217_v33  ;;  %v14765_v33 = vld [vmem:[%s21174_s2 + $0x4c] ss:$16 sps:$4 sm:$0xff]  }
 0x15e   : > { %1992 = vmatprep.mubr.bf16.mxu0 %v17238_v39  ;;  %2098 = vmatprep.mubr.bf16.mxu1 %v17238_v39  ;;  %v14763_v39 = vld [vmem:[%s21174_s2 + $0x48] ss:$16 sps:$4 sm:$0xff]  }
 0x15f   : > { %2790 = vmatpush1.bf16.msra.mxu0 %v14746_v38  ;;  %2896 = vmatpush1.bf16.msra.mxu1 %v14749_v43  ;;  %v14823_v38 = vld [vmem:[%s21174_s2 + $0x188] ss:$16 sps:$4 sm:$0xff]   ;;  %v14828_v43 = vld [vmem:[%s21174_s2 + $0x1a4] ss:$16 sps:$4 sm:$0xff]  }
 0x160   : > { %2791 = vmatprep.subr.bf16.mxu0 %v14755_v44  ;;  %2897 = vmatprep.subr.bf16.mxu1 %v14758_v46  ;;  %v14831_v44 = vld [vmem:[%s21174_s2 + $0x1ac] ss:$16 sps:$4 sm:$0xff]   ;;  %v14826_v46 = vld [vmem:[%s21174_s2 + $0x1a0] ss:$16 sps:$4 sm:$0xff]  }
 0x163   : > { %2792 = vmatpush1.bf16.msra.mxu0 %v14753_v47  ;;  %2898 = vmatpush1.bf16.msra.mxu1 %v14756_v49  ;;  %v14829_v47 = vld [vmem:[%s21174_s2 + $0x1a8] ss:$16 sps:$4 sm:$0xff]   ;;  %v14834_v49 = vld [vmem:[%s21174_s2 + $0x1c4] ss:$16 sps:$4 sm:$0xff]  }
 0x164   : > { %2793 = vmatprep.subr.bf16.mxu0 %v14762_v50  ;;  %2899 = vmatprep.subr.bf16.mxu1 %v14765_v33  ;;  %v14837_v50 = vld [vmem:[%s21174_s2 + $0x1cc] ss:$16 sps:$4 sm:$0xff]   ;;  %v14832_v33 = vld [vmem:[%s21174_s2 + $0x1c0] ss:$16 sps:$4 sm:$0xff]  }
 0x165   : > { %1993 = vmatmul.mubr.bf16.gmra.mrb[12].mxu0 %v17241_v42  ;;  %2099 = vmatmul.mubr.bf16.gmra.mrb[12].mxu1 %v17241_v42  ;;  %v14777_v42 = vld [vmem:[%s21174_s2 + $0x8c] ss:$16 sps:$4 sm:$0xff]  }
 0x166   : > { %2821 = vmatprep.mubr.bf16.mxu0 %v17079_v6  ;;  %2927 = vmatprep.mubr.bf16.mxu1 %v17079_v6  ;;  %v14772_v6 = vld [vmem:[%s21174_s2 + $0x80] ss:$16 sps:$4 sm:$0xff]  }
 0x167   : > { %2794 = vmatpush1.bf16.msra.mxu0 %v14760_v52  ;;  %2900 = vmatpush1.bf16.msra.mxu1 %v14763_v39  ;;  %v14835_v52 = vld [vmem:[%s21174_s2 + $0x1c8] ss:$16 sps:$4 sm:$0xff]   ;;  %v14840_v39 = vld [vmem:[%s21174_s2 + $0x1e4] ss:$16 sps:$4 sm:$0xff]  }
 0x168   : > { %2795 = vmatprep.subr.bf16.mxu0 %v14768_v53  ;;  %2901 = vmatprep.subr.bf16.mxu1 %v14771_v45  ;;  %v14843_v53 = vld [vmem:[%s21174_s2 + $0x1ec] ss:$16 sps:$4 sm:$0xff]   ;;  %v14838_v45 = vld [vmem:[%s21174_s2 + $0x1e0] ss:$16 sps:$4 sm:$0xff]  }
 0x16b   : > { %2796 = vmatpush1.bf16.msra.mxu0 %v14766_v58  ;;  %2902 = vmatpush1.bf16.msra.mxu1 %v14769_v26  ;;  %v14841_v58 = vld [vmem:[%s21174_s2 + $0x1e8] ss:$16 sps:$4 sm:$0xff]   ;;  %v14846_v26 = vld [vmem:[%s21174_s2 + $0x204] ss:$16 sps:$4 sm:$0xff]  }
 0x16c   : > { %2797 = vmatprep.subr.bf16.mxu0 %v14774_v54  ;;  %2903 = vmatprep.subr.bf16.mxu1 %v14777_v42  ;;  %v14849_v54 = vld [vmem:[%s21174_s2 + $0x20c] ss:$16 sps:$4 sm:$0xff]   ;;  %v14844_v42 = vld [vmem:[%s21174_s2 + $0x200] ss:$16 sps:$4 sm:$0xff]  }
 0x16f   : > { %2798 = vmatpush1.bf16.msra.mxu0 %v14772_v6  ;;  %2904 = vmatpush1.bf16.msra.mxu1 %v14775_v55  ;;  %v14847_v6 = vld [vmem:[%s21174_s2 + $0x208] ss:$16 sps:$4 sm:$0xff]   ;;  %v14850_v55 = vld [vmem:[#allocation2 + $0x24] ss:$16 sps:$4 sm:$0xff]  }
 0x170   : > { %2799 = vmatprep.subr.bf16.mxu0 %v14780_v20  ;;  %2905 = vmatprep.subr.bf16.mxu1 %v14783_v0  ;;  %v14854_v20 = vld [vmem:[%s21174_s2 + $0x224] ss:$16 sps:$4 sm:$0xff]   ;;  %v14857_v0 = vld [vmem:[%s21174_s2 + $0x22c] ss:$16 sps:$4 sm:$0xff]  }
 0x173   : > { %2800 = vmatpush1.bf16.msra.mxu0 %v14778_v1  ;;  %2906 = vmatpush1.bf16.msra.mxu1 %v14781_v2  ;;  %v14852_v1 = vld [vmem:[%s21174_s2 + $0x220] ss:$16 sps:$4 sm:$0xff]   ;;  %v14855_v2 = vld [vmem:[%s21174_s2 + $0x228] ss:$16 sps:$4 sm:$0xff]  }
 0x174   : > { %2801 = vmatprep.subr.bf16.mxu0 %v14786_v3  ;;  %2907 = vmatprep.subr.bf16.mxu1 %v14789_v4  ;;  %v14861_v3 = vld [vmem:[%s21174_s2 + $0x244] ss:$16 sps:$4 sm:$0xff]   ;;  %v14858_v4 = vld [vmem:[#allocation2 + $0x20] ss:$16 sps:$4 sm:$0xff]  }
 0x177   : > { %2802 = vmatpush1.bf16.msra.mxu0 %v14784_v5  ;;  %2908 = vmatpush1.bf16.msra.mxu1 %v14787_v60  ;;  %v14859_v5 = vld [vmem:[%s21174_s2 + $0x240] ss:$16 sps:$4 sm:$0xff]   ;;  %v14862_v60 = vld [vmem:[%s21174_s2 + $0x248] ss:$16 sps:$4 sm:$0xff]  }
 0x178   : > { %2803 = vmatprep.subr.bf16.mxu0 %v14792_v32  ;;  %2909 = vmatprep.subr.bf16.mxu1 %v14795_v62  ;;  %v14867_v32 = vld [vmem:[%s21174_s2 + $0x264] ss:$16 sps:$4 sm:$0xff]   ;;  %v14870_v62 = vld [vmem:[%s21174_s2 + $0x26c] ss:$16 sps:$4 sm:$0xff]  }
 0x17b   : > { %2804 = vmatpush1.bf16.msra.mxu0 %v14790_v9  ;;  %2910 = vmatpush1.bf16.msra.mxu1 %v14793_v10  ;;  %v14865_v9 = vld [vmem:[%s21174_s2 + $0x260] ss:$16 sps:$4 sm:$0xff]   ;;  %v14868_v10 = vld [vmem:[%s21174_s2 + $0x268] ss:$16 sps:$4 sm:$0xff]  }
 0x17c   : > { %2805 = vmatprep.subr.bf16.mxu0 %v14798_v11  ;;  %2911 = vmatprep.subr.bf16.mxu1 %v14801_v13  ;;  %v14873_v11 = vld [vmem:[%s21174_s2 + $0x284] ss:$16 sps:$4 sm:$0xff]   ;;  %v14876_v13 = vld [vmem:[%s21174_s2 + $0x28c] ss:$16 sps:$4 sm:$0xff]  }
 0x17f   : > { %2806 = vmatpush1.bf16.msra.mxu0 %v14796_v63  ;;  %2912 = vmatpush1.bf16.msra.mxu1 %v14799_v18  ;;  %v14871_v63 = vld [vmem:[%s21174_s2 + $0x280] ss:$16 sps:$4 sm:$0xff]   ;;  %v14874_v18 = vld [vmem:[%s21174_s2 + $0x288] ss:$16 sps:$4 sm:$0xff]  }
 0x180   : > { %2807 = vmatprep.subr.bf16.mxu0 %v14804_v30  ;;  %2913 = vmatprep.subr.bf16.mxu1 %v14807_v19  ;;  %v14882_v30 = vld [vmem:[%s21174_s2 + $0x2ac] ss:$16 sps:$4 sm:$0xff]   ;;  %v14877_v19 = vld [vmem:[%s21174_s2 + $0x2a0] ss:$16 sps:$4 sm:$0xff]  }
 0x183   : > { %2808 = vmatpush1.bf16.msra.mxu0 %v14802_v21  ;;  %2914 = vmatpush1.bf16.msra.mxu1 %v14805_v22  ;;  %v14880_v21 = vld [vmem:[%s21174_s2 + $0x2a8] ss:$16 sps:$4 sm:$0xff]   ;;  %v14885_v22 = vld [vmem:[%s21174_s2 + $0x2c4] ss:$16 sps:$4 sm:$0xff]  }
 0x184   : > { %2809 = vmatprep.subr.bf16.mxu0 %v14810_v23  ;;  %2915 = vmatprep.subr.bf16.mxu1 %v14813_v24  ;;  %v14888_v23 = vld [vmem:[%s21174_s2 + $0x2cc] ss:$16 sps:$4 sm:$0xff]   ;;  %v14883_v24 = vld [vmem:[%s21174_s2 + $0x2c0] ss:$16 sps:$4 sm:$0xff]  }
 0x187   : > { %2810 = vmatpush1.bf16.msra.mxu0 %v14808_v25  ;;  %2916 = vmatpush1.bf16.msra.mxu1 %v14811_v28  ;;  %v14886_v25 = vld [vmem:[%s21174_s2 + $0x2c8] ss:$16 sps:$4 sm:$0xff]   ;;  %v14891_v28 = vld [vmem:[%s21174_s2 + $0x2e4] ss:$16 sps:$4 sm:$0xff]  }
 0x188   : > { %2811 = vmatprep.subr.bf16.mxu0 %v14816_v29  ;;  %2917 = vmatprep.subr.bf16.mxu1 %v14819_v51  ;;  %v14894_v29 = vld [vmem:[%s21174_s2 + $0x2ec] ss:$16 sps:$4 sm:$0xff]   ;;  %v14889_v51 = vld [vmem:[%s21174_s2 + $0x2e0] ss:$16 sps:$4 sm:$0xff]  }
 0x18b   : > { %2812 = vmatpush1.bf16.msra.mxu0 %v14814_v34  ;;  %2918 = vmatpush1.bf16.msra.mxu1 %v14817_v35  ;;  %v14892_v34 = vld [vmem:[%s21174_s2 + $0x2e8] ss:$16 sps:$4 sm:$0xff]   ;;  %v14897_v35 = vld [vmem:[%s21174_s2 + $0x304] ss:$16 sps:$4 sm:$0xff]  }
 0x18c   : > { %2813 = vmatprep.subr.bf16.mxu0 %v14822_v36  ;;  %2919 = vmatprep.subr.bf16.mxu1 %v14825_v37  ;;  %v14900_v36 = vld [vmem:[%s21174_s2 + $0x30c] ss:$16 sps:$4 sm:$0xff]   ;;  %v14895_v37 = vld [vmem:[%s21174_s2 + $0x300] ss:$16 sps:$4 sm:$0xff]  }
 0x18f   : > { %2814 = vmatpush1.bf16.msra.mxu0 %v14820_v16  ;;  %2920 = vmatpush1.bf16.msra.mxu1 %v14823_v38  ;;  %v14898_v16 = vld [vmem:[%s21174_s2 + $0x308] ss:$16 sps:$4 sm:$0xff]   ;;  %v14903_v38 = vld [vmem:[%s21174_s2 + $0x324] ss:$16 sps:$4 sm:$0xff]  }
 0x190   : > { %2815 = vmatprep.subr.bf16.mxu0 %v14828_v43  ;;  %2921 = vmatprep.subr.bf16.mxu1 %v14831_v44  ;;  %v14906_v43 = vld [vmem:[%s21174_s2 + $0x32c] ss:$16 sps:$4 sm:$0xff]   ;;  %v14901_v44 = vld [vmem:[%s21174_s2 + $0x320] ss:$16 sps:$4 sm:$0xff]  }
 0x193   : > { %2816 = vmatpush1.bf16.msra.mxu0 %v14826_v46  ;;  %2922 = vmatpush1.bf16.msra.mxu1 %v14829_v47  ;;  %v14904_v46 = vld [vmem:[%s21174_s2 + $0x328] ss:$16 sps:$4 sm:$0xff]   ;;  %v14909_v47 = vld [vmem:[%s21174_s2 + $0x344] ss:$16 sps:$4 sm:$0xff]  }
 0x194   : > { %2817 = vmatprep.subr.bf16.mxu0 %v14834_v49  ;;  %2923 = vmatprep.subr.bf16.mxu1 %v14837_v50  ;;  %v14912_v49 = vld [vmem:[%s21174_s2 + $0x34c] ss:$16 sps:$4 sm:$0xff]   ;;  %v14907_v50 = vld [vmem:[%s21174_s2 + $0x340] ss:$16 sps:$4 sm:$0xff]  }
 0x197   : > { %2818 = vmatpush1.bf16.msra.mxu0 %v14832_v33  ;;  %2924 = vmatpush1.bf16.msra.mxu1 %v14835_v52  ;;  %v14910_v33 = vld [vmem:[%s21174_s2 + $0x348] ss:$16 sps:$4 sm:$0xff]   ;;  %v14915_v52 = vld [vmem:[%s21174_s2 + $0x364] ss:$16 sps:$4 sm:$0xff]  }
 0x198   : > { %2819 = vmatprep.subr.bf16.mxu0 %v14840_v39  ;;  %2925 = vmatprep.subr.bf16.mxu1 %v14843_v53  ;;  %v14918_v39 = vld [vmem:[%s21174_s2 + $0x36c] ss:$16 sps:$4 sm:$0xff]   ;;  %v14913_v53 = vld [vmem:[%s21174_s2 + $0x360] ss:$16 sps:$4 sm:$0xff]  }
 0x19b   : > { %2820 = vmatpush1.bf16.msra.mxu0 %v14838_v45  ;;  %2926 = vmatpush1.bf16.msra.mxu1 %v14841_v58  ;;  %v14916_v45 = vld [vmem:[%s21174_s2 + $0x368] ss:$16 sps:$4 sm:$0xff]   ;;  %v14921_v58 = vld [vmem:[%s21174_s2 + $0x384] ss:$16 sps:$4 sm:$0xff]  }
 0x19c   : > { %2842 = vmatprep.subr.bf16.mxu0 %v14846_v26  ;;  %2948 = vmatprep.subr.bf16.mxu1 %v14849_v54  ;;  %v14924_v26 = vld [vmem:[%s21174_s2 + $0x38c] ss:$16 sps:$4 sm:$0xff]   ;;  %v14919_v54 = vld [vmem:[%s21174_s2 + $0x380] ss:$16 sps:$4 sm:$0xff]  }
 0x19e   : > { %2822 = vmatmul.mubr.bf16.vlgmr.msra.gmra.mrb[8].mxu0 %v17081_v7  ;;  %2928 = vmatmul.mubr.bf16.vlgmr.msra.gmra.mrb[8].mxu1 %v17081_v7  ;;  %v14864_v7 = vld [vmem:[%s21174_s2 + $0x24c] ss:$16 sps:$4 sm:$0xff]  }
 0x19f   : > { %2831 = vmatprep.mubr.bf16.mxu0 %v14850_v55  ;;  %2843 = vmatpush1.bf16.msra.mxu0 %v14844_v42  ;;  %v14922_v42 = vld [vmem:[%s21174_s2 + $0x388] ss:$16 sps:$4 sm:$0xff]  }
 0x1a0   : > { %2937 = vmatprep.mubr.bf16.mxu1 %v14850_v55  ;;  %2949 = vmatpush1.bf16.msra.mxu1 %v14847_v6  ;;  %v14927_v6 = vld [vmem:[%s21174_s2 + $0x3a4] ss:$16 sps:$4 sm:$0xff]   ;;  %v14930_v55 = vld [vmem:[%s21174_s2 + $0x3ac] ss:$16 sps:$4 sm:$0xff]  }
 0x1a1   : > { %2844 = vmatprep.subr.bf16.mxu0 %v14854_v20  ;;  %2950 = vmatprep.subr.bf16.mxu1 %v14857_v0  ;;  %v14925_v20 = vld [vmem:[%s21174_s2 + $0x3a0] ss:$16 sps:$4 sm:$0xff]   ;;  %v14928_v0 = vld [vmem:[%s21174_s2 + $0x3a8] ss:$16 sps:$4 sm:$0xff]  }
 0x1a3   : > { %2845 = vmatpush1.bf16.msra.mxu0 %v14852_v1  ;;  %v14933_v1 = vld [vmem:[%s21174_s2 + $0x3c4] ss:$16 sps:$4 sm:$0xff]  }
 0x1a4   : > { %2951 = vmatpush1.bf16.msra.mxu1 %v14855_v2  ;;  %2846 = vmatprep.subr.bf16.mxu0 %v14861_v3  ;;  %v14936_v2 = vld [vmem:[%s21174_s2 + $0x3cc] ss:$16 sps:$4 sm:$0xff]   ;;  %v14931_v3 = vld [vmem:[%s21174_s2 + $0x3c0] ss:$16 sps:$4 sm:$0xff]  }
 0x1a5   : > { %2952 = vmatprep.subr.bf16.mxu1 %v14864_v7  ;;  %v14934_v7 = vld [vmem:[%s21174_s2 + $0x3c8] ss:$16 sps:$4 sm:$0xff]  }
 0x1a6   : > { %2832 = vmatmul.mubr.bf16.gmra.mrb[12].mxu0 %v14858_v4  ;;  %2938 = vmatmul.mubr.bf16.gmra.mrb[12].mxu1 %v14858_v4  ;;  %v14939_v4 = vld [vmem:[%s21174_s2 + $0x3e4] ss:$16 sps:$4 sm:$0xff]  }
 0x1a7   : > { %2847 = vmatpush1.bf16.msra.mxu0 %v14859_v5  ;;  %2874 = vmatprep.mubr.bf16.mxu0 %v17128_v14  ;;  %v14942_v5 = vld [vmem:[%s21174_s2 + $0x3ec] ss:$16 sps:$4 sm:$0xff]  }
 0x1a8   : > { %2953 = vmatpush1.bf16.msra.mxu1 %v14862_v60  ;;  %2980 = vmatprep.mubr.bf16.mxu1 %v17128_v14  ;;  %v14879_v14 = vld [vmem:[%s21174_s2 + $0x2a4] ss:$16 sps:$4 sm:$0xff]   ;;  %v14937_v60 = vld [vmem:[%s21174_s2 + $0x3e0] ss:$16 sps:$4 sm:$0xff]  }
 0x1a9   : > { %2848 = vmatprep.subr.bf16.mxu0 %v14867_v32  ;;  %2954 = vmatprep.subr.bf16.mxu1 %v14870_v62  ;;  %v14940_v32 = vld [vmem:[%s21174_s2 + $0x3e8] ss:$16 sps:$4 sm:$0xff]   ;;  %v14945_v62 = vld [vmem:[%s21174_s2 + $0x804] ss:$16 sps:$4 sm:$0xff]  }
 0x1ab   : > { %2849 = vmatpush1.bf16.msra.mxu0 %v14865_v9  ;;  %v14948_v9 = vld [vmem:[%s21174_s2 + $0x80c] ss:$16 sps:$4 sm:$0xff]  }
 0x1ac   : > { %2955 = vmatpush1.bf16.msra.mxu1 %v14868_v10  ;;  %2850 = vmatprep.subr.bf16.mxu0 %v14873_v11  ;;  %v14943_v10 = vld [vmem:[%s21174_s2 + $0x800] ss:$16 sps:$4 sm:$0xff]   ;;  %v14946_v11 = vld [vmem:[%s21174_s2 + $0x808] ss:$16 sps:$4 sm:$0xff]  }
 0x1ad   : > { %2956 = vmatprep.subr.bf16.mxu1 %v14876_v13  ;;  %v14949_v13 = vld [vmem:[#allocation2 + $0x2c] ss:$16 sps:$4 sm:$0xff]  }
 0x1af   : > { %2851 = vmatpush1.bf16.msra.mxu0 %v14871_v63  ;;  %v14953_v63 = vld [vmem:[%s21174_s2 + $0x824] ss:$16 sps:$4 sm:$0xff]  }
 0x1b0   : > { %2957 = vmatpush1.bf16.msra.mxu1 %v14874_v18  ;;  %2852 = vmatprep.subr.bf16.mxu0 %v14879_v14  ;;  %v14956_v18 = vld [vmem:[%s21174_s2 + $0x82c] ss:$16 sps:$4 sm:$0xff]   ;;  %v14951_v14 = vld [vmem:[%s21174_s2 + $0x820] ss:$16 sps:$4 sm:$0xff]  }
 0x1b1   : > { %2958 = vmatprep.subr.bf16.mxu1 %v14882_v30  ;;  %v14954_v30 = vld [vmem:[%s21174_s2 + $0x828] ss:$16 sps:$4 sm:$0xff]  }
 0x1b3   : > { %2853 = vmatpush1.bf16.msra.mxu0 %v14877_v19  ;;  %v14960_v19 = vld [vmem:[%s21174_s2 + $0x844] ss:$16 sps:$4 sm:$0xff]  }
 0x1b4   : > { %2959 = vmatpush1.bf16.msra.mxu1 %v14880_v21  ;;  %2854 = vmatprep.subr.bf16.mxu0 %v14885_v22  ;;  %v14963_v21 = vld [vmem:[%s21174_s2 + $0x84c] ss:$16 sps:$4 sm:$0xff]   ;;  %v14957_v22 = vld [vmem:[#allocation2 + $0x28] ss:$16 sps:$4 sm:$0xff]  }
 0x1b5   : > { %2960 = vmatprep.subr.bf16.mxu1 %v14888_v23  ;;  %v14961_v23 = vld [vmem:[%s21174_s2 + $0x848] ss:$16 sps:$4 sm:$0xff]  }
 0x1b7   : > { %2855 = vmatpush1.bf16.msra.mxu0 %v14883_v24  ;;  %v14966_v24 = vld [vmem:[%s21174_s2 + $0x864] ss:$16 sps:$4 sm:$0xff]  }
 0x1b8   : > { %2961 = vmatpush1.bf16.msra.mxu1 %v14886_v25  ;;  %2856 = vmatprep.subr.bf16.mxu0 %v14891_v28  ;;  %v14969_v25 = vld [vmem:[%s21174_s2 + $0x86c] ss:$16 sps:$4 sm:$0xff]   ;;  %v14964_v28 = vld [vmem:[%s21174_s2 + $0x860] ss:$16 sps:$4 sm:$0xff]  }
 0x1b9   : > { %2962 = vmatprep.subr.bf16.mxu1 %v14894_v29  ;;  %v14967_v29 = vld [vmem:[%s21174_s2 + $0x868] ss:$16 sps:$4 sm:$0xff]  }
 0x1bb   : > { %2857 = vmatpush1.bf16.msra.mxu0 %v14889_v51  ;;  %v14972_v51 = vld [vmem:[%s21174_s2 + $0x884] ss:$16 sps:$4 sm:$0xff]  }
 0x1bc   : > { %2963 = vmatpush1.bf16.msra.mxu1 %v14892_v34  ;;  %2858 = vmatprep.subr.bf16.mxu0 %v14897_v35  ;;  %v14975_v34 = vld [vmem:[%s21174_s2 + $0x88c] ss:$16 sps:$4 sm:$0xff]   ;;  %v14973_v35 = vld [vmem:[%s21174_s2 + $0x888] ss:$16 sps:$4 sm:$0xff]  }
 0x1bd   : > { %2964 = vmatprep.subr.bf16.mxu1 %v14900_v36  ;;  %v14978_v36 = vld [vmem:[%s21174_s2 + $0x8a4] ss:$16 sps:$4 sm:$0xff]  }
 0x1bf   : > { %2859 = vmatpush1.bf16.msra.mxu0 %v14895_v37  ;;  %v14981_v37 = vld [vmem:[%s21174_s2 + $0x8ac] ss:$16 sps:$4 sm:$0xff]  }
 0x1c0   : > { %2965 = vmatpush1.bf16.msra.mxu1 %v14898_v16  ;;  %2860 = vmatprep.subr.bf16.mxu0 %v14903_v38  ;;  %v14976_v16 = vld [vmem:[%s21174_s2 + $0x8a0] ss:$16 sps:$4 sm:$0xff]   ;;  %v14979_v38 = vld [vmem:[%s21174_s2 + $0x8a8] ss:$16 sps:$4 sm:$0xff]  }
 0x1c1   : > { %2966 = vmatprep.subr.bf16.mxu1 %v14906_v43  ;;  %v14984_v43 = vld [vmem:[%s21174_s2 + $0x8c4] ss:$16 sps:$4 sm:$0xff]  }
 0x1c3   : > { %2861 = vmatpush1.bf16.msra.mxu0 %v14901_v44  ;;  %v14987_v44 = vld [vmem:[%s21174_s2 + $0x8cc] ss:$16 sps:$4 sm:$0xff]  }
 0x1c4   : > { %2967 = vmatpush1.bf16.msra.mxu1 %v14904_v46  ;;  %2862 = vmatprep.subr.bf16.mxu0 %v14909_v47  ;;  %v14982_v46 = vld [vmem:[%s21174_s2 + $0x8c0] ss:$16 sps:$4 sm:$0xff]   ;;  %v14985_v47 = vld [vmem:[%s21174_s2 + $0x8c8] ss:$16 sps:$4 sm:$0xff]  }
 0x1c5   : > { %2968 = vmatprep.subr.bf16.mxu1 %v14912_v49  ;;  %v14990_v49 = vld [vmem:[%s21174_s2 + $0x8e4] ss:$16 sps:$4 sm:$0xff]  }
 0x1c7   : > { %2863 = vmatpush1.bf16.msra.mxu0 %v14907_v50  ;;  %v14993_v50 = vld [vmem:[%s21174_s2 + $0x8ec] ss:$16 sps:$4 sm:$0xff]  }
 0x1c8   : > { %2969 = vmatpush1.bf16.msra.mxu1 %v14910_v33  ;;  %2864 = vmatprep.subr.bf16.mxu0 %v14915_v52  ;;  %v14988_v33 = vld [vmem:[%s21174_s2 + $0x8e0] ss:$16 sps:$4 sm:$0xff]   ;;  %v14991_v52 = vld [vmem:[%s21174_s2 + $0x8e8] ss:$16 sps:$4 sm:$0xff]  }
 0x1c9   : > { %2970 = vmatprep.subr.bf16.mxu1 %v14918_v39  ;;  %v14996_v39 = vld [vmem:[%s21174_s2 + $0x904] ss:$16 sps:$4 sm:$0xff]  }
 0x1cb   : > { %2865 = vmatpush1.bf16.msra.mxu0 %v14913_v53  ;;  %v14999_v53 = vld [vmem:[%s21174_s2 + $0x90c] ss:$16 sps:$4 sm:$0xff]  }
 0x1cc   : > { %2971 = vmatpush1.bf16.msra.mxu1 %v14916_v45  ;;  %2866 = vmatprep.subr.bf16.mxu0 %v14921_v58  ;;  %v14994_v45 = vld [vmem:[%s21174_s2 + $0x900] ss:$16 sps:$4 sm:$0xff]   ;;  %v14997_v58 = vld [vmem:[%s21174_s2 + $0x908] ss:$16 sps:$4 sm:$0xff]  }
 0x1cd   : > { %2972 = vmatprep.subr.bf16.mxu1 %v14924_v26  ;;  %v15002_v26 = vld [vmem:[%s21174_s2 + $0x924] ss:$16 sps:$4 sm:$0xff]  }
 0x1cf   : > { %2867 = vmatpush1.bf16.msra.mxu0 %v14919_v54  ;;  %v15005_v54 = vld [vmem:[%s21174_s2 + $0x92c] ss:$16 sps:$4 sm:$0xff]  }
 0x1d0   : > { %2973 = vmatpush1.bf16.msra.mxu1 %v14922_v42  ;;  %2868 = vmatprep.subr.bf16.mxu0 %v14927_v6  ;;  %v15000_v42 = vld [vmem:[%s21174_s2 + $0x920] ss:$16 sps:$4 sm:$0xff]   ;;  %v15003_v6 = vld [vmem:[%s21174_s2 + $0x928] ss:$16 sps:$4 sm:$0xff]  }
 0x1d1   : > { %2974 = vmatprep.subr.bf16.mxu1 %v14930_v55  ;;  %v15008_v55 = vld [vmem:[%s21174_s2 + $0x944] ss:$16 sps:$4 sm:$0xff]  }
 0x1d3   : > { %2869 = vmatpush1.bf16.msra.mxu0 %v14925_v20  ;;  %v15011_v20 = vld [vmem:[%s21174_s2 + $0x94c] ss:$16 sps:$4 sm:$0xff]  }
 0x1d4   : > { %2975 = vmatpush1.bf16.msra.mxu1 %v14928_v0  ;;  %2870 = vmatprep.subr.bf16.mxu0 %v14933_v1  ;;  %v15006_v0 = vld [vmem:[%s21174_s2 + $0x940] ss:$16 sps:$4 sm:$0xff]   ;;  %v15009_v1 = vld [vmem:[%s21174_s2 + $0x948] ss:$16 sps:$4 sm:$0xff]  }
 0x1d5   : > { %2976 = vmatprep.subr.bf16.mxu1 %v14936_v2  ;;  %v15014_v2 = vld [vmem:[%s21174_s2 + $0x964] ss:$16 sps:$4 sm:$0xff]  }
 0x1d7   : > { %2871 = vmatpush1.bf16.msra.mxu0 %v14931_v3  ;;  %v15017_v3 = vld [vmem:[%s21174_s2 + $0x96c] ss:$16 sps:$4 sm:$0xff]  }
 0x1d8   : > { %2977 = vmatpush1.bf16.msra.mxu1 %v14934_v7  ;;  %2872 = vmatprep.subr.bf16.mxu0 %v14939_v4  ;;  %v15012_v7 = vld [vmem:[%s21174_s2 + $0x960] ss:$16 sps:$4 sm:$0xff]   ;;  %v15015_v4 = vld [vmem:[%s21174_s2 + $0x968] ss:$16 sps:$4 sm:$0xff]  }
 0x1d9   : > { %2978 = vmatprep.subr.bf16.mxu1 %v14942_v5  ;;  %v15020_v5 = vld [vmem:[%s21174_s2 + $0x984] ss:$16 sps:$4 sm:$0xff]  }
 0x1db   : > { %2873 = vmatpush1.bf16.msra.mxu0 %v14937_v60  ;;  %v15023_v60 = vld [vmem:[%s21174_s2 + $0x98c] ss:$16 sps:$4 sm:$0xff]  }
 0x1dc   : > { %2979 = vmatpush1.bf16.msra.mxu1 %v14940_v32  ;;  %3811 = vmatprep.subr.bf16.mxu0 %v14945_v62  ;;  %v15018_v32 = vld [vmem:[%s21174_s2 + $0x980] ss:$16 sps:$4 sm:$0xff]   ;;  %v15021_v62 = vld [vmem:[%s21174_s2 + $0x988] ss:$16 sps:$4 sm:$0xff]  }
 0x1dd   : > { %3917 = vmatprep.subr.bf16.mxu1 %v14948_v9  ;;  %v15026_v9 = vld [vmem:[%s21174_s2 + $0x9a4] ss:$16 sps:$4 sm:$0xff]  }
 0x1de   : > { %2875 = vmatmul.mubr.bf16.vlgmr.msra.gmra.mrb[8].mxu0 %v17130_v15 }
 0x1df   : > { %2981 = vmatmul.mubr.bf16.vlgmr.msra.gmra.mrb[8].mxu1 %v17130_v15  ;;  %2884 = vmatprep.mubr.bf16.mxu0 %v14949_v13  ;;  %v14958_v15 = vld [vmem:[%s21174_s2 + $0x840] ss:$16 sps:$4 sm:$0xff]  }
 0x1e0   : > { %2990 = vmatprep.mubr.bf16.mxu1 %v14949_v13  ;;  %3812 = vmatpush1.bf16.msra.mxu0 %v14943_v10  ;;  %v15029_v10 = vld [vmem:[%s21174_s2 + $0x9ac] ss:$16 sps:$4 sm:$0xff]   ;;  %v15027_v13 = vld [vmem:[%s21174_s2 + $0x9a8] ss:$16 sps:$4 sm:$0xff]  }
 0x1e1   : > { %3918 = vmatpush1.bf16.msra.mxu1 %v14946_v11  ;;  %3813 = vmatprep.subr.bf16.mxu0 %v14953_v63  ;;  %v15024_v11 = vld [vmem:[%s21174_s2 + $0x9a0] ss:$16 sps:$4 sm:$0xff]   ;;  %v15032_v63 = vld [vmem:[%s21174_s2 + $0x9c4] ss:$16 sps:$4 sm:$0xff]  }
 0x1e2   : > { %3919 = vmatprep.subr.bf16.mxu1 %v14956_v18  ;;  %v15035_v18 = vld [vmem:[%s21174_s2 + $0x9cc] ss:$16 sps:$4 sm:$0xff]  }
 0x1e4   : > { %3814 = vmatpush1.bf16.msra.mxu0 %v14951_v14  ;;  %v15030_v14 = vld [vmem:[%s21174_s2 + $0x9c0] ss:$16 sps:$4 sm:$0xff]  }
 0x1e5   : > { %3920 = vmatpush1.bf16.msra.mxu1 %v14954_v30  ;;  %3815 = vmatprep.subr.bf16.mxu0 %v14960_v19  ;;  %v15033_v30 = vld [vmem:[%s21174_s2 + $0x9c8] ss:$16 sps:$4 sm:$0xff]   ;;  %v15038_v19 = vld [vmem:[%s21174_s2 + $0x9e4] ss:$16 sps:$4 sm:$0xff]  }
 0x1e6   : > { %2885 = vmatmul.mubr.bf16.gmra.mrb[12].mxu0 %v14957_v22  ;;  %3921 = vmatprep.subr.bf16.mxu1 %v14963_v21  ;;  %v15041_v21 = vld [vmem:[%s21174_s2 + $0x9ec] ss:$16 sps:$4 sm:$0xff]  }
 0x1e7   : > { %2991 = vmatmul.mubr.bf16.gmra.mrb[12].mxu1 %v14957_v22  ;;  %3843 = vmatprep.mubr.bf16.mxu0 %v17133_v17  ;;  %v15036_v22 = vld [vmem:[%s21174_s2 + $0x9e0] ss:$16 sps:$4 sm:$0xff]  }
 0x1e8   : > { %3816 = vmatpush1.bf16.msra.mxu0 %v14958_v15  ;;  %3949 = vmatprep.mubr.bf16.mxu1 %v17133_v17  ;;  %v14970_v17 = vld [vmem:[%s21174_s2 + $0x880] ss:$16 sps:$4 sm:$0xff]   ;;  %v15039_v15 = vld [vmem:[%s21174_s2 + $0x9e8] ss:$16 sps:$4 sm:$0xff]  }
 0x1e9   : > { %3922 = vmatpush1.bf16.msra.mxu1 %v14961_v23  ;;  %3817 = vmatprep.subr.bf16.mxu0 %v14966_v24  ;;  %v15044_v23 = vld [vmem:[%s21174_s2 + $0xa04] ss:$16 sps:$4 sm:$0xff]   ;;  %v15047_v24 = vld [vmem:[%s21174_s2 + $0xa0c] ss:$16 sps:$4 sm:$0xff]  }
 0x1ea   : > { %3923 = vmatprep.subr.bf16.mxu1 %v14969_v25  ;;  %v15042_v25 = vld [vmem:[%s21174_s2 + $0xa00] ss:$16 sps:$4 sm:$0xff]  }
 0x1ec   : > { %3818 = vmatpush1.bf16.msra.mxu0 %v14964_v28  ;;  %v15045_v28 = vld [vmem:[%s21174_s2 + $0xa08] ss:$16 sps:$4 sm:$0xff]  }
 0x1ed   : > { %3924 = vmatpush1.bf16.msra.mxu1 %v14967_v29  ;;  %3819 = vmatprep.subr.bf16.mxu0 %v14972_v51  ;;  %v15050_v29 = vld [vmem:[%s21174_s2 + $0xa24] ss:$16 sps:$4 sm:$0xff]   ;;  %v15053_v51 = vld [vmem:[%s21174_s2 + $0xa2c] ss:$16 sps:$4 sm:$0xff]  }
 0x1ee   : > { %3925 = vmatprep.subr.bf16.mxu1 %v14975_v34  ;;  %v15048_v34 = vld [vmem:[%s21174_s2 + $0xa20] ss:$16 sps:$4 sm:$0xff]  }
 0x1f0   : > { %3820 = vmatpush1.bf16.msra.mxu0 %v14970_v17  ;;  %v15051_v17 = vld [vmem:[%s21174_s2 + $0xa28] ss:$16 sps:$4 sm:$0xff]  }
 0x1f1   : > { %3926 = vmatpush1.bf16.msra.mxu1 %v14973_v35  ;;  %3821 = vmatprep.subr.bf16.mxu0 %v14978_v36  ;;  %v15056_v35 = vld [vmem:[%s21174_s2 + $0xa44] ss:$16 sps:$4 sm:$0xff]   ;;  %v15059_v36 = vld [vmem:[%s21174_s2 + $0xa4c] ss:$16 sps:$4 sm:$0xff]  }
 0x1f2   : > { %3927 = vmatprep.subr.bf16.mxu1 %v14981_v37  ;;  %v15057_v37 = vld [vmem:[%s21174_s2 + $0xa48] ss:$16 sps:$4 sm:$0xff]  }
 0x1f4   : > { %3822 = vmatpush1.bf16.msra.mxu0 %v14976_v16  ;;  %v15062_v16 = vld [vmem:[%s21174_s2 + $0xa64] ss:$16 sps:$4 sm:$0xff]  }
 0x1f5   : > { %3928 = vmatpush1.bf16.msra.mxu1 %v14979_v38  ;;  %3823 = vmatprep.subr.bf16.mxu0 %v14984_v43  ;;  %v15060_v38 = vld [vmem:[%s21174_s2 + $0xa60] ss:$16 sps:$4 sm:$0xff]   ;;  %v15063_v43 = vld [vmem:[%s21174_s2 + $0xa68] ss:$16 sps:$4 sm:$0xff]  }
 0x1f6   : > { %3929 = vmatprep.subr.bf16.mxu1 %v14987_v44  ;;  %v15068_v44 = vld [vmem:[%s21174_s2 + $0xa84] ss:$16 sps:$4 sm:$0xff]  }
 0x1f8   : > { %3824 = vmatpush1.bf16.msra.mxu0 %v14982_v46  ;;  %v15071_v46 = vld [vmem:[%s21174_s2 + $0xa8c] ss:$16 sps:$4 sm:$0xff]  }
 0x1f9   : > { %3930 = vmatpush1.bf16.msra.mxu1 %v14985_v47  ;;  %3825 = vmatprep.subr.bf16.mxu0 %v14990_v49  ;;  %v15069_v47 = vld [vmem:[%s21174_s2 + $0xa88] ss:$16 sps:$4 sm:$0xff]   ;;  %v15074_v49 = vld [vmem:[%s21174_s2 + $0xaa4] ss:$16 sps:$4 sm:$0xff]  }
 0x1fa   : > { %3931 = vmatprep.subr.bf16.mxu1 %v14993_v50  ;;  %v15072_v50 = vld [vmem:[%s21174_s2 + $0xaa0] ss:$16 sps:$4 sm:$0xff]  }
 0x1fc   : > { %3826 = vmatpush1.bf16.msra.mxu0 %v14988_v33  ;;  %v15075_v33 = vld [vmem:[%s21174_s2 + $0xaa8] ss:$16 sps:$4 sm:$0xff]  }
 0x1fd   : > { %3932 = vmatpush1.bf16.msra.mxu1 %v14991_v52  ;;  %3827 = vmatprep.subr.bf16.mxu0 %v14996_v39  ;;  %v15080_v52 = vld [vmem:[%s21174_s2 + $0xac4] ss:$16 sps:$4 sm:$0xff]   ;;  %v15083_v39 = vld [vmem:[%s21174_s2 + $0xacc] ss:$16 sps:$4 sm:$0xff]  }
 0x1fe   : > { %3933 = vmatprep.subr.bf16.mxu1 %v14999_v53  ;;  %v15078_v53 = vld [vmem:[%s21174_s2 + $0xac0] ss:$16 sps:$4 sm:$0xff]  }
 0x200   : > { %3828 = vmatpush1.bf16.msra.mxu0 %v14994_v45  ;;  %v15081_v45 = vld [vmem:[%s21174_s2 + $0xac8] ss:$16 sps:$4 sm:$0xff]  }
 0x201   : > { %3934 = vmatpush1.bf16.msra.mxu1 %v14997_v58  ;;  %3829 = vmatprep.subr.bf16.mxu0 %v15002_v26  ;;  %v15086_v58 = vld [vmem:[%s21174_s2 + $0xae4] ss:$16 sps:$4 sm:$0xff]   ;;  %v15089_v26 = vld [vmem:[%s21174_s2 + $0xaec] ss:$16 sps:$4 sm:$0xff]  }
 0x202   : > { %3935 = vmatprep.subr.bf16.mxu1 %v15005_v54  ;;  %v15084_v54 = vld [vmem:[%s21174_s2 + $0xae0] ss:$16 sps:$4 sm:$0xff]  }
 0x204   : > { %3830 = vmatpush1.bf16.msra.mxu0 %v15000_v42  ;;  %v15087_v42 = vld [vmem:[%s21174_s2 + $0xae8] ss:$16 sps:$4 sm:$0xff]  }
 0x205   : > { %3936 = vmatpush1.bf16.msra.mxu1 %v15003_v6  ;;  %3831 = vmatprep.subr.bf16.mxu0 %v15008_v55  ;;  %v15092_v6 = vld [vmem:[%s21174_s2 + $0xb04] ss:$16 sps:$4 sm:$0xff]   ;;  %v15095_v55 = vld [vmem:[%s21174_s2 + $0xb0c] ss:$16 sps:$4 sm:$0xff]  }
 0x206   : > { %3937 = vmatprep.subr.bf16.mxu1 %v15011_v20  ;;  %v15090_v20 = vld [vmem:[%s21174_s2 + $0xb00] ss:$16 sps:$4 sm:$0xff]  }
 0x208   : > { %3832 = vmatpush1.bf16.msra.mxu0 %v15006_v0  ;;  %v15093_v0 = vld [vmem:[%s21174_s2 + $0xb08] ss:$16 sps:$4 sm:$0xff]  }
 0x209   : > { %3938 = vmatpush1.bf16.msra.mxu1 %v15009_v1  ;;  %3833 = vmatprep.subr.bf16.mxu0 %v15014_v2  ;;  %v15098_v1 = vld [vmem:[%s21174_s2 + $0xb24] ss:$16 sps:$4 sm:$0xff]   ;;  %v15101_v2 = vld [vmem:[%s21174_s2 + $0xb2c] ss:$16 sps:$4 sm:$0xff]  }
 0x20a   : > { %3939 = vmatprep.subr.bf16.mxu1 %v15017_v3  ;;  %v15096_v3 = vld [vmem:[%s21174_s2 + $0xb20] ss:$16 sps:$4 sm:$0xff]  }
 0x20c   : > { %3834 = vmatpush1.bf16.msra.mxu0 %v15012_v7  ;;  %v15099_v7 = vld [vmem:[%s21174_s2 + $0xb28] ss:$16 sps:$4 sm:$0xff]  }
 0x20d   : > { %3940 = vmatpush1.bf16.msra.mxu1 %v15015_v4  ;;  %3835 = vmatprep.subr.bf16.mxu0 %v15020_v5  ;;  %v15104_v4 = vld [vmem:[%s21174_s2 + $0xb44] ss:$16 sps:$4 sm:$0xff]   ;;  %v15107_v5 = vld [vmem:[%s21174_s2 + $0xb4c] ss:$16 sps:$4 sm:$0xff]  }
 0x20e   : > { %3941 = vmatprep.subr.bf16.mxu1 %v15023_v60  ;;  %v15102_v60 = vld [vmem:[%s21174_s2 + $0xb40] ss:$16 sps:$4 sm:$0xff]  }
 0x210   : > { %3836 = vmatpush1.bf16.msra.mxu0 %v15018_v32  ;;  %v15105_v32 = vld [vmem:[%s21174_s2 + $0xb48] ss:$16 sps:$4 sm:$0xff]  }
 0x211   : > { %3942 = vmatpush1.bf16.msra.mxu1 %v15021_v62  ;;  %3837 = vmatprep.subr.bf16.mxu0 %v15026_v9  ;;  %v15110_v62 = vld [vmem:[%s21174_s2 + $0xb64] ss:$16 sps:$4 sm:$0xff]   ;;  %v15113_v9 = vld [vmem:[%s21174_s2 + $0xb6c] ss:$16 sps:$4 sm:$0xff]  }
 0x212   : > { %3943 = vmatprep.subr.bf16.mxu1 %v15029_v10  ;;  %v15108_v10 = vld [vmem:[%s21174_s2 + $0xb60] ss:$16 sps:$4 sm:$0xff]  }
 0x214   : > { %3838 = vmatpush1.bf16.msra.mxu0 %v15024_v11  ;;  %v15111_v11 = vld [vmem:[%s21174_s2 + $0xb68] ss:$16 sps:$4 sm:$0xff]  }
 0x215   : > { %3944 = vmatpush1.bf16.msra.mxu1 %v15027_v13  ;;  %3839 = vmatprep.subr.bf16.mxu0 %v15032_v63  ;;  %v15116_v13 = vld [vmem:[%s21174_s2 + $0xb84] ss:$16 sps:$4 sm:$0xff]   ;;  %v15119_v63 = vld [vmem:[%s21174_s2 + $0xb8c] ss:$16 sps:$4 sm:$0xff]  }
 0x216   : > { %3945 = vmatprep.subr.bf16.mxu1 %v15035_v18  ;;  %v15114_v18 = vld [vmem:[%s21174_s2 + $0xb80] ss:$16 sps:$4 sm:$0xff]  }
 0x218   : > { %3840 = vmatpush1.bf16.msra.mxu0 %v15030_v14  ;;  %v15117_v14 = vld [vmem:[%s21174_s2 + $0xb88] ss:$16 sps:$4 sm:$0xff]  }
 0x219   : > { %3946 = vmatpush1.bf16.msra.mxu1 %v15033_v30  ;;  %3841 = vmatprep.subr.bf16.mxu0 %v15038_v19  ;;  %v15122_v30 = vld [vmem:[%s21174_s2 + $0xba4] ss:$16 sps:$4 sm:$0xff]   ;;  %v15125_v19 = vld [vmem:[%s21174_s2 + $0xbac] ss:$16 sps:$4 sm:$0xff]  }
 0x21a   : > { %3947 = vmatprep.subr.bf16.mxu1 %v15041_v21  ;;  %v15120_v21 = vld [vmem:[%s21174_s2 + $0xba0] ss:$16 sps:$4 sm:$0xff]  }
 0x21c   : > { %3842 = vmatpush1.bf16.msra.mxu0 %v15036_v22  ;;  %v15123_v22 = vld [vmem:[%s21174_s2 + $0xba8] ss:$16 sps:$4 sm:$0xff]  }
 0x21d   : > { %3948 = vmatpush1.bf16.msra.mxu1 %v15039_v15  ;;  %3864 = vmatprep.subr.bf16.mxu0 %v15044_v23  ;;  %v15128_v15 = vld [vmem:[%s21174_s2 + $0xbc4] ss:$16 sps:$4 sm:$0xff]   ;;  %v15131_v23 = vld [vmem:[%s21174_s2 + $0xbcc] ss:$16 sps:$4 sm:$0xff]  }
 0x21e   : > { %3970 = vmatprep.subr.bf16.mxu1 %v15047_v24  ;;  %v15126_v24 = vld [vmem:[%s21174_s2 + $0xbc0] ss:$16 sps:$4 sm:$0xff]  }
 0x21f   : > { %3844 = vmatmul.mubr.bf16.vlgmr.msra.gmra.mrb[8].mxu0 %v17185_v56 }
 0x220   : > { %3950 = vmatmul.mubr.bf16.vlgmr.msra.gmra.mrb[8].mxu1 %v17185_v56  ;;  %3853 = vmatprep.mubr.bf16.mxu0 %v17167_v48  ;;  %v15054_v56 = vld [vmem:[%s21174_s2 + $0xa40] ss:$16 sps:$4 sm:$0xff]  }
 0x221   : > { %3865 = vmatpush1.bf16.msra.mxu0 %v15042_v25  ;;  %3959 = vmatprep.mubr.bf16.mxu1 %v17167_v48  ;;  %v15065_v48 = vld [vmem:[%s21174_s2 + $0xa6c] ss:$16 sps:$4 sm:$0xff]   ;;  %v15129_v25 = vld [vmem:[%s21174_s2 + $0xbc8] ss:$16 sps:$4 sm:$0xff]  }
 0x222   : > { %3971 = vmatpush1.bf16.msra.mxu1 %v15045_v28  ;;  %3866 = vmatprep.subr.bf16.mxu0 %v15050_v29  ;;  %v15134_v28 = vld [vmem:[%s21174_s2 + $0xbe4] ss:$16 sps:$4 sm:$0xff]   ;;  %v15137_v29 = vld [vmem:[%s21174_s2 + $0xbec] ss:$16 sps:$4 sm:$0xff]  }
 0x223   : > { %3972 = vmatprep.subr.bf16.mxu1 %v15053_v51  ;;  %v15132_v51 = vld [vmem:[%s21174_s2 + $0xbe0] ss:$16 sps:$4 sm:$0xff]  }
 0x225   : > { %3867 = vmatpush1.bf16.msra.mxu0 %v15048_v34  ;;  %v15135_v34 = vld [vmem:[%s21174_s2 + $0xbe8] ss:$16 sps:$4 sm:$0xff]  }
 0x226   : > { %3973 = vmatpush1.bf16.msra.mxu1 %v15051_v17  ;;  %3868 = vmatprep.subr.bf16.mxu0 %v15056_v35  ;;  %v15140_v17 = vld [vmem:[%s21175_s3 + $0x404] ss:$16 sps:$4 sm:$0xff]   ;;  %v15143_v35 = vld [vmem:[%s21175_s3 + $0x40c] ss:$16 sps:$4 sm:$0xff]  }
 0x227   : > { %3854 = vmatmul.mubr.bf16.gmra.mrb[12].mxu0 %v17190_v57  ;;  %3974 = vmatprep.subr.bf16.mxu1 %v15059_v36  ;;  %v15138_v36 = vld [vmem:[%s21175_s3 + $0x400] ss:$16 sps:$4 sm:$0xff]  }
 0x228   : > { %3960 = vmatmul.mubr.bf16.gmra.mrb[12].mxu1 %v17190_v57  ;;  %3896 = vmatprep.mubr.bf16.mxu0 %v17210_v27  ;;  %v15066_v57 = vld [vmem:[%s21174_s2 + $0xa80] ss:$16 sps:$4 sm:$0xff]  }
 0x229   : > { %3869 = vmatpush1.bf16.msra.mxu0 %v15054_v56  ;;  %4002 = vmatprep.mubr.bf16.mxu1 %v17210_v27  ;;  %v15077_v27 = vld [vmem:[%s21174_s2 + $0xaac] ss:$16 sps:$4 sm:$0xff]   ;;  %v15141_v56 = vld [vmem:[%s21175_s3 + $0x408] ss:$16 sps:$4 sm:$0xff]  }
 0x22a   : > { %3975 = vmatpush1.bf16.msra.mxu1 %v15057_v37  ;;  %3870 = vmatprep.subr.bf16.mxu0 %v15062_v16  ;;  %v15146_v37 = vld [vmem:[%s21175_s3 + $0x424] ss:$16 sps:$4 sm:$0xff]   ;;  %v15149_v16 = vld [vmem:[%s21175_s3 + $0x42c] ss:$16 sps:$4 sm:$0xff]  }
 0x22b   : > { %3976 = vmatprep.subr.bf16.mxu1 %v15065_v48  ;;  %v15144_v48 = vld [vmem:[%s21175_s3 + $0x420] ss:$16 sps:$4 sm:$0xff]  }
 0x22d   : > { %3871 = vmatpush1.bf16.msra.mxu0 %v15060_v38  ;;  %v15147_v38 = vld [vmem:[%s21175_s3 + $0x428] ss:$16 sps:$4 sm:$0xff]  }
 0x22e   : > { %3977 = vmatpush1.bf16.msra.mxu1 %v15063_v43  ;;  %3872 = vmatprep.subr.bf16.mxu0 %v15068_v44  ;;  %v15152_v43 = vld [vmem:[%s21175_s3 + $0x444] ss:$16 sps:$4 sm:$0xff]   ;;  %v15155_v44 = vld [vmem:[%s21175_s3 + $0x44c] ss:$16 sps:$4 sm:$0xff]  }
 0x22f   : > { %3978 = vmatprep.subr.bf16.mxu1 %v15071_v46  ;;  %v15153_v46 = vld [vmem:[%s21175_s3 + $0x448] ss:$16 sps:$4 sm:$0xff]  }
 0x231   : > { %3873 = vmatpush1.bf16.msra.mxu0 %v15066_v57  ;;  %v15161_v57 = vld [vmem:[%s21175_s3 + $0x46c] ss:$16 sps:$4 sm:$0xff]  }
 0x232   : > { %3979 = vmatpush1.bf16.msra.mxu1 %v15069_v47  ;;  %3874 = vmatprep.subr.bf16.mxu0 %v15074_v49  ;;  %v15156_v47 = vld [vmem:[%s21175_s3 + $0x460] ss:$16 sps:$4 sm:$0xff]   ;;  %v15159_v49 = vld [vmem:[%s21175_s3 + $0x468] ss:$16 sps:$4 sm:$0xff]  }
 0x233   : > { %3980 = vmatprep.subr.bf16.mxu1 %v15077_v27  ;;  %v15164_v27 = vld [vmem:[%s21175_s3 + $0x484] ss:$16 sps:$4 sm:$0xff]  }
 0x235   : > { %3875 = vmatpush1.bf16.msra.mxu0 %v15072_v50  ;;  %v15167_v50 = vld [vmem:[%s21175_s3 + $0x48c] ss:$16 sps:$4 sm:$0xff]  }
 0x236   : > { %3981 = vmatpush1.bf16.msra.mxu1 %v15075_v33  ;;  %3876 = vmatprep.subr.bf16.mxu0 %v15080_v52  ;;  %v15165_v33 = vld [vmem:[%s21175_s3 + $0x488] ss:$16 sps:$4 sm:$0xff]   ;;  %v15170_v52 = vld [vmem:[%s21175_s3 + $0x4a4] ss:$16 sps:$4 sm:$0xff]  }
 0x237   : > { %3982 = vmatprep.subr.bf16.mxu1 %v15083_v39  ;;  %v15173_v39 = vld [vmem:[%s21175_s3 + $0x4ac] ss:$16 sps:$4 sm:$0xff]  }
 0x239   : > { %3877 = vmatpush1.bf16.msra.mxu0 %v15078_v53  ;;  %v15168_v53 = vld [vmem:[%s21175_s3 + $0x4a0] ss:$16 sps:$4 sm:$0xff]  }
 0x23a   : > { %3983 = vmatpush1.bf16.msra.mxu1 %v15081_v45  ;;  %3878 = vmatprep.subr.bf16.mxu0 %v15086_v58  ;;  %v15171_v45 = vld [vmem:[%s21175_s3 + $0x4a8] ss:$16 sps:$4 sm:$0xff]   ;;  %v15176_v58 = vld [vmem:[%s21175_s3 + $0x4c4] ss:$16 sps:$4 sm:$0xff]  }
 0x23b   : > { %3984 = vmatprep.subr.bf16.mxu1 %v15089_v26  ;;  %v15179_v26 = vld [vmem:[%s21175_s3 + $0x4cc] ss:$16 sps:$4 sm:$0xff]  }
 0x23d   : > { %3879 = vmatpush1.bf16.msra.mxu0 %v15084_v54  ;;  %v15174_v54 = vld [vmem:[%s21175_s3 + $0x4c0] ss:$16 sps:$4 sm:$0xff]  }
 0x23e   : > { %3985 = vmatpush1.bf16.msra.mxu1 %v15087_v42  ;;  %3880 = vmatprep.subr.bf16.mxu0 %v15092_v6  ;;  %v15177_v42 = vld [vmem:[%s21175_s3 + $0x4c8] ss:$16 sps:$4 sm:$0xff]   ;;  %v15182_v6 = vld [vmem:[%s21175_s3 + $0x4e4] ss:$16 sps:$4 sm:$0xff]  }
 0x23f   : > { %3986 = vmatprep.subr.bf16.mxu1 %v15095_v55  ;;  %v15185_v55 = vld [vmem:[%s21175_s3 + $0x4ec] ss:$16 sps:$4 sm:$0xff]  }
 0x241   : > { %3881 = vmatpush1.bf16.msra.mxu0 %v15090_v20  ;;  %v15180_v20 = vld [vmem:[%s21175_s3 + $0x4e0] ss:$16 sps:$4 sm:$0xff]  }
 0x242   : > { %3987 = vmatpush1.bf16.msra.mxu1 %v15093_v0  ;;  %3882 = vmatprep.subr.bf16.mxu0 %v15098_v1  ;;  %v15183_v0 = vld [vmem:[%s21175_s3 + $0x4e8] ss:$16 sps:$4 sm:$0xff]   ;;  %v15188_v1 = vld [vmem:[%s21175_s3 + $0x504] ss:$16 sps:$4 sm:$0xff]  }
 0x243   : > { %3988 = vmatprep.subr.bf16.mxu1 %v15101_v2  ;;  %v15191_v2 = vld [vmem:[%s21175_s3 + $0x50c] ss:$16 sps:$4 sm:$0xff]  }
 0x245   : > { %3883 = vmatpush1.bf16.msra.mxu0 %v15096_v3  ;;  %v15186_v3 = vld [vmem:[%s21175_s3 + $0x500] ss:$16 sps:$4 sm:$0xff]  }
 0x246   : > { %3989 = vmatpush1.bf16.msra.mxu1 %v15099_v7  ;;  %3884 = vmatprep.subr.bf16.mxu0 %v15104_v4  ;;  %v15189_v7 = vld [vmem:[%s21175_s3 + $0x508] ss:$16 sps:$4 sm:$0xff]   ;;  %v15194_v4 = vld [vmem:[%s21175_s3 + $0x524] ss:$16 sps:$4 sm:$0xff]  }
 0x247   : > { %3990 = vmatprep.subr.bf16.mxu1 %v15107_v5  ;;  %v15197_v5 = vld [vmem:[%s21175_s3 + $0x52c] ss:$16 sps:$4 sm:$0xff]  }
 0x249   : > { %3885 = vmatpush1.bf16.msra.mxu0 %v15102_v60  ;;  %v15192_v60 = vld [vmem:[%s21175_s3 + $0x520] ss:$16 sps:$4 sm:$0xff]  }
 0x24a   : > { %3991 = vmatpush1.bf16.msra.mxu1 %v15105_v32  ;;  %3886 = vmatprep.subr.bf16.mxu0 %v15110_v62  ;;  %v15195_v32 = vld [vmem:[%s21175_s3 + $0x528] ss:$16 sps:$4 sm:$0xff]   ;;  %v15200_v62 = vld [vmem:[%s21175_s3 + $0x544] ss:$16 sps:$4 sm:$0xff]  }
 0x24b   : > { %3992 = vmatprep.subr.bf16.mxu1 %v15113_v9  ;;  %v15203_v9 = vld [vmem:[%s21175_s3 + $0x54c] ss:$16 sps:$4 sm:$0xff]  }
 0x24d   : > { %3887 = vmatpush1.bf16.msra.mxu0 %v15108_v10  ;;  %v15198_v10 = vld [vmem:[%s21175_s3 + $0x540] ss:$16 sps:$4 sm:$0xff]  }
 0x24e   : > { %3993 = vmatpush1.bf16.msra.mxu1 %v15111_v11  ;;  %3888 = vmatprep.subr.bf16.mxu0 %v15116_v13  ;;  %v15201_v11 = vld [vmem:[%s21175_s3 + $0x548] ss:$16 sps:$4 sm:$0xff]   ;;  %v15206_v13 = vld [vmem:[%s21175_s3 + $0x564] ss:$16 sps:$4 sm:$0xff]  }
 0x24f   : > { %3994 = vmatprep.subr.bf16.mxu1 %v15119_v63  ;;  %v15209_v63 = vld [vmem:[%s21175_s3 + $0x56c] ss:$16 sps:$4 sm:$0xff]  }
 0x251   : > { %3889 = vmatpush1.bf16.msra.mxu0 %v15114_v18  ;;  %v15204_v18 = vld [vmem:[%s21175_s3 + $0x560] ss:$16 sps:$4 sm:$0xff]  }
 0x252   : > { %3995 = vmatpush1.bf16.msra.mxu1 %v15117_v14  ;;  %3890 = vmatprep.subr.bf16.mxu0 %v15122_v30  ;;  %v15207_v14 = vld [vmem:[%s21175_s3 + $0x568] ss:$16 sps:$4 sm:$0xff]   ;;  %v15212_v30 = vld [vmem:[%s21175_s3 + $0x584] ss:$16 sps:$4 sm:$0xff]  }
 0x253   : > { %3996 = vmatprep.subr.bf16.mxu1 %v15125_v19  ;;  %v15215_v19 = vld [vmem:[%s21175_s3 + $0x58c] ss:$16 sps:$4 sm:$0xff]  }
 0x255   : > { %3891 = vmatpush1.bf16.msra.mxu0 %v15120_v21  ;;  %v15210_v21 = vld [vmem:[%s21175_s3 + $0x580] ss:$16 sps:$4 sm:$0xff]  }
 0x256   : > { %3997 = vmatpush1.bf16.msra.mxu1 %v15123_v22  ;;  %3892 = vmatprep.subr.bf16.mxu0 %v15128_v15  ;;  %v15213_v22 = vld [vmem:[%s21175_s3 + $0x588] ss:$16 sps:$4 sm:$0xff]   ;;  %v15218_v15 = vld [vmem:[%s21175_s3 + $0x5a4] ss:$16 sps:$4 sm:$0xff]  }
 0x257   : > { %3998 = vmatprep.subr.bf16.mxu1 %v15131_v23  ;;  %v15221_v23 = vld [vmem:[%s21175_s3 + $0x5ac] ss:$16 sps:$4 sm:$0xff]  }
 0x259   : > { %3893 = vmatpush1.bf16.msra.mxu0 %v15126_v24  ;;  %v15216_v24 = vld [vmem:[%s21175_s3 + $0x5a0] ss:$16 sps:$4 sm:$0xff]  }
 0x25a   : > { %3999 = vmatpush1.bf16.msra.mxu1 %v15129_v25  ;;  %3894 = vmatprep.subr.bf16.mxu0 %v15134_v28  ;;  %v15219_v25 = vld [vmem:[%s21175_s3 + $0x5a8] ss:$16 sps:$4 sm:$0xff]   ;;  %v15224_v28 = vld [vmem:[%s21175_s3 + $0x5c4] ss:$16 sps:$4 sm:$0xff]  }
 0x25b   : > { %4000 = vmatprep.subr.bf16.mxu1 %v15137_v29  ;;  %v15227_v29 = vld [vmem:[%s21175_s3 + $0x5cc] ss:$16 sps:$4 sm:$0xff]  }
 0x25d   : > { %3895 = vmatpush1.bf16.msra.mxu0 %v15132_v51  ;;  %v15222_v51 = vld [vmem:[%s21175_s3 + $0x5c0] ss:$16 sps:$4 sm:$0xff]  }
 0x25e   : > { %4001 = vmatpush1.bf16.msra.mxu1 %v15135_v34  ;;  %5135 = vmatprep.subr.bf16.mxu0 %v15140_v17  ;;  %v15225_v34 = vld [vmem:[%s21175_s3 + $0x5c8] ss:$16 sps:$4 sm:$0xff]   ;;  %v15230_v17 = vld [vmem:[%s21175_s3 + $0x5e4] ss:$16 sps:$4 sm:$0xff]  }
 0x25f   : > { %5241 = vmatprep.subr.bf16.mxu1 %v15143_v35  ;;  %v15228_v35 = vld [vmem:[%s21175_s3 + $0x5e0] ss:$16 sps:$4 sm:$0xff]  }
 0x260   : > { %3897 = vmatmul.mubr.bf16.vlgmr.msra.gmra.mrb[8].mxu0 %v17226_v8 }
 0x261   : > { %4003 = vmatmul.mubr.bf16.vlgmr.msra.gmra.mrb[8].mxu1 %v17226_v8  ;;  %3906 = vmatprep.mubr.bf16.mxu0 %v17213_v31  ;;  %v15150_v8 = vld [vmem:[%s21175_s3 + $0x440] ss:$16 sps:$4 sm:$0xff]  }
 0x262   : > { %4012 = vmatprep.mubr.bf16.mxu1 %v17213_v31  ;;  %5136 = vmatpush1.bf16.msra.mxu0 %v15138_v36  ;;  %v15158_v31 = vld [vmem:[%s21175_s3 + $0x464] ss:$16 sps:$4 sm:$0xff]   ;;  %v15231_v36 = vld [vmem:[%s21175_s3 + $0x5e8] ss:$16 sps:$4 sm:$0xff]  }
 0x263   : > { %5242 = vmatpush1.bf16.msra.mxu1 %v15141_v56  ;;  %5137 = vmatprep.subr.bf16.mxu0 %v15146_v37  ;;  %v15233_v56 = vld [vmem:[%s21175_s3 + $0x5ec] ss:$16 sps:$4 sm:$0xff]   ;;  %v15236_v37 = vld [vmem:[%s21175_s3 + $0x604] ss:$16 sps:$4 sm:$0xff]  }
 0x264   : > { %5243 = vmatprep.subr.bf16.mxu1 %v15149_v16  ;;  %v15239_v16 = vld [vmem:[%s21175_s3 + $0x60c] ss:$16 sps:$4 sm:$0xff]  }
 0x266   : > { %5138 = vmatpush1.bf16.msra.mxu0 %v15144_v48  ;;  %v12988_v48 = vld [vmem:[%s21178_s6 + $0x1] ss:$8 sm:$0xf] }
 0x267   : > { %5244 = vmatpush1.bf16.msra.mxu1 %v15147_v38  ;;  %5139 = vmatprep.subr.bf16.mxu0 %v15152_v43  ;;  %v4045_v38 = vrot.slane %v12988_v48, %v17061_v40  ;;  %v4053_v43 = vrot.slane %v12988_v48, %v17069_v59 }
 0x268   : > { %3907 = vmatmul.mubr.bf16.gmra.mrb[12].mxu0 %v17229_v12  ;;  %5245 = vmatprep.subr.bf16.mxu1 %v15155_v44  ;;  %v4049_v44 = vrot.slane %v12988_v48, %v17063_v41 }
 0x269   : > { %4013 = vmatmul.mubr.bf16.gmra.mrb[12].mxu1 %v17229_v12  ;;  %v15162_v12 = vld [vmem:[%s21175_s3 + $0x480] ss:$16 sps:$4 sm:$0xff]  }
 0x26a   : > { %5140 = vmatpush1.bf16.msra.mxu0 %v15150_v8  ;;  %v4057_v8 = vrot.slane %v12988_v48, %v17073_v61 }
 0x26b   : > { %5246 = vmatpush1.bf16.msra.mxu1 %v15153_v46  ;;  %5141 = vmatprep.subr.bf16.mxu0 %v15158_v31 }
 0x26c   : > { %5247 = vmatprep.subr.bf16.mxu1 %v15161_v57 }
 0x26e   : > { %5142 = vmatpush1.bf16.msra.mxu0 %v15156_v47 }
 0x26f   : > { %5248 = vmatpush1.bf16.msra.mxu1 %v15159_v49  ;;  %5143 = vmatprep.subr.bf16.mxu0 %v15164_v27 }
 0x270   : > { %5249 = vmatprep.subr.bf16.mxu1 %v15167_v50 }
 0x272   : > { %5144 = vmatpush1.bf16.msra.mxu0 %v15162_v12 }
 0x273   : > { %5250 = vmatpush1.bf16.msra.mxu1 %v15165_v33  ;;  %5145 = vmatprep.subr.bf16.mxu0 %v15170_v52 }
 0x274   : > { %5251 = vmatprep.subr.bf16.mxu1 %v15173_v39 }
 0x276   : > { %5146 = vmatpush1.bf16.msra.mxu0 %v15168_v53 }
 0x277   : > { %5252 = vmatpush1.bf16.msra.mxu1 %v15171_v45  ;;  %5147 = vmatprep.subr.bf16.mxu0 %v15176_v58 }
 0x278   : > { %5253 = vmatprep.subr.bf16.mxu1 %v15179_v26 }
 0x27a   : > { %5148 = vmatpush1.bf16.msra.mxu0 %v15174_v54 }
 0x27b   : > { %5254 = vmatpush1.bf16.msra.mxu1 %v15177_v42  ;;  %5149 = vmatprep.subr.bf16.mxu0 %v15182_v6 }
 0x27c   : > { %5255 = vmatprep.subr.bf16.mxu1 %v15185_v55 }
 0x27e   : > { %5150 = vmatpush1.bf16.msra.mxu0 %v15180_v20 }
 0x27f   : > { %5256 = vmatpush1.bf16.msra.mxu1 %v15183_v0  ;;  %5151 = vmatprep.subr.bf16.mxu0 %v15188_v1 }
 0x280   : > { %5257 = vmatprep.subr.bf16.mxu1 %v15191_v2 }
 0x282   : > { %5152 = vmatpush1.bf16.msra.mxu0 %v15186_v3 }
 0x283   : > { %5258 = vmatpush1.bf16.msra.mxu1 %v15189_v7  ;;  %5153 = vmatprep.subr.bf16.mxu0 %v15194_v4 }
 0x284   : > { %5259 = vmatprep.subr.bf16.mxu1 %v15197_v5 }
 0x286   : > { %5154 = vmatpush1.bf16.msra.mxu0 %v15192_v60 }
 0x287   : > { %5260 = vmatpush1.bf16.msra.mxu1 %v15195_v32  ;;  %5155 = vmatprep.subr.bf16.mxu0 %v15200_v62 }
 0x288   : > { %5261 = vmatprep.subr.bf16.mxu1 %v15203_v9 }
 0x28a   : > { %5156 = vmatpush1.bf16.msra.mxu0 %v15198_v10 }
 0x28b   : > { %5262 = vmatpush1.bf16.msra.mxu1 %v15201_v11  ;;  %5157 = vmatprep.subr.bf16.mxu0 %v15206_v13 }
 0x28c   : > { %5263 = vmatprep.subr.bf16.mxu1 %v15209_v63 }
 0x28e   : > { %5158 = vmatpush1.bf16.msra.mxu0 %v15204_v18 }
 0x28f   : > { %5264 = vmatpush1.bf16.msra.mxu1 %v15207_v14  ;;  %5159 = vmatprep.subr.bf16.mxu0 %v15212_v30 }
 0x290   : > { %5265 = vmatprep.subr.bf16.mxu1 %v15215_v19 }
 0x292   : > { %5160 = vmatpush1.bf16.msra.mxu0 %v15210_v21 }
 0x293   : > { %5266 = vmatpush1.bf16.msra.mxu1 %v15213_v22  ;;  %5161 = vmatprep.subr.bf16.mxu0 %v15218_v15 }
 0x294   : > { %5267 = vmatprep.subr.bf16.mxu1 %v15221_v23 }
 0x296   : > { %5162 = vmatpush1.bf16.msra.mxu0 %v15216_v24 }
 0x297   : > { %5268 = vmatpush1.bf16.msra.mxu1 %v15219_v25  ;;  %5163 = vmatprep.subr.bf16.mxu0 %v15224_v28 }
 0x298   : > { %5269 = vmatprep.subr.bf16.mxu1 %v15227_v29 }
 0x29a   : > { %5164 = vmatpush1.bf16.msra.mxu0 %v15222_v51 }
 0x29b   : > { %5270 = vmatpush1.bf16.msra.mxu1 %v15225_v34  ;;  %5165 = vmatprep.subr.bf16.mxu0 %v15230_v17  ;;  %v4294_v34 = vld [vmem:[#allocation3 + $0x40] sm:$0x11] }
 0x29c   : > { %5271 = vmatprep.subr.bf16.mxu1 %v15233_v56 }
 0x29e   : > { %5166 = vmatpush1.bf16.msra.mxu0 %v15228_v35 }
 0x29f   : > { %5272 = vmatpush1.bf16.msra.mxu1 %v15231_v36  ;;  %5188 = vmatprep.subr.bf16.mxu0 %v15236_v37 }
 0x2a0   : > { %5294 = vmatprep.subr.bf16.mxu1 %v15239_v16 }
 0x333   : > { %v3898_v46 = vpop.f32.mrb[8].mxu0 }
 0x334   : > { %v4062_v31 = vadd.f32 %v4045_v38, %v3898_v46  ;;  %v4004_v57 = vpop.f32.mrb[8].mxu1  ;;  %v3900_v47 = vpop.f32.mrb[9].mxu0 }
 0x335   : > { %v4064_v49 = vadd.f32 %v4053_v43, %v4004_v57  ;;  %v4063_v27 = vadd.f32 %v4049_v44, %v3900_v47  ;;  %v4006_v50 = vpop.f32.mrb[9].mxu1  ;;  %v3902_v12 = vpop.f32.mrb[10].mxu0  ;;  %v13134_v57 = vcombine.high %v4294_v34, %v4294_v34 }
 0x336   : > { %v4078_v33 = vmax.f32 %v4062_v31, 0.0  ;;  %v4065_v52 = vadd.f32 %v4057_v8, %v4006_v50  ;;  %v4066_v39 = vadd.f32 %v4045_v38, %v3902_v12  ;;  %v4008_v53 = vpop.f32.mrb[10].mxu1  ;;  %v3904_v45 = vpop.f32.mrb[11].mxu0 }
 0x337   : > { %v4080_v58 = vmax.f32 %v4064_v49, 0.0  ;;  %v4079_v26 = vmax.f32 %v4063_v27, 0.0  ;;  %v4068_v54 = vadd.f32 %v4053_v43, %v4008_v53  ;;  %v4067_v42 = vadd.f32 %v4049_v44, %v3904_v45  ;;  %v4010_v6 = vpop.f32.mrb[11].mxu1 }
 0x338   : > { %v4081_v55 = vmax.f32 %v4065_v52, 0.0  ;;  %v4082_v20 = vmax.f32 %v4066_v39, 0.0  ;;  %v4069_v0 = vadd.f32 %v4057_v8, %v4010_v6  ;;  %v4481_v52 = vrot.slane %v13134_v57, 1  ;;  %v15281_v57 = vld [vmem:[%s21175_s3 + $0x6e8] ss:$16 sps:$4 sm:$0xff]  }
 0x339   : > { %v14132_v1 = vpack.c.bf16 %v4079_v26, %v4078_v33  ;;  %v4084_v2 = vmax.f32 %v4068_v54, 0.0  ;;  %v4083_v3 = vmax.f32 %v4067_v42, 0.0  ;;  %v15237_v42 = vld [vmem:[%s21175_s3 + $0x608] ss:$16 sps:$4 sm:$0xff]  }
 0x33a   : > { %v14133_v7 = vpack.c.bf16 %v4081_v55, %v4080_v58  ;;  %v4085_v4 = vmax.f32 %v4069_v0, 0.0  ;;  %v18372_v14 = vpack.c.bf16 %v4082_v20, %v4078_v33 }
 0x33b   : > { %4142 = vst [vmem:[#allocation3] sm:$0xff] %v14132_v1  ;;  %v14134_v5 = vpack.c.bf16 %v4083_v3, %v4082_v20  ;;  %v3908_v60 = vpop.f32.mrb[12].mxu0  ;;  %v18374_v30 = vpack.c.bf16 %v4083_v3, %v4079_v26  ;;  %v15243_v3 = vld [vmem:[%s21175_s3 + $0x624] ss:$16 sps:$4 sm:$0xff]  }
 0x33c   : > { %4143 = vst [vmem:[#allocation3 + $0x8] sm:$0xff] %v14133_v7  ;;  %v14135_v32 = vpack.c.bf16 %v4085_v4, %v4084_v2  ;;  %v4070_v62 = vadd.f32 %v4045_v38, %v3908_v60  ;;  %v4014_v9 = vpop.f32.mrb[12].mxu1  ;;  %v3910_v10 = vpop.f32.mrb[13].mxu0  ;;  %v15246_v7 = vld [vmem:[%s21175_s3 + $0x62c] ss:$16 sps:$4 sm:$0xff]   ;;  %v13133_v4 = vcombine.low %v4294_v34, %v4294_v34 }
 0x33d   : > { %v4072_v11 = vadd.f32 %v4053_v43, %v4014_v9  ;;  %v4071_v13 = vadd.f32 %v4049_v44, %v3910_v10  ;;  %v4016_v63 = vpop.f32.mrb[13].mxu1  ;;  %v3912_v18 = vpop.f32.mrb[14].mxu0  ;;  %v15244_v9 = vld [vmem:[%s21175_s3 + $0x628] ss:$16 sps:$4 sm:$0xff]   ;;  %v15249_v10 = vld [vmem:[%s21175_s3 + $0x644] ss:$16 sps:$4 sm:$0xff]  }
 0x33e   : > { %4145 = vst [vmem:[#allocation3 + $0x18] sm:$0xff] %v14135_v32  ;;  %v4086_v19 = vmax.f32 %v4070_v62, 0.0  ;;  %v4073_v21 = vadd.f32 %v4057_v8, %v4016_v63  ;;  %v4074_v22 = vadd.f32 %v4045_v38, %v3912_v18  ;;  %v4018_v15 = vpop.f32.mrb[14].mxu1  ;;  %v3914_v23 = vpop.f32.mrb[15].mxu0  ;;  %v15241_v62 = vld [vmem:[%s21175_s3 + $0x620] ss:$16 sps:$4 sm:$0xff]  }
 0x33f   : > { %v4088_v24 = vmax.f32 %v4072_v11, 0.0  ;;  %v4087_v25 = vmax.f32 %v4071_v13, 0.0  ;;  %v4076_v28 = vadd.f32 %v4053_v43, %v4018_v15  ;;  %v4075_v29 = vadd.f32 %v4049_v44, %v3914_v23  ;;  %v4020_v51 = vpop.f32.mrb[15].mxu1  ;;  %v15252_v11 = vld [vmem:[%s21175_s3 + $0x64c] ss:$16 sps:$4 sm:$0xff]  }
 0x340   : > { %v4089_v17 = vmax.f32 %v4073_v21, 0.0  ;;  %v4090_v35 = vmax.f32 %v4074_v22, 0.0  ;;  %v4077_v36 = vadd.f32 %v4057_v8, %v4020_v51  ;;  %v15234_v8 = vld [vmem:[%s21175_s3 + $0x600] ss:$16 sps:$4 sm:$0xff]   ;;  %v4479_v13 = vrot.slane %v13133_v4, 1 }
 0x341   : > { %v14136_v56 = vpack.c.bf16 %v4087_v25, %v4086_v19  ;;  %v4092_v37 = vmax.f32 %v4076_v28, 0.0  ;;  %v4091_v16 = vmax.f32 %v4075_v29, 0.0  ;;  %v15247_v63 = vld [vmem:[%s21175_s3 + $0x640] ss:$16 sps:$4 sm:$0xff]   ;;  %v15250_v18 = vld [vmem:[%s21175_s3 + $0x648] ss:$16 sps:$4 sm:$0xff]  }
 0x342   : > { %v14137_v48 = vpack.c.bf16 %v4089_v17, %v4088_v24  ;;  %v4093_v46 = vmax.f32 %v4077_v36, 0.0  ;;  %v4286_v31 = vld [vmem:[#allocation3] sm:$0xee]  ;;  %v16538_v33 = vpack.c.bf16 %v4090_v35, %v4086_v19  ;;  %v15259_v22 = vld [vmem:[%s21175_s3 + $0x66c] ss:$16 sps:$4 sm:$0xff]  }
 0x343   : > { %4146 = vst [vmem:[#allocation3 + $0x20] sm:$0xff] %v14136_v56  ;;  %v14138_v38 = vpack.c.bf16 %v4091_v16, %v4090_v35  ;;  %v13126_v47 = vcombine.high %v4286_v31, %v14134_v5  ;;  %v13125_v49 = vcombine.low %v4286_v31, %v14134_v5  ;;  %v4287_v27 = vld [vmem:[#allocation3 + $0x8] sm:$0xee]  ;;  %v16537_v12 = vpack.c.bf16 %v4091_v16, %v4087_v25  ;;  %v15256_v21 = vld [vmem:[%s21175_s3 + $0x664] ss:$16 sps:$4 sm:$0xff]  }
 0x344   : > { %4147 = vst [vmem:[#allocation3 + $0x28] sm:$0xff] %v14137_v48  ;;  %v14139_v43 = vpack.c.bf16 %v4093_v46, %v4092_v37  ;;  %v13128_v44 = vcombine.high %v4287_v27, %v14135_v32  ;;  %v13127_v50 = vcombine.low %v4287_v27, %v14135_v32  ;;  %v18379_v39 = vpack.c.bf16 %v4093_v46, %v4089_v17  ;;  %v15254_v15 = vld [vmem:[%s21175_s3 + $0x660] ss:$16 sps:$4 sm:$0xff]   ;;  %v15257_v23 = vld [vmem:[%s21175_s3 + $0x668] ss:$16 sps:$4 sm:$0xff]  }
 0x345   : > { %4148 = vst [vmem:[#allocation3 + $0x30] sm:$0xff] %v14138_v38  ;;  %v18381_v53 = vpack.c.bf16 %v4092_v37, %v4088_v24  ;;  %v4470_v45 = vrot.slane %v13126_v47, 1  ;;  %v4471_v58 = vrot.slane %v16537_v12, 1  ;;  %v4467_v26 = vrot.slane %v13125_v49, 1  ;;  %v15262_v24 = vld [vmem:[%s21175_s3 + $0x684] ss:$16 sps:$4 sm:$0xff]  }
 0x346   : > { %4149 = vst [vmem:[#allocation3 + $0x38] sm:$0xff] %v14139_v43  ;;  %v4468_v54 = vrot.slane %v16538_v33, 1  ;;  %v4476_v6 = vrot.slane %v13128_v44, 1  ;;  %v4477_v55 = vrot.slane %v18379_v39, 1  ;;  %v4473_v20 = vrot.slane %v13127_v50, 1 }
 0x347   : > { %v4474_v0 = vrot.slane %v18381_v53, 1  ;;  %v4472_v1 = vsel %vm3142_vm1, %v4470_v45, %v4471_v58  ;;  %v4482_v32 = vsel %vm3142_vm1, %v4471_v58, %v4481_v52  ;;  %v15265_v25 = vld [vmem:[%s21175_s3 + $0x68c] ss:$16 sps:$4 sm:$0xff]   ;;  %v15260_v28 = vld [vmem:[%s21175_s3 + $0x680] ss:$16 sps:$4 sm:$0xff]  }
 0x348   : > { %v4469_v2 = vsel %vm3142_vm1, %v4467_v26, %v4468_v54  ;;  %5167 = vmatprep.mubr.bf16.mxu0 %v4472_v1  ;;  %5273 = vmatprep.mubr.bf16.mxu1 %v4472_v1  ;;  %v4478_v5 = vsel %vm3142_vm1, %v4476_v6, %v4477_v55  ;;  %v4480_v19 = vsel %vm3142_vm1, %v4468_v54, %v4479_v13  ;;  %v15263_v29 = vld [vmem:[%s21175_s3 + $0x688] ss:$16 sps:$4 sm:$0xff]   ;;  %v15268_v51 = vld [vmem:[%s21175_s3 + $0x6a4] ss:$16 sps:$4 sm:$0xff]   ;;  %v15271_v34 = vld [vmem:[%s21175_s3 + $0x6ac] ss:$16 sps:$4 sm:$0xff]  }
 0x349   : > { %v18402_v60 = vsel %vm3142_vm1, %v4473_v20, %v4474_v0  ;;  %5168 = vmatmul.mubr.bf16.vlgmr.msra.gmra.mrb[16].mxu0 %v4469_v2  ;;  %5274 = vmatmul.mubr.bf16.vlgmr.msra.gmra.mrb[16].mxu1 %v4469_v2  ;;  %v15266_v17 = vld [vmem:[%s21175_s3 + $0x6a0] ss:$16 sps:$4 sm:$0xff]   ;;  %v15269_v35 = vld [vmem:[%s21175_s3 + $0x6a8] ss:$16 sps:$4 sm:$0xff]   ;;  %v15274_v36 = vld [vmem:[%s21175_s3 + $0x6c4] ss:$16 sps:$4 sm:$0xff]  }
 0x34a   : > { %5189 = vmatpush1.bf16.msra.mxu0 %v15234_v8  ;;  %5295 = vmatpush1.bf16.msra.mxu1 %v15237_v42  ;;  %v15277_v56 = vld [vmem:[%s21175_s3 + $0x6cc] ss:$16 sps:$4 sm:$0xff]   ;;  %v15272_v37 = vld [vmem:[%s21175_s3 + $0x6c0] ss:$16 sps:$4 sm:$0xff]   ;;  %v15275_v16 = vld [vmem:[%s21175_s3 + $0x6c8] ss:$16 sps:$4 sm:$0xff]  }
 0x34b   : > { %5177 = vmatprep.mubr.bf16.mxu0 %v4482_v32  ;;  %5283 = vmatprep.mubr.bf16.mxu1 %v4482_v32  ;;  %v15280_v48 = vld [vmem:[%s21175_s3 + $0x6e4] ss:$16 sps:$4 sm:$0xff]   ;;  %v15283_v46 = vld [vmem:[%s21175_s3 + $0x6ec] ss:$16 sps:$4 sm:$0xff]   ;;  %v15278_v31 = vld [vmem:[%s21175_s3 + $0x6e0] ss:$16 sps:$4 sm:$0xff]  }
 0x34c   : > { %5190 = vmatprep.subr.bf16.mxu0 %v15243_v3  ;;  %5296 = vmatprep.subr.bf16.mxu1 %v15246_v7  ;;  %v15286_v38 = vld [vmem:[%s21175_s3 + $0x704] ss:$16 sps:$4 sm:$0xff]   ;;  %v15289_v47 = vld [vmem:[%s21175_s3 + $0x70c] ss:$16 sps:$4 sm:$0xff]   ;;  %v15284_v49 = vld [vmem:[%s21175_s3 + $0x700] ss:$16 sps:$4 sm:$0xff]  }
 0x34d   : > { %v15287_v27 = vld [vmem:[%s21175_s3 + $0x708] ss:$16 sps:$4 sm:$0xff]   ;;  %v15292_v43 = vld [vmem:[%s21175_s3 + $0x724] ss:$16 sps:$4 sm:$0xff]   ;;  %v15295_v44 = vld [vmem:[%s21175_s3 + $0x72c] ss:$16 sps:$4 sm:$0xff]  }
 0x34e   : > { %5191 = vmatpush1.bf16.msra.mxu0 %v15241_v62  ;;  %5297 = vmatpush1.bf16.msra.mxu1 %v15244_v9  ;;  %v15290_v50 = vld [vmem:[%s21175_s3 + $0x720] ss:$16 sps:$4 sm:$0xff]   ;;  %v15293_v12 = vld [vmem:[%s21175_s3 + $0x728] ss:$16 sps:$4 sm:$0xff]   ;;  %v15298_v33 = vld [vmem:[%s21175_s3 + $0x744] ss:$16 sps:$4 sm:$0xff]  }
 0x34f   : > { %5192 = vmatprep.subr.bf16.mxu0 %v15249_v10  ;;  %5298 = vmatprep.subr.bf16.mxu1 %v15252_v11  ;;  %v15301_v8 = vld [vmem:[%s21175_s3 + $0x74c] ss:$16 sps:$4 sm:$0xff]   ;;  %v15296_v52 = vld [vmem:[%s21175_s3 + $0x740] ss:$16 sps:$4 sm:$0xff]   ;;  %v15299_v45 = vld [vmem:[%s21175_s3 + $0x748] ss:$16 sps:$4 sm:$0xff]  }
 0x350   : > { %v15304_v58 = vld [vmem:[%s21175_s3 + $0x764] ss:$16 sps:$4 sm:$0xff]   ;;  %v15307_v26 = vld [vmem:[%s21175_s3 + $0x76c] ss:$16 sps:$4 sm:$0xff]   ;;  %v15302_v54 = vld [vmem:[%s21175_s3 + $0x760] ss:$16 sps:$4 sm:$0xff]  }
 0x351   : > { %5178 = vmatmul.mubr.bf16.gmra.mrb[20].mxu0 %v4480_v19  ;;  %5284 = vmatmul.mubr.bf16.gmra.mrb[20].mxu1 %v4480_v19  ;;  %v15305_v42 = vld [vmem:[%s21175_s3 + $0x768] ss:$16 sps:$4 sm:$0xff]   ;;  %v15310_v6 = vld [vmem:[%s21175_s3 + $0x784] ss:$16 sps:$4 sm:$0xff]   ;;  %v15313_v20 = vld [vmem:[%s21175_s3 + $0x78c] ss:$16 sps:$4 sm:$0xff]  }
 0x352   : > { %5193 = vmatpush1.bf16.msra.mxu0 %v15247_v63  ;;  %5299 = vmatpush1.bf16.msra.mxu1 %v15250_v18  ;;  %v15308_v1 = vld [vmem:[%s21175_s3 + $0x780] ss:$16 sps:$4 sm:$0xff]   ;;  %v15311_v2 = vld [vmem:[%s21175_s3 + $0x788] ss:$16 sps:$4 sm:$0xff]   ;;  %v15316_v3 = vld [vmem:[%s21175_s3 + $0x7a4] ss:$16 sps:$4 sm:$0xff]  }
 0x353   : > { %5220 = vmatprep.mubr.bf16.mxu0 %v4478_v5  ;;  %5326 = vmatprep.mubr.bf16.mxu1 %v4478_v5  ;;  %v15319_v7 = vld [vmem:[%s21175_s3 + $0x7ac] ss:$16 sps:$4 sm:$0xff]   ;;  %v15314_v4 = vld [vmem:[%s21175_s3 + $0x7a0] ss:$16 sps:$4 sm:$0xff]   ;;  %v15317_v5 = vld [vmem:[%s21175_s3 + $0x7a8] ss:$16 sps:$4 sm:$0xff]  }
 0x354   : > { %5194 = vmatprep.subr.bf16.mxu0 %v15256_v21  ;;  %5300 = vmatprep.subr.bf16.mxu1 %v15259_v22  ;;  %v15322_v32 = vld [vmem:[%s21175_s3 + $0x7c4] ss:$16 sps:$4 sm:$0xff]   ;;  %v15325_v62 = vld [vmem:[%s21175_s3 + $0x7cc] ss:$16 sps:$4 sm:$0xff]   ;;  %v15320_v9 = vld [vmem:[%s21175_s3 + $0x7c0] ss:$16 sps:$4 sm:$0xff]  }
 0x355   : > { %v15323_v10 = vld [vmem:[%s21175_s3 + $0x7c8] ss:$16 sps:$4 sm:$0xff]   ;;  %v15328_v13 = vld [vmem:[%s21175_s3 + $0x7e4] ss:$16 sps:$4 sm:$0xff]   ;;  %v15331_v63 = vld [vmem:[%s21175_s3 + $0x7ec] ss:$16 sps:$4 sm:$0xff]  }
 0x356   : > { %5195 = vmatpush1.bf16.msra.mxu0 %v15254_v15  ;;  %5301 = vmatpush1.bf16.msra.mxu1 %v15257_v23  ;;  %v4295_v11 = vld [vmem:[#allocation3 + $0x48] sm:$0x11]  ;;  %v15326_v19 = vld [vmem:[%s21175_s3 + $0x7e0] ss:$16 sps:$4 sm:$0xff]   ;;  %v15334_v22 = vld [vmem:[%s21175_s3 + $0x4] ss:$16 sps:$4 sm:$0xff]  }
 0x357   : > { %5196 = vmatprep.subr.bf16.mxu0 %v15262_v24  ;;  %5302 = vmatprep.subr.bf16.mxu1 %v15265_v25  ;;  %v13136_v18 = vcombine.high %v4295_v11, %v4295_v11  ;;  %v15329_v21 = vld [vmem:[%s21175_s3 + $0x7e8] ss:$16 sps:$4 sm:$0xff]   ;;  %v15337_v15 = vld [vmem:[%s21175_s3 + $0xc] ss:$16 sps:$4 sm:$0xff]   ;;  %v15332_v24 = vld [vmem:[%s21175_s3] ss:$16 sps:$4 sm:$0xff]  }
 0x358   : > { %v15335_v25 = vld [vmem:[%s21175_s3 + $0x8] ss:$16 sps:$4 sm:$0xff]   ;;  %v15348_v39 = vld [vmem:[%s21175_s3 + $0x44] ss:$16 sps:$4 sm:$0xff]   ;;  %v15352_v53 = vld [vmem:[%s21175_s3 + $0x60] ss:$16 sps:$4 sm:$0xff]  }
 0x359   : > { %v4485_v23 = vrot.slane %v13136_v18, 1  ;;  %v15409_v18 = vld [vmem:[%s21175_s3 + $0x188] ss:$16 sps:$4 sm:$0xff]  }
 0x35a   : > { %5197 = vmatpush1.bf16.msra.mxu0 %v15260_v28  ;;  %5303 = vmatpush1.bf16.msra.mxu1 %v15263_v29  ;;  %v15341_v28 = vld [vmem:[%s21175_s3 + $0x24] ss:$16 sps:$4 sm:$0xff]   ;;  %v15344_v29 = vld [vmem:[%s21175_s3 + $0x2c] ss:$16 sps:$4 sm:$0xff]  }
 0x35b   : > { %5198 = vmatprep.subr.bf16.mxu0 %v15268_v51  ;;  %5304 = vmatprep.subr.bf16.mxu1 %v15271_v34  ;;  %v13135_v51 = vcombine.low %v4295_v11, %v4295_v11  ;;  %v4486_v34 = vsel %vm3142_vm1, %v4477_v55, %v4485_v23  ;;  %v15351_v55 = vld [vmem:[%s21175_s3 + $0x4c] ss:$16 sps:$4 sm:$0xff]   ;;  %v15408_v11 = vld [vmem:[%s21175_s3 + $0x184] ss:$16 sps:$4 sm:$0xff]  }
 0x35c   : > { %v15420_v23 = vld [vmem:[%s21175_s3 + $0x1c4] ss:$16 sps:$4 sm:$0xff]  }
 0x35e   : > { %5199 = vmatpush1.bf16.msra.mxu0 %v15266_v17  ;;  %5305 = vmatpush1.bf16.msra.mxu1 %v15269_v35  ;;  %v15339_v17 = vld [vmem:[%s21175_s3 + $0x20] ss:$16 sps:$4 sm:$0xff]   ;;  %v15342_v35 = vld [vmem:[%s21175_s3 + $0x28] ss:$16 sps:$4 sm:$0xff]  }
 0x35f   : > { %5200 = vmatprep.subr.bf16.mxu0 %v15274_v36  ;;  %5306 = vmatprep.subr.bf16.mxu1 %v15277_v56  ;;  %v4483_v36 = vrot.slane %v13135_v51, 1  ;;  %v15349_v56 = vld [vmem:[%s21175_s3 + $0x48] ss:$16 sps:$4 sm:$0xff]   ;;  %v15429_v51 = vld [vmem:[%s21175_s3 + $0x1ec] ss:$16 sps:$4 sm:$0xff]  }
 0x362   : > { %5201 = vmatpush1.bf16.msra.mxu0 %v15272_v37  ;;  %5307 = vmatpush1.bf16.msra.mxu1 %v15275_v16  ;;  %v4484_v37 = vsel %vm3142_vm1, %v4474_v0, %v4483_v36  ;;  %v15354_v16 = vld [vmem:[%s21175_s3 + $0x64] ss:$16 sps:$4 sm:$0xff]   ;;  %v15355_v0 = vld [vmem:[%s21175_s3 + $0x68] ss:$16 sps:$4 sm:$0xff]   ;;  %v15435_v36 = vld [vmem:[%s21175_s3 + $0x20c] ss:$16 sps:$4 sm:$0xff]  }
 0x363   : > { %5202 = vmatprep.subr.bf16.mxu0 %v15280_v48  ;;  %5308 = vmatprep.subr.bf16.mxu1 %v15283_v46  ;;  %v15357_v48 = vld [vmem:[%s21175_s3 + $0x6c] ss:$16 sps:$4 sm:$0xff]   ;;  %v15360_v46 = vld [vmem:[%s21175_s3 + $0x84] ss:$16 sps:$4 sm:$0xff]  }
 0x366   : > { %5203 = vmatpush1.bf16.msra.mxu0 %v15278_v31  ;;  %5309 = vmatpush1.bf16.msra.mxu1 %v15281_v57  ;;  %v15358_v31 = vld [vmem:[%s21175_s3 + $0x80] ss:$16 sps:$4 sm:$0xff]   ;;  %v15361_v57 = vld [vmem:[%s21175_s3 + $0x88] ss:$16 sps:$4 sm:$0xff]  }
 0x367   : > { %5204 = vmatprep.subr.bf16.mxu0 %v15286_v38  ;;  %5310 = vmatprep.subr.bf16.mxu1 %v15289_v47  ;;  %v15366_v38 = vld [vmem:[%s21175_s3 + $0xa4] ss:$16 sps:$4 sm:$0xff]   ;;  %v15369_v47 = vld [vmem:[%s21175_s3 + $0xac] ss:$16 sps:$4 sm:$0xff]  }
 0x36a   : > { %5205 = vmatpush1.bf16.msra.mxu0 %v15284_v49  ;;  %5311 = vmatpush1.bf16.msra.mxu1 %v15287_v27  ;;  %v15364_v49 = vld [vmem:[%s21175_s3 + $0xa0] ss:$16 sps:$4 sm:$0xff]   ;;  %v15367_v27 = vld [vmem:[%s21175_s3 + $0xa8] ss:$16 sps:$4 sm:$0xff]  }
 0x36b   : > { %5206 = vmatprep.subr.bf16.mxu0 %v15292_v43  ;;  %5312 = vmatprep.subr.bf16.mxu1 %v15295_v44  ;;  %v15372_v43 = vld [vmem:[%s21175_s3 + $0xc4] ss:$16 sps:$4 sm:$0xff]   ;;  %v15375_v44 = vld [vmem:[%s21175_s3 + $0xcc] ss:$16 sps:$4 sm:$0xff]  }
 0x36e   : > { %5207 = vmatpush1.bf16.msra.mxu0 %v15290_v50  ;;  %5313 = vmatpush1.bf16.msra.mxu1 %v15293_v12  ;;  %v15370_v50 = vld [vmem:[%s21175_s3 + $0xc0] ss:$16 sps:$4 sm:$0xff]   ;;  %v15373_v12 = vld [vmem:[%s21175_s3 + $0xc8] ss:$16 sps:$4 sm:$0xff]  }
 0x36f   : > { %5208 = vmatprep.subr.bf16.mxu0 %v15298_v33  ;;  %5314 = vmatprep.subr.bf16.mxu1 %v15301_v8  ;;  %v15378_v33 = vld [vmem:[%s21175_s3 + $0xe4] ss:$16 sps:$4 sm:$0xff]   ;;  %v15381_v8 = vld [vmem:[%s21175_s3 + $0xec] ss:$16 sps:$4 sm:$0xff]  }
 0x372   : > { %5209 = vmatpush1.bf16.msra.mxu0 %v15296_v52  ;;  %5315 = vmatpush1.bf16.msra.mxu1 %v15299_v45  ;;  %v15376_v52 = vld [vmem:[%s21175_s3 + $0xe0] ss:$16 sps:$4 sm:$0xff]   ;;  %v15379_v45 = vld [vmem:[%s21175_s3 + $0xe8] ss:$16 sps:$4 sm:$0xff]  }
 0x373   : > { %5210 = vmatprep.subr.bf16.mxu0 %v15304_v58  ;;  %5316 = vmatprep.subr.bf16.mxu1 %v15307_v26  ;;  %v15384_v58 = vld [vmem:[%s21175_s3 + $0x104] ss:$16 sps:$4 sm:$0xff]   ;;  %v15387_v26 = vld [vmem:[%s21175_s3 + $0x10c] ss:$16 sps:$4 sm:$0xff]  }
 0x376   : > { %5211 = vmatpush1.bf16.msra.mxu0 %v15302_v54  ;;  %5317 = vmatpush1.bf16.msra.mxu1 %v15305_v42  ;;  %v15382_v54 = vld [vmem:[%s21175_s3 + $0x100] ss:$16 sps:$4 sm:$0xff]   ;;  %v15385_v42 = vld [vmem:[%s21175_s3 + $0x108] ss:$16 sps:$4 sm:$0xff]  }
 0x377   : > { %5212 = vmatprep.subr.bf16.mxu0 %v15310_v6  ;;  %5318 = vmatprep.subr.bf16.mxu1 %v15313_v20  ;;  %v15390_v6 = vld [vmem:[%s21175_s3 + $0x124] ss:$16 sps:$4 sm:$0xff]   ;;  %v15393_v20 = vld [vmem:[%s21175_s3 + $0x12c] ss:$16 sps:$4 sm:$0xff]  }
 0x37a   : > { %5213 = vmatpush1.bf16.msra.mxu0 %v15308_v1  ;;  %5319 = vmatpush1.bf16.msra.mxu1 %v15311_v2  ;;  %v15388_v1 = vld [vmem:[%s21175_s3 + $0x120] ss:$16 sps:$4 sm:$0xff]   ;;  %v15391_v2 = vld [vmem:[%s21175_s3 + $0x128] ss:$16 sps:$4 sm:$0xff]  }
 0x37b   : > { %5214 = vmatprep.subr.bf16.mxu0 %v15316_v3  ;;  %5320 = vmatprep.subr.bf16.mxu1 %v15319_v7  ;;  %v15396_v3 = vld [vmem:[%s21175_s3 + $0x144] ss:$16 sps:$4 sm:$0xff]   ;;  %v15399_v7 = vld [vmem:[%s21175_s3 + $0x14c] ss:$16 sps:$4 sm:$0xff]  }
 0x37e   : > { %5215 = vmatpush1.bf16.msra.mxu0 %v15314_v4  ;;  %5321 = vmatpush1.bf16.msra.mxu1 %v15317_v5  ;;  %v15394_v4 = vld [vmem:[%s21175_s3 + $0x140] ss:$16 sps:$4 sm:$0xff]   ;;  %v15397_v5 = vld [vmem:[%s21175_s3 + $0x148] ss:$16 sps:$4 sm:$0xff]  }
 0x37f   : > { %5216 = vmatprep.subr.bf16.mxu0 %v15322_v32  ;;  %5322 = vmatprep.subr.bf16.mxu1 %v15325_v62  ;;  %v15402_v32 = vld [vmem:[%s21175_s3 + $0x164] ss:$16 sps:$4 sm:$0xff]   ;;  %v15405_v62 = vld [vmem:[%s21175_s3 + $0x16c] ss:$16 sps:$4 sm:$0xff]  }
 0x382   : > { %5217 = vmatpush1.bf16.msra.mxu0 %v15320_v9  ;;  %5323 = vmatpush1.bf16.msra.mxu1 %v15323_v10  ;;  %v15400_v9 = vld [vmem:[%s21175_s3 + $0x160] ss:$16 sps:$4 sm:$0xff]   ;;  %v15403_v10 = vld [vmem:[%s21175_s3 + $0x168] ss:$16 sps:$4 sm:$0xff]  }
 0x383   : > { %5218 = vmatprep.subr.bf16.mxu0 %v15328_v13  ;;  %5324 = vmatprep.subr.bf16.mxu1 %v15331_v63  ;;  %v15411_v13 = vld [vmem:[%s21175_s3 + $0x18c] ss:$16 sps:$4 sm:$0xff]   ;;  %v15406_v63 = vld [vmem:[%s21175_s3 + $0x180] ss:$16 sps:$4 sm:$0xff]  }
 0x386   : > { %5219 = vmatpush1.bf16.msra.mxu0 %v15326_v19  ;;  %5325 = vmatpush1.bf16.msra.mxu1 %v15329_v21  ;;  %v15414_v19 = vld [vmem:[%s21175_s3 + $0x1a4] ss:$16 sps:$4 sm:$0xff]   ;;  %v15417_v21 = vld [vmem:[%s21175_s3 + $0x1ac] ss:$16 sps:$4 sm:$0xff]  }
 0x387   : > { %6027 = vmatprep.subr.bf16.mxu0 %v15334_v22  ;;  %6133 = vmatprep.subr.bf16.mxu1 %v15337_v15  ;;  %v15412_v22 = vld [vmem:[%s21175_s3 + $0x1a0] ss:$16 sps:$4 sm:$0xff]   ;;  %v15415_v15 = vld [vmem:[%s21175_s3 + $0x1a8] ss:$16 sps:$4 sm:$0xff]  }
 0x389   : > { %5221 = vmatmul.mubr.bf16.vlgmr.msra.gmra.mrb[16].mxu0 %v18402_v60  ;;  %5327 = vmatmul.mubr.bf16.vlgmr.msra.gmra.mrb[16].mxu1 %v18402_v60  ;;  %v15346_v60 = vld [vmem:[%s21175_s3 + $0x40] ss:$16 sps:$4 sm:$0xff]  }
 0x38a   : > { %5230 = vmatprep.mubr.bf16.mxu0 %v4486_v34  ;;  %5336 = vmatprep.mubr.bf16.mxu1 %v4486_v34  ;;  %v15424_v34 = vld [vmem:[%s21175_s3 + $0x1e0] ss:$16 sps:$4 sm:$0xff]  }
 0x38b   : > { %6028 = vmatpush1.bf16.msra.mxu0 %v15332_v24  ;;  %6134 = vmatpush1.bf16.msra.mxu1 %v15335_v25  ;;  %v15423_v24 = vld [vmem:[%s21175_s3 + $0x1cc] ss:$16 sps:$4 sm:$0xff]   ;;  %v15418_v25 = vld [vmem:[%s21175_s3 + $0x1c0] ss:$16 sps:$4 sm:$0xff]  }
 0x38c   : > { %6029 = vmatprep.subr.bf16.mxu0 %v15341_v28  ;;  %6135 = vmatprep.subr.bf16.mxu1 %v15344_v29  ;;  %v15421_v28 = vld [vmem:[%s21175_s3 + $0x1c8] ss:$16 sps:$4 sm:$0xff]   ;;  %v15426_v29 = vld [vmem:[%s21175_s3 + $0x1e4] ss:$16 sps:$4 sm:$0xff]  }
 0x38f   : > { %6030 = vmatpush1.bf16.msra.mxu0 %v15339_v17  ;;  %6136 = vmatpush1.bf16.msra.mxu1 %v15342_v35  ;;  %v15427_v17 = vld [vmem:[%s21175_s3 + $0x1e8] ss:$16 sps:$4 sm:$0xff]   ;;  %v15432_v35 = vld [vmem:[%s21175_s3 + $0x204] ss:$16 sps:$4 sm:$0xff]  }
 0x390   : > { %6031 = vmatprep.subr.bf16.mxu0 %v15348_v39  ;;  %6137 = vmatprep.subr.bf16.mxu1 %v15351_v55  ;;  %v15430_v39 = vld [vmem:[%s21175_s3 + $0x200] ss:$16 sps:$4 sm:$0xff]   ;;  %v15433_v55 = vld [vmem:[%s21175_s3 + $0x208] ss:$16 sps:$4 sm:$0xff]  }
 0x391   : > { %5231 = vmatmul.mubr.bf16.gmra.mrb[20].mxu0 %v4484_v37  ;;  %5337 = vmatmul.mubr.bf16.gmra.mrb[20].mxu1 %v4484_v37  ;;  %v15443_v37 = vld [vmem:[%s21175_s3 + $0x22c] ss:$16 sps:$4 sm:$0xff]  }
 0x392   : > { %6059 = vmatprep.mubr.bf16.mxu0 %v18374_v30  ;;  %6165 = vmatprep.mubr.bf16.mxu1 %v18374_v30  ;;  %v15363_v30 = vld [vmem:[%s21175_s3 + $0x8c] ss:$16 sps:$4 sm:$0xff]  }
 0x393   : > { %6032 = vmatpush1.bf16.msra.mxu0 %v15346_v60  ;;  %6138 = vmatpush1.bf16.msra.mxu1 %v15349_v56  ;;  %v15436_v60 = vld [vmem:[#allocation3 + $0x24] ss:$16 sps:$4 sm:$0xff]  }
 0x394   : > { %6033 = vmatprep.subr.bf16.mxu0 %v15354_v16  ;;  %6139 = vmatprep.subr.bf16.mxu1 %v15357_v48  ;;  %v15440_v56 = vld [vmem:[%s21175_s3 + $0x224] ss:$16 sps:$4 sm:$0xff]   ;;  %v15438_v16 = vld [vmem:[%s21175_s3 + $0x220] ss:$16 sps:$4 sm:$0xff]   ;;  %v15441_v48 = vld [vmem:[%s21175_s3 + $0x228] ss:$16 sps:$4 sm:$0xff]  }
 0x397   : > { %6034 = vmatpush1.bf16.msra.mxu0 %v15352_v53  ;;  %6140 = vmatpush1.bf16.msra.mxu1 %v15355_v0  ;;  %v15447_v53 = vld [vmem:[%s21175_s3 + $0x244] ss:$16 sps:$4 sm:$0xff]   ;;  %v15445_v0 = vld [vmem:[%s21175_s3 + $0x240] ss:$16 sps:$4 sm:$0xff]  }
 0x398   : > { %6035 = vmatprep.subr.bf16.mxu0 %v15360_v46  ;;  %6141 = vmatprep.subr.bf16.mxu1 %v15363_v30  ;;  %v15444_v46 = vld [vmem:[#allocation3 + $0x20] ss:$16 sps:$4 sm:$0xff]   ;;  %v15448_v30 = vld [vmem:[%s21175_s3 + $0x248] ss:$16 sps:$4 sm:$0xff]  }
 0x39b   : > { %6036 = vmatpush1.bf16.msra.mxu0 %v15358_v31  ;;  %6142 = vmatpush1.bf16.msra.mxu1 %v15361_v57  ;;  %v15453_v31 = vld [vmem:[#allocation3 + $0xc] ss:$16 sps:$4 sm:$0xff]   ;;  %v15456_v57 = vld [vmem:[%s21175_s3 + $0x264] ss:$16 sps:$4 sm:$0xff]  }
 0x39c   : > { %6037 = vmatprep.subr.bf16.mxu0 %v15366_v38  ;;  %6143 = vmatprep.subr.bf16.mxu1 %v15369_v47  ;;  %v15459_v38 = vld [vmem:[%s21175_s3 + $0x26c] ss:$16 sps:$4 sm:$0xff]   ;;  %v15454_v47 = vld [vmem:[%s21175_s3 + $0x260] ss:$16 sps:$4 sm:$0xff]  }
 0x39f   : > { %6038 = vmatpush1.bf16.msra.mxu0 %v15364_v49  ;;  %6144 = vmatpush1.bf16.msra.mxu1 %v15367_v27  ;;  %v15457_v49 = vld [vmem:[%s21175_s3 + $0x268] ss:$16 sps:$4 sm:$0xff]   ;;  %v15462_v27 = vld [vmem:[%s21175_s3 + $0x284] ss:$16 sps:$4 sm:$0xff]  }
 0x3a0   : > { %6039 = vmatprep.subr.bf16.mxu0 %v15372_v43  ;;  %6145 = vmatprep.subr.bf16.mxu1 %v15375_v44  ;;  %v15465_v43 = vld [vmem:[%s21175_s3 + $0x28c] ss:$16 sps:$4 sm:$0xff]   ;;  %v15460_v44 = vld [vmem:[%s21175_s3 + $0x280] ss:$16 sps:$4 sm:$0xff]  }
 0x3a3   : > { %6040 = vmatpush1.bf16.msra.mxu0 %v15370_v50  ;;  %6146 = vmatpush1.bf16.msra.mxu1 %v15373_v12  ;;  %v15463_v50 = vld [vmem:[%s21175_s3 + $0x288] ss:$16 sps:$4 sm:$0xff]   ;;  %v15468_v12 = vld [vmem:[%s21175_s3 + $0x2a4] ss:$16 sps:$4 sm:$0xff]  }
 0x3a4   : > { %6041 = vmatprep.subr.bf16.mxu0 %v15378_v33  ;;  %6147 = vmatprep.subr.bf16.mxu1 %v15381_v8  ;;  %v15471_v33 = vld [vmem:[%s21175_s3 + $0x2ac] ss:$16 sps:$4 sm:$0xff]   ;;  %v15466_v8 = vld [vmem:[%s21175_s3 + $0x2a0] ss:$16 sps:$4 sm:$0xff]  }
 0x3a7   : > { %6042 = vmatpush1.bf16.msra.mxu0 %v15376_v52  ;;  %6148 = vmatpush1.bf16.msra.mxu1 %v15379_v45  ;;  %v15469_v52 = vld [vmem:[%s21175_s3 + $0x2a8] ss:$16 sps:$4 sm:$0xff]   ;;  %v15474_v45 = vld [vmem:[%s21175_s3 + $0x2c4] ss:$16 sps:$4 sm:$0xff]  }
 0x3a8   : > { %6043 = vmatprep.subr.bf16.mxu0 %v15384_v58  ;;  %6149 = vmatprep.subr.bf16.mxu1 %v15387_v26  ;;  %v15477_v58 = vld [vmem:[%s21175_s3 + $0x2cc] ss:$16 sps:$4 sm:$0xff]   ;;  %v15472_v26 = vld [vmem:[%s21175_s3 + $0x2c0] ss:$16 sps:$4 sm:$0xff]  }
 0x3ab   : > { %6044 = vmatpush1.bf16.msra.mxu0 %v15382_v54  ;;  %6150 = vmatpush1.bf16.msra.mxu1 %v15385_v42  ;;  %v15475_v54 = vld [vmem:[%s21175_s3 + $0x2c8] ss:$16 sps:$4 sm:$0xff]   ;;  %v15480_v42 = vld [vmem:[%s21175_s3 + $0x2e4] ss:$16 sps:$4 sm:$0xff]  }
 0x3ac   : > { %6045 = vmatprep.subr.bf16.mxu0 %v15390_v6  ;;  %6151 = vmatprep.subr.bf16.mxu1 %v15393_v20  ;;  %v15483_v6 = vld [vmem:[%s21175_s3 + $0x2ec] ss:$16 sps:$4 sm:$0xff]   ;;  %v15478_v20 = vld [vmem:[%s21175_s3 + $0x2e0] ss:$16 sps:$4 sm:$0xff]  }
 0x3af   : > { %6046 = vmatpush1.bf16.msra.mxu0 %v15388_v1  ;;  %6152 = vmatpush1.bf16.msra.mxu1 %v15391_v2  ;;  %v15481_v1 = vld [vmem:[%s21175_s3 + $0x2e8] ss:$16 sps:$4 sm:$0xff]   ;;  %v15486_v2 = vld [vmem:[%s21175_s3 + $0x304] ss:$16 sps:$4 sm:$0xff]  }
 0x3b0   : > { %6047 = vmatprep.subr.bf16.mxu0 %v15396_v3  ;;  %6153 = vmatprep.subr.bf16.mxu1 %v15399_v7  ;;  %v15489_v3 = vld [vmem:[%s21175_s3 + $0x30c] ss:$16 sps:$4 sm:$0xff]   ;;  %v15484_v7 = vld [vmem:[%s21175_s3 + $0x300] ss:$16 sps:$4 sm:$0xff]  }
 0x3b3   : > { %6048 = vmatpush1.bf16.msra.mxu0 %v15394_v4  ;;  %6154 = vmatpush1.bf16.msra.mxu1 %v15397_v5  ;;  %v15487_v4 = vld [vmem:[%s21175_s3 + $0x308] ss:$16 sps:$4 sm:$0xff]   ;;  %v15492_v5 = vld [vmem:[%s21175_s3 + $0x324] ss:$16 sps:$4 sm:$0xff]  }
 0x3b4   : > { %6049 = vmatprep.subr.bf16.mxu0 %v15402_v32  ;;  %6155 = vmatprep.subr.bf16.mxu1 %v15405_v62  ;;  %v15495_v32 = vld [vmem:[%s21175_s3 + $0x32c] ss:$16 sps:$4 sm:$0xff]   ;;  %v15490_v62 = vld [vmem:[%s21175_s3 + $0x320] ss:$16 sps:$4 sm:$0xff]  }
 0x3b7   : > { %6050 = vmatpush1.bf16.msra.mxu0 %v15400_v9  ;;  %6156 = vmatpush1.bf16.msra.mxu1 %v15403_v10  ;;  %v15493_v9 = vld [vmem:[%s21175_s3 + $0x328] ss:$16 sps:$4 sm:$0xff]   ;;  %v15498_v10 = vld [vmem:[%s21175_s3 + $0x344] ss:$16 sps:$4 sm:$0xff]  }
 0x3b8   : > { %6051 = vmatprep.subr.bf16.mxu0 %v15408_v11  ;;  %6157 = vmatprep.subr.bf16.mxu1 %v15411_v13  ;;  %v15501_v11 = vld [vmem:[%s21175_s3 + $0x34c] ss:$16 sps:$4 sm:$0xff]   ;;  %v15496_v13 = vld [vmem:[%s21175_s3 + $0x340] ss:$16 sps:$4 sm:$0xff]  }
 0x3bb   : > { %6052 = vmatpush1.bf16.msra.mxu0 %v15406_v63  ;;  %6158 = vmatpush1.bf16.msra.mxu1 %v15409_v18  ;;  %v15499_v63 = vld [vmem:[%s21175_s3 + $0x348] ss:$16 sps:$4 sm:$0xff]   ;;  %v15504_v18 = vld [vmem:[%s21175_s3 + $0x364] ss:$16 sps:$4 sm:$0xff]  }
 0x3bc   : > { %6053 = vmatprep.subr.bf16.mxu0 %v15414_v19  ;;  %6159 = vmatprep.subr.bf16.mxu1 %v15417_v21  ;;  %v15507_v19 = vld [vmem:[%s21175_s3 + $0x36c] ss:$16 sps:$4 sm:$0xff]   ;;  %v15502_v21 = vld [vmem:[%s21175_s3 + $0x360] ss:$16 sps:$4 sm:$0xff]  }
 0x3bf   : > { %6054 = vmatpush1.bf16.msra.mxu0 %v15412_v22  ;;  %6160 = vmatpush1.bf16.msra.mxu1 %v15415_v15  ;;  %v15505_v22 = vld [vmem:[%s21175_s3 + $0x368] ss:$16 sps:$4 sm:$0xff]   ;;  %v15510_v15 = vld [vmem:[%s21175_s3 + $0x384] ss:$16 sps:$4 sm:$0xff]  }
 0x3c0   : > { %6055 = vmatprep.subr.bf16.mxu0 %v15420_v23  ;;  %6161 = vmatprep.subr.bf16.mxu1 %v15423_v24  ;;  %v15513_v23 = vld [vmem:[%s21175_s3 + $0x38c] ss:$16 sps:$4 sm:$0xff]   ;;  %v15508_v24 = vld [vmem:[%s21175_s3 + $0x380] ss:$16 sps:$4 sm:$0xff]  }
 0x3c3   : > { %6056 = vmatpush1.bf16.msra.mxu0 %v15418_v25  ;;  %6162 = vmatpush1.bf16.msra.mxu1 %v15421_v28  ;;  %v15511_v25 = vld [vmem:[%s21175_s3 + $0x388] ss:$16 sps:$4 sm:$0xff]   ;;  %v15516_v28 = vld [vmem:[%s21175_s3 + $0x3a4] ss:$16 sps:$4 sm:$0xff]  }
 0x3c4   : > { %6057 = vmatprep.subr.bf16.mxu0 %v15426_v29  ;;  %6163 = vmatprep.subr.bf16.mxu1 %v15429_v51  ;;  %v15519_v29 = vld [vmem:[%s21175_s3 + $0x3ac] ss:$16 sps:$4 sm:$0xff]   ;;  %v15514_v51 = vld [vmem:[%s21175_s3 + $0x3a0] ss:$16 sps:$4 sm:$0xff]  }
 0x3c7   : > { %6058 = vmatpush1.bf16.msra.mxu0 %v15424_v34  ;;  %6164 = vmatpush1.bf16.msra.mxu1 %v15427_v17  ;;  %v15517_v34 = vld [vmem:[%s21175_s3 + $0x3a8] ss:$16 sps:$4 sm:$0xff]   ;;  %v15522_v17 = vld [vmem:[%s21175_s3 + $0x3c4] ss:$16 sps:$4 sm:$0xff]  }
 0x3c8   : > { %6080 = vmatprep.subr.bf16.mxu0 %v15432_v35  ;;  %6186 = vmatprep.subr.bf16.mxu1 %v15435_v36  ;;  %v15525_v35 = vld [vmem:[%s21175_s3 + $0x3cc] ss:$16 sps:$4 sm:$0xff]   ;;  %v15520_v36 = vld [vmem:[%s21175_s3 + $0x3c0] ss:$16 sps:$4 sm:$0xff]  }
 0x3ca   : > { %6060 = vmatmul.mubr.bf16.vlgmr.msra.gmra.mrb[16].mxu0 %v18372_v14  ;;  %6166 = vmatmul.mubr.bf16.vlgmr.msra.gmra.mrb[16].mxu1 %v18372_v14  ;;  %v15450_v14 = vld [vmem:[%s21175_s3 + $0x24c] ss:$16 sps:$4 sm:$0xff]  }
 0x3cb   : > { %6069 = vmatprep.mubr.bf16.mxu0 %v15436_v60  ;;  %6081 = vmatpush1.bf16.msra.mxu0 %v15430_v39  ;;  %v15523_v39 = vld [vmem:[%s21175_s3 + $0x3c8] ss:$16 sps:$4 sm:$0xff]  }
 0x3cc   : > { %6175 = vmatprep.mubr.bf16.mxu1 %v15436_v60  ;;  %6187 = vmatpush1.bf16.msra.mxu1 %v15433_v55  ;;  %v15528_v55 = vld [vmem:[%s21175_s3 + $0x3e4] ss:$16 sps:$4 sm:$0xff]   ;;  %v15531_v60 = vld [vmem:[%s21175_s3 + $0x3ec] ss:$16 sps:$4 sm:$0xff]  }
 0x3cd   : > { %6082 = vmatprep.subr.bf16.mxu0 %v15440_v56  ;;  %6188 = vmatprep.subr.bf16.mxu1 %v15443_v37  ;;  %v15526_v56 = vld [vmem:[%s21175_s3 + $0x3e0] ss:$16 sps:$4 sm:$0xff]   ;;  %v15529_v37 = vld [vmem:[%s21175_s3 + $0x3e8] ss:$16 sps:$4 sm:$0xff]  }
 0x3cf   : > { %6083 = vmatpush1.bf16.msra.mxu0 %v15438_v16  ;;  %v15537_v16 = vld [vmem:[%s21176_s4 + $0x4] ss:$16 sps:$4 sm:$0xff]  }
 0x3d0   : > { %6189 = vmatpush1.bf16.msra.mxu1 %v15441_v48  ;;  %6084 = vmatprep.subr.bf16.mxu0 %v15447_v53  ;;  %v15540_v48 = vld [vmem:[%s21176_s4 + $0xc] ss:$16 sps:$4 sm:$0xff]   ;;  %v15451_v53 = vld [vmem:[#allocation3 + $0x8] ss:$16 sps:$4 sm:$0xff]  }
 0x3d1   : > { %6190 = vmatprep.subr.bf16.mxu1 %v15450_v14  ;;  %v15535_v14 = vld [vmem:[%s21176_s4] ss:$16 sps:$4 sm:$0xff]  }
 0x3d2   : > { %6070 = vmatmul.mubr.bf16.gmra.mrb[20].mxu0 %v15444_v46  ;;  %6176 = vmatmul.mubr.bf16.gmra.mrb[20].mxu1 %v15444_v46  ;;  %v15538_v46 = vld [vmem:[%s21176_s4 + $0x8] ss:$16 sps:$4 sm:$0xff]  }
 0x3d3   : > { %6085 = vmatpush1.bf16.msra.mxu0 %v15445_v0  ;;  %6112 = vmatprep.mubr.bf16.mxu0 %v15453_v31  ;;  %v15532_v0 = vld [vmem:[#allocation3 + $0x2c] ss:$16 sps:$4 sm:$0xff]  }
 0x3d4   : > { %6191 = vmatpush1.bf16.msra.mxu1 %v15448_v30  ;;  %6218 = vmatprep.mubr.bf16.mxu1 %v15453_v31  ;;  %v15543_v30 = vld [vmem:[%s21176_s4 + $0x24] ss:$16 sps:$4 sm:$0xff]   ;;  %v15546_v31 = vld [vmem:[%s21176_s4 + $0x2c] ss:$16 sps:$4 sm:$0xff]  }
 0x3d5   : > { %6086 = vmatprep.subr.bf16.mxu0 %v15456_v57  ;;  %6192 = vmatprep.subr.bf16.mxu1 %v15459_v38  ;;  %v15541_v57 = vld [vmem:[%s21176_s4 + $0x20] ss:$16 sps:$4 sm:$0xff]   ;;  %v15544_v38 = vld [vmem:[%s21176_s4 + $0x28] ss:$16 sps:$4 sm:$0xff]  }
 0x3d7   : > { %6087 = vmatpush1.bf16.msra.mxu0 %v15454_v47  ;;  %v15549_v47 = vld [vmem:[%s21176_s4 + $0x44] ss:$16 sps:$4 sm:$0xff]  }
 0x3d8   : > { %6193 = vmatpush1.bf16.msra.mxu1 %v15457_v49  ;;  %6088 = vmatprep.subr.bf16.mxu0 %v15462_v27  ;;  %v15552_v49 = vld [vmem:[%s21176_s4 + $0x4c] ss:$16 sps:$4 sm:$0xff]   ;;  %v15534_v27 = vld [vmem:[#allocation3 + $0x28] ss:$16 sps:$4 sm:$0xff]  }
 0x3d9   : > { %6194 = vmatprep.subr.bf16.mxu1 %v15465_v43  ;;  %v15547_v43 = vld [vmem:[%s21176_s4 + $0x40] ss:$16 sps:$4 sm:$0xff]  }
 0x3db   : > { %6089 = vmatpush1.bf16.msra.mxu0 %v15460_v44  ;;  %v15550_v44 = vld [vmem:[%s21176_s4 + $0x48] ss:$16 sps:$4 sm:$0xff]  }
 0x3dc   : > { %6195 = vmatpush1.bf16.msra.mxu1 %v15463_v50  ;;  %6090 = vmatprep.subr.bf16.mxu0 %v15468_v12  ;;  %v15555_v50 = vld [vmem:[%s21176_s4 + $0x64] ss:$16 sps:$4 sm:$0xff]   ;;  %v15558_v12 = vld [vmem:[%s21176_s4 + $0x6c] ss:$16 sps:$4 sm:$0xff]  }
 0x3dd   : > { %6196 = vmatprep.subr.bf16.mxu1 %v15471_v33  ;;  %v15553_v33 = vld [vmem:[%s21176_s4 + $0x60] ss:$16 sps:$4 sm:$0xff]  }
 0x3df   : > { %6091 = vmatpush1.bf16.msra.mxu0 %v15466_v8  ;;  %v15556_v8 = vld [vmem:[%s21176_s4 + $0x68] ss:$16 sps:$4 sm:$0xff]  }
 0x3e0   : > { %6197 = vmatpush1.bf16.msra.mxu1 %v15469_v52  ;;  %6092 = vmatprep.subr.bf16.mxu0 %v15474_v45  ;;  %v15561_v52 = vld [vmem:[%s21176_s4 + $0x84] ss:$16 sps:$4 sm:$0xff]   ;;  %v15564_v45 = vld [vmem:[%s21176_s4 + $0x8c] ss:$16 sps:$4 sm:$0xff]  }
 0x3e1   : > { %6198 = vmatprep.subr.bf16.mxu1 %v15477_v58  ;;  %v15559_v58 = vld [vmem:[%s21176_s4 + $0x80] ss:$16 sps:$4 sm:$0xff]  }
 0x3e3   : > { %6093 = vmatpush1.bf16.msra.mxu0 %v15472_v26  ;;  %v15562_v26 = vld [vmem:[%s21176_s4 + $0x88] ss:$16 sps:$4 sm:$0xff]  }
 0x3e4   : > { %6199 = vmatpush1.bf16.msra.mxu1 %v15475_v54  ;;  %6094 = vmatprep.subr.bf16.mxu0 %v15480_v42  ;;  %v15567_v54 = vld [vmem:[%s21176_s4 + $0xa4] ss:$16 sps:$4 sm:$0xff]   ;;  %v15570_v42 = vld [vmem:[%s21176_s4 + $0xac] ss:$16 sps:$4 sm:$0xff]  }
 0x3e5   : > { %6200 = vmatprep.subr.bf16.mxu1 %v15483_v6  ;;  %v15565_v6 = vld [vmem:[%s21176_s4 + $0xa0] ss:$16 sps:$4 sm:$0xff]  }
 0x3e7   : > { %6095 = vmatpush1.bf16.msra.mxu0 %v15478_v20  ;;  %v15568_v20 = vld [vmem:[%s21176_s4 + $0xa8] ss:$16 sps:$4 sm:$0xff]  }
 0x3e8   : > { %6201 = vmatpush1.bf16.msra.mxu1 %v15481_v1  ;;  %6096 = vmatprep.subr.bf16.mxu0 %v15486_v2  ;;  %v15573_v1 = vld [vmem:[%s21176_s4 + $0xc4] ss:$16 sps:$4 sm:$0xff]   ;;  %v15576_v2 = vld [vmem:[%s21176_s4 + $0xcc] ss:$16 sps:$4 sm:$0xff]  }
 0x3e9   : > { %6202 = vmatprep.subr.bf16.mxu1 %v15489_v3  ;;  %v15571_v3 = vld [vmem:[%s21176_s4 + $0xc0] ss:$16 sps:$4 sm:$0xff]  }
 0x3eb   : > { %6097 = vmatpush1.bf16.msra.mxu0 %v15484_v7  ;;  %v15574_v7 = vld [vmem:[%s21176_s4 + $0xc8] ss:$16 sps:$4 sm:$0xff]  }
 0x3ec   : > { %6203 = vmatpush1.bf16.msra.mxu1 %v15487_v4  ;;  %6098 = vmatprep.subr.bf16.mxu0 %v15492_v5  ;;  %v15579_v4 = vld [vmem:[%s21176_s4 + $0xe4] ss:$16 sps:$4 sm:$0xff]   ;;  %v15582_v5 = vld [vmem:[%s21176_s4 + $0xec] ss:$16 sps:$4 sm:$0xff]  }
 0x3ed   : > { %6204 = vmatprep.subr.bf16.mxu1 %v15495_v32  ;;  %v15577_v32 = vld [vmem:[%s21176_s4 + $0xe0] ss:$16 sps:$4 sm:$0xff]  }
 0x3ef   : > { %6099 = vmatpush1.bf16.msra.mxu0 %v15490_v62  ;;  %v15580_v62 = vld [vmem:[%s21176_s4 + $0xe8] ss:$16 sps:$4 sm:$0xff]  }
 0x3f0   : > { %6205 = vmatpush1.bf16.msra.mxu1 %v15493_v9  ;;  %6100 = vmatprep.subr.bf16.mxu0 %v15498_v10  ;;  %v15585_v9 = vld [vmem:[%s21176_s4 + $0x104] ss:$16 sps:$4 sm:$0xff]   ;;  %v15588_v10 = vld [vmem:[%s21176_s4 + $0x10c] ss:$16 sps:$4 sm:$0xff]  }
 0x3f1   : > { %6206 = vmatprep.subr.bf16.mxu1 %v15501_v11  ;;  %v15583_v11 = vld [vmem:[%s21176_s4 + $0x100] ss:$16 sps:$4 sm:$0xff]  }
 0x3f3   : > { %6101 = vmatpush1.bf16.msra.mxu0 %v15496_v13  ;;  %v15586_v13 = vld [vmem:[%s21176_s4 + $0x108] ss:$16 sps:$4 sm:$0xff]  }
 0x3f4   : > { %6207 = vmatpush1.bf16.msra.mxu1 %v15499_v63  ;;  %6102 = vmatprep.subr.bf16.mxu0 %v15504_v18  ;;  %v15591_v63 = vld [vmem:[%s21176_s4 + $0x124] ss:$16 sps:$4 sm:$0xff]   ;;  %v15594_v18 = vld [vmem:[%s21176_s4 + $0x12c] ss:$16 sps:$4 sm:$0xff]  }
 0x3f5   : > { %6208 = vmatprep.subr.bf16.mxu1 %v15507_v19  ;;  %v15589_v19 = vld [vmem:[%s21176_s4 + $0x120] ss:$16 sps:$4 sm:$0xff]  }
 0x3f7   : > { %6103 = vmatpush1.bf16.msra.mxu0 %v15502_v21  ;;  %v15592_v21 = vld [vmem:[%s21176_s4 + $0x128] ss:$16 sps:$4 sm:$0xff]  }
 0x3f8   : > { %6209 = vmatpush1.bf16.msra.mxu1 %v15505_v22  ;;  %6104 = vmatprep.subr.bf16.mxu0 %v15510_v15  ;;  %v15597_v22 = vld [vmem:[%s21176_s4 + $0x144] ss:$16 sps:$4 sm:$0xff]   ;;  %v15600_v15 = vld [vmem:[%s21176_s4 + $0x14c] ss:$16 sps:$4 sm:$0xff]  }
 0x3f9   : > { %6210 = vmatprep.subr.bf16.mxu1 %v15513_v23  ;;  %v15595_v23 = vld [vmem:[%s21176_s4 + $0x140] ss:$16 sps:$4 sm:$0xff]  }
 0x3fb   : > { %6105 = vmatpush1.bf16.msra.mxu0 %v15508_v24  ;;  %v15598_v24 = vld [vmem:[%s21176_s4 + $0x148] ss:$16 sps:$4 sm:$0xff]  }
 0x3fc   : > { %6211 = vmatpush1.bf16.msra.mxu1 %v15511_v25  ;;  %6106 = vmatprep.subr.bf16.mxu0 %v15516_v28  ;;  %v15603_v25 = vld [vmem:[%s21176_s4 + $0x164] ss:$16 sps:$4 sm:$0xff]   ;;  %v15606_v28 = vld [vmem:[%s21176_s4 + $0x16c] ss:$16 sps:$4 sm:$0xff]  }
 0x3fd   : > { %6212 = vmatprep.subr.bf16.mxu1 %v15519_v29  ;;  %v15601_v29 = vld [vmem:[%s21176_s4 + $0x160] ss:$16 sps:$4 sm:$0xff]  }
 0x3ff   : > { %6107 = vmatpush1.bf16.msra.mxu0 %v15514_v51  ;;  %v15604_v51 = vld [vmem:[%s21176_s4 + $0x168] ss:$16 sps:$4 sm:$0xff]  }
 0x400   : > { %6213 = vmatpush1.bf16.msra.mxu1 %v15517_v34  ;;  %6108 = vmatprep.subr.bf16.mxu0 %v15522_v17  ;;  %v15609_v34 = vld [vmem:[%s21176_s4 + $0x184] ss:$16 sps:$4 sm:$0xff]   ;;  %v15612_v17 = vld [vmem:[%s21176_s4 + $0x18c] ss:$16 sps:$4 sm:$0xff]  }
 0x401   : > { %6214 = vmatprep.subr.bf16.mxu1 %v15525_v35  ;;  %v15607_v35 = vld [vmem:[%s21176_s4 + $0x180] ss:$16 sps:$4 sm:$0xff]  }
 0x403   : > { %6109 = vmatpush1.bf16.msra.mxu0 %v15520_v36  ;;  %v15610_v36 = vld [vmem:[%s21176_s4 + $0x188] ss:$16 sps:$4 sm:$0xff]  }
 0x404   : > { %6215 = vmatpush1.bf16.msra.mxu1 %v15523_v39  ;;  %6110 = vmatprep.subr.bf16.mxu0 %v15528_v55  ;;  %v15615_v39 = vld [vmem:[%s21176_s4 + $0x1a4] ss:$16 sps:$4 sm:$0xff]   ;;  %v15613_v55 = vld [vmem:[%s21176_s4 + $0x1a0] ss:$16 sps:$4 sm:$0xff]  }
 0x405   : > { %6216 = vmatprep.subr.bf16.mxu1 %v15531_v60  ;;  %v15616_v60 = vld [vmem:[%s21176_s4 + $0x1a8] ss:$16 sps:$4 sm:$0xff]  }
 0x407   : > { %6111 = vmatpush1.bf16.msra.mxu0 %v15526_v56  ;;  %v15618_v56 = vld [vmem:[%s21176_s4 + $0x1ac] ss:$16 sps:$4 sm:$0xff]  }
 0x408   : > { %6217 = vmatpush1.bf16.msra.mxu1 %v15529_v37  ;;  %7189 = vmatprep.subr.bf16.mxu0 %v15537_v16  ;;  %v15621_v37 = vld [vmem:[%s21176_s4 + $0x1c4] ss:$16 sps:$4 sm:$0xff]   ;;  %v15624_v16 = vld [vmem:[%s21176_s4 + $0x1cc] ss:$16 sps:$4 sm:$0xff]  }
 0x409   : > { %7295 = vmatprep.subr.bf16.mxu1 %v15540_v48  ;;  %v15619_v48 = vld [vmem:[%s21176_s4 + $0x1c0] ss:$16 sps:$4 sm:$0xff]  }
 0x40a   : > { %6113 = vmatmul.mubr.bf16.vlgmr.msra.gmra.mrb[16].mxu0 %v15451_v53 }
 0x40b   : > { %6219 = vmatmul.mubr.bf16.vlgmr.msra.gmra.mrb[16].mxu1 %v15451_v53  ;;  %6122 = vmatprep.mubr.bf16.mxu0 %v15532_v0  ;;  %v15622_v53 = vld [vmem:[%s21176_s4 + $0x1c8] ss:$16 sps:$4 sm:$0xff]  }
 0x40c   : > { %6228 = vmatprep.mubr.bf16.mxu1 %v15532_v0  ;;  %7190 = vmatpush1.bf16.msra.mxu0 %v15535_v14  ;;  %v15627_v14 = vld [vmem:[%s21176_s4 + $0x1e4] ss:$16 sps:$4 sm:$0xff]   ;;  %v15630_v0 = vld [vmem:[%s21176_s4 + $0x1ec] ss:$16 sps:$4 sm:$0xff]  }
 0x40d   : > { %7296 = vmatpush1.bf16.msra.mxu1 %v15538_v46  ;;  %7191 = vmatprep.subr.bf16.mxu0 %v15543_v30  ;;  %v15625_v46 = vld [vmem:[%s21176_s4 + $0x1e0] ss:$16 sps:$4 sm:$0xff]   ;;  %v15628_v30 = vld [vmem:[%s21176_s4 + $0x1e8] ss:$16 sps:$4 sm:$0xff]  }
 0x40e   : > { %7297 = vmatprep.subr.bf16.mxu1 %v15546_v31  ;;  %v15633_v31 = vld [vmem:[%s21176_s4 + $0x204] ss:$16 sps:$4 sm:$0xff]  }
 0x410   : > { %7192 = vmatpush1.bf16.msra.mxu0 %v15541_v57  ;;  %v15636_v57 = vld [vmem:[%s21176_s4 + $0x20c] ss:$16 sps:$4 sm:$0xff]  }
 0x411   : > { %7298 = vmatpush1.bf16.msra.mxu1 %v15544_v38  ;;  %7193 = vmatprep.subr.bf16.mxu0 %v15549_v47  ;;  %v13401_v38 = vld [vmem:[%s21178_s6 + $0x2] ss:$8 sm:$0xf] }
 0x412   : > { %6123 = vmatmul.mubr.bf16.gmra.mrb[20].mxu0 %v15534_v27  ;;  %7299 = vmatprep.subr.bf16.mxu1 %v15552_v49  ;;  %v6245_v47 = vrot.slane %v13401_v38, %v17061_v40  ;;  %v6253_v49 = vrot.slane %v13401_v38, %v17069_v59 }
 0x413   : > { %6229 = vmatmul.mubr.bf16.gmra.mrb[20].mxu1 %v15534_v27  ;;  %v6249_v27 = vrot.slane %v13401_v38, %v17063_v41 }
 0x414   : > { %7194 = vmatpush1.bf16.msra.mxu0 %v15547_v43  ;;  %v6257_v43 = vrot.slane %v13401_v38, %v17073_v61  ;;  %v15637_v38 = vld [vmem:[%s21176_s4 + $0x220] ss:$16 sps:$4 sm:$0xff]  }
 0x415   : > { %7300 = vmatpush1.bf16.msra.mxu1 %v15550_v44  ;;  %7195 = vmatprep.subr.bf16.mxu0 %v15555_v50 }
 0x416   : > { %7301 = vmatprep.subr.bf16.mxu1 %v15558_v12 }
 0x418   : > { %7196 = vmatpush1.bf16.msra.mxu0 %v15553_v33 }
 0x419   : > { %7302 = vmatpush1.bf16.msra.mxu1 %v15556_v8  ;;  %7197 = vmatprep.subr.bf16.mxu0 %v15561_v52 }
 0x41a   : > { %7303 = vmatprep.subr.bf16.mxu1 %v15564_v45 }
 0x41c   : > { %7198 = vmatpush1.bf16.msra.mxu0 %v15559_v58 }
 0x41d   : > { %7304 = vmatpush1.bf16.msra.mxu1 %v15562_v26  ;;  %7199 = vmatprep.subr.bf16.mxu0 %v15567_v54 }
 0x41e   : > { %7305 = vmatprep.subr.bf16.mxu1 %v15570_v42 }
 0x420   : > { %7200 = vmatpush1.bf16.msra.mxu0 %v15565_v6 }
 0x421   : > { %7306 = vmatpush1.bf16.msra.mxu1 %v15568_v20  ;;  %7201 = vmatprep.subr.bf16.mxu0 %v15573_v1 }
 0x422   : > { %7307 = vmatprep.subr.bf16.mxu1 %v15576_v2 }
 0x424   : > { %7202 = vmatpush1.bf16.msra.mxu0 %v15571_v3 }
 0x425   : > { %7308 = vmatpush1.bf16.msra.mxu1 %v15574_v7  ;;  %7203 = vmatprep.subr.bf16.mxu0 %v15579_v4 }
 0x426   : > { %7309 = vmatprep.subr.bf16.mxu1 %v15582_v5 }
 0x428   : > { %7204 = vmatpush1.bf16.msra.mxu0 %v15577_v32 }
 0x429   : > { %7310 = vmatpush1.bf16.msra.mxu1 %v15580_v62  ;;  %7205 = vmatprep.subr.bf16.mxu0 %v15585_v9 }
 0x42a   : > { %7311 = vmatprep.subr.bf16.mxu1 %v15588_v10 }
 0x42c   : > { %7206 = vmatpush1.bf16.msra.mxu0 %v15583_v11 }
 0x42d   : > { %7312 = vmatpush1.bf16.msra.mxu1 %v15586_v13  ;;  %7207 = vmatprep.subr.bf16.mxu0 %v15591_v63 }
 0x42e   : > { %7313 = vmatprep.subr.bf16.mxu1 %v15594_v18 }
 0x430   : > { %7208 = vmatpush1.bf16.msra.mxu0 %v15589_v19 }
 0x431   : > { %7314 = vmatpush1.bf16.msra.mxu1 %v15592_v21  ;;  %7209 = vmatprep.subr.bf16.mxu0 %v15597_v22  ;;  %v15631_v21 = vld [vmem:[%s21176_s4 + $0x200] ss:$16 sps:$4 sm:$0xff]  }
 0x432   : > { %7315 = vmatprep.subr.bf16.mxu1 %v15600_v15 }
 0x434   : > { %7210 = vmatpush1.bf16.msra.mxu0 %v15595_v23 }
 0x435   : > { %7316 = vmatpush1.bf16.msra.mxu1 %v15598_v24  ;;  %7211 = vmatprep.subr.bf16.mxu0 %v15603_v25 }
 0x436   : > { %7317 = vmatprep.subr.bf16.mxu1 %v15606_v28 }
 0x438   : > { %7212 = vmatpush1.bf16.msra.mxu0 %v15601_v29  ;;  %v15634_v29 = vld [vmem:[%s21176_s4 + $0x208] ss:$16 sps:$4 sm:$0xff]  }
 0x439   : > { %7318 = vmatpush1.bf16.msra.mxu1 %v15604_v51  ;;  %7213 = vmatprep.subr.bf16.mxu0 %v15609_v34  ;;  %v15639_v51 = vld [vmem:[%s21176_s4 + $0x224] ss:$16 sps:$4 sm:$0xff]  }
 0x43a   : > { %7319 = vmatprep.subr.bf16.mxu1 %v15612_v17 }
 0x43c   : > { %7214 = vmatpush1.bf16.msra.mxu0 %v15607_v35 }
 0x43d   : > { %7320 = vmatpush1.bf16.msra.mxu1 %v15610_v36  ;;  %7215 = vmatprep.subr.bf16.mxu0 %v15615_v39 }
 0x43e   : > { %7321 = vmatprep.subr.bf16.mxu1 %v15618_v56 }
 0x440   : > { %7216 = vmatpush1.bf16.msra.mxu0 %v15613_v55  ;;  %v15642_v55 = vld [vmem:[%s21176_s4 + $0x22c] ss:$16 sps:$4 sm:$0xff]  }
 0x441   : > { %7322 = vmatpush1.bf16.msra.mxu1 %v15616_v60  ;;  %7217 = vmatprep.subr.bf16.mxu0 %v15621_v37 }
 0x442   : > { %7323 = vmatprep.subr.bf16.mxu1 %v15624_v16 }
 0x444   : > { %7218 = vmatpush1.bf16.msra.mxu0 %v15619_v48 }
 0x445   : > { %7324 = vmatpush1.bf16.msra.mxu1 %v15622_v53  ;;  %7219 = vmatprep.subr.bf16.mxu0 %v15627_v14 }
 0x446   : > { %7325 = vmatprep.subr.bf16.mxu1 %v15630_v0 }
 0x448   : > { %7220 = vmatpush1.bf16.msra.mxu0 %v15625_v46 }
 0x449   : > { %7326 = vmatpush1.bf16.msra.mxu1 %v15628_v30  ;;  %7242 = vmatprep.subr.bf16.mxu0 %v15633_v31 }
 0x44a   : > { %7348 = vmatprep.subr.bf16.mxu1 %v15636_v57 }
 0x4dd   : > { %v6114_v44 = vpop.f32.mrb[16].mxu0 }
 0x4de   : > { %v6262_v50 = vadd.f32 %v6245_v47, %v6114_v44  ;;  %v6220_v12 = vpop.f32.mrb[16].mxu1  ;;  %v6116_v33 = vpop.f32.mrb[17].mxu0 }
 0x4df   : > { %v6264_v8 = vadd.f32 %v6253_v49, %v6220_v12  ;;  %v6263_v52 = vadd.f32 %v6249_v27, %v6116_v33  ;;  %v6222_v45 = vpop.f32.mrb[17].mxu1  ;;  %v6118_v58 = vpop.f32.mrb[18].mxu0  ;;  %v15646_v12 = vld [vmem:[%s21176_s4 + $0x248] ss:$16 sps:$4 sm:$0xff]  }
 0x4e0   : > { %v6278_v26 = vmax.f32 %v6262_v50, 0.0  ;;  %v6265_v54 = vadd.f32 %v6257_v43, %v6222_v45  ;;  %v6266_v42 = vadd.f32 %v6245_v47, %v6118_v58  ;;  %v6224_v6 = vpop.f32.mrb[18].mxu1  ;;  %v6120_v20 = vpop.f32.mrb[19].mxu0  ;;  %v15643_v50 = vld [vmem:[%s21176_s4 + $0x240] ss:$16 sps:$4 sm:$0xff]  }
 0x4e1   : > { %v6280_v1 = vmax.f32 %v6264_v8, 0.0  ;;  %v6279_v2 = vmax.f32 %v6263_v52, 0.0  ;;  %v6268_v3 = vadd.f32 %v6253_v49, %v6224_v6  ;;  %v6267_v7 = vadd.f32 %v6249_v27, %v6120_v20  ;;  %v6226_v4 = vpop.f32.mrb[19].mxu1  ;;  %v15651_v45 = vld [vmem:[%s21176_s4 + $0x264] ss:$16 sps:$4 sm:$0xff]  }
 0x4e2   : > { %v6281_v5 = vmax.f32 %v6265_v54, 0.0  ;;  %v6282_v32 = vmax.f32 %v6266_v42, 0.0  ;;  %v6269_v62 = vadd.f32 %v6257_v43, %v6226_v4  ;;  %v15654_v58 = vld [vmem:[%s21176_s4 + $0x26c] ss:$16 sps:$4 sm:$0xff]   ;;  %v15652_v54 = vld [vmem:[%s21176_s4 + $0x268] ss:$16 sps:$4 sm:$0xff]  }
 0x4e3   : > { %v6284_v9 = vmax.f32 %v6268_v3, 0.0  ;;  %v6283_v10 = vmax.f32 %v6267_v7, 0.0  ;;  %v15657_v42 = vld [vmem:[%s21176_s4 + $0x284] ss:$16 sps:$4 sm:$0xff]   ;;  %v15660_v6 = vld [vmem:[%s21176_s4 + $0x28c] ss:$16 sps:$4 sm:$0xff]  }
 0x4e4   : > { %v6285_v11 = vmax.f32 %v6269_v62, 0.0  ;;  %v16541_v25 = vpack.c.bf16 %v6282_v32, %v6278_v26  ;;  %v15649_v26 = vld [vmem:[%s21176_s4 + $0x260] ss:$16 sps:$4 sm:$0xff]   ;;  %v15666_v3 = vld [vmem:[%s21176_s4 + $0x2ac] ss:$16 sps:$4 sm:$0xff]  }
 0x4e5   : > { %v6124_v13 = vpop.f32.mrb[20].mxu0  ;;  %v16542_v28 = vpack.c.bf16 %v6283_v10, %v6279_v2  ;;  %v19193_v60 = vpack.c.bf16 %v6284_v9, %v6280_v1  ;;  %v15655_v20 = vld [vmem:[%s21176_s4 + $0x280] ss:$16 sps:$4 sm:$0xff]   ;;  %v15658_v1 = vld [vmem:[%s21176_s4 + $0x288] ss:$16 sps:$4 sm:$0xff]  }
 0x4e6   : > { %v6270_v63 = vadd.f32 %v6245_v47, %v6124_v13  ;;  %v6230_v18 = vpop.f32.mrb[20].mxu1  ;;  %v6126_v19 = vpop.f32.mrb[21].mxu0  ;;  %v16544_v30 = vpack.c.bf16 %v6285_v11, %v6281_v5  ;;  %v15663_v2 = vld [vmem:[%s21176_s4 + $0x2a4] ss:$16 sps:$4 sm:$0xff]   ;;  %v15661_v7 = vld [vmem:[%s21176_s4 + $0x2a0] ss:$16 sps:$4 sm:$0xff]  }
 0x4e7   : > { %v6272_v22 = vadd.f32 %v6253_v49, %v6230_v18  ;;  %v6271_v15 = vadd.f32 %v6249_v27, %v6126_v19  ;;  %v6232_v23 = vpop.f32.mrb[21].mxu1  ;;  %v6128_v24 = vpop.f32.mrb[22].mxu0  ;;  %7221 = vmatprep.mubr.bf16.mxu0 %v16542_v28  ;;  %7327 = vmatprep.mubr.bf16.mxu1 %v16542_v28  ;;  %v15664_v4 = vld [vmem:[%s21176_s4 + $0x2a8] ss:$16 sps:$4 sm:$0xff]   ;;  %v15669_v5 = vld [vmem:[%s21176_s4 + $0x2c4] ss:$16 sps:$4 sm:$0xff]  }
 0x4e8   : > { %v6286_v34 = vmax.f32 %v6270_v63, 0.0  ;;  %v6273_v17 = vadd.f32 %v6257_v43, %v6232_v23  ;;  %v6274_v35 = vadd.f32 %v6245_v47, %v6128_v24  ;;  %v6234_v36 = vpop.f32.mrb[22].mxu1  ;;  %v6130_v39 = vpop.f32.mrb[23].mxu0  ;;  %7222 = vmatmul.mubr.bf16.vlgmr.msra.gmra.mrb[24].mxu0 %v16541_v25  ;;  %7328 = vmatmul.mubr.bf16.vlgmr.msra.gmra.mrb[24].mxu1 %v16541_v25  ;;  %v15640_v47 = vld [vmem:[%s21176_s4 + $0x228] ss:$16 sps:$4 sm:$0xff]  }
 0x4e9   : > { %v6288_v56 = vmax.f32 %v6272_v22, 0.0  ;;  %v6287_v37 = vmax.f32 %v6271_v15, 0.0  ;;  %v6276_v16 = vadd.f32 %v6253_v49, %v6234_v36  ;;  %v6275_v48 = vadd.f32 %v6249_v27, %v6130_v39  ;;  %v6236_v53 = vpop.f32.mrb[23].mxu1  ;;  %7243 = vmatpush1.bf16.msra.mxu0 %v15631_v21  ;;  %7349 = vmatpush1.bf16.msra.mxu1 %v15634_v29  ;;  %v15645_v27 = vld [vmem:[%s21176_s4 + $0x244] ss:$16 sps:$4 sm:$0xff]  }
 0x4ea   : > { %v6289_v14 = vmax.f32 %v6273_v17, 0.0  ;;  %v6290_v0 = vmax.f32 %v6274_v35, 0.0  ;;  %v6277_v46 = vadd.f32 %v6257_v43, %v6236_v53  ;;  %7244 = vmatprep.subr.bf16.mxu0 %v15639_v51  ;;  %7350 = vmatprep.subr.bf16.mxu1 %v15642_v55  ;;  %v15648_v43 = vld [vmem:[%s21176_s4 + $0x24c] ss:$16 sps:$4 sm:$0xff]   ;;  %v15667_v62 = vld [vmem:[%s21176_s4 + $0x2c0] ss:$16 sps:$4 sm:$0xff]  }
 0x4eb   : > { %v6292_v31 = vmax.f32 %v6276_v16, 0.0  ;;  %v6291_v57 = vmax.f32 %v6275_v48, 0.0  ;;  %v15672_v32 = vld [vmem:[%s21176_s4 + $0x2cc] ss:$16 sps:$4 sm:$0xff]   ;;  %v15670_v9 = vld [vmem:[%s21176_s4 + $0x2c8] ss:$16 sps:$4 sm:$0xff]  }
 0x4ec   : > { %v6293_v49 = vmax.f32 %v6277_v46, 0.0  ;;  %v16546_v33 = vpack.c.bf16 %v6290_v0, %v6286_v34  ;;  %v15675_v10 = vld [vmem:[%s21176_s4 + $0x2e4] ss:$16 sps:$4 sm:$0xff]   ;;  %v15678_v11 = vld [vmem:[%s21176_s4 + $0x2ec] ss:$16 sps:$4 sm:$0xff]  }
 0x4ed   : > { %7245 = vmatpush1.bf16.msra.mxu0 %v15637_v38  ;;  %7351 = vmatpush1.bf16.msra.mxu1 %v15640_v47  ;;  %v16545_v44 = vpack.c.bf16 %v6291_v57, %v6287_v37  ;;  %v19215_v52 = vpack.c.bf16 %v6292_v31, %v6288_v56  ;;  %v15673_v13 = vld [vmem:[%s21176_s4 + $0x2e0] ss:$16 sps:$4 sm:$0xff]   ;;  %v15676_v63 = vld [vmem:[%s21176_s4 + $0x2e8] ss:$16 sps:$4 sm:$0xff]   ;;  %v15681_v18 = vld [vmem:[%s21176_s4 + $0x304] ss:$16 sps:$4 sm:$0xff]  }
 0x4ee   : > { %7246 = vmatprep.subr.bf16.mxu0 %v15645_v27  ;;  %7352 = vmatprep.subr.bf16.mxu1 %v15648_v43  ;;  %v19213_v8 = vpack.c.bf16 %v6293_v49, %v6289_v14  ;;  %v15684_v19 = vld [vmem:[%s21176_s4 + $0x30c] ss:$16 sps:$4 sm:$0xff]   ;;  %v15679_v21 = vld [vmem:[%s21176_s4 + $0x300] ss:$16 sps:$4 sm:$0xff]   ;;  %v15682_v22 = vld [vmem:[%s21176_s4 + $0x308] ss:$16 sps:$4 sm:$0xff]  }
 0x4ef   : > { %7231 = vmatprep.mubr.bf16.mxu0 %v16545_v44  ;;  %7337 = vmatprep.mubr.bf16.mxu1 %v16545_v44  ;;  %v15687_v15 = vld [vmem:[%s21176_s4 + $0x324] ss:$16 sps:$4 sm:$0xff]   ;;  %v15690_v23 = vld [vmem:[%s21176_s4 + $0x32c] ss:$16 sps:$4 sm:$0xff]   ;;  %v15685_v24 = vld [vmem:[%s21176_s4 + $0x320] ss:$16 sps:$4 sm:$0xff]  }
 0x4f0   : > { %7232 = vmatmul.mubr.bf16.gmra.mrb[28].mxu0 %v16546_v33  ;;  %7338 = vmatmul.mubr.bf16.gmra.mrb[28].mxu1 %v16546_v33  ;;  %v15688_v25 = vld [vmem:[%s21176_s4 + $0x328] ss:$16 sps:$4 sm:$0xff]   ;;  %v15693_v28 = vld [vmem:[%s21176_s4 + $0x344] ss:$16 sps:$4 sm:$0xff]   ;;  %v15696_v29 = vld [vmem:[%s21176_s4 + $0x34c] ss:$16 sps:$4 sm:$0xff]  }
 0x4f1   : > { %7247 = vmatpush1.bf16.msra.mxu0 %v15643_v50  ;;  %7353 = vmatpush1.bf16.msra.mxu1 %v15646_v12  ;;  %v15691_v51 = vld [vmem:[%s21176_s4 + $0x340] ss:$16 sps:$4 sm:$0xff]   ;;  %v15694_v34 = vld [vmem:[%s21176_s4 + $0x348] ss:$16 sps:$4 sm:$0xff]   ;;  %v15699_v17 = vld [vmem:[%s21176_s4 + $0x364] ss:$16 sps:$4 sm:$0xff]  }
 0x4f2   : > { %7274 = vmatprep.mubr.bf16.mxu0 %v16544_v30  ;;  %7380 = vmatprep.mubr.bf16.mxu1 %v16544_v30  ;;  %v15702_v35 = vld [vmem:[%s21176_s4 + $0x36c] ss:$16 sps:$4 sm:$0xff]   ;;  %v15697_v36 = vld [vmem:[%s21176_s4 + $0x360] ss:$16 sps:$4 sm:$0xff]   ;;  %v15700_v39 = vld [vmem:[%s21176_s4 + $0x368] ss:$16 sps:$4 sm:$0xff]  }
 0x4f3   : > { %7248 = vmatprep.subr.bf16.mxu0 %v15651_v45  ;;  %7354 = vmatprep.subr.bf16.mxu1 %v15654_v58  ;;  %v15705_v55 = vld [vmem:[%s21176_s4 + $0x384] ss:$16 sps:$4 sm:$0xff]   ;;  %v15708_v56 = vld [vmem:[%s21176_s4 + $0x38c] ss:$16 sps:$4 sm:$0xff]   ;;  %v15703_v37 = vld [vmem:[%s21176_s4 + $0x380] ss:$16 sps:$4 sm:$0xff]  }
 0x4f4   : > { %v15706_v16 = vld [vmem:[%s21176_s4 + $0x388] ss:$16 sps:$4 sm:$0xff]   ;;  %v15711_v48 = vld [vmem:[%s21176_s4 + $0x3a4] ss:$16 sps:$4 sm:$0xff]   ;;  %v15714_v53 = vld [vmem:[%s21176_s4 + $0x3ac] ss:$16 sps:$4 sm:$0xff]  }
 0x4f5   : > { %7249 = vmatpush1.bf16.msra.mxu0 %v15649_v26  ;;  %7355 = vmatpush1.bf16.msra.mxu1 %v15652_v54  ;;  %v15709_v14 = vld [vmem:[%s21176_s4 + $0x3a0] ss:$16 sps:$4 sm:$0xff]   ;;  %v15712_v0 = vld [vmem:[%s21176_s4 + $0x3a8] ss:$16 sps:$4 sm:$0xff]   ;;  %v15717_v46 = vld [vmem:[%s21176_s4 + $0x3c4] ss:$16 sps:$4 sm:$0xff]  }
 0x4f6   : > { %7250 = vmatprep.subr.bf16.mxu0 %v15657_v42  ;;  %7356 = vmatprep.subr.bf16.mxu1 %v15660_v6  ;;  %v15720_v30 = vld [vmem:[%s21176_s4 + $0x3cc] ss:$16 sps:$4 sm:$0xff]   ;;  %v15715_v31 = vld [vmem:[%s21176_s4 + $0x3c0] ss:$16 sps:$4 sm:$0xff]   ;;  %v15718_v57 = vld [vmem:[%s21176_s4 + $0x3c8] ss:$16 sps:$4 sm:$0xff]  }
 0x4f7   : > { %v15723_v38 = vld [vmem:[%s21176_s4 + $0x3e4] ss:$16 sps:$4 sm:$0xff]   ;;  %v15726_v47 = vld [vmem:[%s21176_s4 + $0x3ec] ss:$16 sps:$4 sm:$0xff]   ;;  %v15721_v49 = vld [vmem:[%s21176_s4 + $0x3e0] ss:$16 sps:$4 sm:$0xff]  }
 0x4f8   : > { %v15724_v27 = vld [vmem:[%s21176_s4 + $0x3e8] ss:$16 sps:$4 sm:$0xff]   ;;  %v15729_v43 = vld [vmem:[%s21177_s5 + $0x4] ss:$16 sps:$4 sm:$0xff]   ;;  %v15732_v44 = vld [vmem:[%s21177_s5 + $0xc] ss:$16 sps:$4 sm:$0xff]  }
 0x4f9   : > { %7251 = vmatpush1.bf16.msra.mxu0 %v15655_v20  ;;  %7357 = vmatpush1.bf16.msra.mxu1 %v15658_v1  ;;  %v15727_v50 = vld [vmem:[%s21177_s5] ss:$16 sps:$4 sm:$0xff]   ;;  %v15730_v12 = vld [vmem:[%s21177_s5 + $0x8] ss:$16 sps:$4 sm:$0xff]   ;;  %v15735_v33 = vld [vmem:[%s21177_s5 + $0x24] ss:$16 sps:$4 sm:$0xff]  }
 0x4fa   : > { %7252 = vmatprep.subr.bf16.mxu0 %v15663_v2  ;;  %7358 = vmatprep.subr.bf16.mxu1 %v15666_v3  ;;  %v15738_v45 = vld [vmem:[%s21177_s5 + $0x2c] ss:$16 sps:$4 sm:$0xff]   ;;  %v15733_v58 = vld [vmem:[%s21177_s5 + $0x20] ss:$16 sps:$4 sm:$0xff]   ;;  %v15736_v26 = vld [vmem:[%s21177_s5 + $0x28] ss:$16 sps:$4 sm:$0xff]  }
 0x4fb   : > { %v15739_v54 = vld [vmem:[%s21177_s5 + $0x40] ss:$16 sps:$4 sm:$0xff]   ;;  %v15742_v42 = vld [vmem:[%s21177_s5 + $0x48] ss:$16 sps:$4 sm:$0xff]   ;;  %v15747_v6 = vld [vmem:[%s21177_s5 + $0x64] ss:$16 sps:$4 sm:$0xff]  }
 0x4fc   : > { %v15750_v20 = vld [vmem:[%s21177_s5 + $0x6c] ss:$16 sps:$4 sm:$0xff]   ;;  %v15745_v1 = vld [vmem:[%s21177_s5 + $0x60] ss:$16 sps:$4 sm:$0xff]   ;;  %v15748_v2 = vld [vmem:[%s21177_s5 + $0x68] ss:$16 sps:$4 sm:$0xff]  }
 0x4fd   : > { %7253 = vmatpush1.bf16.msra.mxu0 %v15661_v7  ;;  %7359 = vmatpush1.bf16.msra.mxu1 %v15664_v4  ;;  %v15753_v3 = vld [vmem:[%s21177_s5 + $0x84] ss:$16 sps:$4 sm:$0xff]   ;;  %v15751_v7 = vld [vmem:[%s21177_s5 + $0x80] ss:$16 sps:$4 sm:$0xff]   ;;  %v15754_v4 = vld [vmem:[%s21177_s5 + $0x88] ss:$16 sps:$4 sm:$0xff]  }
 0x4fe   : > { %7254 = vmatprep.subr.bf16.mxu0 %v15669_v5  ;;  %7360 = vmatprep.subr.bf16.mxu1 %v15672_v32  ;;  %v15759_v5 = vld [vmem:[%s21177_s5 + $0xa4] ss:$16 sps:$4 sm:$0xff]   ;;  %v15762_v32 = vld [vmem:[%s21177_s5 + $0xac] ss:$16 sps:$4 sm:$0xff]  }
 0x501   : > { %7255 = vmatpush1.bf16.msra.mxu0 %v15667_v62  ;;  %7361 = vmatpush1.bf16.msra.mxu1 %v15670_v9  ;;  %v15757_v62 = vld [vmem:[%s21177_s5 + $0xa0] ss:$16 sps:$4 sm:$0xff]   ;;  %v15760_v9 = vld [vmem:[%s21177_s5 + $0xa8] ss:$16 sps:$4 sm:$0xff]  }
 0x502   : > { %7256 = vmatprep.subr.bf16.mxu0 %v15675_v10  ;;  %7362 = vmatprep.subr.bf16.mxu1 %v15678_v11  ;;  %v15765_v10 = vld [vmem:[%s21177_s5 + $0xc4] ss:$16 sps:$4 sm:$0xff]   ;;  %v15768_v11 = vld [vmem:[%s21177_s5 + $0xcc] ss:$16 sps:$4 sm:$0xff]  }
 0x505   : > { %7257 = vmatpush1.bf16.msra.mxu0 %v15673_v13  ;;  %7363 = vmatpush1.bf16.msra.mxu1 %v15676_v63  ;;  %v15763_v13 = vld [vmem:[%s21177_s5 + $0xc0] ss:$16 sps:$4 sm:$0xff]   ;;  %v15766_v63 = vld [vmem:[%s21177_s5 + $0xc8] ss:$16 sps:$4 sm:$0xff]  }
 0x506   : > { %7258 = vmatprep.subr.bf16.mxu0 %v15681_v18  ;;  %7364 = vmatprep.subr.bf16.mxu1 %v15684_v19  ;;  %v15771_v18 = vld [vmem:[%s21177_s5 + $0xe4] ss:$16 sps:$4 sm:$0xff]   ;;  %v15774_v19 = vld [vmem:[%s21177_s5 + $0xec] ss:$16 sps:$4 sm:$0xff]  }
 0x509   : > { %7259 = vmatpush1.bf16.msra.mxu0 %v15679_v21  ;;  %7365 = vmatpush1.bf16.msra.mxu1 %v15682_v22  ;;  %v15769_v21 = vld [vmem:[%s21177_s5 + $0xe0] ss:$16 sps:$4 sm:$0xff]   ;;  %v15772_v22 = vld [vmem:[%s21177_s5 + $0xe8] ss:$16 sps:$4 sm:$0xff]  }
 0x50a   : > { %7260 = vmatprep.subr.bf16.mxu0 %v15687_v15  ;;  %7366 = vmatprep.subr.bf16.mxu1 %v15690_v23  ;;  %v15777_v15 = vld [vmem:[%s21177_s5 + $0x104] ss:$16 sps:$4 sm:$0xff]   ;;  %v15780_v23 = vld [vmem:[%s21177_s5 + $0x10c] ss:$16 sps:$4 sm:$0xff]  }
 0x50d   : > { %7261 = vmatpush1.bf16.msra.mxu0 %v15685_v24  ;;  %7367 = vmatpush1.bf16.msra.mxu1 %v15688_v25  ;;  %v15775_v24 = vld [vmem:[%s21177_s5 + $0x100] ss:$16 sps:$4 sm:$0xff]   ;;  %v15778_v25 = vld [vmem:[%s21177_s5 + $0x108] ss:$16 sps:$4 sm:$0xff]  }
 0x50e   : > { %7262 = vmatprep.subr.bf16.mxu0 %v15693_v28  ;;  %7368 = vmatprep.subr.bf16.mxu1 %v15696_v29  ;;  %v15783_v28 = vld [vmem:[%s21177_s5 + $0x124] ss:$16 sps:$4 sm:$0xff]   ;;  %v15786_v29 = vld [vmem:[%s21177_s5 + $0x12c] ss:$16 sps:$4 sm:$0xff]  }
 0x511   : > { %7263 = vmatpush1.bf16.msra.mxu0 %v15691_v51  ;;  %7369 = vmatpush1.bf16.msra.mxu1 %v15694_v34  ;;  %v15781_v51 = vld [vmem:[%s21177_s5 + $0x120] ss:$16 sps:$4 sm:$0xff]   ;;  %v15784_v34 = vld [vmem:[%s21177_s5 + $0x128] ss:$16 sps:$4 sm:$0xff]  }
 0x512   : > { %7264 = vmatprep.subr.bf16.mxu0 %v15699_v17  ;;  %7370 = vmatprep.subr.bf16.mxu1 %v15702_v35  ;;  %v15789_v17 = vld [vmem:[%s21177_s5 + $0x144] ss:$16 sps:$4 sm:$0xff]   ;;  %v15792_v35 = vld [vmem:[%s21177_s5 + $0x14c] ss:$16 sps:$4 sm:$0xff]  }
 0x515   : > { %7265 = vmatpush1.bf16.msra.mxu0 %v15697_v36  ;;  %7371 = vmatpush1.bf16.msra.mxu1 %v15700_v39  ;;  %v15787_v36 = vld [vmem:[%s21177_s5 + $0x140] ss:$16 sps:$4 sm:$0xff]   ;;  %v15790_v39 = vld [vmem:[%s21177_s5 + $0x148] ss:$16 sps:$4 sm:$0xff]  }
 0x516   : > { %7266 = vmatprep.subr.bf16.mxu0 %v15705_v55  ;;  %7372 = vmatprep.subr.bf16.mxu1 %v15708_v56  ;;  %v15795_v55 = vld [vmem:[%s21177_s5 + $0x164] ss:$16 sps:$4 sm:$0xff]   ;;  %v15798_v56 = vld [vmem:[%s21177_s5 + $0x16c] ss:$16 sps:$4 sm:$0xff]  }
 0x519   : > { %7267 = vmatpush1.bf16.msra.mxu0 %v15703_v37  ;;  %7373 = vmatpush1.bf16.msra.mxu1 %v15706_v16  ;;  %v15793_v37 = vld [vmem:[%s21177_s5 + $0x160] ss:$16 sps:$4 sm:$0xff]   ;;  %v15796_v16 = vld [vmem:[%s21177_s5 + $0x168] ss:$16 sps:$4 sm:$0xff]  }
 0x51a   : > { %7268 = vmatprep.subr.bf16.mxu0 %v15711_v48  ;;  %7374 = vmatprep.subr.bf16.mxu1 %v15714_v53  ;;  %v15801_v48 = vld [vmem:[%s21177_s5 + $0x184] ss:$16 sps:$4 sm:$0xff]   ;;  %v15804_v53 = vld [vmem:[%s21177_s5 + $0x18c] ss:$16 sps:$4 sm:$0xff]  }
 0x51d   : > { %7269 = vmatpush1.bf16.msra.mxu0 %v15709_v14  ;;  %7375 = vmatpush1.bf16.msra.mxu1 %v15712_v0  ;;  %v15799_v14 = vld [vmem:[%s21177_s5 + $0x180] ss:$16 sps:$4 sm:$0xff]   ;;  %v15802_v0 = vld [vmem:[%s21177_s5 + $0x188] ss:$16 sps:$4 sm:$0xff]  }
 0x51e   : > { %7270 = vmatprep.subr.bf16.mxu0 %v15717_v46  ;;  %7376 = vmatprep.subr.bf16.mxu1 %v15720_v30  ;;  %v15807_v46 = vld [vmem:[%s21177_s5 + $0x1a4] ss:$16 sps:$4 sm:$0xff]   ;;  %v15810_v30 = vld [vmem:[%s21177_s5 + $0x1ac] ss:$16 sps:$4 sm:$0xff]  }
 0x521   : > { %7271 = vmatpush1.bf16.msra.mxu0 %v15715_v31  ;;  %7377 = vmatpush1.bf16.msra.mxu1 %v15718_v57  ;;  %v15805_v31 = vld [vmem:[%s21177_s5 + $0x1a0] ss:$16 sps:$4 sm:$0xff]   ;;  %v15808_v57 = vld [vmem:[%s21177_s5 + $0x1a8] ss:$16 sps:$4 sm:$0xff]  }
 0x522   : > { %7272 = vmatprep.subr.bf16.mxu0 %v15723_v38  ;;  %7378 = vmatprep.subr.bf16.mxu1 %v15726_v47  ;;  %v15813_v38 = vld [vmem:[%s21177_s5 + $0x1c4] ss:$16 sps:$4 sm:$0xff]   ;;  %v15816_v47 = vld [vmem:[%s21177_s5 + $0x1cc] ss:$16 sps:$4 sm:$0xff]  }
 0x525   : > { %7273 = vmatpush1.bf16.msra.mxu0 %v15721_v49  ;;  %7379 = vmatpush1.bf16.msra.mxu1 %v15724_v27  ;;  %v15811_v49 = vld [vmem:[%s21177_s5 + $0x1c0] ss:$16 sps:$4 sm:$0xff]   ;;  %v15814_v27 = vld [vmem:[%s21177_s5 + $0x1c8] ss:$16 sps:$4 sm:$0xff]  }
 0x526   : > { %8312 = vmatprep.subr.bf16.mxu0 %v15729_v43  ;;  %8418 = vmatprep.subr.bf16.mxu1 %v15732_v44  ;;  %v15819_v43 = vld [vmem:[%s21177_s5 + $0x1e4] ss:$16 sps:$4 sm:$0xff]   ;;  %v15822_v44 = vld [vmem:[%s21177_s5 + $0x1ec] ss:$16 sps:$4 sm:$0xff]  }
 0x528   : > { %7275 = vmatmul.mubr.bf16.vlgmr.msra.gmra.mrb[24].mxu0 %v19193_v60  ;;  %7381 = vmatmul.mubr.bf16.vlgmr.msra.gmra.mrb[24].mxu1 %v19193_v60  ;;  %v15741_v60 = vld [vmem:[%s21177_s5 + $0x44] ss:$16 sps:$4 sm:$0xff]  }
 0x529   : > { %7284 = vmatprep.mubr.bf16.mxu0 %v19213_v8  ;;  %7390 = vmatprep.mubr.bf16.mxu1 %v19213_v8  ;;  %v15744_v8 = vld [vmem:[%s21177_s5 + $0x4c] ss:$16 sps:$4 sm:$0xff]  }
 0x52a   : > { %8313 = vmatpush1.bf16.msra.mxu0 %v15727_v50  ;;  %8419 = vmatpush1.bf16.msra.mxu1 %v15730_v12  ;;  %v15817_v50 = vld [vmem:[%s21177_s5 + $0x1e0] ss:$16 sps:$4 sm:$0xff]   ;;  %v15820_v12 = vld [vmem:[%s21177_s5 + $0x1e8] ss:$16 sps:$4 sm:$0xff]  }
 0x52b   : > { %8314 = vmatprep.subr.bf16.mxu0 %v15735_v33  ;;  %8420 = vmatprep.subr.bf16.mxu1 %v15738_v45  ;;  %v15825_v33 = vld [vmem:[%s21177_s5 + $0x204] ss:$16 sps:$4 sm:$0xff]   ;;  %v15828_v45 = vld [vmem:[%s21177_s5 + $0x20c] ss:$16 sps:$4 sm:$0xff]  }
 0x52e   : > { %8315 = vmatpush1.bf16.msra.mxu0 %v15733_v58  ;;  %8421 = vmatpush1.bf16.msra.mxu1 %v15736_v26  ;;  %v13410_v58 = vld [vmem:[%s21178_s6 + $0x3] ss:$8 sm:$0xf] }
 0x52f   : > { %8316 = vmatprep.subr.bf16.mxu0 %v15741_v60  ;;  %8422 = vmatprep.subr.bf16.mxu1 %v15744_v8  ;;  %v6492_v26 = vrot.slane %v13410_v58, %v17061_v40  ;;  %v6500_v60 = vrot.slane %v13410_v58, %v17069_v59  ;;  %v6496_v8 = vrot.slane %v13410_v58, %v17063_v41 }
 0x530   : > { %7285 = vmatmul.mubr.bf16.gmra.mrb[28].mxu0 %v19215_v52  ;;  %7391 = vmatmul.mubr.bf16.gmra.mrb[28].mxu1 %v19215_v52  ;;  %v15756_v52 = vld [vmem:[%s21177_s5 + $0x8c] ss:$16 sps:$4 sm:$0xff]  }
 0x532   : > { %8317 = vmatpush1.bf16.msra.mxu0 %v15739_v54  ;;  %8423 = vmatpush1.bf16.msra.mxu1 %v15742_v42  ;;  %v6504_v54 = vrot.slane %v13410_v58, %v17073_v61 }
 0x533   : > { %8318 = vmatprep.subr.bf16.mxu0 %v15747_v6  ;;  %8424 = vmatprep.subr.bf16.mxu1 %v15750_v20 }
 0x536   : > { %8319 = vmatpush1.bf16.msra.mxu0 %v15745_v1  ;;  %8425 = vmatpush1.bf16.msra.mxu1 %v15748_v2 }
 0x537   : > { %8320 = vmatprep.subr.bf16.mxu0 %v15753_v3  ;;  %8426 = vmatprep.subr.bf16.mxu1 %v15756_v52 }
 0x53a   : > { %8321 = vmatpush1.bf16.msra.mxu0 %v15751_v7  ;;  %8427 = vmatpush1.bf16.msra.mxu1 %v15754_v4 }
 0x53b   : > { %8322 = vmatprep.subr.bf16.mxu0 %v15759_v5  ;;  %8428 = vmatprep.subr.bf16.mxu1 %v15762_v32 }
 0x53e   : > { %8323 = vmatpush1.bf16.msra.mxu0 %v15757_v62  ;;  %8429 = vmatpush1.bf16.msra.mxu1 %v15760_v9 }
 0x53f   : > { %8324 = vmatprep.subr.bf16.mxu0 %v15765_v10  ;;  %8430 = vmatprep.subr.bf16.mxu1 %v15768_v11 }
 0x542   : > { %8325 = vmatpush1.bf16.msra.mxu0 %v15763_v13  ;;  %8431 = vmatpush1.bf16.msra.mxu1 %v15766_v63 }
 0x543   : > { %8326 = vmatprep.subr.bf16.mxu0 %v15771_v18  ;;  %8432 = vmatprep.subr.bf16.mxu1 %v15774_v19 }
 0x546   : > { %8327 = vmatpush1.bf16.msra.mxu0 %v15769_v21  ;;  %8433 = vmatpush1.bf16.msra.mxu1 %v15772_v22 }
 0x547   : > { %8328 = vmatprep.subr.bf16.mxu0 %v15777_v15  ;;  %8434 = vmatprep.subr.bf16.mxu1 %v15780_v23 }
 0x54a   : > { %8329 = vmatpush1.bf16.msra.mxu0 %v15775_v24  ;;  %8435 = vmatpush1.bf16.msra.mxu1 %v15778_v25 }
 0x54b   : > { %8330 = vmatprep.subr.bf16.mxu0 %v15783_v28  ;;  %8436 = vmatprep.subr.bf16.mxu1 %v15786_v29 }
 0x54e   : > { %8331 = vmatpush1.bf16.msra.mxu0 %v15781_v51  ;;  %8437 = vmatpush1.bf16.msra.mxu1 %v15784_v34 }
 0x54f   : > { %8332 = vmatprep.subr.bf16.mxu0 %v15789_v17  ;;  %8438 = vmatprep.subr.bf16.mxu1 %v15792_v35 }
 0x552   : > { %8333 = vmatpush1.bf16.msra.mxu0 %v15787_v36  ;;  %8439 = vmatpush1.bf16.msra.mxu1 %v15790_v39 }
 0x553   : > { %8334 = vmatprep.subr.bf16.mxu0 %v15795_v55  ;;  %8440 = vmatprep.subr.bf16.mxu1 %v15798_v56  ;;  %v15823_v55 = vld [vmem:[%s21177_s5 + $0x200] ss:$16 sps:$4 sm:$0xff]  }
 0x556   : > { %8335 = vmatpush1.bf16.msra.mxu0 %v15793_v37  ;;  %8441 = vmatpush1.bf16.msra.mxu1 %v15796_v16 }
 0x557   : > { %8336 = vmatprep.subr.bf16.mxu0 %v15801_v48  ;;  %8442 = vmatprep.subr.bf16.mxu1 %v15804_v53 }
 0x55a   : > { %8337 = vmatpush1.bf16.msra.mxu0 %v15799_v14  ;;  %8443 = vmatpush1.bf16.msra.mxu1 %v15802_v0  ;;  %v15826_v0 = vld [vmem:[%s21177_s5 + $0x208] ss:$16 sps:$4 sm:$0xff]  }
 0x55b   : > { %8338 = vmatprep.subr.bf16.mxu0 %v15807_v46  ;;  %8444 = vmatprep.subr.bf16.mxu1 %v15810_v30  ;;  %v15831_v46 = vld [vmem:[%s21177_s5 + $0x224] ss:$16 sps:$4 sm:$0xff]  }
 0x55e   : > { %8339 = vmatpush1.bf16.msra.mxu0 %v15805_v31  ;;  %8445 = vmatpush1.bf16.msra.mxu1 %v15808_v57 }
 0x55f   : > { %8340 = vmatprep.subr.bf16.mxu0 %v15813_v38  ;;  %8446 = vmatprep.subr.bf16.mxu1 %v15816_v47 }
 0x562   : > { %8341 = vmatpush1.bf16.msra.mxu0 %v15811_v49  ;;  %8447 = vmatpush1.bf16.msra.mxu1 %v15814_v27  ;;  %v15834_v27 = vld [vmem:[%s21177_s5 + $0x22c] ss:$16 sps:$4 sm:$0xff]  }
 0x563   : > { %8342 = vmatprep.subr.bf16.mxu0 %v15819_v43  ;;  %8448 = vmatprep.subr.bf16.mxu1 %v15822_v44 }
 0x566   : > { %8343 = vmatpush1.bf16.msra.mxu0 %v15817_v50  ;;  %8449 = vmatpush1.bf16.msra.mxu1 %v15820_v12 }
 0x567   : > { %8365 = vmatprep.subr.bf16.mxu0 %v15825_v33  ;;  %8471 = vmatprep.subr.bf16.mxu1 %v15828_v45 }
 0x5fb   : > { %v7276_v42 = vpop.f32.mrb[24].mxu0  ;;  %v7382_v6 = vpop.f32.mrb[24].mxu1 }
 0x5fc   : > { %v14224_v20 = vadd.f32 %v7276_v42, %v6492_v26  ;;  %v14232_v1 = vadd.f32 %v7382_v6, %v6500_v60  ;;  %v7278_v2 = vpop.f32.mrb[25].mxu0  ;;  %v7384_v3 = vpop.f32.mrb[25].mxu1 }
 0x5fd   : > { %v14225_v52 = vadd.f32 %v7278_v2, %v6496_v8  ;;  %v14233_v7 = vadd.f32 %v7384_v3, %v6504_v54  ;;  %v7280_v4 = vpop.f32.mrb[26].mxu0  ;;  %v7386_v5 = vpop.f32.mrb[26].mxu1  ;;  %v15840_v2 = vld [vmem:[%s21177_s5 + $0x24c] ss:$16 sps:$4 sm:$0xff]  }
 0x5fe   : > { %v7401_v32 = vmax.f32 %v14224_v20, 0.0  ;;  %v7403_v62 = vmax.f32 %v14232_v1, 0.0  ;;  %v14226_v9 = vadd.f32 %v7280_v4, %v6492_v26  ;;  %v14234_v10 = vadd.f32 %v7386_v5, %v6500_v60  ;;  %v7282_v11 = vpop.f32.mrb[27].mxu0  ;;  %v7388_v13 = vpop.f32.mrb[27].mxu1  ;;  %v15837_v1 = vld [vmem:[%s21177_s5 + $0x244] ss:$16 sps:$4 sm:$0xff]  }
 0x5ff   : > { %v7402_v63 = vmax.f32 %v14225_v52, 0.0  ;;  %v7404_v18 = vmax.f32 %v14233_v7, 0.0  ;;  %v14227_v19 = vadd.f32 %v7282_v11, %v6496_v8  ;;  %v14235_v21 = vadd.f32 %v7388_v13, %v6504_v54  ;;  %v15835_v4 = vld [vmem:[%s21177_s5 + $0x240] ss:$16 sps:$4 sm:$0xff]   ;;  %v15838_v5 = vld [vmem:[%s21177_s5 + $0x248] ss:$16 sps:$4 sm:$0xff]  }
 0x600   : > { %v7405_v22 = vmax.f32 %v14226_v9, 0.0  ;;  %v7407_v15 = vmax.f32 %v14234_v10, 0.0  ;;  %v15843_v10 = vld [vmem:[%s21177_s5 + $0x264] ss:$16 sps:$4 sm:$0xff]   ;;  %v15846_v11 = vld [vmem:[%s21177_s5 + $0x26c] ss:$16 sps:$4 sm:$0xff]  }
 0x601   : > { %v14148_v23 = vpack.c.bf16 %v7402_v63, %v7401_v32  ;;  %v14149_v24 = vpack.c.bf16 %v7404_v18, %v7403_v62  ;;  %v7406_v25 = vmax.f32 %v14227_v19, 0.0  ;;  %v7408_v28 = vmax.f32 %v14235_v21, 0.0  ;;  %v15841_v13 = vld [vmem:[%s21177_s5 + $0x260] ss:$16 sps:$4 sm:$0xff]   ;;  %v15852_v19 = vld [vmem:[%s21177_s5 + $0x28c] ss:$16 sps:$4 sm:$0xff]  }
 0x602   : > { %v16549_v53 = vpack.c.bf16 %v7405_v22, %v7401_v32  ;;  %v19596_v58 = vpack.c.bf16 %v7407_v15, %v7403_v62  ;;  %v15847_v21 = vld [vmem:[%s21177_s5 + $0x280] ss:$16 sps:$4 sm:$0xff]   ;;  %v15850_v22 = vld [vmem:[%s21177_s5 + $0x288] ss:$16 sps:$4 sm:$0xff]  }
 0x603   : > { %7465 = vst [vmem:[#allocation3] sm:$0xff] %v14148_v23  ;;  %7466 = vst [vmem:[#allocation3 + $0x8] sm:$0xff] %v14149_v24  ;;  %v14151_v29 = vpack.c.bf16 %v7408_v28, %v7407_v15  ;;  %v7286_v51 = vpop.f32.mrb[28].mxu0  ;;  %v7392_v34 = vpop.f32.mrb[28].mxu1  ;;  %v16550_v14 = vpack.c.bf16 %v7406_v25, %v7402_v63  ;;  %v15844_v63 = vld [vmem:[%s21177_s5 + $0x268] ss:$16 sps:$4 sm:$0xff]  }
 0x604   : > { %v14228_v17 = vadd.f32 %v7286_v51, %v6492_v26  ;;  %v14236_v35 = vadd.f32 %v7392_v34, %v6500_v60  ;;  %v7288_v36 = vpop.f32.mrb[29].mxu0  ;;  %v7394_v39 = vpop.f32.mrb[29].mxu1  ;;  %v15855_v15 = vld [vmem:[%s21177_s5 + $0x2a4] ss:$16 sps:$4 sm:$0xff]   ;;  %v15858_v23 = vld [vmem:[%s21177_s5 + $0x2ac] ss:$16 sps:$4 sm:$0xff]  }
 0x605   : > { %7468 = vst [vmem:[#allocation3 + $0x18] sm:$0xff] %v14151_v29  ;;  %v14229_v56 = vadd.f32 %v7288_v36, %v6496_v8  ;;  %v14237_v37 = vadd.f32 %v7394_v39, %v6504_v54  ;;  %v7290_v16 = vpop.f32.mrb[30].mxu0  ;;  %v7396_v48 = vpop.f32.mrb[30].mxu1  ;;  %8344 = vmatprep.mubr.bf16.mxu0 %v16550_v14  ;;  %8450 = vmatprep.mubr.bf16.mxu1 %v16550_v14  ;;  %v15853_v24 = vld [vmem:[%s21177_s5 + $0x2a0] ss:$16 sps:$4 sm:$0xff]  }
 0x606   : > { %v7409_v30 = vmax.f32 %v14228_v17, 0.0  ;;  %v7411_v31 = vmax.f32 %v14236_v35, 0.0  ;;  %v14230_v57 = vadd.f32 %v7290_v16, %v6492_v26  ;;  %v14238_v38 = vadd.f32 %v7396_v48, %v6500_v60  ;;  %v7292_v47 = vpop.f32.mrb[31].mxu0  ;;  %v7398_v49 = vpop.f32.mrb[31].mxu1  ;;  %8345 = vmatmul.mubr.bf16.vlgmr.msra.gmra.mrb[32].mxu0 %v16549_v53  ;;  %8451 = vmatmul.mubr.bf16.vlgmr.msra.gmra.mrb[32].mxu1 %v16549_v53  ;;  %v15856_v25 = vld [vmem:[%s21177_s5 + $0x2a8] ss:$16 sps:$4 sm:$0xff]  }
 0x607   : > { %v7410_v43 = vmax.f32 %v14229_v56, 0.0  ;;  %v7412_v44 = vmax.f32 %v14237_v37, 0.0  ;;  %v14231_v50 = vadd.f32 %v7292_v47, %v6496_v8  ;;  %v14239_v12 = vadd.f32 %v7398_v49, %v6504_v54  ;;  %8366 = vmatpush1.bf16.msra.mxu0 %v15823_v55  ;;  %8472 = vmatpush1.bf16.msra.mxu1 %v15826_v0  ;;  %v15829_v8 = vld [vmem:[%s21177_s5 + $0x220] ss:$16 sps:$4 sm:$0xff]   ;;  %v15832_v54 = vld [vmem:[%s21177_s5 + $0x228] ss:$16 sps:$4 sm:$0xff]  }
 0x608   : > { %v7413_v33 = vmax.f32 %v14230_v57, 0.0  ;;  %v7415_v45 = vmax.f32 %v14238_v38, 0.0  ;;  %v16552_v26 = vpack.c.bf16 %v7408_v28, %v7404_v18  ;;  %8367 = vmatprep.subr.bf16.mxu0 %v15831_v46  ;;  %8473 = vmatprep.subr.bf16.mxu1 %v15834_v27  ;;  %v15849_v18 = vld [vmem:[%s21177_s5 + $0x284] ss:$16 sps:$4 sm:$0xff]   ;;  %v15864_v29 = vld [vmem:[%s21177_s5 + $0x2cc] ss:$16 sps:$4 sm:$0xff]  }
 0x609   : > { %v14152_v60 = vpack.c.bf16 %v7410_v43, %v7409_v30  ;;  %v14153_v42 = vpack.c.bf16 %v7412_v44, %v7411_v31  ;;  %v7414_v6 = vmax.f32 %v14231_v50, 0.0  ;;  %v7416_v20 = vmax.f32 %v14239_v12, 0.0  ;;  %v15861_v28 = vld [vmem:[%s21177_s5 + $0x2c4] ss:$16 sps:$4 sm:$0xff]   ;;  %v15859_v51 = vld [vmem:[%s21177_s5 + $0x2c0] ss:$16 sps:$4 sm:$0xff]  }
 0x60a   : > { %v16554_v32 = vpack.c.bf16 %v7413_v33, %v7409_v30  ;;  %v19618_v9 = vpack.c.bf16 %v7415_v45, %v7411_v31  ;;  %v15862_v34 = vld [vmem:[%s21177_s5 + $0x2c8] ss:$16 sps:$4 sm:$0xff]   ;;  %v15867_v17 = vld [vmem:[%s21177_s5 + $0x2e4] ss:$16 sps:$4 sm:$0xff]   ;;  %v15870_v35 = vld [vmem:[%s21177_s5 + $0x2ec] ss:$16 sps:$4 sm:$0xff]  }
 0x60b   : > { %7469 = vst [vmem:[#allocation3 + $0x20] sm:$0xff] %v14152_v60  ;;  %7470 = vst [vmem:[#allocation3 + $0x28] sm:$0xff] %v14153_v42  ;;  %v14154_v3 = vpack.c.bf16 %v7414_v6, %v7413_v33  ;;  %v14155_v52 = vpack.c.bf16 %v7416_v20, %v7415_v45  ;;  %8368 = vmatpush1.bf16.msra.mxu0 %v15829_v8  ;;  %8474 = vmatpush1.bf16.msra.mxu1 %v15832_v54  ;;  %v15865_v36 = vld [vmem:[%s21177_s5 + $0x2e0] ss:$16 sps:$4 sm:$0xff]   ;;  %v15868_v39 = vld [vmem:[%s21177_s5 + $0x2e8] ss:$16 sps:$4 sm:$0xff]  }
 0x60c   : > { %v16553_v7 = vpack.c.bf16 %v7414_v6, %v7410_v43  ;;  %v19616_v62 = vpack.c.bf16 %v7416_v20, %v7412_v44  ;;  %8369 = vmatprep.subr.bf16.mxu0 %v15837_v1  ;;  %8475 = vmatprep.subr.bf16.mxu1 %v15840_v2  ;;  %v15873_v55 = vld [vmem:[%s21177_s5 + $0x304] ss:$16 sps:$4 sm:$0xff]   ;;  %v15876_v56 = vld [vmem:[%s21177_s5 + $0x30c] ss:$16 sps:$4 sm:$0xff]   ;;  %v15871_v37 = vld [vmem:[%s21177_s5 + $0x300] ss:$16 sps:$4 sm:$0xff]  }
 0x60d   : > { %7471 = vst [vmem:[#allocation3 + $0x30] sm:$0xff] %v14154_v3  ;;  %7472 = vst [vmem:[#allocation3 + $0x38] sm:$0xff] %v14155_v52  ;;  %v15874_v16 = vld [vmem:[%s21177_s5 + $0x308] ss:$16 sps:$4 sm:$0xff]   ;;  %v15879_v48 = vld [vmem:[%s21177_s5 + $0x324] ss:$16 sps:$4 sm:$0xff]  }
 0x60e   : > { %8354 = vmatprep.mubr.bf16.mxu0 %v16553_v7  ;;  %8460 = vmatprep.mubr.bf16.mxu1 %v16553_v7  ;;  %v15882_v53 = vld [vmem:[%s21177_s5 + $0x32c] ss:$16 sps:$4 sm:$0xff]   ;;  %v15877_v14 = vld [vmem:[%s21177_s5 + $0x320] ss:$16 sps:$4 sm:$0xff]   ;;  %v15880_v0 = vld [vmem:[%s21177_s5 + $0x328] ss:$16 sps:$4 sm:$0xff]  }
 0x60f   : > { %8355 = vmatmul.mubr.bf16.gmra.mrb[36].mxu0 %v16554_v32  ;;  %8461 = vmatmul.mubr.bf16.gmra.mrb[36].mxu1 %v16554_v32  ;;  %v15885_v46 = vld [vmem:[%s21177_s5 + $0x344] ss:$16 sps:$4 sm:$0xff]   ;;  %v15888_v30 = vld [vmem:[%s21177_s5 + $0x34c] ss:$16 sps:$4 sm:$0xff]   ;;  %v15883_v31 = vld [vmem:[%s21177_s5 + $0x340] ss:$16 sps:$4 sm:$0xff]  }
 0x610   : > { %8370 = vmatpush1.bf16.msra.mxu0 %v15835_v4  ;;  %8476 = vmatpush1.bf16.msra.mxu1 %v15838_v5  ;;  %v15886_v57 = vld [vmem:[%s21177_s5 + $0x348] ss:$16 sps:$4 sm:$0xff]   ;;  %v15891_v38 = vld [vmem:[%s21177_s5 + $0x364] ss:$16 sps:$4 sm:$0xff]   ;;  %v15894_v47 = vld [vmem:[%s21177_s5 + $0x36c] ss:$16 sps:$4 sm:$0xff]  }
 0x611   : > { %8397 = vmatprep.mubr.bf16.mxu0 %v16552_v26  ;;  %8503 = vmatprep.mubr.bf16.mxu1 %v16552_v26  ;;  %v15889_v49 = vld [vmem:[%s21177_s5 + $0x360] ss:$16 sps:$4 sm:$0xff]   ;;  %v15892_v27 = vld [vmem:[%s21177_s5 + $0x368] ss:$16 sps:$4 sm:$0xff]   ;;  %v15897_v43 = vld [vmem:[%s21177_s5 + $0x384] ss:$16 sps:$4 sm:$0xff]  }
 0x612   : > { %8371 = vmatprep.subr.bf16.mxu0 %v15843_v10  ;;  %8477 = vmatprep.subr.bf16.mxu1 %v15846_v11  ;;  %v15900_v44 = vld [vmem:[%s21177_s5 + $0x38c] ss:$16 sps:$4 sm:$0xff]   ;;  %v15895_v50 = vld [vmem:[%s21177_s5 + $0x380] ss:$16 sps:$4 sm:$0xff]   ;;  %v15898_v12 = vld [vmem:[%s21177_s5 + $0x388] ss:$16 sps:$4 sm:$0xff]  }
 0x613   : > { %v15903_v33 = vld [vmem:[%s21177_s5 + $0x3a4] ss:$16 sps:$4 sm:$0xff]   ;;  %v15906_v45 = vld [vmem:[%s21177_s5 + $0x3ac] ss:$16 sps:$4 sm:$0xff]   ;;  %v15901_v26 = vld [vmem:[%s21177_s5 + $0x3a0] ss:$16 sps:$4 sm:$0xff]  }
 0x614   : > { %8372 = vmatpush1.bf16.msra.mxu0 %v15841_v13  ;;  %8478 = vmatpush1.bf16.msra.mxu1 %v15844_v63  ;;  %v15904_v60 = vld [vmem:[%s21177_s5 + $0x3a8] ss:$16 sps:$4 sm:$0xff]   ;;  %v15909_v42 = vld [vmem:[%s21177_s5 + $0x3c4] ss:$16 sps:$4 sm:$0xff]   ;;  %v15912_v6 = vld [vmem:[%s21177_s5 + $0x3cc] ss:$16 sps:$4 sm:$0xff]  }
 0x615   : > { %8373 = vmatprep.subr.bf16.mxu0 %v15849_v18  ;;  %8479 = vmatprep.subr.bf16.mxu1 %v15852_v19  ;;  %v15907_v20 = vld [vmem:[%s21177_s5 + $0x3c0] ss:$16 sps:$4 sm:$0xff]   ;;  %v15910_v8 = vld [vmem:[%s21177_s5 + $0x3c8] ss:$16 sps:$4 sm:$0xff]   ;;  %v15915_v54 = vld [vmem:[%s21177_s5 + $0x3e4] ss:$16 sps:$4 sm:$0xff]  }
 0x616   : > { %v15918_v1 = vld [vmem:[%s21177_s5 + $0x3ec] ss:$16 sps:$4 sm:$0xff]   ;;  %v15913_v2 = vld [vmem:[%s21177_s5 + $0x3e0] ss:$16 sps:$4 sm:$0xff]   ;;  %v15916_v3 = vld [vmem:[%s21177_s5 + $0x3e8] ss:$16 sps:$4 sm:$0xff]  }
 0x617   : > { %v16626_v52 = vmov 0.0   ;;  %v13555_v7 = vld [vmem:[%s21178_s6 + $0x4] ss:$8 sm:$0xf] }
 0x618   : > { %8374 = vmatpush1.bf16.msra.mxu0 %v15847_v21  ;;  %8480 = vmatpush1.bf16.msra.mxu1 %v15850_v22  ;;  %v7615_v4 = vrot.slane %v13555_v7, %v17061_v40  ;;  %v7619_v5 = vrot.slane %v13555_v7, %v17063_v41  ;;  %v7627_v32 = vrot.slane %v13555_v7, %v17073_v61 }
 0x619   : > { %8375 = vmatprep.subr.bf16.mxu0 %v15855_v15  ;;  %8481 = vmatprep.subr.bf16.mxu1 %v15858_v23 }
 0x61c   : > { %8376 = vmatpush1.bf16.msra.mxu0 %v15853_v24  ;;  %8482 = vmatpush1.bf16.msra.mxu1 %v15856_v25 }
 0x61d   : > { %8377 = vmatprep.subr.bf16.mxu0 %v15861_v28  ;;  %8483 = vmatprep.subr.bf16.mxu1 %v15864_v29 }
 0x620   : > { %8378 = vmatpush1.bf16.msra.mxu0 %v15859_v51  ;;  %8484 = vmatpush1.bf16.msra.mxu1 %v15862_v34 }
 0x621   : > { %8379 = vmatprep.subr.bf16.mxu0 %v15867_v17  ;;  %8485 = vmatprep.subr.bf16.mxu1 %v15870_v35 }
 0x624   : > { %8380 = vmatpush1.bf16.msra.mxu0 %v15865_v36  ;;  %8486 = vmatpush1.bf16.msra.mxu1 %v15868_v39 }
 0x625   : > { %8381 = vmatprep.subr.bf16.mxu0 %v15873_v55  ;;  %8487 = vmatprep.subr.bf16.mxu1 %v15876_v56 }
 0x628   : > { %8382 = vmatpush1.bf16.msra.mxu0 %v15871_v37  ;;  %8488 = vmatpush1.bf16.msra.mxu1 %v15874_v16 }
 0x629   : > { %8383 = vmatprep.subr.bf16.mxu0 %v15879_v48  ;;  %8489 = vmatprep.subr.bf16.mxu1 %v15882_v53 }
 0x62c   : > { %8384 = vmatpush1.bf16.msra.mxu0 %v15877_v14  ;;  %8490 = vmatpush1.bf16.msra.mxu1 %v15880_v0 }
 0x62d   : > { %8385 = vmatprep.subr.bf16.mxu0 %v15885_v46  ;;  %8491 = vmatprep.subr.bf16.mxu1 %v15888_v30 }
 0x630   : > { %8386 = vmatpush1.bf16.msra.mxu0 %v15883_v31  ;;  %8492 = vmatpush1.bf16.msra.mxu1 %v15886_v57 }
 0x631   : > { %8387 = vmatprep.subr.bf16.mxu0 %v15891_v38  ;;  %8493 = vmatprep.subr.bf16.mxu1 %v15894_v47 }
 0x634   : > { %8388 = vmatpush1.bf16.msra.mxu0 %v15889_v49  ;;  %8494 = vmatpush1.bf16.msra.mxu1 %v15892_v27 }
 0x635   : > { %8389 = vmatprep.subr.bf16.mxu0 %v15897_v43  ;;  %8495 = vmatprep.subr.bf16.mxu1 %v15900_v44 }
 0x638   : > { %8390 = vmatpush1.bf16.msra.mxu0 %v15895_v50  ;;  %8496 = vmatpush1.bf16.msra.mxu1 %v15898_v12 }
 0x639   : > { %8391 = vmatprep.subr.bf16.mxu0 %v15903_v33  ;;  %8497 = vmatprep.subr.bf16.mxu1 %v15906_v45 }
 0x63c   : > { %8392 = vmatpush1.bf16.msra.mxu0 %v15901_v26  ;;  %8498 = vmatpush1.bf16.msra.mxu1 %v15904_v60 }
 0x63d   : > { %8393 = vmatprep.subr.bf16.mxu0 %v15909_v42  ;;  %8499 = vmatprep.subr.bf16.mxu1 %v15912_v6 }
 0x640   : > { %8394 = vmatpush1.bf16.msra.mxu0 %v15907_v20  ;;  %8500 = vmatpush1.bf16.msra.mxu1 %v15910_v8 }
 0x641   : > { %8395 = vmatprep.subr.bf16.mxu0 %v15915_v54  ;;  %8501 = vmatprep.subr.bf16.mxu1 %v15918_v1 }
 0x644   : > { %8396 = vmatpush1.bf16.msra.mxu0 %v15913_v2  ;;  %8502 = vmatpush1.bf16.msra.mxu1 %v15916_v3 }
 0x647   : > { %8398 = vmatmul.mubr.bf16.vlgmr.msra.gmra.mrb[32].mxu0 %v19596_v58  ;;  %8504 = vmatmul.mubr.bf16.vlgmr.msra.gmra.mrb[32].mxu1 %v19596_v58  ;;  %v7623_v58 = vrot.slane %v13555_v7, %v17069_v59 }
 0x648   : > { %8407 = vmatprep.mubr.bf16.mxu0 %v19616_v62  ;;  %8513 = vmatprep.mubr.bf16.mxu1 %v19616_v62 }
 0x64f   : > { %8408 = vmatmul.mubr.bf16.gmra.mrb[36].mxu0 %v19618_v9  ;;  %8514 = vmatmul.mubr.bf16.gmra.mrb[36].mxu1 %v19618_v9 }
 0x650   : > { %8721 = vmatprep.mubr.f32.mxu0 %v16626_v52  ;;  %8792 = vmatprep.mubr.f32.mxu1 %v16626_v52 }
 0x71a   : > { %v8399_v62 = vpop.f32.mrb[32].mxu0  ;;  %v8505_v10 = vpop.f32.mrb[32].mxu1 }
 0x71b   : > { %v14240_v9 = vadd.f32 %v8399_v62, %v7615_v4  ;;  %v14248_v11 = vadd.f32 %v8505_v10, %v7623_v58  ;;  %v8401_v13 = vpop.f32.mrb[33].mxu0  ;;  %v8507_v63 = vpop.f32.mrb[33].mxu1 }
 0x71c   : > { %v14241_v18 = vadd.f32 %v8401_v13, %v7619_v5  ;;  %v14249_v19 = vadd.f32 %v8507_v63, %v7627_v32  ;;  %v8403_v21 = vpop.f32.mrb[34].mxu0  ;;  %v8509_v22 = vpop.f32.mrb[34].mxu1  ;;  %v16627_v63 = vmov 1.0  }
 0x71d   : > { %v8524_v15 = vmax.f32 %v14240_v9, 0.0  ;;  %v8526_v23 = vmax.f32 %v14248_v11, 0.0  ;;  %v14242_v24 = vadd.f32 %v8403_v21, %v7615_v4  ;;  %v14250_v25 = vadd.f32 %v8509_v22, %v7623_v58  ;;  %v8405_v28 = vpop.f32.mrb[35].mxu0  ;;  %v8511_v29 = vpop.f32.mrb[35].mxu1 }
 0x71e   : > { %v8525_v51 = vmax.f32 %v14241_v18, 0.0  ;;  %v8527_v34 = vmax.f32 %v14249_v19, 0.0  ;;  %v14243_v17 = vadd.f32 %v8405_v28, %v7619_v5  ;;  %v14251_v35 = vadd.f32 %v8511_v29, %v7627_v32 }
 0x71f   : > { %v8528_v36 = vmax.f32 %v14242_v24, 0.0  ;;  %v8530_v39 = vmax.f32 %v14250_v25, 0.0 }
 0x720   : > { %v19791_v55 = vpack.c.bf16 %v8525_v51, %v8524_v15  ;;  %v19793_v56 = vpack.c.bf16 %v8527_v34, %v8526_v23  ;;  %v8529_v37 = vmax.f32 %v14243_v17, 0.0  ;;  %v8531_v16 = vmax.f32 %v14251_v35, 0.0 }
 0x721   : > { %v16559_v2 = vpack.c.bf16 %v8528_v36, %v8524_v15  ;;  %v16560_v3 = vpack.c.bf16 %v8530_v39, %v8526_v23 }
 0x722   : > { %8588 = vst [vmem:[#allocation2] sm:$0xff] %v19791_v55  ;;  %8589 = vst [vmem:[#allocation2 + $0x8] sm:$0xff] %v19793_v56  ;;  %v19797_v48 = vpack.c.bf16 %v8529_v37, %v8528_v36  ;;  %v19799_v53 = vpack.c.bf16 %v8531_v16, %v8530_v39  ;;  %v8409_v14 = vpop.f32.mrb[36].mxu0  ;;  %v8515_v0 = vpop.f32.mrb[36].mxu1  ;;  %v16557_v43 = vpack.c.bf16 %v8529_v37, %v8525_v51  ;;  %v8604_v15 = vunpack.c.l.bf16 %v19791_v55 }
 0x723   : > { %v14244_v46 = vadd.f32 %v8409_v14, %v7615_v4  ;;  %v14252_v30 = vadd.f32 %v8515_v0, %v7623_v58  ;;  %v8411_v31 = vpop.f32.mrb[37].mxu0  ;;  %v8517_v57 = vpop.f32.mrb[37].mxu1  ;;  %v16558_v44 = vpack.c.bf16 %v8531_v16, %v8527_v34  ;;  %v8606_v51 = vunpack.c.l.bf16 %v19793_v56 }
 0x724   : > { %v14245_v38 = vadd.f32 %v8411_v31, %v7619_v5  ;;  %v14253_v47 = vadd.f32 %v8517_v57, %v7627_v32  ;;  %v8413_v49 = vpop.f32.mrb[38].mxu0  ;;  %v8519_v27 = vpop.f32.mrb[38].mxu1  ;;  %14209 = vmatprep.subr.bf16.mxu0 %v16557_v43  ;;  %v8608_v28 = vunpack.c.l.bf16 %v19797_v48  ;;  %v8605_v36 = vunpack.c.h.bf16 %v19791_v55 }
 0x725   : > { %v8532_v50 = vmax.f32 %v14244_v46, 0.0  ;;  %v8534_v12 = vmax.f32 %v14252_v30, 0.0  ;;  %v14246_v33 = vadd.f32 %v8413_v49, %v7615_v4  ;;  %v14254_v45 = vadd.f32 %v8519_v27, %v7623_v58  ;;  %v8415_v26 = vpop.f32.mrb[39].mxu0  ;;  %v8521_v60 = vpop.f32.mrb[39].mxu1  ;;  %14213 = vmatprep.subr.bf16.mxu1 %v16558_v44  ;;  %14211 = vmatpush1.bf16.msra.mxu0 %v16559_v2  ;;  %v15921_v2 = vld [vmem:[%s21179_s7 + $0x4] ss:$16 sps:$4 sm:$0xff]  }
 0x726   : > { %v8533_v42 = vmax.f32 %v14245_v38, 0.0  ;;  %v8535_v6 = vmax.f32 %v14253_v47, 0.0  ;;  %v14247_v20 = vadd.f32 %v8415_v26, %v7619_v5  ;;  %v14255_v8 = vadd.f32 %v8521_v60, %v7627_v32  ;;  %14215 = vmatpush1.bf16.msra.mxu1 %v16560_v3 }
 0x727   : > { %v8536_v54 = vmax.f32 %v14246_v33, 0.0  ;;  %v8538_v1 = vmax.f32 %v14254_v45, 0.0  ;;  %v8609_v14 = vunpack.c.h.bf16 %v19797_v48  ;;  %v8607_v30 = vunpack.c.h.bf16 %v19793_v56 }
 0x728   : > { %v19801_v7 = vpack.c.bf16 %v8533_v42, %v8532_v50  ;;  %v19803_v62 = vpack.c.bf16 %v8535_v6, %v8534_v12  ;;  %v8537_v10 = vmax.f32 %v14247_v20, 0.0  ;;  %v8539_v9 = vmax.f32 %v14255_v8, 0.0 }
 0x729   : > { %v8611_v31 = vunpack.c.h.bf16 %v19799_v53 }
 0x72a   : > { %8592 = vst [vmem:[#allocation2 + $0x20] sm:$0xff] %v19801_v7  ;;  %8593 = vst [vmem:[#allocation2 + $0x28] sm:$0xff] %v19803_v62  ;;  %v14162_v4 = vpack.c.bf16 %v8537_v10, %v8536_v54  ;;  %v14163_v58 = vpack.c.bf16 %v8539_v9, %v8538_v1  ;;  %v8612_v5 = vunpack.c.l.bf16 %v19801_v7  ;;  %v8613_v32 = vunpack.c.h.bf16 %v19801_v7  ;;  %v15919_v7 = vld [vmem:[%s21179_s7] ss:$16 sps:$4 sm:$0xff]   ;;  %v15922_v10 = vld [vmem:[%s21179_s7 + $0x8] ss:$16 sps:$4 sm:$0xff]  }
 0x72b   : > { %v8614_v11 = vunpack.c.l.bf16 %v19803_v62  ;;  %v8615_v13 = vunpack.c.h.bf16 %v19803_v62  ;;  %v15924_v62 = vld [vmem:[%s21179_s7 + $0xc] ss:$16 sps:$4 sm:$0xff]   ;;  %v15927_v9 = vld [vmem:[%s21179_s7 + $0x24] ss:$16 sps:$4 sm:$0xff]  }
 0x72c   : > { %8594 = vst [vmem:[#allocation2 + $0x30] sm:$0xff] %v14162_v4  ;;  %8595 = vst [vmem:[#allocation2 + $0x38] sm:$0xff] %v14163_v58  ;;  %8661 = vmatprep.subr.mxu0 %v8613_v32  ;;  %v15930_v58 = vld [vmem:[%s21179_s7 + $0x2c] ss:$16 sps:$4 sm:$0xff]  }
 0x72d   : > { %8732 = vmatprep.subr.mxu1 %v8615_v13  ;;  %8662 = vmatpush1.msra.mxu0 %v8612_v5 }
 0x72e   : > { %8733 = vmatpush1.msra.mxu1 %v8614_v11  ;;  %13700 = vmatmul.mubr.msk.f32.vlgmr.msra.gmra.mrb[40].mxu0 %vm8653_vm2, %v16627_v63 }
 0x72f   : > { %13701 = vmatmul.mubr.msk.f32.vlgmr.msra.gmra.mrb[40].mxu1 %vm8653_vm2, %v16627_v63  ;;  %8931 = vmatprep.mubr.f32.mxu0 %v16626_v52 }
 0x730   : > { %9002 = vmatprep.mubr.f32.mxu1 %v16626_v52  ;;  %v8610_v52 = vunpack.c.l.bf16 %v19799_v53 }
 0x801   : > { %v8723_v18 = vpop.f32.mrb[40].mxu0 }
 0x802   : > { %v19817_v19 = vmul.f32 0.041666668, %v8723_v18  ;;  %v8794_v21 = vpop.f32.mrb[40].mxu1  ;;  %v8725_v22 = vpop.f32.mrb[41].mxu0  ;;  %v15934_v18 = vld [vmem:[%s21179_s7 + $0x48] ss:$16 sps:$4 sm:$0xff]  }
 0x803   : > { %v19820_v23 = vmul.f32 0.041666668, %v8794_v21  ;;  %v8800_v24 = vmul.f32 0.041666668, %v8725_v22  ;;  %v8796_v25 = vpop.f32.mrb[41].mxu1 }
 0x804   : > { %v8806_v29 = vrot.slane %v19817_v19, %v17061_v40  ;;  %v19826_v34 = vmul.f32 0.041666668, %v8796_v25  ;;  %v15939_v21 = vld [vmem:[%s21179_s7 + $0x64] ss:$16 sps:$4 sm:$0xff]   ;;  %v15942_v22 = vld [vmem:[%s21179_s7 + $0x6c] ss:$16 sps:$4 sm:$0xff]  }
 0x805   : > { %v8814_v17 = vrot.slane %v19820_v23, %v17061_v40  ;;  %v8810_v35 = vrot.slane %v8800_v24, %v17061_v40  ;;  %v9014_v4 = vpack.c.bf16 %v8800_v24, %v8800_v24  ;;  %v15940_v24 = vld [vmem:[%s21179_s7 + $0x68] ss:$16 sps:$4 sm:$0xff]   ;;  %v15945_v25 = vld [vmem:[%s21179_s7 + $0x84] ss:$16 sps:$4 sm:$0xff]  }
 0x806   : > { %v8819_v39 = vsub.f32 %v8604_v15, %v8806_v29  ;;  %v8823_v37 = vsub.f32 %v8608_v28, %v8806_v29  ;;  %v8818_v16 = vrot.slane %v19826_v34, %v17061_v40  ;;  %v8827_v56 = vsub.f32 %v8612_v5, %v8806_v29  ;;  %v15925_v5 = vld [vmem:[%s21179_s7 + $0x20] ss:$16 sps:$4 sm:$0xff]   ;;  %v15948_v28 = vld [vmem:[%s21179_s7 + $0x8c] ss:$16 sps:$4 sm:$0xff]  }
 0x807   : > { %v8821_v0 = vsub.f32 %v8606_v51, %v8814_v17  ;;  %v8825_v46 = vsub.f32 %v8610_v52, %v8814_v17  ;;  %v8820_v47 = vsub.f32 %v8605_v36, %v8810_v35  ;;  %v8824_v49 = vsub.f32 %v8609_v14, %v8810_v35  ;;  %v15937_v15 = vld [vmem:[%s21179_s7 + $0x60] ss:$16 sps:$4 sm:$0xff]   ;;  %v15946_v51 = vld [vmem:[%s21179_s7 + $0x88] ss:$16 sps:$4 sm:$0xff]   ;;  %v15951_v52 = vld [vmem:[%s21179_s7 + $0xa4] ss:$16 sps:$4 sm:$0xff]  }
 0x808   : > { %v8851_v57 = vmul.f32 %v8819_v39, %v8819_v39  ;;  %v8855_v38 = vmul.f32 %v8823_v37, %v8823_v37  ;;  %v8822_v55 = vsub.f32 %v8607_v30, %v8818_v16  ;;  %v8826_v44 = vsub.f32 %v8611_v31, %v8818_v16  ;;  %v15943_v29 = vld [vmem:[%s21179_s7 + $0x80] ss:$16 sps:$4 sm:$0xff]   ;;  %v15952_v36 = vld [vmem:[%s21179_s7 + $0xa8] ss:$16 sps:$4 sm:$0xff]   ;;  %v15957_v39 = vld [vmem:[%s21179_s7 + $0xc4] ss:$16 sps:$4 sm:$0xff]  }
 0x809   : > { %v8853_v27 = vmul.f32 %v8821_v0, %v8821_v0  ;;  %v8857_v43 = vmul.f32 %v8825_v46, %v8825_v46  ;;  %v8852_v50 = vmul.f32 %v8820_v47, %v8820_v47  ;;  %v8856_v12 = vmul.f32 %v8824_v49, %v8824_v49  ;;  %v15960_v37 = vld [vmem:[%s21179_s7 + $0xcc] ss:$16 sps:$4 sm:$0xff]   ;;  %v15958_v14 = vld [vmem:[%s21179_s7 + $0xc8] ss:$16 sps:$4 sm:$0xff]   ;;  %v15963_v0 = vld [vmem:[%s21179_s7 + $0xe4] ss:$16 sps:$4 sm:$0xff]  }
 0x80a   : > { %v14218_v33 = vpack.c.bf16 %v8855_v38, %v8851_v57  ;;  %v8828_v45 = vsub.f32 %v8613_v32, %v8810_v35  ;;  %v8854_v26 = vmul.f32 %v8822_v55, %v8822_v55  ;;  %v8858_v48 = vmul.f32 %v8826_v44, %v8826_v44  ;;  %v15928_v32 = vld [vmem:[%s21179_s7 + $0x28] ss:$16 sps:$4 sm:$0xff]   ;;  %v15949_v35 = vld [vmem:[%s21179_s7 + $0xa0] ss:$16 sps:$4 sm:$0xff]   ;;  %v15966_v46 = vld [vmem:[%s21179_s7 + $0xec] ss:$16 sps:$4 sm:$0xff]  }
 0x80b   : > { %v14222_v60 = vpack.c.bf16 %v8857_v43, %v8853_v27  ;;  %v8830_v42 = vsub.f32 %v8615_v13, %v8818_v16  ;;  %v14216_v6 = vpack.c.bf16 %v8856_v12, %v8852_v50  ;;  %v8829_v53 = vsub.f32 %v8614_v11, %v8814_v17  ;;  %v15933_v11 = vld [vmem:[%s21179_s7 + $0x44] ss:$16 sps:$4 sm:$0xff]   ;;  %v15936_v13 = vld [vmem:[%s21179_s7 + $0x4c] ss:$16 sps:$4 sm:$0xff]   ;;  %v15955_v16 = vld [vmem:[%s21179_s7 + $0xc0] ss:$16 sps:$4 sm:$0xff]  }
 0x80c   : > { %v14220_v20 = vpack.c.bf16 %v8858_v48, %v8854_v26  ;;  %v8860_v8 = vmul.f32 %v8828_v45, %v8828_v45  ;;  %v8859_v1 = vmul.f32 %v8827_v56, %v8827_v56  ;;  %v15954_v17 = vld [vmem:[%s21179_s7 + $0xac] ss:$16 sps:$4 sm:$0xff]   ;;  %v15961_v30 = vld [vmem:[%s21179_s7 + $0xe0] ss:$16 sps:$4 sm:$0xff]   ;;  %v15964_v31 = vld [vmem:[%s21179_s7 + $0xe8] ss:$16 sps:$4 sm:$0xff]  }
 0x80d   : > { %14217 = vmatprep.subr.bf16.mxu0 %v14216_v6  ;;  %v8862_v54 = vmul.f32 %v8830_v42, %v8830_v42  ;;  %v8861_v3 = vmul.f32 %v8829_v53, %v8829_v53  ;;  %v15969_v57 = vld [vmem:[%s21179_s7 + $0x104] ss:$16 sps:$4 sm:$0xff]   ;;  %v15972_v38 = vld [vmem:[%s21179_s7 + $0x10c] ss:$16 sps:$4 sm:$0xff]   ;;  %v15967_v47 = vld [vmem:[%s21179_s7 + $0x100] ss:$16 sps:$4 sm:$0xff]  }
 0x80e   : > { %14221 = vmatprep.subr.bf16.mxu1 %v14220_v20  ;;  %14219 = vmatpush1.bf16.msra.mxu0 %v14218_v33  ;;  %v15970_v49 = vld [vmem:[%s21179_s7 + $0x108] ss:$16 sps:$4 sm:$0xff]   ;;  %v15975_v27 = vld [vmem:[%s21179_s7 + $0x124] ss:$16 sps:$4 sm:$0xff]   ;;  %v15978_v43 = vld [vmem:[%s21179_s7 + $0x12c] ss:$16 sps:$4 sm:$0xff]  }
 0x80f   : > { %14223 = vmatpush1.bf16.msra.mxu1 %v14222_v60  ;;  %8871 = vmatprep.subr.mxu0 %v8860_v8  ;;  %v15973_v55 = vld [vmem:[%s21179_s7 + $0x120] ss:$16 sps:$4 sm:$0xff]   ;;  %v15976_v44 = vld [vmem:[%s21179_s7 + $0x128] ss:$16 sps:$4 sm:$0xff]   ;;  %v15981_v50 = vld [vmem:[%s21179_s7 + $0x144] ss:$16 sps:$4 sm:$0xff]  }
 0x810   : > { %8942 = vmatprep.subr.mxu1 %v8862_v54  ;;  %v15984_v12 = vld [vmem:[%s21179_s7 + $0x14c] ss:$16 sps:$4 sm:$0xff]   ;;  %v15979_v33 = vld [vmem:[%s21179_s7 + $0x140] ss:$16 sps:$4 sm:$0xff]   ;;  %v15982_v45 = vld [vmem:[%s21179_s7 + $0x148] ss:$16 sps:$4 sm:$0xff]  }
 0x811   : > { %v15987_v26 = vld [vmem:[%s21179_s7 + $0x164] ss:$16 sps:$4 sm:$0xff]   ;;  %v15990_v48 = vld [vmem:[%s21179_s7 + $0x16c] ss:$16 sps:$4 sm:$0xff]   ;;  %v15985_v60 = vld [vmem:[%s21179_s7 + $0x160] ss:$16 sps:$4 sm:$0xff]  }
 0x812   : > { %8872 = vmatpush1.msra.mxu0 %v8859_v1  ;;  %v15988_v42 = vld [vmem:[%s21179_s7 + $0x168] ss:$16 sps:$4 sm:$0xff]   ;;  %v15993_v6 = vld [vmem:[%s21179_s7 + $0x184] ss:$16 sps:$4 sm:$0xff]   ;;  %v15996_v56 = vld [vmem:[%s21179_s7 + $0x18c] ss:$16 sps:$4 sm:$0xff]  }
 0x813   : > { %8943 = vmatpush1.msra.mxu1 %v8861_v3  ;;  %13702 = vmatmul.mubr.msk.f32.vlgmr.msra.gmra.mrb[42].mxu0 %vm8653_vm2, %v16627_v63  ;;  %v15991_v20 = vld [vmem:[%s21179_s7 + $0x180] ss:$16 sps:$4 sm:$0xff]   ;;  %v15994_v53 = vld [vmem:[%s21179_s7 + $0x188] ss:$16 sps:$4 sm:$0xff]   ;;  %v15999_v8 = vld [vmem:[%s21179_s7 + $0x1a4] ss:$16 sps:$4 sm:$0xff]  }
 0x814   : > { %13703 = vmatmul.mubr.msk.f32.vlgmr.msra.gmra.mrb[42].mxu1 %vm8653_vm2, %v16627_v63  ;;  %10579 = vmatprep.subr.bf16.mxu0 %v15921_v2  ;;  %v15931_v63 = vld [vmem:[%s21179_s7 + $0x40] ss:$16 sps:$4 sm:$0xff]   ;;  %v16002_v54 = vld [vmem:[%s21179_s7 + $0x1ac] ss:$16 sps:$4 sm:$0xff]   ;;  %v16000_v2 = vld [vmem:[%s21179_s7 + $0x1a8] ss:$16 sps:$4 sm:$0xff]  }
 0x815   : > { %10743 = vmatprep.subr.bf16.mxu1 %v15924_v62  ;;  %10580 = vmatpush1.bf16.msra.mxu0 %v15919_v7  ;;  %v15997_v1 = vld [vmem:[%s21179_s7 + $0x1a0] ss:$16 sps:$4 sm:$0xff]   ;;  %v16005_v3 = vld [vmem:[%s21179_s7 + $0x1c4] ss:$16 sps:$4 sm:$0xff]   ;;  %v16008_v7 = vld [vmem:[%s21179_s7 + $0x1cc] ss:$16 sps:$4 sm:$0xff]  }
 0x816   : > { %10611 = vmatprep.mubr.bf16.mxu0 %v9014_v4  ;;  %10744 = vmatpush1.bf16.msra.mxu1 %v15922_v10  ;;  %v16003_v62 = vld [vmem:[%s21179_s7 + $0x1c0] ss:$16 sps:$4 sm:$0xff]   ;;  %v16006_v10 = vld [vmem:[%s21179_s7 + $0x1c8] ss:$16 sps:$4 sm:$0xff]  }
 0x817   : > { %10775 = vmatprep.mubr.bf16.mxu1 %v9014_v4  ;;  %10581 = vmatprep.subr.bf16.mxu0 %v15927_v9  ;;  %v16011_v9 = vld [vmem:[%s21179_s7 + $0x1e4] ss:$16 sps:$4 sm:$0xff]   ;;  %v16014_v4 = vld [vmem:[%s21179_s7 + $0x1ec] ss:$16 sps:$4 sm:$0xff]  }
 0x818   : > { %10745 = vmatprep.subr.bf16.mxu1 %v15930_v58  ;;  %v16009_v58 = vld [vmem:[%s21179_s7 + $0x1e0] ss:$16 sps:$4 sm:$0xff]  }
 0x819   : > { %10582 = vmatpush1.bf16.msra.mxu0 %v15925_v5  ;;  %v16012_v5 = vld [vmem:[%s21179_s7 + $0x1e8] ss:$16 sps:$4 sm:$0xff]  }
 0x81a   : > { %10746 = vmatpush1.bf16.msra.mxu1 %v15928_v32  ;;  %10583 = vmatprep.subr.bf16.mxu0 %v15933_v11  ;;  %v16017_v32 = vld [vmem:[%s21179_s7 + $0x204] ss:$16 sps:$4 sm:$0xff]   ;;  %v16020_v11 = vld [vmem:[%s21179_s7 + $0x20c] ss:$16 sps:$4 sm:$0xff]  }
 0x81b   : > { %10747 = vmatprep.subr.bf16.mxu1 %v15936_v13  ;;  %v16015_v13 = vld [vmem:[%s21179_s7 + $0x200] ss:$16 sps:$4 sm:$0xff]  }
 0x81d   : > { %10584 = vmatpush1.bf16.msra.mxu0 %v15931_v63  ;;  %v9013_v63 = vpack.c.bf16 %v19817_v19, %v19817_v19  ;;  %v16021_v19 = vld [vmem:[%s21179_s7 + $0x220] ss:$16 sps:$4 sm:$0xff]  }
 0x81e   : > { %10748 = vmatpush1.bf16.msra.mxu1 %v15934_v18  ;;  %10585 = vmatprep.subr.bf16.mxu0 %v15939_v21  ;;  %v16018_v18 = vld [vmem:[%s21179_s7 + $0x208] ss:$16 sps:$4 sm:$0xff]   ;;  %v16023_v21 = vld [vmem:[%s21179_s7 + $0x224] ss:$16 sps:$4 sm:$0xff]  }
 0x81f   : > { %10749 = vmatprep.subr.bf16.mxu1 %v15942_v22  ;;  %v9016_v22 = vpack.c.bf16 %v19826_v34, %v19826_v34  ;;  %v16029_v34 = vld [vmem:[%s21179_s7 + $0x244] ss:$16 sps:$4 sm:$0xff]  }
 0x821   : > { %10586 = vmatpush1.bf16.msra.mxu0 %v15937_v15  ;;  %v16026_v15 = vld [vmem:[%s21179_s7 + $0x22c] ss:$16 sps:$4 sm:$0xff]  }
 0x822   : > { %10750 = vmatpush1.bf16.msra.mxu1 %v15940_v24  ;;  %10587 = vmatprep.subr.bf16.mxu0 %v15945_v25  ;;  %v16024_v24 = vld [vmem:[%s21179_s7 + $0x228] ss:$16 sps:$4 sm:$0xff]   ;;  %v16032_v25 = vld [vmem:[%s21179_s7 + $0x24c] ss:$16 sps:$4 sm:$0xff]  }
 0x823   : > { %10751 = vmatprep.subr.bf16.mxu1 %v15948_v28  ;;  %v16027_v28 = vld [vmem:[%s21179_s7 + $0x240] ss:$16 sps:$4 sm:$0xff]  }
 0x825   : > { %10588 = vmatpush1.bf16.msra.mxu0 %v15943_v29  ;;  %v16030_v29 = vld [vmem:[%s21179_s7 + $0x248] ss:$16 sps:$4 sm:$0xff]  }
 0x826   : > { %10752 = vmatpush1.bf16.msra.mxu1 %v15946_v51  ;;  %10589 = vmatprep.subr.bf16.mxu0 %v15951_v52  ;;  %v16035_v51 = vld [vmem:[%s21179_s7 + $0x264] ss:$16 sps:$4 sm:$0xff]   ;;  %v16038_v52 = vld [vmem:[%s21179_s7 + $0x26c] ss:$16 sps:$4 sm:$0xff]  }
 0x827   : > { %10753 = vmatprep.subr.bf16.mxu1 %v15954_v17  ;;  %v16033_v17 = vld [vmem:[%s21179_s7 + $0x260] ss:$16 sps:$4 sm:$0xff]  }
 0x829   : > { %10590 = vmatpush1.bf16.msra.mxu0 %v15949_v35  ;;  %v16036_v35 = vld [vmem:[%s21179_s7 + $0x268] ss:$16 sps:$4 sm:$0xff]  }
 0x82a   : > { %10754 = vmatpush1.bf16.msra.mxu1 %v15952_v36  ;;  %10591 = vmatprep.subr.bf16.mxu0 %v15957_v39  ;;  %v16041_v36 = vld [vmem:[%s21179_s7 + $0x284] ss:$16 sps:$4 sm:$0xff]   ;;  %v16044_v39 = vld [vmem:[%s21179_s7 + $0x28c] ss:$16 sps:$4 sm:$0xff]  }
 0x82b   : > { %10755 = vmatprep.subr.bf16.mxu1 %v15960_v37  ;;  %v16039_v37 = vld [vmem:[%s21179_s7 + $0x280] ss:$16 sps:$4 sm:$0xff]  }
 0x82d   : > { %10592 = vmatpush1.bf16.msra.mxu0 %v15955_v16  ;;  %v16042_v16 = vld [vmem:[%s21179_s7 + $0x288] ss:$16 sps:$4 sm:$0xff]  }
 0x82e   : > { %10756 = vmatpush1.bf16.msra.mxu1 %v15958_v14  ;;  %10593 = vmatprep.subr.bf16.mxu0 %v15963_v0  ;;  %v16047_v14 = vld [vmem:[%s21179_s7 + $0x2a4] ss:$16 sps:$4 sm:$0xff]   ;;  %v16050_v0 = vld [vmem:[%s21179_s7 + $0x2ac] ss:$16 sps:$4 sm:$0xff]  }
 0x82f   : > { %10757 = vmatprep.subr.bf16.mxu1 %v15966_v46  ;;  %v16045_v46 = vld [vmem:[%s21179_s7 + $0x2a0] ss:$16 sps:$4 sm:$0xff]  }
 0x831   : > { %10594 = vmatpush1.bf16.msra.mxu0 %v15961_v30  ;;  %v16048_v30 = vld [vmem:[%s21179_s7 + $0x2a8] ss:$16 sps:$4 sm:$0xff]  }
 0x832   : > { %10758 = vmatpush1.bf16.msra.mxu1 %v15964_v31  ;;  %10595 = vmatprep.subr.bf16.mxu0 %v15969_v57  ;;  %v16053_v31 = vld [vmem:[%s21179_s7 + $0x2c4] ss:$16 sps:$4 sm:$0xff]   ;;  %v16056_v57 = vld [vmem:[%s21179_s7 + $0x2cc] ss:$16 sps:$4 sm:$0xff]  }
 0x833   : > { %10759 = vmatprep.subr.bf16.mxu1 %v15972_v38  ;;  %v16051_v38 = vld [vmem:[%s21179_s7 + $0x2c0] ss:$16 sps:$4 sm:$0xff]  }
 0x835   : > { %10596 = vmatpush1.bf16.msra.mxu0 %v15967_v47  ;;  %v16054_v47 = vld [vmem:[%s21179_s7 + $0x2c8] ss:$16 sps:$4 sm:$0xff]  }
 0x836   : > { %10760 = vmatpush1.bf16.msra.mxu1 %v15970_v49  ;;  %10597 = vmatprep.subr.bf16.mxu0 %v15975_v27  ;;  %v16059_v49 = vld [vmem:[%s21179_s7 + $0x2e4] ss:$16 sps:$4 sm:$0xff]   ;;  %v16062_v27 = vld [vmem:[%s21179_s7 + $0x2ec] ss:$16 sps:$4 sm:$0xff]  }
 0x837   : > { %10761 = vmatprep.subr.bf16.mxu1 %v15978_v43  ;;  %v16057_v43 = vld [vmem:[%s21179_s7 + $0x2e0] ss:$16 sps:$4 sm:$0xff]  }
 0x839   : > { %10598 = vmatpush1.bf16.msra.mxu0 %v15973_v55  ;;  %v16060_v55 = vld [vmem:[%s21179_s7 + $0x2e8] ss:$16 sps:$4 sm:$0xff]  }
 0x83a   : > { %10762 = vmatpush1.bf16.msra.mxu1 %v15976_v44  ;;  %10599 = vmatprep.subr.bf16.mxu0 %v15981_v50  ;;  %v16065_v44 = vld [vmem:[%s21179_s7 + $0x304] ss:$16 sps:$4 sm:$0xff]   ;;  %v16068_v50 = vld [vmem:[%s21179_s7 + $0x30c] ss:$16 sps:$4 sm:$0xff]  }
 0x83b   : > { %10763 = vmatprep.subr.bf16.mxu1 %v15984_v12  ;;  %v16063_v12 = vld [vmem:[%s21179_s7 + $0x300] ss:$16 sps:$4 sm:$0xff]  }
 0x83d   : > { %10600 = vmatpush1.bf16.msra.mxu0 %v15979_v33  ;;  %v16066_v33 = vld [vmem:[%s21179_s7 + $0x308] ss:$16 sps:$4 sm:$0xff]  }
 0x83e   : > { %10764 = vmatpush1.bf16.msra.mxu1 %v15982_v45  ;;  %10601 = vmatprep.subr.bf16.mxu0 %v15987_v26  ;;  %v16071_v45 = vld [vmem:[%s21179_s7 + $0x324] ss:$16 sps:$4 sm:$0xff]   ;;  %v16074_v26 = vld [vmem:[%s21179_s7 + $0x32c] ss:$16 sps:$4 sm:$0xff]  }
 0x83f   : > { %10765 = vmatprep.subr.bf16.mxu1 %v15990_v48  ;;  %v16069_v48 = vld [vmem:[%s21179_s7 + $0x320] ss:$16 sps:$4 sm:$0xff]  }
 0x841   : > { %10602 = vmatpush1.bf16.msra.mxu0 %v15985_v60  ;;  %v16072_v60 = vld [vmem:[%s21179_s7 + $0x328] ss:$16 sps:$4 sm:$0xff]  }
 0x842   : > { %10766 = vmatpush1.bf16.msra.mxu1 %v15988_v42  ;;  %10603 = vmatprep.subr.bf16.mxu0 %v15993_v6  ;;  %v16077_v42 = vld [vmem:[%s21179_s7 + $0x344] ss:$16 sps:$4 sm:$0xff]   ;;  %v16080_v6 = vld [vmem:[%s21179_s7 + $0x34c] ss:$16 sps:$4 sm:$0xff]  }
 0x843   : > { %10767 = vmatprep.subr.bf16.mxu1 %v15996_v56  ;;  %v16075_v56 = vld [vmem:[%s21179_s7 + $0x340] ss:$16 sps:$4 sm:$0xff]  }
 0x845   : > { %10604 = vmatpush1.bf16.msra.mxu0 %v15991_v20  ;;  %v16078_v20 = vld [vmem:[%s21179_s7 + $0x348] ss:$16 sps:$4 sm:$0xff]  }
 0x846   : > { %10768 = vmatpush1.bf16.msra.mxu1 %v15994_v53  ;;  %10605 = vmatprep.subr.bf16.mxu0 %v15999_v8  ;;  %v16083_v53 = vld [vmem:[%s21179_s7 + $0x364] ss:$16 sps:$4 sm:$0xff]   ;;  %v16086_v8 = vld [vmem:[%s21179_s7 + $0x36c] ss:$16 sps:$4 sm:$0xff]  }
 0x847   : > { %10769 = vmatprep.subr.bf16.mxu1 %v16002_v54  ;;  %v16081_v54 = vld [vmem:[%s21179_s7 + $0x360] ss:$16 sps:$4 sm:$0xff]  }
 0x849   : > { %10606 = vmatpush1.bf16.msra.mxu0 %v15997_v1  ;;  %v16084_v1 = vld [vmem:[%s21179_s7 + $0x368] ss:$16 sps:$4 sm:$0xff]  }
 0x84a   : > { %10770 = vmatpush1.bf16.msra.mxu1 %v16000_v2  ;;  %10607 = vmatprep.subr.bf16.mxu0 %v16005_v3  ;;  %v16089_v2 = vld [vmem:[%s21179_s7 + $0x384] ss:$16 sps:$4 sm:$0xff]   ;;  %v16092_v3 = vld [vmem:[%s21179_s7 + $0x38c] ss:$16 sps:$4 sm:$0xff]  }
 0x84b   : > { %10771 = vmatprep.subr.bf16.mxu1 %v16008_v7  ;;  %v16087_v7 = vld [vmem:[%s21179_s7 + $0x380] ss:$16 sps:$4 sm:$0xff]  }
 0x84d   : > { %10608 = vmatpush1.bf16.msra.mxu0 %v16003_v62  ;;  %v16090_v62 = vld [vmem:[%s21179_s7 + $0x388] ss:$16 sps:$4 sm:$0xff]  }
 0x84e   : > { %10772 = vmatpush1.bf16.msra.mxu1 %v16006_v10  ;;  %10609 = vmatprep.subr.bf16.mxu0 %v16011_v9  ;;  %v16095_v10 = vld [vmem:[%s21179_s7 + $0x3a4] ss:$16 sps:$4 sm:$0xff]   ;;  %v16098_v9 = vld [vmem:[%s21179_s7 + $0x3ac] ss:$16 sps:$4 sm:$0xff]  }
 0x84f   : > { %10773 = vmatprep.subr.bf16.mxu1 %v16014_v4  ;;  %v16093_v4 = vld [vmem:[%s21179_s7 + $0x3a0] ss:$16 sps:$4 sm:$0xff]  }
 0x851   : > { %10610 = vmatpush1.bf16.msra.mxu0 %v16009_v58  ;;  %v16096_v58 = vld [vmem:[%s21179_s7 + $0x3a8] ss:$16 sps:$4 sm:$0xff]  }
 0x852   : > { %10774 = vmatpush1.bf16.msra.mxu1 %v16012_v5  ;;  %10620 = vmatprep.subr.bf16.mxu0 %v16017_v32  ;;  %v16101_v5 = vld [vmem:[%s21179_s7 + $0x3c4] ss:$16 sps:$4 sm:$0xff]   ;;  %v16104_v32 = vld [vmem:[%s21179_s7 + $0x3cc] ss:$16 sps:$4 sm:$0xff]  }
 0x853   : > { %10784 = vmatprep.subr.bf16.mxu1 %v16020_v11  ;;  %v16099_v11 = vld [vmem:[%s21179_s7 + $0x3c0] ss:$16 sps:$4 sm:$0xff]  }
 0x854   : > { %10612 = vmatmul.mubr.bf16.vlgmr.msra.gmra.mrb[44].mxu0 %v9013_v63 }
 0x855   : > { %10776 = vmatmul.mubr.bf16.vlgmr.msra.gmra.mrb[44].mxu1 %v9013_v63  ;;  %10621 = vmatpush1.bf16.msra.mxu0 %v16015_v13  ;;  %v16102_v13 = vld [vmem:[%s21179_s7 + $0x3c8] ss:$16 sps:$4 sm:$0xff]   ;;  %v16107_v63 = vld [vmem:[%s21179_s7 + $0x3e4] ss:$16 sps:$4 sm:$0xff]  }
 0x856   : > { %10652 = vmatprep.mubr.bf16.mxu0 %v9016_v22  ;;  %10785 = vmatpush1.bf16.msra.mxu1 %v16018_v18  ;;  %v16110_v18 = vld [vmem:[%s21179_s7 + $0x3ec] ss:$16 sps:$4 sm:$0xff]  }
 0x857   : > { %10816 = vmatprep.mubr.bf16.mxu1 %v9016_v22  ;;  %10622 = vmatprep.subr.bf16.mxu0 %v16023_v21  ;;  %v16105_v21 = vld [vmem:[%s21179_s7 + $0x3e0] ss:$16 sps:$4 sm:$0xff]   ;;  %v16108_v22 = vld [vmem:[%s21179_s7 + $0x3e8] ss:$16 sps:$4 sm:$0xff]  }
 0x858   : > { %10786 = vmatprep.subr.bf16.mxu1 %v16026_v15  ;;  %v16113_v15 = vld [vmem:[%s21179_s7 + $0x404] ss:$16 sps:$4 sm:$0xff]  }
 0x859   : > { %10623 = vmatpush1.bf16.msra.mxu0 %v16021_v19  ;;  %v16116_v19 = vld [vmem:[%s21179_s7 + $0x40c] ss:$16 sps:$4 sm:$0xff]  }
 0x85a   : > { %10787 = vmatpush1.bf16.msra.mxu1 %v16024_v24  ;;  %10624 = vmatprep.subr.bf16.mxu0 %v16029_v34  ;;  %v16111_v24 = vld [vmem:[%s21179_s7 + $0x400] ss:$16 sps:$4 sm:$0xff]   ;;  %v9015_v34 = vpack.c.bf16 %v19820_v23, %v19820_v23 }
 0x85b   : > { %10788 = vmatprep.subr.bf16.mxu1 %v16032_v25  ;;  %v16114_v25 = vld [vmem:[%s21179_s7 + $0x408] ss:$16 sps:$4 sm:$0xff]   ;;  %v16117_v23 = vld [vmem:[%s21179_s7 + $0x420] ss:$16 sps:$4 sm:$0xff]  }
 0x85d   : > { %10625 = vmatpush1.bf16.msra.mxu0 %v16027_v28  ;;  %v16119_v28 = vld [vmem:[%s21179_s7 + $0x424] ss:$16 sps:$4 sm:$0xff]  }
 0x85e   : > { %10789 = vmatpush1.bf16.msra.mxu1 %v16030_v29  ;;  %10626 = vmatprep.subr.bf16.mxu0 %v16035_v51  ;;  %v16122_v29 = vld [vmem:[%s21179_s7 + $0x42c] ss:$16 sps:$4 sm:$0xff]   ;;  %v16120_v51 = vld [vmem:[%s21179_s7 + $0x428] ss:$16 sps:$4 sm:$0xff]  }
 0x85f   : > { %10790 = vmatprep.subr.bf16.mxu1 %v16038_v52  ;;  %v16125_v52 = vld [vmem:[%s21179_s7 + $0x444] ss:$16 sps:$4 sm:$0xff]  }
 0x861   : > { %10627 = vmatpush1.bf16.msra.mxu0 %v16033_v17  ;;  %v16128_v17 = vld [vmem:[%s21179_s7 + $0x44c] ss:$16 sps:$4 sm:$0xff]  }
 0x862   : > { %10791 = vmatpush1.bf16.msra.mxu1 %v16036_v35  ;;  %10628 = vmatprep.subr.bf16.mxu0 %v16041_v36  ;;  %v16123_v35 = vld [vmem:[%s21179_s7 + $0x440] ss:$16 sps:$4 sm:$0xff]   ;;  %v16126_v36 = vld [vmem:[%s21179_s7 + $0x448] ss:$16 sps:$4 sm:$0xff]  }
 0x863   : > { %10792 = vmatprep.subr.bf16.mxu1 %v16044_v39  ;;  %v16131_v39 = vld [vmem:[%s21179_s7 + $0x464] ss:$16 sps:$4 sm:$0xff]  }
 0x865   : > { %10629 = vmatpush1.bf16.msra.mxu0 %v16039_v37  ;;  %v16134_v37 = vld [vmem:[%s21179_s7 + $0x46c] ss:$16 sps:$4 sm:$0xff]  }
 0x866   : > { %10793 = vmatpush1.bf16.msra.mxu1 %v16042_v16  ;;  %10630 = vmatprep.subr.bf16.mxu0 %v16047_v14  ;;  %v16129_v16 = vld [vmem:[%s21179_s7 + $0x460] ss:$16 sps:$4 sm:$0xff]   ;;  %v16132_v14 = vld [vmem:[%s21179_s7 + $0x468] ss:$16 sps:$4 sm:$0xff]  }
 0x867   : > { %10794 = vmatprep.subr.bf16.mxu1 %v16050_v0  ;;  %v16137_v0 = vld [vmem:[%s21179_s7 + $0x484] ss:$16 sps:$4 sm:$0xff]  }
 0x869   : > { %10631 = vmatpush1.bf16.msra.mxu0 %v16045_v46  ;;  %v16140_v46 = vld [vmem:[%s21179_s7 + $0x48c] ss:$16 sps:$4 sm:$0xff]  }
 0x86a   : > { %10795 = vmatpush1.bf16.msra.mxu1 %v16048_v30  ;;  %10632 = vmatprep.subr.bf16.mxu0 %v16053_v31  ;;  %v16135_v30 = vld [vmem:[%s21179_s7 + $0x480] ss:$16 sps:$4 sm:$0xff]   ;;  %v16138_v31 = vld [vmem:[%s21179_s7 + $0x488] ss:$16 sps:$4 sm:$0xff]  }
 0x86b   : > { %10796 = vmatprep.subr.bf16.mxu1 %v16056_v57  ;;  %v16143_v57 = vld [vmem:[%s21179_s7 + $0x4a4] ss:$16 sps:$4 sm:$0xff]  }
 0x86d   : > { %10633 = vmatpush1.bf16.msra.mxu0 %v16051_v38  ;;  %v16146_v38 = vld [vmem:[%s21179_s7 + $0x4ac] ss:$16 sps:$4 sm:$0xff]  }
 0x86e   : > { %10797 = vmatpush1.bf16.msra.mxu1 %v16054_v47  ;;  %10634 = vmatprep.subr.bf16.mxu0 %v16059_v49  ;;  %v16141_v47 = vld [vmem:[%s21179_s7 + $0x4a0] ss:$16 sps:$4 sm:$0xff]   ;;  %v16144_v49 = vld [vmem:[%s21179_s7 + $0x4a8] ss:$16 sps:$4 sm:$0xff]  }
 0x86f   : > { %10798 = vmatprep.subr.bf16.mxu1 %v16062_v27  ;;  %v16149_v27 = vld [vmem:[%s21179_s7 + $0x4c4] ss:$16 sps:$4 sm:$0xff]  }
 0x871   : > { %10635 = vmatpush1.bf16.msra.mxu0 %v16057_v43  ;;  %v16152_v43 = vld [vmem:[%s21179_s7 + $0x4cc] ss:$16 sps:$4 sm:$0xff]  }
 0x872   : > { %10799 = vmatpush1.bf16.msra.mxu1 %v16060_v55  ;;  %10636 = vmatprep.subr.bf16.mxu0 %v16065_v44  ;;  %v16147_v55 = vld [vmem:[%s21179_s7 + $0x4c0] ss:$16 sps:$4 sm:$0xff]   ;;  %v16150_v44 = vld [vmem:[%s21179_s7 + $0x4c8] ss:$16 sps:$4 sm:$0xff]  }
 0x873   : > { %10800 = vmatprep.subr.bf16.mxu1 %v16068_v50  ;;  %v16155_v50 = vld [vmem:[%s21179_s7 + $0x4e4] ss:$16 sps:$4 sm:$0xff]  }
 0x875   : > { %10637 = vmatpush1.bf16.msra.mxu0 %v16063_v12  ;;  %v16158_v12 = vld [vmem:[%s21179_s7 + $0x4ec] ss:$16 sps:$4 sm:$0xff]  }
 0x876   : > { %10801 = vmatpush1.bf16.msra.mxu1 %v16066_v33  ;;  %10638 = vmatprep.subr.bf16.mxu0 %v16071_v45  ;;  %v16153_v33 = vld [vmem:[%s21179_s7 + $0x4e0] ss:$16 sps:$4 sm:$0xff]   ;;  %v16156_v45 = vld [vmem:[%s21179_s7 + $0x4e8] ss:$16 sps:$4 sm:$0xff]  }
 0x877   : > { %10802 = vmatprep.subr.bf16.mxu1 %v16074_v26  ;;  %v16161_v26 = vld [vmem:[%s21179_s7 + $0x504] ss:$16 sps:$4 sm:$0xff]  }
 0x879   : > { %10639 = vmatpush1.bf16.msra.mxu0 %v16069_v48  ;;  %v16164_v48 = vld [vmem:[%s21179_s7 + $0x50c] ss:$16 sps:$4 sm:$0xff]  }
 0x87a   : > { %10803 = vmatpush1.bf16.msra.mxu1 %v16072_v60  ;;  %10640 = vmatprep.subr.bf16.mxu0 %v16077_v42  ;;  %v16159_v60 = vld [vmem:[%s21179_s7 + $0x500] ss:$16 sps:$4 sm:$0xff]   ;;  %v16162_v42 = vld [vmem:[%s21179_s7 + $0x508] ss:$16 sps:$4 sm:$0xff]  }
 0x87b   : > { %10804 = vmatprep.subr.bf16.mxu1 %v16080_v6  ;;  %v16167_v6 = vld [vmem:[%s21179_s7 + $0x524] ss:$16 sps:$4 sm:$0xff]  }
 0x87d   : > { %10641 = vmatpush1.bf16.msra.mxu0 %v16075_v56  ;;  %v16170_v56 = vld [vmem:[%s21179_s7 + $0x52c] ss:$16 sps:$4 sm:$0xff]  }
 0x87e   : > { %10805 = vmatpush1.bf16.msra.mxu1 %v16078_v20  ;;  %10642 = vmatprep.subr.bf16.mxu0 %v16083_v53  ;;  %v16165_v20 = vld [vmem:[%s21179_s7 + $0x520] ss:$16 sps:$4 sm:$0xff]   ;;  %v16168_v53 = vld [vmem:[%s21179_s7 + $0x528] ss:$16 sps:$4 sm:$0xff]  }
 0x87f   : > { %10806 = vmatprep.subr.bf16.mxu1 %v16086_v8  ;;  %v16173_v8 = vld [vmem:[%s21179_s7 + $0x544] ss:$16 sps:$4 sm:$0xff]  }
 0x881   : > { %10643 = vmatpush1.bf16.msra.mxu0 %v16081_v54  ;;  %v16176_v54 = vld [vmem:[%s21179_s7 + $0x54c] ss:$16 sps:$4 sm:$0xff]  }
 0x882   : > { %10807 = vmatpush1.bf16.msra.mxu1 %v16084_v1  ;;  %10644 = vmatprep.subr.bf16.mxu0 %v16089_v2  ;;  %v16171_v1 = vld [vmem:[%s21179_s7 + $0x540] ss:$16 sps:$4 sm:$0xff]   ;;  %v16174_v2 = vld [vmem:[%s21179_s7 + $0x548] ss:$16 sps:$4 sm:$0xff]  }
 0x883   : > { %10808 = vmatprep.subr.bf16.mxu1 %v16092_v3  ;;  %v16179_v3 = vld [vmem:[%s21179_s7 + $0x564] ss:$16 sps:$4 sm:$0xff]  }
 0x885   : > { %10645 = vmatpush1.bf16.msra.mxu0 %v16087_v7  ;;  %v16182_v7 = vld [vmem:[%s21179_s7 + $0x56c] ss:$16 sps:$4 sm:$0xff]  }
 0x886   : > { %10809 = vmatpush1.bf16.msra.mxu1 %v16090_v62  ;;  %10646 = vmatprep.subr.bf16.mxu0 %v16095_v10  ;;  %v16177_v62 = vld [vmem:[%s21179_s7 + $0x560] ss:$16 sps:$4 sm:$0xff]   ;;  %v16180_v10 = vld [vmem:[%s21179_s7 + $0x568] ss:$16 sps:$4 sm:$0xff]  }
 0x887   : > { %10810 = vmatprep.subr.bf16.mxu1 %v16098_v9  ;;  %v16185_v9 = vld [vmem:[%s21179_s7 + $0x584] ss:$16 sps:$4 sm:$0xff]  }
 0x889   : > { %10647 = vmatpush1.bf16.msra.mxu0 %v16093_v4  ;;  %v16188_v4 = vld [vmem:[%s21179_s7 + $0x58c] ss:$16 sps:$4 sm:$0xff]  }
 0x88a   : > { %10811 = vmatpush1.bf16.msra.mxu1 %v16096_v58  ;;  %10648 = vmatprep.subr.bf16.mxu0 %v16101_v5  ;;  %v16183_v58 = vld [vmem:[%s21179_s7 + $0x580] ss:$16 sps:$4 sm:$0xff]   ;;  %v16186_v5 = vld [vmem:[%s21179_s7 + $0x588] ss:$16 sps:$4 sm:$0xff]  }
 0x88b   : > { %10812 = vmatprep.subr.bf16.mxu1 %v16104_v32  ;;  %v16191_v32 = vld [vmem:[%s21179_s7 + $0x5a4] ss:$16 sps:$4 sm:$0xff]  }
 0x88d   : > { %10649 = vmatpush1.bf16.msra.mxu0 %v16099_v11  ;;  %v16194_v11 = vld [vmem:[%s21179_s7 + $0x5ac] ss:$16 sps:$4 sm:$0xff]  }
 0x88e   : > { %10813 = vmatpush1.bf16.msra.mxu1 %v16102_v13  ;;  %10650 = vmatprep.subr.bf16.mxu0 %v16107_v63  ;;  %v16189_v13 = vld [vmem:[%s21179_s7 + $0x5a0] ss:$16 sps:$4 sm:$0xff]   ;;  %v16192_v63 = vld [vmem:[%s21179_s7 + $0x5a8] ss:$16 sps:$4 sm:$0xff]  }
 0x88f   : > { %10814 = vmatprep.subr.bf16.mxu1 %v16110_v18  ;;  %v16197_v18 = vld [vmem:[%s21179_s7 + $0x5c4] ss:$16 sps:$4 sm:$0xff]  }
 0x891   : > { %10651 = vmatpush1.bf16.msra.mxu0 %v16105_v21  ;;  %v16200_v21 = vld [vmem:[%s21179_s7 + $0x5cc] ss:$16 sps:$4 sm:$0xff]  }
 0x892   : > { %10815 = vmatpush1.bf16.msra.mxu1 %v16108_v22  ;;  %10661 = vmatprep.subr.bf16.mxu0 %v16113_v15  ;;  %v16195_v22 = vld [vmem:[%s21179_s7 + $0x5c0] ss:$16 sps:$4 sm:$0xff]   ;;  %v16198_v15 = vld [vmem:[%s21179_s7 + $0x5c8] ss:$16 sps:$4 sm:$0xff]  }
 0x893   : > { %10825 = vmatprep.subr.bf16.mxu1 %v16116_v19  ;;  %v16203_v19 = vld [vmem:[%s21179_s7 + $0x5e4] ss:$16 sps:$4 sm:$0xff]  }
 0x894   : > { %10653 = vmatmul.mubr.bf16.vlgmr.msra.gmra.mrb[44].mxu0 %v9015_v34 }
 0x895   : > { %10817 = vmatmul.mubr.bf16.vlgmr.msra.gmra.mrb[44].mxu1 %v9015_v34  ;;  %10662 = vmatpush1.bf16.msra.mxu0 %v16111_v24  ;;  %v16206_v24 = vld [vmem:[%s21179_s7 + $0x5ec] ss:$16 sps:$4 sm:$0xff]   ;;  %v16201_v34 = vld [vmem:[%s21179_s7 + $0x5e0] ss:$16 sps:$4 sm:$0xff]  }
 0x896   : > { %10826 = vmatpush1.bf16.msra.mxu1 %v16114_v25  ;;  %10663 = vmatprep.subr.bf16.mxu0 %v16119_v28  ;;  %v16204_v25 = vld [vmem:[%s21179_s7 + $0x5e8] ss:$16 sps:$4 sm:$0xff]   ;;  %v16209_v28 = vld [vmem:[%s21179_s7 + $0x604] ss:$16 sps:$4 sm:$0xff]  }
 0x897   : > { %10827 = vmatprep.subr.bf16.mxu1 %v16122_v29  ;;  %v16212_v29 = vld [vmem:[%s21179_s7 + $0x60c] ss:$16 sps:$4 sm:$0xff]  }
 0x899   : > { %10664 = vmatpush1.bf16.msra.mxu0 %v16117_v23 }
 0x89a   : > { %10828 = vmatpush1.bf16.msra.mxu1 %v16120_v51  ;;  %10665 = vmatprep.subr.bf16.mxu0 %v16125_v52 }
 0x89b   : > { %10829 = vmatprep.subr.bf16.mxu1 %v16128_v17 }
 0x89d   : > { %10666 = vmatpush1.bf16.msra.mxu0 %v16123_v35 }
 0x89e   : > { %10830 = vmatpush1.bf16.msra.mxu1 %v16126_v36  ;;  %10667 = vmatprep.subr.bf16.mxu0 %v16131_v39 }
 0x89f   : > { %10831 = vmatprep.subr.bf16.mxu1 %v16134_v37 }
 0x8a1   : > { %10668 = vmatpush1.bf16.msra.mxu0 %v16129_v16  ;;  %v16207_v16 = vld [vmem:[%s21179_s7 + $0x600] ss:$16 sps:$4 sm:$0xff]  }
 0x8a2   : > { %10832 = vmatpush1.bf16.msra.mxu1 %v16132_v14  ;;  %10669 = vmatprep.subr.bf16.mxu0 %v16137_v0  ;;  %v16210_v14 = vld [vmem:[%s21179_s7 + $0x608] ss:$16 sps:$4 sm:$0xff]  }
 0x8a3   : > { %10833 = vmatprep.subr.bf16.mxu1 %v16140_v46  ;;  %v16215_v46 = vld [vmem:[%s21179_s7 + $0x624] ss:$16 sps:$4 sm:$0xff]  }
 0x8a5   : > { %10670 = vmatpush1.bf16.msra.mxu0 %v16135_v30  ;;  %v16218_v30 = vld [vmem:[%s21179_s7 + $0x62c] ss:$16 sps:$4 sm:$0xff]  }
 0x8a6   : > { %10834 = vmatpush1.bf16.msra.mxu1 %v16138_v31  ;;  %10671 = vmatprep.subr.bf16.mxu0 %v16143_v57  ;;  %v16213_v57 = vld [vmem:[%s21179_s7 + $0x620] ss:$16 sps:$4 sm:$0xff]  }
 0x8a7   : > { %10835 = vmatprep.subr.bf16.mxu1 %v16146_v38  ;;  %v16216_v38 = vld [vmem:[%s21179_s7 + $0x628] ss:$16 sps:$4 sm:$0xff]  }
 0x8a9   : > { %10672 = vmatpush1.bf16.msra.mxu0 %v16141_v47  ;;  %v16221_v47 = vld [vmem:[%s21179_s7 + $0x644] ss:$16 sps:$4 sm:$0xff]  }
 0x8aa   : > { %10836 = vmatpush1.bf16.msra.mxu1 %v16144_v49  ;;  %10673 = vmatprep.subr.bf16.mxu0 %v16149_v27  ;;  %v16224_v49 = vld [vmem:[%s21179_s7 + $0x64c] ss:$16 sps:$4 sm:$0xff]   ;;  %v16219_v27 = vld [vmem:[%s21179_s7 + $0x640] ss:$16 sps:$4 sm:$0xff]  }
 0x8ab   : > { %10837 = vmatprep.subr.bf16.mxu1 %v16152_v43  ;;  %v16222_v43 = vld [vmem:[%s21179_s7 + $0x648] ss:$16 sps:$4 sm:$0xff]  }
 0x8ad   : > { %10674 = vmatpush1.bf16.msra.mxu0 %v16147_v55  ;;  %v16227_v55 = vld [vmem:[%s21179_s7 + $0x664] ss:$16 sps:$4 sm:$0xff]  }
 0x8ae   : > { %10838 = vmatpush1.bf16.msra.mxu1 %v16150_v44  ;;  %10675 = vmatprep.subr.bf16.mxu0 %v16155_v50  ;;  %v16230_v44 = vld [vmem:[%s21179_s7 + $0x66c] ss:$16 sps:$4 sm:$0xff]   ;;  %v16225_v50 = vld [vmem:[%s21179_s7 + $0x660] ss:$16 sps:$4 sm:$0xff]  }
 0x8af   : > { %10839 = vmatprep.subr.bf16.mxu1 %v16158_v12  ;;  %v16228_v12 = vld [vmem:[%s21179_s7 + $0x668] ss:$16 sps:$4 sm:$0xff]  }
 0x8b1   : > { %10676 = vmatpush1.bf16.msra.mxu0 %v16153_v33  ;;  %v16233_v33 = vld [vmem:[%s21179_s7 + $0x684] ss:$16 sps:$4 sm:$0xff]  }
 0x8b2   : > { %10840 = vmatpush1.bf16.msra.mxu1 %v16156_v45  ;;  %10677 = vmatprep.subr.bf16.mxu0 %v16161_v26  ;;  %v16236_v45 = vld [vmem:[%s21179_s7 + $0x68c] ss:$16 sps:$4 sm:$0xff]   ;;  %v16231_v26 = vld [vmem:[%s21179_s7 + $0x680] ss:$16 sps:$4 sm:$0xff]  }
 0x8b3   : > { %10841 = vmatprep.subr.bf16.mxu1 %v16164_v48  ;;  %v16234_v48 = vld [vmem:[%s21179_s7 + $0x688] ss:$16 sps:$4 sm:$0xff]  }
 0x8b5   : > { %10678 = vmatpush1.bf16.msra.mxu0 %v16159_v60  ;;  %v16239_v60 = vld [vmem:[%s21179_s7 + $0x6a4] ss:$16 sps:$4 sm:$0xff]  }
 0x8b6   : > { %10842 = vmatpush1.bf16.msra.mxu1 %v16162_v42  ;;  %10679 = vmatprep.subr.bf16.mxu0 %v16167_v6  ;;  %v16242_v42 = vld [vmem:[%s21179_s7 + $0x6ac] ss:$16 sps:$4 sm:$0xff]   ;;  %v16237_v6 = vld [vmem:[%s21179_s7 + $0x6a0] ss:$16 sps:$4 sm:$0xff]  }
 0x8b7   : > { %10843 = vmatprep.subr.bf16.mxu1 %v16170_v56  ;;  %v16240_v56 = vld [vmem:[%s21179_s7 + $0x6a8] ss:$16 sps:$4 sm:$0xff]  }
 0x8b9   : > { %10680 = vmatpush1.bf16.msra.mxu0 %v16165_v20  ;;  %v16245_v20 = vld [vmem:[%s21179_s7 + $0x6c4] ss:$16 sps:$4 sm:$0xff]  }
 0x8ba   : > { %10844 = vmatpush1.bf16.msra.mxu1 %v16168_v53  ;;  %10681 = vmatprep.subr.bf16.mxu0 %v16173_v8  ;;  %v16248_v53 = vld [vmem:[%s21179_s7 + $0x6cc] ss:$16 sps:$4 sm:$0xff]   ;;  %v16243_v8 = vld [vmem:[%s21179_s7 + $0x6c0] ss:$16 sps:$4 sm:$0xff]  }
 0x8bb   : > { %10845 = vmatprep.subr.bf16.mxu1 %v16176_v54  ;;  %v16246_v54 = vld [vmem:[%s21179_s7 + $0x6c8] ss:$16 sps:$4 sm:$0xff]  }
 0x8bd   : > { %10682 = vmatpush1.bf16.msra.mxu0 %v16171_v1  ;;  %v16251_v1 = vld [vmem:[%s21179_s7 + $0x6e4] ss:$16 sps:$4 sm:$0xff]  }
 0x8be   : > { %10846 = vmatpush1.bf16.msra.mxu1 %v16174_v2  ;;  %10683 = vmatprep.subr.bf16.mxu0 %v16179_v3  ;;  %v16254_v2 = vld [vmem:[%s21179_s7 + $0x6ec] ss:$16 sps:$4 sm:$0xff]   ;;  %v16249_v3 = vld [vmem:[%s21179_s7 + $0x6e0] ss:$16 sps:$4 sm:$0xff]  }
 0x8bf   : > { %10847 = vmatprep.subr.bf16.mxu1 %v16182_v7  ;;  %v16252_v7 = vld [vmem:[%s21179_s7 + $0x6e8] ss:$16 sps:$4 sm:$0xff]  }
 0x8c1   : > { %10684 = vmatpush1.bf16.msra.mxu0 %v16177_v62  ;;  %v16257_v62 = vld [vmem:[%s21179_s7 + $0x704] ss:$16 sps:$4 sm:$0xff]  }
 0x8c2   : > { %10848 = vmatpush1.bf16.msra.mxu1 %v16180_v10  ;;  %10685 = vmatprep.subr.bf16.mxu0 %v16185_v9  ;;  %v16260_v10 = vld [vmem:[%s21179_s7 + $0x70c] ss:$16 sps:$4 sm:$0xff]   ;;  %v16255_v9 = vld [vmem:[%s21179_s7 + $0x700] ss:$16 sps:$4 sm:$0xff]  }
 0x8c3   : > { %10849 = vmatprep.subr.bf16.mxu1 %v16188_v4  ;;  %v16258_v4 = vld [vmem:[%s21179_s7 + $0x708] ss:$16 sps:$4 sm:$0xff]  }
 0x8c5   : > { %10686 = vmatpush1.bf16.msra.mxu0 %v16183_v58  ;;  %v16263_v58 = vld [vmem:[%s21179_s7 + $0x724] ss:$16 sps:$4 sm:$0xff]  }
 0x8c6   : > { %10850 = vmatpush1.bf16.msra.mxu1 %v16186_v5  ;;  %10687 = vmatprep.subr.bf16.mxu0 %v16191_v32  ;;  %v16266_v5 = vld [vmem:[%s21179_s7 + $0x72c] ss:$16 sps:$4 sm:$0xff]   ;;  %v16261_v32 = vld [vmem:[%s21179_s7 + $0x720] ss:$16 sps:$4 sm:$0xff]  }
 0x8c7   : > { %10851 = vmatprep.subr.bf16.mxu1 %v16194_v11  ;;  %v16264_v11 = vld [vmem:[%s21179_s7 + $0x728] ss:$16 sps:$4 sm:$0xff]  }
 0x8c9   : > { %10688 = vmatpush1.bf16.msra.mxu0 %v16189_v13  ;;  %v16269_v13 = vld [vmem:[%s21179_s7 + $0x744] ss:$16 sps:$4 sm:$0xff]  }
 0x8ca   : > { %10852 = vmatpush1.bf16.msra.mxu1 %v16192_v63  ;;  %10689 = vmatprep.subr.bf16.mxu0 %v16197_v18  ;;  %v16272_v63 = vld [vmem:[%s21179_s7 + $0x74c] ss:$16 sps:$4 sm:$0xff]   ;;  %v16267_v18 = vld [vmem:[%s21179_s7 + $0x740] ss:$16 sps:$4 sm:$0xff]  }
 0x8cb   : > { %10853 = vmatprep.subr.bf16.mxu1 %v16200_v21  ;;  %v16270_v21 = vld [vmem:[%s21179_s7 + $0x748] ss:$16 sps:$4 sm:$0xff]  }
 0x8cd   : > { %10690 = vmatpush1.bf16.msra.mxu0 %v16195_v22  ;;  %v16275_v22 = vld [vmem:[%s21179_s7 + $0x764] ss:$16 sps:$4 sm:$0xff]  }
 0x8ce   : > { %10854 = vmatpush1.bf16.msra.mxu1 %v16198_v15  ;;  %10691 = vmatprep.subr.bf16.mxu0 %v16203_v19  ;;  %v16278_v15 = vld [vmem:[%s21179_s7 + $0x76c] ss:$16 sps:$4 sm:$0xff]   ;;  %v16273_v19 = vld [vmem:[%s21179_s7 + $0x760] ss:$16 sps:$4 sm:$0xff]  }
 0x8cf   : > { %10855 = vmatprep.subr.bf16.mxu1 %v16206_v24  ;;  %v16276_v24 = vld [vmem:[%s21179_s7 + $0x768] ss:$16 sps:$4 sm:$0xff]  }
 0x8d1   : > { %10692 = vmatpush1.bf16.msra.mxu0 %v16201_v34  ;;  %v16281_v34 = vld [vmem:[%s21179_s7 + $0x784] ss:$16 sps:$4 sm:$0xff]  }
 0x8d2   : > { %10856 = vmatpush1.bf16.msra.mxu1 %v16204_v25  ;;  %10702 = vmatprep.subr.bf16.mxu0 %v16209_v28  ;;  %v16284_v25 = vld [vmem:[%s21179_s7 + $0x78c] ss:$16 sps:$4 sm:$0xff]   ;;  %v16279_v28 = vld [vmem:[%s21179_s7 + $0x780] ss:$16 sps:$4 sm:$0xff]  }
 0x8d3   : > { %10866 = vmatprep.subr.bf16.mxu1 %v16212_v29  ;;  %v16282_v29 = vld [vmem:[%s21179_s7 + $0x788] ss:$16 sps:$4 sm:$0xff]  }
 0x8e6   : > { %v8933_v23 = vpop.f32.mrb[42].mxu0 }
 0x8e7   : > { %v9009_v51 = vmul.f32 0.04347826, %v8933_v23  ;;  %v8935_v52 = vpop.f32.mrb[43].mxu0  ;;  %v20430_v17 = vpop.f32.mrb[42].mxu1  ;;  %v16287_v23 = vld [vmem:[%s21179_s7 + $0x7a4] ss:$16 sps:$4 sm:$0xff]  }
 0x8e8   : > { %v9010_v35 = vmul.f32 0.04347826, %v8935_v52  ;;  %v9006_v36 = vpop.f32.mrb[43].mxu1  ;;  %v16285_v52 = vld [vmem:[%s21179_s7 + $0x7a0] ss:$16 sps:$4 sm:$0xff]  }
 0x8e9   : > { %v9012_v39 = vmul.f32 0.04347826, %v9006_v36  ;;  %v9017_v0 = vpack.c.bf16 %v9009_v51, %v9009_v51  ;;  %v16290_v51 = vld [vmem:[%s21179_s7 + $0x7ac] ss:$16 sps:$4 sm:$0xff]   ;;  %v16293_v36 = vld [vmem:[%s21179_s7 + $0x7c4] ss:$16 sps:$4 sm:$0xff]  }
 0x8ea   : > { %v9018_v37 = vpack.c.bf16 %v9010_v35, %v9010_v35  ;;  %v16288_v35 = vld [vmem:[%s21179_s7 + $0x7a8] ss:$16 sps:$4 sm:$0xff]  }
 0x8eb   : > { %v9020_v31 = vpack.c.bf16 %v9012_v39, %v9012_v39  ;;  %v16296_v39 = vld [vmem:[%s21179_s7 + $0x7cc] ss:$16 sps:$4 sm:$0xff]  }
 0x8ec   : > { %10693 = vmatprep.mubr.bf16.mxu0 %v9018_v37  ;;  %10857 = vmatprep.mubr.bf16.mxu1 %v9018_v37  ;;  %v16291_v37 = vld [vmem:[%s21179_s7 + $0x7c0] ss:$16 sps:$4 sm:$0xff]  }
 0x8ed   : > { %10694 = vmatmul.mubr.bf16.vlgmr.msra.gmra.mrb[44].mxu0 %v9017_v0  ;;  %10858 = vmatmul.mubr.bf16.vlgmr.msra.gmra.mrb[44].mxu1 %v9017_v0  ;;  %v16302_v0 = vld [vmem:[%s21179_s7 + $0x7ec] ss:$16 sps:$4 sm:$0xff]  }
 0x8ee   : > { %10703 = vmatpush1.bf16.msra.mxu0 %v16207_v16  ;;  %10867 = vmatpush1.bf16.msra.mxu1 %v16210_v14  ;;  %v16294_v16 = vld [vmem:[%s21179_s7 + $0x7c8] ss:$16 sps:$4 sm:$0xff]   ;;  %v16299_v14 = vld [vmem:[%s21179_s7 + $0x7e4] ss:$16 sps:$4 sm:$0xff]  }
 0x8ef   : > { %10704 = vmatprep.subr.bf16.mxu0 %v16215_v46  ;;  %10868 = vmatprep.subr.bf16.mxu1 %v16218_v30  ;;  %v16297_v46 = vld [vmem:[%s21179_s7 + $0x7e0] ss:$16 sps:$4 sm:$0xff]   ;;  %v16300_v30 = vld [vmem:[%s21179_s7 + $0x7e8] ss:$16 sps:$4 sm:$0xff]  }
 0x8f0   : > { %10734 = vmatprep.mubr.bf16.mxu0 %v9020_v31  ;;  %10898 = vmatprep.mubr.bf16.mxu1 %v9020_v31  ;;  %v9011_v31 = vmul.f32 0.04347826, %v20430_v17  ;;  %v16306_v17 = vld [vmem:[%s21181_s9 + $0x8] ss:$16 sps:$4 sm:$0xff]  }
 0x8f2   : > { %10705 = vmatpush1.bf16.msra.mxu0 %v16213_v57  ;;  %10869 = vmatpush1.bf16.msra.mxu1 %v16216_v38  ;;  %v16305_v57 = vld [vmem:[%s21181_s9 + $0x4] ss:$16 sps:$4 sm:$0xff]   ;;  %v16308_v38 = vld [vmem:[%s21181_s9 + $0xc] ss:$16 sps:$4 sm:$0xff]  }
 0x8f3   : > { %10706 = vmatprep.subr.bf16.mxu0 %v16221_v47  ;;  %10870 = vmatprep.subr.bf16.mxu1 %v16224_v49  ;;  %v16303_v47 = vld [vmem:[%s21181_s9] ss:$16 sps:$4 sm:$0xff]   ;;  %v9019_v49 = vpack.c.bf16 %v9011_v31, %v9011_v31 }
 0x8f4   : > { %v16387_v31 = vld [vmem:[%s21181_s9 + $0x1c0] ss:$16 sps:$4 sm:$0xff]  }
 0x8f6   : > { %10707 = vmatpush1.bf16.msra.mxu0 %v16219_v27  ;;  %10871 = vmatpush1.bf16.msra.mxu1 %v16222_v43  ;;  %v16311_v27 = vld [vmem:[%s21181_s9 + $0x24] ss:$16 sps:$4 sm:$0xff]   ;;  %v16314_v43 = vld [vmem:[%s21181_s9 + $0x2c] ss:$16 sps:$4 sm:$0xff]  }
 0x8f7   : > { %10708 = vmatprep.subr.bf16.mxu0 %v16227_v55  ;;  %10872 = vmatprep.subr.bf16.mxu1 %v16230_v44  ;;  %v16309_v55 = vld [vmem:[%s21181_s9 + $0x20] ss:$16 sps:$4 sm:$0xff]   ;;  %v16312_v44 = vld [vmem:[%s21181_s9 + $0x28] ss:$16 sps:$4 sm:$0xff]  }
 0x8fa   : > { %10709 = vmatpush1.bf16.msra.mxu0 %v16225_v50  ;;  %10873 = vmatpush1.bf16.msra.mxu1 %v16228_v12  ;;  %v16317_v50 = vld [vmem:[%s21181_s9 + $0x44] ss:$16 sps:$4 sm:$0xff]   ;;  %v16320_v12 = vld [vmem:[%s21181_s9 + $0x4c] ss:$16 sps:$4 sm:$0xff]  }
 0x8fb   : > { %10710 = vmatprep.subr.bf16.mxu0 %v16233_v33  ;;  %10874 = vmatprep.subr.bf16.mxu1 %v16236_v45  ;;  %v16315_v33 = vld [vmem:[%s21181_s9 + $0x40] ss:$16 sps:$4 sm:$0xff]   ;;  %v16318_v45 = vld [vmem:[%s21181_s9 + $0x48] ss:$16 sps:$4 sm:$0xff]  }
 0x8fe   : > { %10711 = vmatpush1.bf16.msra.mxu0 %v16231_v26  ;;  %10875 = vmatpush1.bf16.msra.mxu1 %v16234_v48  ;;  %v16323_v26 = vld [vmem:[%s21181_s9 + $0x64] ss:$16 sps:$4 sm:$0xff]   ;;  %v16326_v48 = vld [vmem:[%s21181_s9 + $0x6c] ss:$16 sps:$4 sm:$0xff]  }
 0x8ff   : > { %10712 = vmatprep.subr.bf16.mxu0 %v16239_v60  ;;  %10876 = vmatprep.subr.bf16.mxu1 %v16242_v42  ;;  %v16321_v60 = vld [vmem:[%s21181_s9 + $0x60] ss:$16 sps:$4 sm:$0xff]   ;;  %v16324_v42 = vld [vmem:[%s21181_s9 + $0x68] ss:$16 sps:$4 sm:$0xff]  }
 0x902   : > { %10713 = vmatpush1.bf16.msra.mxu0 %v16237_v6  ;;  %10877 = vmatpush1.bf16.msra.mxu1 %v16240_v56  ;;  %v16329_v6 = vld [vmem:[%s21181_s9 + $0x84] ss:$16 sps:$4 sm:$0xff]   ;;  %v16332_v56 = vld [vmem:[%s21181_s9 + $0x8c] ss:$16 sps:$4 sm:$0xff]  }
 0x903   : > { %10714 = vmatprep.subr.bf16.mxu0 %v16245_v20  ;;  %10878 = vmatprep.subr.bf16.mxu1 %v16248_v53  ;;  %v16327_v20 = vld [vmem:[%s21181_s9 + $0x80] ss:$16 sps:$4 sm:$0xff]   ;;  %v16330_v53 = vld [vmem:[%s21181_s9 + $0x88] ss:$16 sps:$4 sm:$0xff]  }
 0x906   : > { %10715 = vmatpush1.bf16.msra.mxu0 %v16243_v8  ;;  %10879 = vmatpush1.bf16.msra.mxu1 %v16246_v54  ;;  %v16335_v8 = vld [vmem:[%s21181_s9 + $0xa4] ss:$16 sps:$4 sm:$0xff]   ;;  %v16338_v54 = vld [vmem:[%s21181_s9 + $0xac] ss:$16 sps:$4 sm:$0xff]  }
 0x907   : > { %10716 = vmatprep.subr.bf16.mxu0 %v16251_v1  ;;  %10880 = vmatprep.subr.bf16.mxu1 %v16254_v2  ;;  %v16333_v1 = vld [vmem:[%s21181_s9 + $0xa0] ss:$16 sps:$4 sm:$0xff]   ;;  %v16336_v2 = vld [vmem:[%s21181_s9 + $0xa8] ss:$16 sps:$4 sm:$0xff]  }
 0x90a   : > { %10717 = vmatpush1.bf16.msra.mxu0 %v16249_v3  ;;  %10881 = vmatpush1.bf16.msra.mxu1 %v16252_v7  ;;  %v16341_v3 = vld [vmem:[%s21181_s9 + $0xc4] ss:$16 sps:$4 sm:$0xff]   ;;  %v16344_v7 = vld [vmem:[%s21181_s9 + $0xcc] ss:$16 sps:$4 sm:$0xff]  }
 0x90b   : > { %10718 = vmatprep.subr.bf16.mxu0 %v16257_v62  ;;  %10882 = vmatprep.subr.bf16.mxu1 %v16260_v10  ;;  %v16339_v62 = vld [vmem:[%s21181_s9 + $0xc0] ss:$16 sps:$4 sm:$0xff]   ;;  %v16342_v10 = vld [vmem:[%s21181_s9 + $0xc8] ss:$16 sps:$4 sm:$0xff]  }
 0x90e   : > { %10719 = vmatpush1.bf16.msra.mxu0 %v16255_v9  ;;  %10883 = vmatpush1.bf16.msra.mxu1 %v16258_v4  ;;  %v16347_v9 = vld [vmem:[%s21181_s9 + $0xe4] ss:$16 sps:$4 sm:$0xff]   ;;  %v16350_v4 = vld [vmem:[%s21181_s9 + $0xec] ss:$16 sps:$4 sm:$0xff]  }
 0x90f   : > { %10720 = vmatprep.subr.bf16.mxu0 %v16263_v58  ;;  %10884 = vmatprep.subr.bf16.mxu1 %v16266_v5  ;;  %v16345_v58 = vld [vmem:[%s21181_s9 + $0xe0] ss:$16 sps:$4 sm:$0xff]   ;;  %v16348_v5 = vld [vmem:[%s21181_s9 + $0xe8] ss:$16 sps:$4 sm:$0xff]  }
 0x912   : > { %10721 = vmatpush1.bf16.msra.mxu0 %v16261_v32  ;;  %10885 = vmatpush1.bf16.msra.mxu1 %v16264_v11  ;;  %v16353_v32 = vld [vmem:[%s21181_s9 + $0x104] ss:$16 sps:$4 sm:$0xff]   ;;  %v16356_v11 = vld [vmem:[%s21181_s9 + $0x10c] ss:$16 sps:$4 sm:$0xff]  }
 0x913   : > { %10722 = vmatprep.subr.bf16.mxu0 %v16269_v13  ;;  %10886 = vmatprep.subr.bf16.mxu1 %v16272_v63  ;;  %v16351_v13 = vld [vmem:[%s21181_s9 + $0x100] ss:$16 sps:$4 sm:$0xff]   ;;  %v16354_v63 = vld [vmem:[%s21181_s9 + $0x108] ss:$16 sps:$4 sm:$0xff]  }
 0x916   : > { %10723 = vmatpush1.bf16.msra.mxu0 %v16267_v18  ;;  %10887 = vmatpush1.bf16.msra.mxu1 %v16270_v21  ;;  %v16359_v18 = vld [vmem:[%s21181_s9 + $0x124] ss:$16 sps:$4 sm:$0xff]   ;;  %v16362_v21 = vld [vmem:[%s21181_s9 + $0x12c] ss:$16 sps:$4 sm:$0xff]  }
 0x917   : > { %10724 = vmatprep.subr.bf16.mxu0 %v16275_v22  ;;  %10888 = vmatprep.subr.bf16.mxu1 %v16278_v15  ;;  %v16357_v22 = vld [vmem:[%s21181_s9 + $0x120] ss:$16 sps:$4 sm:$0xff]   ;;  %v16360_v15 = vld [vmem:[%s21181_s9 + $0x128] ss:$16 sps:$4 sm:$0xff]  }
 0x91a   : > { %10725 = vmatpush1.bf16.msra.mxu0 %v16273_v19  ;;  %10889 = vmatpush1.bf16.msra.mxu1 %v16276_v24  ;;  %v16365_v19 = vld [vmem:[%s21181_s9 + $0x144] ss:$16 sps:$4 sm:$0xff]   ;;  %v16368_v24 = vld [vmem:[%s21181_s9 + $0x14c] ss:$16 sps:$4 sm:$0xff]  }
 0x91b   : > { %10726 = vmatprep.subr.bf16.mxu0 %v16281_v34  ;;  %10890 = vmatprep.subr.bf16.mxu1 %v16284_v25  ;;  %v16363_v34 = vld [vmem:[%s21181_s9 + $0x140] ss:$16 sps:$4 sm:$0xff]   ;;  %v16366_v25 = vld [vmem:[%s21181_s9 + $0x148] ss:$16 sps:$4 sm:$0xff]  }
 0x91e   : > { %10727 = vmatpush1.bf16.msra.mxu0 %v16279_v28  ;;  %10891 = vmatpush1.bf16.msra.mxu1 %v16282_v29  ;;  %v16371_v28 = vld [vmem:[%s21181_s9 + $0x164] ss:$16 sps:$4 sm:$0xff]   ;;  %v16374_v29 = vld [vmem:[%s21181_s9 + $0x16c] ss:$16 sps:$4 sm:$0xff]  }
 0x91f   : > { %10728 = vmatprep.subr.bf16.mxu0 %v16287_v23  ;;  %10892 = vmatprep.subr.bf16.mxu1 %v16290_v51  ;;  %v16369_v23 = vld [vmem:[%s21181_s9 + $0x160] ss:$16 sps:$4 sm:$0xff]   ;;  %v16372_v51 = vld [vmem:[%s21181_s9 + $0x168] ss:$16 sps:$4 sm:$0xff]  }
 0x922   : > { %10729 = vmatpush1.bf16.msra.mxu0 %v16285_v52  ;;  %10893 = vmatpush1.bf16.msra.mxu1 %v16288_v35  ;;  %v16377_v52 = vld [vmem:[%s21181_s9 + $0x184] ss:$16 sps:$4 sm:$0xff]   ;;  %v16380_v35 = vld [vmem:[%s21181_s9 + $0x18c] ss:$16 sps:$4 sm:$0xff]  }
 0x923   : > { %10730 = vmatprep.subr.bf16.mxu0 %v16293_v36  ;;  %10894 = vmatprep.subr.bf16.mxu1 %v16296_v39  ;;  %v16375_v36 = vld [vmem:[%s21181_s9 + $0x180] ss:$16 sps:$4 sm:$0xff]   ;;  %v16378_v39 = vld [vmem:[%s21181_s9 + $0x188] ss:$16 sps:$4 sm:$0xff]  }
 0x926   : > { %10731 = vmatpush1.bf16.msra.mxu0 %v16291_v37  ;;  %10895 = vmatpush1.bf16.msra.mxu1 %v16294_v16  ;;  %v16383_v37 = vld [vmem:[%s21181_s9 + $0x1a4] ss:$16 sps:$4 sm:$0xff]   ;;  %v16386_v16 = vld [vmem:[%s21181_s9 + $0x1ac] ss:$16 sps:$4 sm:$0xff]  }
 0x927   : > { %10732 = vmatprep.subr.bf16.mxu0 %v16299_v14  ;;  %10896 = vmatprep.subr.bf16.mxu1 %v16302_v0  ;;  %v16381_v14 = vld [vmem:[%s21181_s9 + $0x1a0] ss:$16 sps:$4 sm:$0xff]   ;;  %v16384_v0 = vld [vmem:[%s21181_s9 + $0x1a8] ss:$16 sps:$4 sm:$0xff]  }
 0x92a   : > { %10733 = vmatpush1.bf16.msra.mxu0 %v16297_v46  ;;  %10897 = vmatpush1.bf16.msra.mxu1 %v16300_v30  ;;  %v16389_v46 = vld [vmem:[%s21181_s9 + $0x1c4] ss:$16 sps:$4 sm:$0xff]   ;;  %v16392_v30 = vld [vmem:[%s21181_s9 + $0x1cc] ss:$16 sps:$4 sm:$0xff]  }
 0x92b   : > { %11701 = vmatprep.subr.bf16.mxu0 %v16305_v57  ;;  %11783 = vmatprep.subr.bf16.mxu1 %v16308_v38  ;;  %v16390_v57 = vld [vmem:[%s21181_s9 + $0x1c8] ss:$16 sps:$4 sm:$0xff]   ;;  %v16395_v38 = vld [vmem:[%s21181_s9 + $0x1e4] ss:$16 sps:$4 sm:$0xff]  }
 0x92d   : > { %10735 = vmatmul.mubr.bf16.vlgmr.msra.gmra.mrb[44].mxu0 %v9019_v49  ;;  %10899 = vmatmul.mubr.bf16.vlgmr.msra.gmra.mrb[44].mxu1 %v9019_v49  ;;  %v16396_v49 = vld [vmem:[%s21181_s9 + $0x1e8] ss:$16 sps:$4 sm:$0xff]  }
 0x92e   : > { %11702 = vmatpush1.bf16.msra.mxu0 %v16303_v47  ;;  %11784 = vmatpush1.bf16.msra.mxu1 %v16306_v17  ;;  %v16398_v47 = vld [vmem:[%s21181_s9 + $0x1ec] ss:$16 sps:$4 sm:$0xff]   ;;  %v16393_v17 = vld [vmem:[%s21181_s9 + $0x1e0] ss:$16 sps:$4 sm:$0xff]  }
 0x92f   : > { %11703 = vmatprep.subr.bf16.mxu0 %v16311_v27  ;;  %11785 = vmatprep.subr.bf16.mxu1 %v16314_v43  ;;  %v16401_v27 = vld [vmem:[%s21181_s9 + $0x204] ss:$16 sps:$4 sm:$0xff]   ;;  %v16404_v43 = vld [vmem:[%s21181_s9 + $0x20c] ss:$16 sps:$4 sm:$0xff]  }
 0x932   : > { %11704 = vmatpush1.bf16.msra.mxu0 %v16309_v55  ;;  %11786 = vmatpush1.bf16.msra.mxu1 %v16312_v44  ;;  %v20820_v55 = vld [vmem:[%s21180_s8] sm:$0xf] }
 0x933   : > { %11705 = vmatprep.subr.bf16.mxu0 %v16317_v50  ;;  %11787 = vmatprep.subr.bf16.mxu1 %v16320_v12  ;;  %v10562_v44 = vrot.slane %v20820_v55, %v17061_v40  ;;  %v10566_v50 = vrot.slane %v20820_v55, %v17063_v41  ;;  %v10574_v12 = vrot.slane %v20820_v55, %v17073_v61 }
 0x936   : > { %11706 = vmatpush1.bf16.msra.mxu0 %v16315_v33  ;;  %11788 = vmatpush1.bf16.msra.mxu1 %v16318_v45 }
 0x937   : > { %11707 = vmatprep.subr.bf16.mxu0 %v16323_v26  ;;  %11789 = vmatprep.subr.bf16.mxu1 %v16326_v48 }
 0x93a   : > { %11708 = vmatpush1.bf16.msra.mxu0 %v16321_v60  ;;  %11790 = vmatpush1.bf16.msra.mxu1 %v16324_v42 }
 0x93b   : > { %11709 = vmatprep.subr.bf16.mxu0 %v16329_v6  ;;  %11791 = vmatprep.subr.bf16.mxu1 %v16332_v56 }
 0x93e   : > { %11710 = vmatpush1.bf16.msra.mxu0 %v16327_v20  ;;  %11792 = vmatpush1.bf16.msra.mxu1 %v16330_v53 }
 0x93f   : > { %11711 = vmatprep.subr.bf16.mxu0 %v16335_v8  ;;  %11793 = vmatprep.subr.bf16.mxu1 %v16338_v54 }
 0x942   : > { %11712 = vmatpush1.bf16.msra.mxu0 %v16333_v1  ;;  %11794 = vmatpush1.bf16.msra.mxu1 %v16336_v2  ;;  %v16399_v1 = vld [vmem:[%s21181_s9 + $0x200] ss:$16 sps:$4 sm:$0xff]   ;;  %v16402_v2 = vld [vmem:[%s21181_s9 + $0x208] ss:$16 sps:$4 sm:$0xff]  }
 0x943   : > { %11713 = vmatprep.subr.bf16.mxu0 %v16341_v3  ;;  %11795 = vmatprep.subr.bf16.mxu1 %v16344_v7  ;;  %v16407_v7 = vld [vmem:[%s21181_s9 + $0x224] ss:$16 sps:$4 sm:$0xff]  }
 0x946   : > { %11714 = vmatpush1.bf16.msra.mxu0 %v16339_v62  ;;  %11796 = vmatpush1.bf16.msra.mxu1 %v16342_v10  ;;  %v16410_v62 = vld [vmem:[%s21181_s9 + $0x22c] ss:$16 sps:$4 sm:$0xff]  }
 0x947   : > { %11715 = vmatprep.subr.bf16.mxu0 %v16347_v9  ;;  %11797 = vmatprep.subr.bf16.mxu1 %v16350_v4  ;;  %v16405_v9 = vld [vmem:[%s21181_s9 + $0x220] ss:$16 sps:$4 sm:$0xff]   ;;  %v16408_v4 = vld [vmem:[%s21181_s9 + $0x228] ss:$16 sps:$4 sm:$0xff]  }
 0x94a   : > { %11716 = vmatpush1.bf16.msra.mxu0 %v16345_v58  ;;  %11798 = vmatpush1.bf16.msra.mxu1 %v16348_v5  ;;  %v16413_v58 = vld [vmem:[%s21181_s9 + $0x244] ss:$16 sps:$4 sm:$0xff]   ;;  %v16416_v5 = vld [vmem:[%s21181_s9 + $0x24c] ss:$16 sps:$4 sm:$0xff]  }
 0x94b   : > { %11717 = vmatprep.subr.bf16.mxu0 %v16353_v32  ;;  %11799 = vmatprep.subr.bf16.mxu1 %v16356_v11  ;;  %v16411_v32 = vld [vmem:[%s21181_s9 + $0x240] ss:$16 sps:$4 sm:$0xff]   ;;  %v16414_v11 = vld [vmem:[%s21181_s9 + $0x248] ss:$16 sps:$4 sm:$0xff]  }
 0x94e   : > { %11718 = vmatpush1.bf16.msra.mxu0 %v16351_v13  ;;  %11800 = vmatpush1.bf16.msra.mxu1 %v16354_v63  ;;  %v16419_v13 = vld [vmem:[%s21181_s9 + $0x264] ss:$16 sps:$4 sm:$0xff]   ;;  %v16422_v63 = vld [vmem:[%s21181_s9 + $0x26c] ss:$16 sps:$4 sm:$0xff]  }
 0x94f   : > { %11719 = vmatprep.subr.bf16.mxu0 %v16359_v18  ;;  %11801 = vmatprep.subr.bf16.mxu1 %v16362_v21  ;;  %v16417_v18 = vld [vmem:[%s21181_s9 + $0x260] ss:$16 sps:$4 sm:$0xff]   ;;  %v16420_v21 = vld [vmem:[%s21181_s9 + $0x268] ss:$16 sps:$4 sm:$0xff]  }
 0x952   : > { %11720 = vmatpush1.bf16.msra.mxu0 %v16357_v22  ;;  %11802 = vmatpush1.bf16.msra.mxu1 %v16360_v15  ;;  %v16425_v22 = vld [vmem:[%s21181_s9 + $0x284] ss:$16 sps:$4 sm:$0xff]   ;;  %v16428_v15 = vld [vmem:[%s21181_s9 + $0x28c] ss:$16 sps:$4 sm:$0xff]  }
 0x953   : > { %11721 = vmatprep.subr.bf16.mxu0 %v16365_v19  ;;  %11803 = vmatprep.subr.bf16.mxu1 %v16368_v24  ;;  %v16423_v19 = vld [vmem:[%s21181_s9 + $0x280] ss:$16 sps:$4 sm:$0xff]   ;;  %v16426_v24 = vld [vmem:[%s21181_s9 + $0x288] ss:$16 sps:$4 sm:$0xff]  }
 0x956   : > { %11722 = vmatpush1.bf16.msra.mxu0 %v16363_v34  ;;  %11804 = vmatpush1.bf16.msra.mxu1 %v16366_v25  ;;  %v16431_v34 = vld [vmem:[%s21181_s9 + $0x2a4] ss:$16 sps:$4 sm:$0xff]   ;;  %v16434_v25 = vld [vmem:[%s21181_s9 + $0x2ac] ss:$16 sps:$4 sm:$0xff]  }
 0x957   : > { %11723 = vmatprep.subr.bf16.mxu0 %v16371_v28  ;;  %11805 = vmatprep.subr.bf16.mxu1 %v16374_v29  ;;  %v16429_v28 = vld [vmem:[%s21181_s9 + $0x2a0] ss:$16 sps:$4 sm:$0xff]   ;;  %v16432_v29 = vld [vmem:[%s21181_s9 + $0x2a8] ss:$16 sps:$4 sm:$0xff]  }
 0x95a   : > { %11724 = vmatpush1.bf16.msra.mxu0 %v16369_v23  ;;  %11806 = vmatpush1.bf16.msra.mxu1 %v16372_v51  ;;  %v16437_v23 = vld [vmem:[%s21181_s9 + $0x2c4] ss:$16 sps:$4 sm:$0xff]   ;;  %v16440_v51 = vld [vmem:[%s21181_s9 + $0x2cc] ss:$16 sps:$4 sm:$0xff]  }
 0x95b   : > { %11725 = vmatprep.subr.bf16.mxu0 %v16377_v52  ;;  %11807 = vmatprep.subr.bf16.mxu1 %v16380_v35  ;;  %v16435_v52 = vld [vmem:[%s21181_s9 + $0x2c0] ss:$16 sps:$4 sm:$0xff]   ;;  %v16438_v35 = vld [vmem:[%s21181_s9 + $0x2c8] ss:$16 sps:$4 sm:$0xff]  }
 0x95e   : > { %11726 = vmatpush1.bf16.msra.mxu0 %v16375_v36  ;;  %11808 = vmatpush1.bf16.msra.mxu1 %v16378_v39  ;;  %v16443_v36 = vld [vmem:[%s21181_s9 + $0x2e4] ss:$16 sps:$4 sm:$0xff]   ;;  %v16446_v39 = vld [vmem:[%s21181_s9 + $0x2ec] ss:$16 sps:$4 sm:$0xff]  }
 0x95f   : > { %11727 = vmatprep.subr.bf16.mxu0 %v16383_v37  ;;  %11809 = vmatprep.subr.bf16.mxu1 %v16386_v16  ;;  %v16441_v37 = vld [vmem:[%s21181_s9 + $0x2e0] ss:$16 sps:$4 sm:$0xff]   ;;  %v16444_v16 = vld [vmem:[%s21181_s9 + $0x2e8] ss:$16 sps:$4 sm:$0xff]  }
 0x962   : > { %11728 = vmatpush1.bf16.msra.mxu0 %v16381_v14  ;;  %11810 = vmatpush1.bf16.msra.mxu1 %v16384_v0  ;;  %v16449_v14 = vld [vmem:[%s21181_s9 + $0x304] ss:$16 sps:$4 sm:$0xff]   ;;  %v16452_v0 = vld [vmem:[%s21181_s9 + $0x30c] ss:$16 sps:$4 sm:$0xff]  }
 0x963   : > { %11729 = vmatprep.subr.bf16.mxu0 %v16389_v46  ;;  %11811 = vmatprep.subr.bf16.mxu1 %v16392_v30  ;;  %v16447_v46 = vld [vmem:[%s21181_s9 + $0x300] ss:$16 sps:$4 sm:$0xff]   ;;  %v16450_v30 = vld [vmem:[%s21181_s9 + $0x308] ss:$16 sps:$4 sm:$0xff]  }
 0x966   : > { %11730 = vmatpush1.bf16.msra.mxu0 %v16387_v31  ;;  %11812 = vmatpush1.bf16.msra.mxu1 %v16390_v57  ;;  %v16455_v31 = vld [vmem:[%s21181_s9 + $0x324] ss:$16 sps:$4 sm:$0xff]   ;;  %v16458_v57 = vld [vmem:[%s21181_s9 + $0x32c] ss:$16 sps:$4 sm:$0xff]  }
 0x967   : > { %11731 = vmatprep.subr.bf16.mxu0 %v16395_v38  ;;  %11813 = vmatprep.subr.bf16.mxu1 %v16398_v47  ;;  %v16453_v38 = vld [vmem:[%s21181_s9 + $0x320] ss:$16 sps:$4 sm:$0xff]   ;;  %v16456_v47 = vld [vmem:[%s21181_s9 + $0x328] ss:$16 sps:$4 sm:$0xff]  }
 0x96a   : > { %11732 = vmatpush1.bf16.msra.mxu0 %v16393_v17  ;;  %11814 = vmatpush1.bf16.msra.mxu1 %v16396_v49  ;;  %v16461_v17 = vld [vmem:[%s21181_s9 + $0x344] ss:$16 sps:$4 sm:$0xff]   ;;  %v16464_v49 = vld [vmem:[%s21181_s9 + $0x34c] ss:$16 sps:$4 sm:$0xff]  }
 0x96b   : > { %11742 = vmatprep.subr.bf16.mxu0 %v16401_v27  ;;  %11824 = vmatprep.subr.bf16.mxu1 %v16404_v43  ;;  %v16459_v27 = vld [vmem:[%s21181_s9 + $0x340] ss:$16 sps:$4 sm:$0xff]   ;;  %v16462_v43 = vld [vmem:[%s21181_s9 + $0x348] ss:$16 sps:$4 sm:$0xff]  }
 0xa00   : > { %v10736_v33 = vpop.f32.mrb[44].mxu0  ;;  %v20828_v45 = vpop.f32.mrb[44].mxu1 }
 0xa01   : > { %v14256_v26 = vadd.f32 %v10736_v33, %v10562_v44  ;;  %v10738_v48 = vpop.f32.mrb[45].mxu0  ;;  %v10902_v60 = vpop.f32.mrb[45].mxu1  ;;  %v16467_v44 = vld [vmem:[%s21181_s9 + $0x364] ss:$16 sps:$4 sm:$0xff]   ;;  %v16468_v33 = vld [vmem:[%s21181_s9 + $0x368] ss:$16 sps:$4 sm:$0xff]  }
 0xa02   : > { %v14257_v42 = vadd.f32 %v10738_v48, %v10566_v50  ;;  %v10740_v6 = vpop.f32.mrb[46].mxu0  ;;  %v10904_v56 = vpop.f32.mrb[46].mxu1  ;;  %v14259_v20 = vadd.f32 %v10902_v60, %v10574_v12  ;;  %v16470_v50 = vld [vmem:[%s21181_s9 + $0x36c] ss:$16 sps:$4 sm:$0xff]   ;;  %v16465_v12 = vld [vmem:[%s21181_s9 + $0x360] ss:$16 sps:$4 sm:$0xff]  }
 0xa03   : > { %v10741_v53 = vpop.f32.mrb[47].mxu0  ;;  %v10905_v8 = vpop.f32.mrb[47].mxu1  ;;  %v10907_v3 = vpack.c.bf16 %v14256_v26, %v14256_v26  ;;  %v16473_v26 = vld [vmem:[%s21181_s9 + $0x384] ss:$16 sps:$4 sm:$0xff]   ;;  %v16476_v48 = vld [vmem:[%s21181_s9 + $0x38c] ss:$16 sps:$4 sm:$0xff]  }
 0xa04   : > { %v10908_v54 = vpack.c.bf16 %v14257_v42, %v14257_v42  ;;  %v10910_v10 = vpack.c.bf16 %v14259_v20, %v14259_v20  ;;  %v16471_v60 = vld [vmem:[%s21181_s9 + $0x380] ss:$16 sps:$4 sm:$0xff]   ;;  %v16474_v42 = vld [vmem:[%s21181_s9 + $0x388] ss:$16 sps:$4 sm:$0xff]   ;;  %v16479_v6 = vld [vmem:[%s21181_s9 + $0x3a4] ss:$16 sps:$4 sm:$0xff]  }
 0xa05   : > { %v16482_v56 = vld [vmem:[%s21181_s9 + $0x3ac] ss:$16 sps:$4 sm:$0xff]   ;;  %v16477_v20 = vld [vmem:[%s21181_s9 + $0x3a0] ss:$16 sps:$4 sm:$0xff]   ;;  %v16480_v53 = vld [vmem:[%s21181_s9 + $0x3a8] ss:$16 sps:$4 sm:$0xff]  }
 0xa06   : > { %11733 = vmatprep.mubr.bf16.mxu0 %v10908_v54  ;;  %11815 = vmatprep.mubr.bf16.mxu1 %v10908_v54  ;;  %v16485_v8 = vld [vmem:[%s21181_s9 + $0x3c4] ss:$16 sps:$4 sm:$0xff]   ;;  %v16488_v54 = vld [vmem:[%s21181_s9 + $0x3cc] ss:$16 sps:$4 sm:$0xff]  }
 0xa07   : > { %11734 = vmatmul.mubr.bf16.vlgmr.msra.gmra.mrb[48].mxu0 %v10907_v3  ;;  %11816 = vmatmul.mubr.bf16.vlgmr.msra.gmra.mrb[48].mxu1 %v10907_v3  ;;  %v10570_v3 = vrot.slane %v20820_v55, %v17069_v59  ;;  %v16492_v55 = vld [vmem:[%s21181_s9 + $0x3e8] ss:$16 sps:$4 sm:$0xff]  }
 0xa08   : > { %11743 = vmatpush1.bf16.msra.mxu0 %v16399_v1  ;;  %11825 = vmatpush1.bf16.msra.mxu1 %v16402_v2  ;;  %v16483_v1 = vld [vmem:[%s21181_s9 + $0x3c0] ss:$16 sps:$4 sm:$0xff]   ;;  %v16486_v2 = vld [vmem:[%s21181_s9 + $0x3c8] ss:$16 sps:$4 sm:$0xff]  }
 0xa09   : > { %11774 = vmatprep.mubr.bf16.mxu0 %v10910_v10  ;;  %11856 = vmatprep.mubr.bf16.mxu1 %v10910_v10  ;;  %v16489_v10 = vld [vmem:[%s21181_s9 + $0x3e0] ss:$16 sps:$4 sm:$0xff]  }
 0xa0a   : > { %11744 = vmatprep.subr.bf16.mxu0 %v16407_v7  ;;  %11826 = vmatprep.subr.bf16.mxu1 %v16410_v62  ;;  %v16491_v7 = vld [vmem:[%s21181_s9 + $0x3e4] ss:$16 sps:$4 sm:$0xff]   ;;  %v16494_v62 = vld [vmem:[%s21181_s9 + $0x3ec] ss:$16 sps:$4 sm:$0xff]  }
 0xa0c   : > { %11745 = vmatpush1.bf16.msra.mxu0 %v16405_v9  ;;  %11827 = vmatpush1.bf16.msra.mxu1 %v16408_v4  ;;  %v14258_v9 = vadd.f32 %v20828_v45, %v10570_v3  ;;  %v16495_v4 = vld [vmem:[%s21183_s11 + $0x40] sm:$0xff]  }
 0xa0d   : > { %11746 = vmatprep.subr.bf16.mxu0 %v16413_v58  ;;  %11828 = vmatprep.subr.bf16.mxu1 %v16416_v5  ;;  %v16496_v58 = vld [vmem:[%s21183_s11 + $0xc0] sm:$0xff]  }
 0xa0e   : > { %v16497_v5 = vld [vmem:[%s21183_s11] sm:$0xff]  }
 0xa0f   : > { %v16498_v45 = vld [vmem:[%s21183_s11 + $0x80] sm:$0xff]  }
 0xa10   : > { %11747 = vmatpush1.bf16.msra.mxu0 %v16411_v32  ;;  %11829 = vmatpush1.bf16.msra.mxu1 %v16414_v11  ;;  %v10909_v32 = vpack.c.bf16 %v14258_v9, %v14258_v9  ;;  %v16499_v11 = vld [vmem:[%s21183_s11 + $0x48] sm:$0xff]  }
 0xa11   : > { %11748 = vmatprep.subr.bf16.mxu0 %v16419_v13  ;;  %11830 = vmatprep.subr.bf16.mxu1 %v16422_v63  ;;  %v16500_v13 = vld [vmem:[%s21183_s11 + $0xc8] sm:$0xff]  }
 0xa12   : > { %v16501_v63 = vld [vmem:[%s21183_s11 + $0x8] sm:$0xff]  }
 0xa14   : > { %11749 = vmatpush1.bf16.msra.mxu0 %v16417_v18  ;;  %11831 = vmatpush1.bf16.msra.mxu1 %v16420_v21  ;;  %v16502_v18 = vld [vmem:[%s21183_s11 + $0x88] sm:$0xff]   ;;  %v16503_v21 = vld [vmem:[%s21183_s11 + $0x50] sm:$0xff]  }
 0xa15   : > { %11750 = vmatprep.subr.bf16.mxu0 %v16425_v22  ;;  %11832 = vmatprep.subr.bf16.mxu1 %v16428_v15  ;;  %v16504_v22 = vld [vmem:[%s21183_s11 + $0xd0] sm:$0xff]  }
 0xa16   : > { %v16505_v15 = vld [vmem:[%s21183_s11 + $0x10] sm:$0xff]  }
 0xa18   : > { %11751 = vmatpush1.bf16.msra.mxu0 %v16423_v19  ;;  %11833 = vmatpush1.bf16.msra.mxu1 %v16426_v24  ;;  %v16506_v19 = vld [vmem:[%s21183_s11 + $0x90] sm:$0xff]   ;;  %v16507_v24 = vld [vmem:[%s21183_s11 + $0x58] sm:$0xff]  }
 0xa19   : > { %11752 = vmatprep.subr.bf16.mxu0 %v16431_v34  ;;  %11834 = vmatprep.subr.bf16.mxu1 %v16434_v25  ;;  %v16508_v34 = vld [vmem:[%s21183_s11 + $0xd8] sm:$0xff]  }
 0xa1a   : > { %v16509_v25 = vld [vmem:[%s21183_s11 + $0x18] sm:$0xff]  }
 0xa1c   : > { %11753 = vmatpush1.bf16.msra.mxu0 %v16429_v28  ;;  %11835 = vmatpush1.bf16.msra.mxu1 %v16432_v29  ;;  %v16510_v28 = vld [vmem:[%s21183_s11 + $0x98] sm:$0xff]   ;;  %v16511_v29 = vld [vmem:[%s21183_s11 + $0x60] sm:$0xff]  }
 0xa1d   : > { %11754 = vmatprep.subr.bf16.mxu0 %v16437_v23  ;;  %11836 = vmatprep.subr.bf16.mxu1 %v16440_v51  ;;  %v16512_v23 = vld [vmem:[%s21183_s11 + $0xe0] sm:$0xff]  }
 0xa1e   : > { %v16513_v51 = vld [vmem:[%s21183_s11 + $0x20] sm:$0xff]  }
 0xa20   : > { %11755 = vmatpush1.bf16.msra.mxu0 %v16435_v52  ;;  %11837 = vmatpush1.bf16.msra.mxu1 %v16438_v35  ;;  %v16514_v52 = vld [vmem:[%s21183_s11 + $0xa0] sm:$0xff]   ;;  %v16515_v35 = vld [vmem:[%s21183_s11 + $0x68] sm:$0xff]  }
 0xa21   : > { %11756 = vmatprep.subr.bf16.mxu0 %v16443_v36  ;;  %11838 = vmatprep.subr.bf16.mxu1 %v16446_v39  ;;  %v16516_v36 = vld [vmem:[%s21183_s11 + $0xe8] sm:$0xff]  }
 0xa22   : > { %v16517_v39 = vld [vmem:[%s21183_s11 + $0x28] sm:$0xff]  }
 0xa24   : > { %11757 = vmatpush1.bf16.msra.mxu0 %v16441_v37  ;;  %11839 = vmatpush1.bf16.msra.mxu1 %v16444_v16  ;;  %v16518_v37 = vld [vmem:[%s21183_s11 + $0xa8] sm:$0xff]   ;;  %v16519_v16 = vld [vmem:[%s21183_s11 + $0x70] sm:$0xff]  }
 0xa25   : > { %11758 = vmatprep.subr.bf16.mxu0 %v16449_v14  ;;  %11840 = vmatprep.subr.bf16.mxu1 %v16452_v0  ;;  %v16520_v14 = vld [vmem:[%s21183_s11 + $0xf0] sm:$0xff]  }
 0xa26   : > { %v16521_v0 = vld [vmem:[%s21183_s11 + $0x30] sm:$0xff]  }
 0xa28   : > { %11759 = vmatpush1.bf16.msra.mxu0 %v16447_v46  ;;  %11841 = vmatpush1.bf16.msra.mxu1 %v16450_v30  ;;  %v16522_v46 = vld [vmem:[%s21183_s11 + $0xb0] sm:$0xff]   ;;  %v16523_v30 = vld [vmem:[%s21183_s11 + $0x78] sm:$0xff]  }
 0xa29   : > { %11760 = vmatprep.subr.bf16.mxu0 %v16455_v31  ;;  %11842 = vmatprep.subr.bf16.mxu1 %v16458_v57  ;;  %v16524_v31 = vld [vmem:[%s21183_s11 + $0xf8] sm:$0xff]  }
 0xa2a   : > { %v16525_v57 = vld [vmem:[%s21183_s11 + $0x38] sm:$0xff]  }
 0xa2c   : > { %11761 = vmatpush1.bf16.msra.mxu0 %v16453_v38  ;;  %11843 = vmatpush1.bf16.msra.mxu1 %v16456_v47  ;;  %v16526_v38 = vld [vmem:[%s21183_s11 + $0xb8] sm:$0xff]   ;;  %v11039_v47 = vld [vmem:[%s21182_s10] sm:$0xf] }
 0xa2d   : > { %11762 = vmatprep.subr.bf16.mxu0 %v16461_v17  ;;  %11844 = vmatprep.subr.bf16.mxu1 %v16464_v49  ;;  %v11684_v17 = vrot.slane %v11039_v47, %v17061_v40  ;;  %v11692_v49 = vrot.slane %v11039_v47, %v17069_v59 }
 0xa30   : > { %11763 = vmatpush1.bf16.msra.mxu0 %v16459_v27  ;;  %11845 = vmatpush1.bf16.msra.mxu1 %v16462_v43  ;;  %v11688_v27 = vrot.slane %v11039_v47, %v17063_v41  ;;  %v11696_v43 = vrot.slane %v11039_v47, %v17073_v61 }
 0xa31   : > { %11764 = vmatprep.subr.bf16.mxu0 %v16467_v44  ;;  %11846 = vmatprep.subr.bf16.mxu1 %v16470_v50 }
 0xa34   : > { %11765 = vmatpush1.bf16.msra.mxu0 %v16465_v12  ;;  %11847 = vmatpush1.bf16.msra.mxu1 %v16468_v33 }
 0xa35   : > { %11766 = vmatprep.subr.bf16.mxu0 %v16473_v26  ;;  %11848 = vmatprep.subr.bf16.mxu1 %v16476_v48 }
 0xa38   : > { %11767 = vmatpush1.bf16.msra.mxu0 %v16471_v60  ;;  %11849 = vmatpush1.bf16.msra.mxu1 %v16474_v42 }
 0xa39   : > { %11768 = vmatprep.subr.bf16.mxu0 %v16479_v6  ;;  %11850 = vmatprep.subr.bf16.mxu1 %v16482_v56 }
 0xa3c   : > { %11769 = vmatpush1.bf16.msra.mxu0 %v16477_v20  ;;  %11851 = vmatpush1.bf16.msra.mxu1 %v16480_v53 }
 0xa3d   : > { %11770 = vmatprep.subr.bf16.mxu0 %v16485_v8  ;;  %11852 = vmatprep.subr.bf16.mxu1 %v16488_v54 }
 0xa40   : > { %11771 = vmatpush1.bf16.msra.mxu0 %v16483_v1  ;;  %11853 = vmatpush1.bf16.msra.mxu1 %v16486_v2  ;;  %v11933_v1 = vld [vmem:[%s21184_s12] sm:$0x1] }
 0xa41   : > { %11772 = vmatprep.subr.bf16.mxu0 %v16491_v7  ;;  %11854 = vmatprep.subr.bf16.mxu1 %v16494_v62 }
 0xa44   : > { %11773 = vmatpush1.bf16.msra.mxu0 %v16489_v10  ;;  %11855 = vmatpush1.bf16.msra.mxu1 %v16492_v55 }
 0xa45   : > { %14164 = vmatprep.subr.bf16.mxu0 %v16495_v4  ;;  %14186 = vmatprep.subr.bf16.mxu1 %v16496_v58 }
 0xa47   : > { %11775 = vmatmul.mubr.bf16.vlgmr.msra.gmra.mrb[48].mxu0 %v10909_v32  ;;  %11857 = vmatmul.mubr.bf16.vlgmr.msra.gmra.mrb[48].mxu1 %v10909_v32 }
 0xa48   : > { %14165 = vmatpush3.bf16.msra.mxu0 %v16497_v5  ;;  %14187 = vmatpush3.bf16.msra.mxu1 %v16498_v45 }
 0xa49   : > { %14166 = vmatprep.subr.bf16.mxu0 %v16499_v11  ;;  %14188 = vmatprep.subr.bf16.mxu1 %v16500_v13 }
 0xa4c   : > { %14167 = vmatpush3.bf16.msra.mxu0 %v16501_v63  ;;  %14189 = vmatpush3.bf16.msra.mxu1 %v16502_v18 }
 0xa4d   : > { %14168 = vmatprep.subr.bf16.mxu0 %v16503_v21  ;;  %14190 = vmatprep.subr.bf16.mxu1 %v16504_v22 }
 0xa50   : > { %14169 = vmatpush3.bf16.msra.mxu0 %v16505_v15  ;;  %14191 = vmatpush3.bf16.msra.mxu1 %v16506_v19 }
 0xa51   : > { %14170 = vmatprep.subr.bf16.mxu0 %v16507_v24  ;;  %14192 = vmatprep.subr.bf16.mxu1 %v16508_v34 }
 0xa54   : > { %14171 = vmatpush3.bf16.msra.mxu0 %v16509_v25  ;;  %14193 = vmatpush3.bf16.msra.mxu1 %v16510_v28 }
 0xa55   : > { %14172 = vmatprep.subr.bf16.mxu0 %v16511_v29  ;;  %14194 = vmatprep.subr.bf16.mxu1 %v16512_v23 }
 0xa58   : > { %14173 = vmatpush3.bf16.msra.mxu0 %v16513_v51  ;;  %14195 = vmatpush3.bf16.msra.mxu1 %v16514_v52 }
 0xa59   : > { %14174 = vmatprep.subr.bf16.mxu0 %v16515_v35  ;;  %14196 = vmatprep.subr.bf16.mxu1 %v16516_v36 }
 0xa5c   : > { %14175 = vmatpush3.bf16.msra.mxu0 %v16517_v39  ;;  %14197 = vmatpush3.bf16.msra.mxu1 %v16518_v37 }
 0xa5d   : > { %14176 = vmatprep.subr.bf16.mxu0 %v16519_v16  ;;  %14198 = vmatprep.subr.bf16.mxu1 %v16520_v14 }
 0xa60   : > { %14177 = vmatpush3.bf16.msra.mxu0 %v16521_v0  ;;  %14199 = vmatpush3.bf16.msra.mxu1 %v16522_v46 }
 0xa61   : > { %14178 = vmatprep.subr.bf16.mxu0 %v16523_v30  ;;  %14200 = vmatprep.subr.bf16.mxu1 %v16524_v31 }
 0xa64   : > { %14179 = vmatpush3.bf16.msra.mxu0 %v16525_v57  ;;  %14201 = vmatpush3.bf16.msra.mxu1 %v16526_v38 }
 0xb1a   : > { %v11776_v44 = vpop.f32.mrb[48].mxu0  ;;  %v11858_v50 = vpop.f32.mrb[48].mxu1 }
 0xb1b   : > { %v14260_v12 = vadd.f32 %v11776_v44, %v11684_v17  ;;  %v14262_v33 = vadd.f32 %v11858_v50, %v11692_v49  ;;  %v11778_v26 = vpop.f32.mrb[49].mxu0  ;;  %v11860_v48 = vpop.f32.mrb[49].mxu1 }
 0xb1c   : > { %v14261_v60 = vadd.f32 %v11778_v26, %v11688_v27  ;;  %v14263_v42 = vadd.f32 %v11860_v48, %v11696_v43  ;;  %v11780_v6 = vpop.f32.mrb[50].mxu0  ;;  %v11862_v56 = vpop.f32.mrb[50].mxu1 }
 0xb1d   : > { %v11781_v20 = vpop.f32.mrb[51].mxu0  ;;  %v11863_v53 = vpop.f32.mrb[51].mxu1  ;;  %v11865_v59 = vpack.c.bf16 %v14260_v12, %v14260_v12  ;;  %v11867_v54 = vpack.c.bf16 %v14262_v33, %v14262_v33 }
 0xb1e   : > { %v11866_v40 = vpack.c.bf16 %v14261_v60, %v14261_v60  ;;  %v11868_v8 = vpack.c.bf16 %v14263_v42, %v14263_v42 }
 0xb20   : > { %12158 = vmatprep.mubr.bf16.mxu0 %v11866_v40  ;;  %12198 = vmatprep.mubr.bf16.mxu1 %v11868_v8 }
 0xb21   : > { %12159 = vmatmul.mubr.bf16.vlgmr.msra.gmra.mrb[52].mxu0 %v11865_v59  ;;  %12199 = vmatmul.mubr.bf16.vlgmr.msra.gmra.mrb[52].mxu1 %v11867_v54 }
 0xbf4   : > { %v14180_v41 = vpop.f32.mrb[52].mxu0  ;;  %v14202_v61 = vpop.f32.mrb[52].mxu1 }
 0xbf5   : > { %v14181_v2 = vpop.f32.mrb[53].mxu0  ;;  %v14203_v3 = vpop.f32.mrb[53].mxu1 }
 0xbf6   : > { %v14182_v7 = vadd.f32 %v14181_v2, %v14180_v41  ;;  %v14204_v62 = vadd.f32 %v14203_v3, %v14202_v61  ;;  %v14183_v10 = vpop.f32.mrb[54].mxu0  ;;  %v14205_v55 = vpop.f32.mrb[54].mxu1 }
 0xbf7   : > { %v14184_v9 = vpop.f32.mrb[55].mxu0  ;;  %v14206_v4 = vpop.f32.mrb[55].mxu1 }
 0xbf8   : > { %v12161_v58 = vadd.f32 %v14182_v7, %v11933_v1 }
 0xbfa   : > { %v12201_v5 = vadd.f32 %v14204_v62, %v12161_v58 }
 0xbfc   : > { %12207 = vst.msk [vmem:[%s432_s19] sm:$0x1] %vm12206_vm3, %v12201_v5 }
 0xbfd   : > { %16574 = shalt.err (!%p16571_p3)
}
 0xbfe   : > { %s16575_s17 = scalar_lea.hbm %s21130_s21, 16  ;;  %s16579_s19 = scalar_lea.hbm %s21185_s13, 32 }
 0xbff   : > { %p16576_p4 = scmp.ne.s32.totalorder %s21130_s21, %s16575_s17  ;;  %p16580_p9 = scmp.lt.u32.totalorder %s21130_s21, %s21185_s13 }
 0xc00   : > { %p16581_p10 = scmp.lt.u32.totalorder %s16579_s19, %s16575_s17  ;;  %p16583_p12 = scmp.lt.u32.totalorder %s16575_s17, %s21130_s21 }
 0xc01   : > { %p16577_p7 = pnand %p16576_p4, %p16737_p5 }
 0xc02   : > { %p16582_p11 = por %p16581_p10, %p16580_p9 }
 0xc03   : > { %p16578_p8 = pneg %p16577_p7 }
 0xc04   : > { %p16584_p13 = por %p16583_p12, %p16582_p11 }
 0xc06   : > { %p16585_p0 = pnand %p16584_p13, %p16578_p8 }
 0xc08   : > { %16588 = shalt.err (!%p16585_p0)
}
 0xc09   : > { %14460 = dma.vmem_to_hbm [thread:$0]  (%p16737_p5), %s21132_s23, 16, %s21130_s21, %s12209_s15  }
 0xc0a PF: > { %p14466_p1 = scmp.ge.s32.totalorder %s16623_s28, 2  ;;  %s12233_s29 = sand.u32 1, %s16611_s25  }
 0xc0b   : > { %s12234_s27 = scalar_lea.sflag [#allocation5], %s12233_s29 }
 0xc0c   : > { %p14463_p2 = pnand %p14466_p1, %p16741_p6 }
 0xc0e   : > { %16606 = dma.done.wait (!%p14463_p2), %s12234_s27, 16  }
 0xc0f   : > { %16608 = vsyncadd (!%p14463_p2), %s12234_s27, 4294967280  ;;  %s21197_s28 = sld [smem:[#allocation8_spill]]  ;;  %s21198_s24 = sld [smem:[#allocation7_spill]] }
 0xc10   : > { %s21199_s27 = sld [smem:[#allocation9_spill]]  ;;  %s21200_s25 = smov %s16615_s26 }
 0xc15   : > { %p23_p3 = scmp.ge.s32.totalorder %s21197_s28, 4   ;;  %s21201_s26 = smov %s21198_s24 }
 0xc17   :  { %25 = sbr.rel (!%p23_p3) target bundleno = 3 (0x3), region = 114 }
 0xc1e   :  { %12238 = vsyncpa [#allocation5], 1 }
 0xc1f   :  { %12240 = vsyncpa [#allocation5 + $0x1], 1 }

</bundles_post_ra>
